<compile_context>
chip_gen: v6e
topology: v6e:2x2x1
jax: 0.10.0
libtpu: 0.0.40
codegen_flags: <defaults>
</compile_context>

<pallas_src>
import functools
import math

import jax
import jax.numpy as jnp
from jax import lax
from jax.experimental import pallas as pl
from jax.experimental.pallas import tpu as pltpu

LANE = 128


def _round_up(x, m):
    return (x + m - 1) // m * m


# ------------------------------ static plan ---------------------------------


def build_plan(N, K):
    """Static description of the SNAIL stack + padded channel layout."""
    T = N * K + 1
    L = int(math.ceil(math.log(T) / math.log(2)))
    blocks = []
    zero_gaps = []                    # padded-tail column ranges no block writes
    c_real = 65                       # real (unpadded) channel count so far
    c_in_pad = _round_up(c_real, LANE)
    off = c_in_pad                    # padded offset where the next block writes

    def add_attn(key_sz, val_sz):
        nonlocal c_real, off
        blocks.append(dict(kind="attn", in_w=off, c_real=c_real,
                           k=key_sz, v=val_sz, out_off=off))
        pad = _round_up(val_sz, LANE)
        if pad > val_sz:
            zero_gaps.append((off + val_sz, off + pad))
        c_real += val_sz
        off += pad

    def add_tc(filters):
        nonlocal c_real, off
        for i in range(L):
            blocks.append(dict(kind="dense", in_w=off, c_real=c_real,
                               f=filters, dil_idx=i, out_off=off))
            pad = _round_up(filters, LANE)
            if pad > filters:
                zero_gaps.append((off + filters, off + pad))
            c_real += filters
            off += pad

    add_attn(64, 32)      # mod0
    add_tc(128)           # mod1
    add_attn(256, 128)    # mod2
    add_tc(128)           # mod3
    add_attn(512, 256)    # mod4
    return dict(T=T, L=L, blocks=blocks, c_total=off, c_real_final=c_real,
                c_in=65, c_in_pad=c_in_pad, zero_gaps=zero_gaps,
                n_classes=N, out_pad=_round_up(N, LANE))


# ------------------------------ row tiling -----------------------------------


def _rows_target():
    # ~2 MXU tiles worth of rows: 256 on v6e/v7x (2x256x256 MXU), 128 on v5e.
    try:
        kind = jax.devices()[0].device_kind.lower()
    except Exception:
        return 256
    if "v5 lite" in kind or "v5lite" in kind or "v5e" in kind:
        return 128
    return 256


def _row_plan(B, T, target):
    """Rows per grid step (bt) and padded total rows.

    bt is always a multiple of 8 (sublane tile); when there is more than one
    grid step it is also a multiple of T so every step starts on a sample
    boundary.  Row padding only ever creates isolated fake samples.
    """
    R = B * T
    unit = T * 8 // math.gcd(T, 8)            # lcm(T, 8)
    if R <= max(target + target // 2, unit):
        bt = _round_up(R, 8)                   # a single well-fed grid step
        return bt, bt
    bt = max(unit, target // unit * unit)
    return bt, _round_up(R, bt)


# ------------------------------ fused kernel --------------------------------


def _fused_forward_kernel(plan, *refs):
    T = plan["T"]
    f32, bf16 = jnp.float32, jnp.bfloat16

    x_ref = refs[0]
    param_refs = refs[1:-2]
    out_ref = refs[-2]
    act = refs[-1]                              # (BT, c_total) bf16 scratch
    BT = x_ref.shape[0]

    n_params = sum(2 if b["kind"] == "attn" else 3 for b in plan["blocks"]) + 2
    assert len(param_refs) == n_params

    # Channel-padded input slab -> first 128 lanes of the feature scratch.
    act[:, :plan["c_in_pad"]] = x_ref[...].astype(bf16)
    # Zero only the padded-gap columns nothing ever writes, so the (random)
    # weight rows addressing them contribute exactly 0 == the unpadded net.
    for lo, hi in plan["zero_gaps"]:
        act[:, lo:hi] = jnp.zeros((BT, hi - lo), bf16)

    # Per-row in-sample position (r mod T) without vector int div/mod:
    # binary restoring division using compare/subtract only (cheap VPU work).
    pos = lax.broadcasted_iota(jnp.int32, (BT, 1), 0)
    step = 1
    while T * step * 2 <= BT:
        step *= 2
    while step >= 1:
        pos = jnp.where(pos >= T * step, pos - T * step, pos)
        step //= 2

    pi = 0
    for blk in plan["blocks"]:
        xb = act[:, :blk["in_w"]]               # bf16, 128-lane aligned prefix
        if blk["kind"] == "attn":
            w = param_refs[pi][...]
            b = param_refs[pi + 1][...]
            pi += 2
            Ksz, Vsz = blk["k"], blk["v"]
            # fused q|k|v projection: one wide bf16 MXU dot, f32 accumulation
            qkv = jnp.dot(xb, w, preferred_element_type=f32) + b
            q = qkv[:, :Ksz].astype(bf16)
            k = qkv[:, Ksz:2 * Ksz].astype(bf16)
            v = qkv[:, 2 * Ksz:].astype(bf16)
            logits = lax.dot_general(q, k, (((1,), (1,)), ((), ())),
                                     preferred_element_type=f32)
            # block-diagonal causal mask from iota: allowed iff 0 <= r-c <= r%T
            ri = lax.broadcasted_iota(jnp.int32, (BT, BT), 0)
            ci = lax.broadcasted_iota(jnp.int32, (BT, BT), 1)
            diff = ri - ci
            allowed = (diff >= 0) & (diff <= pos)
            logits = jnp.where(allowed, logits * (1.0 / math.sqrt(Ksz)), -1e30)
            m = jnp.max(logits, axis=-1, keepdims=True)
            e = jnp.exp(logits - m)
            p = e * pl.reciprocal(jnp.sum(e, axis=-1, keepdims=True), approx=True)
            read = jnp.dot(p.astype(bf16), v, preferred_element_type=f32)
            act[:, blk["out_off"]:blk["out_off"] + Vsz] = read.astype(bf16)
        else:   # dense (causal conv kernel=2, dilation 2^i, gated tanh*sigmoid)
            wx = param_refs[pi][...]            # taps on x[t]     -> [filter|gate]
            ws = param_refs[pi + 1][...]        # taps on x[t - d] -> [filter|gate]
            b = param_refs[pi + 2][...]
            pi += 3
            F = blk["f"]
            d = 2 ** blk["dil_idx"]
            cur = jnp.dot(xb, wx, preferred_element_type=f32)
            prev = jnp.dot(xb, ws, preferred_element_type=f32)
            # Causal dilated shift on the (BT, 2F) tap product instead of a
            # (BT,BT) shift matmul: row r reads row r-d (XLU roll); rows whose
            # in-sample position < d correspond to the conv's left zero-pad.
            prev = pltpu.roll(prev, shift=d, axis=0)
            prev = jnp.where(pos >= d, prev, 0.0)
            a = cur + prev + b
            gate = pl.reciprocal(1.0 + jnp.exp(-a[:, F:]), approx=True)
            act[:, blk["out_off"]:blk["out_off"] + F] = (
                jnp.tanh(a[:, :F]) * gate).astype(bf16)

    # out layer: 1x1 conv == per-position linear, N padded to 128 lanes
    wo = param_refs[pi][...]
    bo = param_refs[pi + 1][...]
    out = jnp.dot(act[...], wo, preferred_element_type=f32) + bo
    out_ref[...] = out.astype(out_ref.dtype)


def _fused_call(plan, flat_params, x_rows, bt):
    rows, c_in_pad = x_rows.shape
    assert rows % bt == 0
    grid_steps = rows // bt
    out_pad = plan["out_pad"]

    in_specs = [pl.BlockSpec((bt, c_in_pad), lambda b: (b, 0))]
    # Constant index_map -> each weight/bias is DMA'd to VMEM once and stays
    # resident across grid steps (~8 MB of bf16 weights).
    in_specs += [pl.BlockSpec(p.shape, lambda b: (0, 0)) for p in flat_params]

    return pl.pallas_call(
        functools.partial(_fused_forward_kernel, plan),
        out_shape=jax.ShapeDtypeStruct((rows, out_pad), jnp.float32),
        grid=(grid_steps,),
        in_specs=in_specs,
        out_specs=pl.BlockSpec((bt, out_pad), lambda b: (b, 0)),
        scratch_shapes=[pltpu.VMEM((bt, plan["c_total"]), jnp.bfloat16)],
        compiler_params=pltpu.CompilerParams(
            dimension_semantics=("parallel",) if grid_steps > 1 else ("arbitrary",),
            vmem_limit_bytes=48 * 1024 * 1024,   # ~20 MB used; < 64 MiB (v7x)
        ),
    )(x_rows, *flat_params)


# ------------------------------ parameter init ------------------------------


def _uniform(key, shape, bound):
    return jax.random.uniform(key, shape, jnp.float32, -bound, bound)


def init_params(key, N, K):
    """Weights use padded input dims; padded activation columns are always zero,
    so the extra weight rows never contribute (same math as the unpadded net)."""
    plan = build_plan(N, K)
    flat = []
    for blk in plan["blocks"]:
        if blk["kind"] == "attn":
            key, k1, k2 = jax.random.split(key, 3)
            bound = 1.0 / math.sqrt(blk["c_real"])
            width = 2 * blk["k"] + blk["v"]
            flat += [_uniform(k1, (blk["in_w"], width), bound).astype(jnp.bfloat16),
                     _uniform(k2, (1, width), bound)]
        else:
            key, k1, k2, k3 = jax.random.split(key, 4)
            bound = 1.0 / math.sqrt(2 * blk["c_real"])   # Conv1d fan_in = c_in * 2
            width = 2 * blk["f"]
            flat += [_uniform(k1, (blk["in_w"], width), bound).astype(jnp.bfloat16),
                     _uniform(k2, (blk["in_w"], width), bound).astype(jnp.bfloat16),
                     _uniform(k3, (1, width), bound)]
    key, k1, k2 = jax.random.split(key, 3)
    bound = 1.0 / math.sqrt(plan["c_real_final"])
    pad = plan["out_pad"] - N
    wo = jnp.pad(_uniform(k1, (plan["c_total"], N), bound), ((0, 0), (0, pad)))
    bo = jnp.pad(_uniform(k2, (1, N), bound), ((0, 0), (0, pad)))
    flat += [wo.astype(jnp.bfloat16), bo]
    return plan, flat


# --------------------------------- forward ----------------------------------


def omniglot_forward(plan, flat_params, minibatch):
    # minibatch: NCL (B, 65, T), same layout as the PyTorch module.
    B = minibatch.shape[0]
    T, N = plan["T"], plan["n_classes"]
    R = B * T
    # (B, 65, T) -> lane-dense (B*T, 128) slab (channels zero-padded 65 -> 128).
    x = jnp.transpose(minibatch, (0, 2, 1)).reshape(R, plan["c_in"])
    x = jnp.pad(x, ((0, 0), (0, plan["c_in_pad"] - plan["c_in"])))
    bt, rows = _row_plan(B, T, _rows_target())
    if rows > R:
        x = jnp.pad(x, ((0, rows - R), (0, 0)))         # isolated fake samples
    out = _fused_call(plan, flat_params, x, bt)          # (rows, out_pad) f32
    out = out[:R, :N].reshape(B, T, N)                   # drop row/lane padding
    return jnp.transpose(out, (0, 2, 1))                 # -> (B, N, T) like nn.Conv1d


if __name__ == "__main__":
    N, K, B = 5, 1, 2
    T = N * K + 1                                        # 6
    key = jax.random.PRNGKey(0)
    pkey, xkey = jax.random.split(key)
    plan, params = init_params(pkey, N, K)
    minibatch = jax.random.normal(xkey, (B, 65, T), jnp.float32)

    fwd = jax.jit(functools.partial(omniglot_forward, plan))
    out = fwd(params, minibatch)
    jax.block_until_ready(out)
    assert out.shape == (B, N, T), out.shape
    assert bool(jnp.all(jnp.isfinite(out)))
    print("KERNEL_OK")
</pallas_src>

<mosaic_0001>
module attributes {stable_mosaic.version = 11 : i64} {
  func.func @_fused_forward_kernel(%arg0: i32, %arg1: memref<16x128xf32, #tpu.memory_space<vmem>>, %arg2: memref<128x160xbf16, #tpu.memory_space<vmem>>, %arg3: memref<1x160xf32, #tpu.memory_space<vmem>>, %arg4: memref<256x256xbf16, #tpu.memory_space<vmem>>, %arg5: memref<256x256xbf16, #tpu.memory_space<vmem>>, %arg6: memref<1x256xf32, #tpu.memory_space<vmem>>, %arg7: memref<384x256xbf16, #tpu.memory_space<vmem>>, %arg8: memref<384x256xbf16, #tpu.memory_space<vmem>>, %arg9: memref<1x256xf32, #tpu.memory_space<vmem>>, %arg10: memref<512x256xbf16, #tpu.memory_space<vmem>>, %arg11: memref<512x256xbf16, #tpu.memory_space<vmem>>, %arg12: memref<1x256xf32, #tpu.memory_space<vmem>>, %arg13: memref<640x640xbf16, #tpu.memory_space<vmem>>, %arg14: memref<1x640xf32, #tpu.memory_space<vmem>>, %arg15: memref<768x256xbf16, #tpu.memory_space<vmem>>, %arg16: memref<768x256xbf16, #tpu.memory_space<vmem>>, %arg17: memref<1x256xf32, #tpu.memory_space<vmem>>, %arg18: memref<896x256xbf16, #tpu.memory_space<vmem>>, %arg19: memref<896x256xbf16, #tpu.memory_space<vmem>>, %arg20: memref<1x256xf32, #tpu.memory_space<vmem>>, %arg21: memref<1024x256xbf16, #tpu.memory_space<vmem>>, %arg22: memref<1024x256xbf16, #tpu.memory_space<vmem>>, %arg23: memref<1x256xf32, #tpu.memory_space<vmem>>, %arg24: memref<1152x1280xbf16, #tpu.memory_space<vmem>>, %arg25: memref<1x1280xf32, #tpu.memory_space<vmem>>, %arg26: memref<1408x128xbf16, #tpu.memory_space<vmem>>, %arg27: memref<1x128xf32, #tpu.memory_space<vmem>>, %arg28: memref<16x128xf32, #tpu.memory_space<vmem>>, %arg29: memref<16x1408xbf16, #tpu.memory_space<vmem>>) attributes {dimension_semantics = [#tpu.dimension_semantics<arbitrary>], iteration_bounds = array<i64: 1>, scalar_prefetch = 0 : i64, scratch_operands = 1 : i64, tpu.core_type = #tpu.core_type<tc>, window_params = [{transform_indices = @transform_0, window_bounds = array<i64: 16, 128>}, {pipeline_mode = #tpu.pipeline_mode<synchronous>, transform_indices = @transform_1, window_bounds = array<i64: 128, 160>}, {pipeline_mode = #tpu.pipeline_mode<synchronous>, transform_indices = @transform_2, window_bounds = array<i64: 1, 160>}, {pipeline_mode = #tpu.pipeline_mode<synchronous>, transform_indices = @transform_3, window_bounds = array<i64: 256, 256>}, {pipeline_mode = #tpu.pipeline_mode<synchronous>, transform_indices = @transform_4, window_bounds = array<i64: 256, 256>}, {pipeline_mode = #tpu.pipeline_mode<synchronous>, transform_indices = @transform_5, window_bounds = array<i64: 1, 256>}, {pipeline_mode = #tpu.pipeline_mode<synchronous>, transform_indices = @transform_6, window_bounds = array<i64: 384, 256>}, {pipeline_mode = #tpu.pipeline_mode<synchronous>, transform_indices = @transform_7, window_bounds = array<i64: 384, 256>}, {pipeline_mode = #tpu.pipeline_mode<synchronous>, transform_indices = @transform_8, window_bounds = array<i64: 1, 256>}, {pipeline_mode = #tpu.pipeline_mode<synchronous>, transform_indices = @transform_9, window_bounds = array<i64: 512, 256>}, {pipeline_mode = #tpu.pipeline_mode<synchronous>, transform_indices = @transform_10, window_bounds = array<i64: 512, 256>}, {pipeline_mode = #tpu.pipeline_mode<synchronous>, transform_indices = @transform_11, window_bounds = array<i64: 1, 256>}, {pipeline_mode = #tpu.pipeline_mode<synchronous>, transform_indices = @transform_12, window_bounds = array<i64: 640, 640>}, {pipeline_mode = #tpu.pipeline_mode<synchronous>, transform_indices = @transform_13, window_bounds = array<i64: 1, 640>}, {pipeline_mode = #tpu.pipeline_mode<synchronous>, transform_indices = @transform_14, window_bounds = array<i64: 768, 256>}, {pipeline_mode = #tpu.pipeline_mode<synchronous>, transform_indices = @transform_15, window_bounds = array<i64: 768, 256>}, {pipeline_mode = #tpu.pipeline_mode<synchronous>, transform_indices = @transform_16, window_bounds = array<i64: 1, 256>}, {pipeline_mode = #tpu.pipeline_mode<synchronous>, transform_indices = @transform_17, window_bounds = array<i64: 896, 256>}, {pipeline_mode = #tpu.pipeline_mode<synchronous>, transform_indices = @transform_18, window_bounds = array<i64: 896, 256>}, {pipeline_mode = #tpu.pipeline_mode<synchronous>, transform_indices = @transform_19, window_bounds = array<i64: 1, 256>}, {pipeline_mode = #tpu.pipeline_mode<synchronous>, transform_indices = @transform_20, window_bounds = array<i64: 1024, 256>}, {pipeline_mode = #tpu.pipeline_mode<synchronous>, transform_indices = @transform_21, window_bounds = array<i64: 1024, 256>}, {pipeline_mode = #tpu.pipeline_mode<synchronous>, transform_indices = @transform_22, window_bounds = array<i64: 1, 256>}, {pipeline_mode = #tpu.pipeline_mode<synchronous>, transform_indices = @transform_23, window_bounds = array<i64: 1152, 1280>}, {pipeline_mode = #tpu.pipeline_mode<synchronous>, transform_indices = @transform_24, window_bounds = array<i64: 1, 1280>}, {pipeline_mode = #tpu.pipeline_mode<synchronous>, transform_indices = @transform_25, window_bounds = array<i64: 1408, 128>}, {pipeline_mode = #tpu.pipeline_mode<synchronous>, transform_indices = @transform_26, window_bounds = array<i64: 1, 128>}, {transform_indices = @transform_27, window_bounds = array<i64: 16, 128>}]} {
    %c0 = arith.constant 0 : index
    %c0_0 = arith.constant 0 : index
    %0 = vector.load %arg1[%c0, %c0_0] : memref<16x128xf32, #tpu.memory_space<vmem>>, vector<16x128xf32>
    %1 = arith.truncf %0 : vector<16x128xf32> to vector<16x128xbf16>
    %c0_1 = arith.constant 0 : index
    %c0_2 = arith.constant 0 : index
    %2 = vector.load %arg29[%c0_1, %c0_2] : memref<16x1408xbf16, #tpu.memory_space<vmem>>, vector<16x128xbf16>
    tpu.vector_store %arg29[%c0_1, %c0_2], %1 {strides = array<i32>} : memref<16x1408xbf16, #tpu.memory_space<vmem>>, vector<16x128xbf16>,
    %cst = arith.constant 0.000000e+00 : bf16
    %3 = vector.broadcast %cst : bf16 to vector<16x96xbf16>
    %c0_3 = arith.constant 0 : index
    %c160 = arith.constant 160 : index
    %4 = vector.load %arg29[%c0_3, %c160] : memref<16x1408xbf16, #tpu.memory_space<vmem>>, vector<16x96xbf16>
    tpu.vector_store %arg29[%c0_3, %c160], %3 {strides = array<i32>} : memref<16x1408xbf16, #tpu.memory_space<vmem>>, vector<16x96xbf16>,
    %5 = tpu.iota {dimensions = array<i32: 0>} : vector<16x1xi32>
    %c12_i32 = arith.constant 12 : i32
    %6 = vector.broadcast %c12_i32 : i32 to vector<16x1xi32>
    %7 = arith.cmpi sge, %5, %6 : vector<16x1xi32>
    %c12_i32_4 = arith.constant 12 : i32
    %8 = vector.broadcast %c12_i32_4 : i32 to vector<16x1xi32>
    %9 = arith.subi %5, %8 : vector<16x1xi32>
    %10 = arith.select %7, %9, %5 : vector<16x1xi1>, vector<16x1xi32>
    %c6_i32 = arith.constant 6 : i32
    %11 = vector.broadcast %c6_i32 : i32 to vector<16x1xi32>
    %12 = arith.cmpi sge, %10, %11 : vector<16x1xi32>
    %c6_i32_5 = arith.constant 6 : i32
    %13 = vector.broadcast %c6_i32_5 : i32 to vector<16x1xi32>
    %14 = arith.subi %10, %13 : vector<16x1xi32>
    %15 = arith.select %12, %14, %10 : vector<16x1xi1>, vector<16x1xi32>
    %c0_6 = arith.constant 0 : index
    %c0_7 = arith.constant 0 : index
    %16 = vector.load %arg29[%c0_6, %c0_7] : memref<16x1408xbf16, #tpu.memory_space<vmem>>, vector<16x128xbf16>
    %c0_8 = arith.constant 0 : index
    %c0_9 = arith.constant 0 : index
    %17 = vector.load %arg2[%c0_8, %c0_9] : memref<128x160xbf16, #tpu.memory_space<vmem>>, vector<128x160xbf16>
    %c0_10 = arith.constant 0 : index
    %c0_11 = arith.constant 0 : index
    %18 = vector.load %arg3[%c0_10, %c0_11] : memref<1x160xf32, #tpu.memory_space<vmem>>, vector<1x160xf32>
    %cst_12 = arith.constant dense<0.000000e+00> : vector<16x160xf32>
    %19 = tpu.matmul %16, %17, %cst_12 {dimension_numbers = #tpu.dot_dimension_numbers<[1], [0], [0], [1], [0, 0, 1, 1], [], []>} : vector<16x128xbf16>, vector<128x160xbf16>, vector<16x160xf32> -> vector<16x160xf32>
    %20 = vector.broadcast %18 : vector<1x160xf32> to vector<16x160xf32>
    %21 = arith.addf %19, %20 : vector<16x160xf32>
    %22 = vector.extract_strided_slice %21 {offsets = [0, 0], sizes = [16, 64], strides = [1, 1]} : vector<16x160xf32> to vector<16x64xf32>
    %23 = arith.truncf %22 : vector<16x64xf32> to vector<16x64xbf16>
    %24 = vector.extract_strided_slice %21 {offsets = [0, 64], sizes = [16, 64], strides = [1, 1]} : vector<16x160xf32> to vector<16x64xf32>
    %25 = arith.truncf %24 : vector<16x64xf32> to vector<16x64xbf16>
    %26 = vector.extract_strided_slice %21 {offsets = [0, 128], sizes = [16, 32], strides = [1, 1]} : vector<16x160xf32> to vector<16x32xf32>
    %27 = arith.truncf %26 : vector<16x32xf32> to vector<16x32xbf16>
    %cst_13 = arith.constant dense<0.000000e+00> : vector<16x16xf32>
    %28 = tpu.matmul %23, %25, %cst_13 {dimension_numbers = #tpu.dot_dimension_numbers<[1], [1], [0], [0], [0, 0, 1, 0], [], []>} : vector<16x64xbf16>, vector<16x64xbf16>, vector<16x16xf32> -> vector<16x16xf32>
    %29 = tpu.iota {dimensions = array<i32: 0>} : vector<16x16xi32>
    %30 = tpu.iota {dimensions = array<i32: 1>} : vector<16x16xi32>
    %31 = arith.subi %29, %30 : vector<16x16xi32>
    %c0_i32 = arith.constant 0 : i32
    %32 = vector.broadcast %c0_i32 : i32 to vector<16x16xi32>
    %33 = arith.cmpi sge, %31, %32 : vector<16x16xi32>
    %34 = vector.broadcast %15 : vector<16x1xi32> to vector<16x16xi32>
    %35 = arith.cmpi sle, %31, %34 : vector<16x16xi32>
    %36 = arith.andi %33, %35 : vector<16x16xi1>
    %cst_14 = arith.constant 1.250000e-01 : f32
    %37 = vector.broadcast %cst_14 : f32 to vector<16x16xf32>
    %38 = arith.mulf %28, %37 : vector<16x16xf32>
    %cst_15 = arith.constant -1.000000e+30 : f32
    %39 = vector.broadcast %cst_15 : f32 to vector<16x16xf32>
    %40 = arith.select %36, %38, %39 : vector<16x16xi1>, vector<16x16xf32>
    %cst_16 = arith.constant dense<0xFF800000> : vector<16xf32>
    %41 = vector.multi_reduction <maximumf>, %40, %cst_16 [1] : vector<16x16xf32> to vector<16xf32>
    %42 = vector.shape_cast %41 : vector<16xf32> to vector<16x1xf32>
    %43 = vector.broadcast %42 : vector<16x1xf32> to vector<16x16xf32>
    %44 = arith.subf %40, %43 : vector<16x16xf32>
    %45 = math.exp %44 : vector<16x16xf32>
    %cst_17 = arith.constant dense<0.000000e+00> : vector<16xf32>
    %46 = vector.multi_reduction <add>, %45, %cst_17 [1] : vector<16x16xf32> to vector<16xf32>
    %47 = vector.shape_cast %46 : vector<16xf32> to vector<16x1xf32>
    %48 = tpu.reciprocal %47 {approx = true} : vector<16x1xf32> -> vector<16x1xf32>
    %49 = vector.broadcast %48 : vector<16x1xf32> to vector<16x16xf32>
    %50 = arith.mulf %45, %49 : vector<16x16xf32>
    %51 = arith.truncf %50 : vector<16x16xf32> to vector<16x16xbf16>
    %cst_18 = arith.constant dense<0.000000e+00> : vector<16x32xf32>
    %52 = tpu.matmul %51, %27, %cst_18 {dimension_numbers = #tpu.dot_dimension_numbers<[1], [0], [0], [1], [0, 0, 1, 1], [], []>} : vector<16x16xbf16>, vector<16x32xbf16>, vector<16x32xf32> -> vector<16x32xf32>
    %53 = arith.truncf %52 : vector<16x32xf32> to vector<16x32xbf16>
    %c0_19 = arith.constant 0 : index
    %c128 = arith.constant 128 : index
    %54 = vector.load %arg29[%c0_19, %c128] : memref<16x1408xbf16, #tpu.memory_space<vmem>>, vector<16x32xbf16>
    tpu.vector_store %arg29[%c0_19, %c128], %53 {strides = array<i32>} : memref<16x1408xbf16, #tpu.memory_space<vmem>>, vector<16x32xbf16>,
    %c0_20 = arith.constant 0 : index
    %c0_21 = arith.constant 0 : index
    %55 = vector.load %arg29[%c0_20, %c0_21] : memref<16x1408xbf16, #tpu.memory_space<vmem>>, vector<16x256xbf16>
    %c0_22 = arith.constant 0 : index
    %c0_23 = arith.constant 0 : index
    %56 = vector.load %arg4[%c0_22, %c0_23] : memref<256x256xbf16, #tpu.memory_space<vmem>>, vector<256x256xbf16>
    %c0_24 = arith.constant 0 : index
    %c0_25 = arith.constant 0 : index
    %57 = vector.load %arg5[%c0_24, %c0_25] : memref<256x256xbf16, #tpu.memory_space<vmem>>, vector<256x256xbf16>
    %c0_26 = arith.constant 0 : index
    %c0_27 = arith.constant 0 : index
    %58 = vector.load %arg6[%c0_26, %c0_27] : memref<1x256xf32, #tpu.memory_space<vmem>>, vector<1x256xf32>
    %cst_28 = arith.constant dense<0.000000e+00> : vector<16x256xf32>
    %59 = tpu.matmul %55, %56, %cst_28 {dimension_numbers = #tpu.dot_dimension_numbers<[1], [0], [0], [1], [0, 0, 1, 1], [], []>} : vector<16x256xbf16>, vector<256x256xbf16>, vector<16x256xf32> -> vector<16x256xf32>
    %cst_29 = arith.constant dense<0.000000e+00> : vector<16x256xf32>
    %60 = tpu.matmul %55, %57, %cst_29 {dimension_numbers = #tpu.dot_dimension_numbers<[1], [0], [0], [1], [0, 0, 1, 1], [], []>} : vector<16x256xbf16>, vector<256x256xbf16>, vector<16x256xf32> -> vector<16x256xf32>
    %c1_i32 = arith.constant 1 : i32
    %61 = tpu.dynamic_rotate %60 by %c1_i32 dim 0 : vector<16x256xf32>, i32 -> vector<16x256xf32>
    %c1_i32_30 = arith.constant 1 : i32
    %62 = vector.broadcast %c1_i32_30 : i32 to vector<16x1xi32>
    %63 = arith.cmpi sge, %15, %62 : vector<16x1xi32>
    %cst_31 = arith.constant 0.000000e+00 : f32
    %64 = vector.shape_cast %63 : vector<16x1xi1> to vector<16x1xi1>
    %65 = vector.broadcast %64 : vector<16x1xi1> to vector<16x256xi1>
    %66 = vector.broadcast %cst_31 : f32 to vector<16x256xf32>
    %67 = arith.select %65, %61, %66 : vector<16x256xi1>, vector<16x256xf32>
    %68 = arith.addf %59, %67 : vector<16x256xf32>
    %69 = vector.broadcast %58 : vector<1x256xf32> to vector<16x256xf32>
    %70 = arith.addf %68, %69 : vector<16x256xf32>
    %71 = vector.extract_strided_slice %70 {offsets = [0, 128], sizes = [16, 128], strides = [1, 1]} : vector<16x256xf32> to vector<16x128xf32>
    %cst_32 = arith.constant 0.000000e+00 : f32
    %72 = vector.broadcast %cst_32 : f32 to vector<16x128xf32>
    %73 = arith.subf %72, %71 : vector<16x128xf32>
    %74 = math.exp %73 : vector<16x128xf32>
    %cst_33 = arith.constant 1.000000e+00 : f32
    %75 = vector.broadcast %cst_33 : f32 to vector<16x128xf32>
    %76 = arith.addf %75, %74 : vector<16x128xf32>
    %77 = tpu.reciprocal %76 {approx = true} : vector<16x128xf32> -> vector<16x128xf32>
    %78 = vector.extract_strided_slice %70 {offsets = [0, 0], sizes = [16, 128], strides = [1, 1]} : vector<16x256xf32> to vector<16x128xf32>
    %79 = math.tanh %78 : vector<16x128xf32>
    %80 = arith.mulf %79, %77 : vector<16x128xf32>
    %81 = arith.truncf %80 : vector<16x128xf32> to vector<16x128xbf16>
    %c0_34 = arith.constant 0 : index
    %c256 = arith.constant 256 : index
    %82 = vector.load %arg29[%c0_34, %c256] : memref<16x1408xbf16, #tpu.memory_space<vmem>>, vector<16x128xbf16>
    tpu.vector_store %arg29[%c0_34, %c256], %81 {strides = array<i32>} : memref<16x1408xbf16, #tpu.memory_space<vmem>>, vector<16x128xbf16>,
    %c0_35 = arith.constant 0 : index
    %c0_36 = arith.constant 0 : index
    %83 = vector.load %arg29[%c0_35, %c0_36] : memref<16x1408xbf16, #tpu.memory_space<vmem>>, vector<16x384xbf16>
    %c0_37 = arith.constant 0 : index
    %c0_38 = arith.constant 0 : index
    %84 = vector.load %arg7[%c0_37, %c0_38] : memref<384x256xbf16, #tpu.memory_space<vmem>>, vector<384x256xbf16>
    %c0_39 = arith.constant 0 : index
    %c0_40 = arith.constant 0 : index
    %85 = vector.load %arg8[%c0_39, %c0_40] : memref<384x256xbf16, #tpu.memory_space<vmem>>, vector<384x256xbf16>
    %c0_41 = arith.constant 0 : index
    %c0_42 = arith.constant 0 : index
    %86 = vector.load %arg9[%c0_41, %c0_42] : memref<1x256xf32, #tpu.memory_space<vmem>>, vector<1x256xf32>
    %cst_43 = arith.constant dense<0.000000e+00> : vector<16x256xf32>
    %87 = tpu.matmul %83, %84, %cst_43 {dimension_numbers = #tpu.dot_dimension_numbers<[1], [0], [0], [1], [0, 0, 1, 1], [], []>} : vector<16x384xbf16>, vector<384x256xbf16>, vector<16x256xf32> -> vector<16x256xf32>
    %cst_44 = arith.constant dense<0.000000e+00> : vector<16x256xf32>
    %88 = tpu.matmul %83, %85, %cst_44 {dimension_numbers = #tpu.dot_dimension_numbers<[1], [0], [0], [1], [0, 0, 1, 1], [], []>} : vector<16x384xbf16>, vector<384x256xbf16>, vector<16x256xf32> -> vector<16x256xf32>
    %c2_i32 = arith.constant 2 : i32
    %89 = tpu.dynamic_rotate %88 by %c2_i32 dim 0 : vector<16x256xf32>, i32 -> vector<16x256xf32>
    %c2_i32_45 = arith.constant 2 : i32
    %90 = vector.broadcast %c2_i32_45 : i32 to vector<16x1xi32>
    %91 = arith.cmpi sge, %15, %90 : vector<16x1xi32>
    %cst_46 = arith.constant 0.000000e+00 : f32
    %92 = vector.shape_cast %91 : vector<16x1xi1> to vector<16x1xi1>
    %93 = vector.broadcast %92 : vector<16x1xi1> to vector<16x256xi1>
    %94 = vector.broadcast %cst_46 : f32 to vector<16x256xf32>
    %95 = arith.select %93, %89, %94 : vector<16x256xi1>, vector<16x256xf32>
    %96 = arith.addf %87, %95 : vector<16x256xf32>
    %97 = vector.broadcast %86 : vector<1x256xf32> to vector<16x256xf32>
    %98 = arith.addf %96, %97 : vector<16x256xf32>
    %99 = vector.extract_strided_slice %98 {offsets = [0, 128], sizes = [16, 128], strides = [1, 1]} : vector<16x256xf32> to vector<16x128xf32>
    %cst_47 = arith.constant 0.000000e+00 : f32
    %100 = vector.broadcast %cst_47 : f32 to vector<16x128xf32>
    %101 = arith.subf %100, %99 : vector<16x128xf32>
    %102 = math.exp %101 : vector<16x128xf32>
    %cst_48 = arith.constant 1.000000e+00 : f32
    %103 = vector.broadcast %cst_48 : f32 to vector<16x128xf32>
    %104 = arith.addf %103, %102 : vector<16x128xf32>
    %105 = tpu.reciprocal %104 {approx = true} : vector<16x128xf32> -> vector<16x128xf32>
    %106 = vector.extract_strided_slice %98 {offsets = [0, 0], sizes = [16, 128], strides = [1, 1]} : vector<16x256xf32> to vector<16x128xf32>
    %107 = math.tanh %106 : vector<16x128xf32>
    %108 = arith.mulf %107, %105 : vector<16x128xf32>
    %109 = arith.truncf %108 : vector<16x128xf32> to vector<16x128xbf16>
    %c0_49 = arith.constant 0 : index
    %c384 = arith.constant 384 : index
    %110 = vector.load %arg29[%c0_49, %c384] : memref<16x1408xbf16, #tpu.memory_space<vmem>>, vector<16x128xbf16>
    tpu.vector_store %arg29[%c0_49, %c384], %109 {strides = array<i32>} : memref<16x1408xbf16, #tpu.memory_space<vmem>>, vector<16x128xbf16>,
    %c0_50 = arith.constant 0 : index
    %c0_51 = arith.constant 0 : index
    %111 = vector.load %arg29[%c0_50, %c0_51] : memref<16x1408xbf16, #tpu.memory_space<vmem>>, vector<16x512xbf16>
    %c0_52 = arith.constant 0 : index
    %c0_53 = arith.constant 0 : index
    %112 = vector.load %arg10[%c0_52, %c0_53] : memref<512x256xbf16, #tpu.memory_space<vmem>>, vector<512x256xbf16>
    %c0_54 = arith.constant 0 : index
    %c0_55 = arith.constant 0 : index
    %113 = vector.load %arg11[%c0_54, %c0_55] : memref<512x256xbf16, #tpu.memory_space<vmem>>, vector<512x256xbf16>
    %c0_56 = arith.constant 0 : index
    %c0_57 = arith.constant 0 : index
    %114 = vector.load %arg12[%c0_56, %c0_57] : memref<1x256xf32, #tpu.memory_space<vmem>>, vector<1x256xf32>
    %cst_58 = arith.constant dense<0.000000e+00> : vector<16x256xf32>
    %115 = tpu.matmul %111, %112, %cst_58 {dimension_numbers = #tpu.dot_dimension_numbers<[1], [0], [0], [1], [0, 0, 1, 1], [], []>} : vector<16x512xbf16>, vector<512x256xbf16>, vector<16x256xf32> -> vector<16x256xf32>
    %cst_59 = arith.constant dense<0.000000e+00> : vector<16x256xf32>
    %116 = tpu.matmul %111, %113, %cst_59 {dimension_numbers = #tpu.dot_dimension_numbers<[1], [0], [0], [1], [0, 0, 1, 1], [], []>} : vector<16x512xbf16>, vector<512x256xbf16>, vector<16x256xf32> -> vector<16x256xf32>
    %c4_i32 = arith.constant 4 : i32
    %117 = tpu.dynamic_rotate %116 by %c4_i32 dim 0 : vector<16x256xf32>, i32 -> vector<16x256xf32>
    %c4_i32_60 = arith.constant 4 : i32
    %118 = vector.broadcast %c4_i32_60 : i32 to vector<16x1xi32>
    %119 = arith.cmpi sge, %15, %118 : vector<16x1xi32>
    %cst_61 = arith.constant 0.000000e+00 : f32
    %120 = vector.shape_cast %119 : vector<16x1xi1> to vector<16x1xi1>
    %121 = vector.broadcast %120 : vector<16x1xi1> to vector<16x256xi1>
    %122 = vector.broadcast %cst_61 : f32 to vector<16x256xf32>
    %123 = arith.select %121, %117, %122 : vector<16x256xi1>, vector<16x256xf32>
    %124 = arith.addf %115, %123 : vector<16x256xf32>
    %125 = vector.broadcast %114 : vector<1x256xf32> to vector<16x256xf32>
    %126 = arith.addf %124, %125 : vector<16x256xf32>
    %127 = vector.extract_strided_slice %126 {offsets = [0, 128], sizes = [16, 128], strides = [1, 1]} : vector<16x256xf32> to vector<16x128xf32>
    %cst_62 = arith.constant 0.000000e+00 : f32
    %128 = vector.broadcast %cst_62 : f32 to vector<16x128xf32>
    %129 = arith.subf %128, %127 : vector<16x128xf32>
    %130 = math.exp %129 : vector<16x128xf32>
    %cst_63 = arith.constant 1.000000e+00 : f32
    %131 = vector.broadcast %cst_63 : f32 to vector<16x128xf32>
    %132 = arith.addf %131, %130 : vector<16x128xf32>
    %133 = tpu.reciprocal %132 {approx = true} : vector<16x128xf32> -> vector<16x128xf32>
    %134 = vector.extract_strided_slice %126 {offsets = [0, 0], sizes = [16, 128], strides = [1, 1]} : vector<16x256xf32> to vector<16x128xf32>
    %135 = math.tanh %134 : vector<16x128xf32>
    %136 = arith.mulf %135, %133 : vector<16x128xf32>
    %137 = arith.truncf %136 : vector<16x128xf32> to vector<16x128xbf16>
    %c0_64 = arith.constant 0 : index
    %c512 = arith.constant 512 : index
    %138 = vector.load %arg29[%c0_64, %c512] : memref<16x1408xbf16, #tpu.memory_space<vmem>>, vector<16x128xbf16>
    tpu.vector_store %arg29[%c0_64, %c512], %137 {strides = array<i32>} : memref<16x1408xbf16, #tpu.memory_space<vmem>>, vector<16x128xbf16>,
    %c0_65 = arith.constant 0 : index
    %c0_66 = arith.constant 0 : index
    %139 = vector.load %arg29[%c0_65, %c0_66] : memref<16x1408xbf16, #tpu.memory_space<vmem>>, vector<16x640xbf16>
    %c0_67 = arith.constant 0 : index
    %c0_68 = arith.constant 0 : index
    %140 = vector.load %arg13[%c0_67, %c0_68] : memref<640x640xbf16, #tpu.memory_space<vmem>>, vector<640x640xbf16>
    %c0_69 = arith.constant 0 : index
    %c0_70 = arith.constant 0 : index
    %141 = vector.load %arg14[%c0_69, %c0_70] : memref<1x640xf32, #tpu.memory_space<vmem>>, vector<1x640xf32>
    %cst_71 = arith.constant dense<0.000000e+00> : vector<16x640xf32>
    %142 = tpu.matmul %139, %140, %cst_71 {dimension_numbers = #tpu.dot_dimension_numbers<[1], [0], [0], [1], [0, 0, 1, 1], [], []>} : vector<16x640xbf16>, vector<640x640xbf16>, vector<16x640xf32> -> vector<16x640xf32>
    %143 = vector.broadcast %141 : vector<1x640xf32> to vector<16x640xf32>
    %144 = arith.addf %142, %143 : vector<16x640xf32>
    %145 = vector.extract_strided_slice %144 {offsets = [0, 0], sizes = [16, 256], strides = [1, 1]} : vector<16x640xf32> to vector<16x256xf32>
    %146 = arith.truncf %145 : vector<16x256xf32> to vector<16x256xbf16>
    %147 = vector.extract_strided_slice %144 {offsets = [0, 256], sizes = [16, 256], strides = [1, 1]} : vector<16x640xf32> to vector<16x256xf32>
    %148 = arith.truncf %147 : vector<16x256xf32> to vector<16x256xbf16>
    %149 = vector.extract_strided_slice %144 {offsets = [0, 512], sizes = [16, 128], strides = [1, 1]} : vector<16x640xf32> to vector<16x128xf32>
    %150 = arith.truncf %149 : vector<16x128xf32> to vector<16x128xbf16>
    %cst_72 = arith.constant dense<0.000000e+00> : vector<16x16xf32>
    %151 = tpu.matmul %146, %148, %cst_72 {dimension_numbers = #tpu.dot_dimension_numbers<[1], [1], [0], [0], [0, 0, 1, 0], [], []>} : vector<16x256xbf16>, vector<16x256xbf16>, vector<16x16xf32> -> vector<16x16xf32>
    %152 = tpu.iota {dimensions = array<i32: 0>} : vector<16x16xi32>
    %153 = tpu.iota {dimensions = array<i32: 1>} : vector<16x16xi32>
    %154 = arith.subi %152, %153 : vector<16x16xi32>
    %c0_i32_73 = arith.constant 0 : i32
    %155 = vector.broadcast %c0_i32_73 : i32 to vector<16x16xi32>
    %156 = arith.cmpi sge, %154, %155 : vector<16x16xi32>
    %157 = vector.broadcast %15 : vector<16x1xi32> to vector<16x16xi32>
    %158 = arith.cmpi sle, %154, %157 : vector<16x16xi32>
    %159 = arith.andi %156, %158 : vector<16x16xi1>
    %cst_74 = arith.constant 6.250000e-02 : f32
    %160 = vector.broadcast %cst_74 : f32 to vector<16x16xf32>
    %161 = arith.mulf %151, %160 : vector<16x16xf32>
    %cst_75 = arith.constant -1.000000e+30 : f32
    %162 = vector.broadcast %cst_75 : f32 to vector<16x16xf32>
    %163 = arith.select %159, %161, %162 : vector<16x16xi1>, vector<16x16xf32>
    %cst_76 = arith.constant dense<0xFF800000> : vector<16xf32>
    %164 = vector.multi_reduction <maximumf>, %163, %cst_76 [1] : vector<16x16xf32> to vector<16xf32>
    %165 = vector.shape_cast %164 : vector<16xf32> to vector<16x1xf32>
    %166 = vector.broadcast %165 : vector<16x1xf32> to vector<16x16xf32>
    %167 = arith.subf %163, %166 : vector<16x16xf32>
    %168 = math.exp %167 : vector<16x16xf32>
    %cst_77 = arith.constant dense<0.000000e+00> : vector<16xf32>
    %169 = vector.multi_reduction <add>, %168, %cst_77 [1] : vector<16x16xf32> to vector<16xf32>
    %170 = vector.shape_cast %169 : vector<16xf32> to vector<16x1xf32>
    %171 = tpu.reciprocal %170 {approx = true} : vector<16x1xf32> -> vector<16x1xf32>
    %172 = vector.broadcast %171 : vector<16x1xf32> to vector<16x16xf32>
    %173 = arith.mulf %168, %172 : vector<16x16xf32>
    %174 = arith.truncf %173 : vector<16x16xf32> to vector<16x16xbf16>
    %cst_78 = arith.constant dense<0.000000e+00> : vector<16x128xf32>
    %175 = tpu.matmul %174, %150, %cst_78 {dimension_numbers = #tpu.dot_dimension_numbers<[1], [0], [0], [1], [0, 0, 1, 1], [], []>} : vector<16x16xbf16>, vector<16x128xbf16>, vector<16x128xf32> -> vector<16x128xf32>
    %176 = arith.truncf %175 : vector<16x128xf32> to vector<16x128xbf16>
    %c0_79 = arith.constant 0 : index
    %c640 = arith.constant 640 : index
    %177 = vector.load %arg29[%c0_79, %c640] : memref<16x1408xbf16, #tpu.memory_space<vmem>>, vector<16x128xbf16>
    tpu.vector_store %arg29[%c0_79, %c640], %176 {strides = array<i32>} : memref<16x1408xbf16, #tpu.memory_space<vmem>>, vector<16x128xbf16>,
    %c0_80 = arith.constant 0 : index
    %c0_81 = arith.constant 0 : index
    %178 = vector.load %arg29[%c0_80, %c0_81] : memref<16x1408xbf16, #tpu.memory_space<vmem>>, vector<16x768xbf16>
    %c0_82 = arith.constant 0 : index
    %c0_83 = arith.constant 0 : index
    %179 = vector.load %arg15[%c0_82, %c0_83] : memref<768x256xbf16, #tpu.memory_space<vmem>>, vector<768x256xbf16>
    %c0_84 = arith.constant 0 : index
    %c0_85 = arith.constant 0 : index
    %180 = vector.load %arg16[%c0_84, %c0_85] : memref<768x256xbf16, #tpu.memory_space<vmem>>, vector<768x256xbf16>
    %c0_86 = arith.constant 0 : index
    %c0_87 = arith.constant 0 : index
    %181 = vector.load %arg17[%c0_86, %c0_87] : memref<1x256xf32, #tpu.memory_space<vmem>>, vector<1x256xf32>
    %cst_88 = arith.constant dense<0.000000e+00> : vector<16x256xf32>
    %182 = tpu.matmul %178, %179, %cst_88 {dimension_numbers = #tpu.dot_dimension_numbers<[1], [0], [0], [1], [0, 0, 1, 1], [], []>} : vector<16x768xbf16>, vector<768x256xbf16>, vector<16x256xf32> -> vector<16x256xf32>
    %cst_89 = arith.constant dense<0.000000e+00> : vector<16x256xf32>
    %183 = tpu.matmul %178, %180, %cst_89 {dimension_numbers = #tpu.dot_dimension_numbers<[1], [0], [0], [1], [0, 0, 1, 1], [], []>} : vector<16x768xbf16>, vector<768x256xbf16>, vector<16x256xf32> -> vector<16x256xf32>
    %c1_i32_90 = arith.constant 1 : i32
    %184 = tpu.dynamic_rotate %183 by %c1_i32_90 dim 0 : vector<16x256xf32>, i32 -> vector<16x256xf32>
    %c1_i32_91 = arith.constant 1 : i32
    %185 = vector.broadcast %c1_i32_91 : i32 to vector<16x1xi32>
    %186 = arith.cmpi sge, %15, %185 : vector<16x1xi32>
    %cst_92 = arith.constant 0.000000e+00 : f32
    %187 = vector.shape_cast %186 : vector<16x1xi1> to vector<16x1xi1>
    %188 = vector.broadcast %187 : vector<16x1xi1> to vector<16x256xi1>
    %189 = vector.broadcast %cst_92 : f32 to vector<16x256xf32>
    %190 = arith.select %188, %184, %189 : vector<16x256xi1>, vector<16x256xf32>
    %191 = arith.addf %182, %190 : vector<16x256xf32>
    %192 = vector.broadcast %181 : vector<1x256xf32> to vector<16x256xf32>
    %193 = arith.addf %191, %192 : vector<16x256xf32>
    %194 = vector.extract_strided_slice %193 {offsets = [0, 128], sizes = [16, 128], strides = [1, 1]} : vector<16x256xf32> to vector<16x128xf32>
    %cst_93 = arith.constant 0.000000e+00 : f32
    %195 = vector.broadcast %cst_93 : f32 to vector<16x128xf32>
    %196 = arith.subf %195, %194 : vector<16x128xf32>
    %197 = math.exp %196 : vector<16x128xf32>
    %cst_94 = arith.constant 1.000000e+00 : f32
    %198 = vector.broadcast %cst_94 : f32 to vector<16x128xf32>
    %199 = arith.addf %198, %197 : vector<16x128xf32>
    %200 = tpu.reciprocal %199 {approx = true} : vector<16x128xf32> -> vector<16x128xf32>
    %201 = vector.extract_strided_slice %193 {offsets = [0, 0], sizes = [16, 128], strides = [1, 1]} : vector<16x256xf32> to vector<16x128xf32>
    %202 = math.tanh %201 : vector<16x128xf32>
    %203 = arith.mulf %202, %200 : vector<16x128xf32>
    %204 = arith.truncf %203 : vector<16x128xf32> to vector<16x128xbf16>
    %c0_95 = arith.constant 0 : index
    %c768 = arith.constant 768 : index
    %205 = vector.load %arg29[%c0_95, %c768] : memref<16x1408xbf16, #tpu.memory_space<vmem>>, vector<16x128xbf16>
    tpu.vector_store %arg29[%c0_95, %c768], %204 {strides = array<i32>} : memref<16x1408xbf16, #tpu.memory_space<vmem>>, vector<16x128xbf16>,
    %c0_96 = arith.constant 0 : index
    %c0_97 = arith.constant 0 : index
    %206 = vector.load %arg29[%c0_96, %c0_97] : memref<16x1408xbf16, #tpu.memory_space<vmem>>, vector<16x896xbf16>
    %c0_98 = arith.constant 0 : index
    %c0_99 = arith.constant 0 : index
    %207 = vector.load %arg18[%c0_98, %c0_99] : memref<896x256xbf16, #tpu.memory_space<vmem>>, vector<896x256xbf16>
    %c0_100 = arith.constant 0 : index
    %c0_101 = arith.constant 0 : index
    %208 = vector.load %arg19[%c0_100, %c0_101] : memref<896x256xbf16, #tpu.memory_space<vmem>>, vector<896x256xbf16>
    %c0_102 = arith.constant 0 : index
    %c0_103 = arith.constant 0 : index
    %209 = vector.load %arg20[%c0_102, %c0_103] : memref<1x256xf32, #tpu.memory_space<vmem>>, vector<1x256xf32>
    %cst_104 = arith.constant dense<0.000000e+00> : vector<16x256xf32>
    %210 = tpu.matmul %206, %207, %cst_104 {dimension_numbers = #tpu.dot_dimension_numbers<[1], [0], [0], [1], [0, 0, 1, 1], [], []>} : vector<16x896xbf16>, vector<896x256xbf16>, vector<16x256xf32> -> vector<16x256xf32>
    %cst_105 = arith.constant dense<0.000000e+00> : vector<16x256xf32>
    %211 = tpu.matmul %206, %208, %cst_105 {dimension_numbers = #tpu.dot_dimension_numbers<[1], [0], [0], [1], [0, 0, 1, 1], [], []>} : vector<16x896xbf16>, vector<896x256xbf16>, vector<16x256xf32> -> vector<16x256xf32>
    %c2_i32_106 = arith.constant 2 : i32
    %212 = tpu.dynamic_rotate %211 by %c2_i32_106 dim 0 : vector<16x256xf32>, i32 -> vector<16x256xf32>
    %c2_i32_107 = arith.constant 2 : i32
    %213 = vector.broadcast %c2_i32_107 : i32 to vector<16x1xi32>
    %214 = arith.cmpi sge, %15, %213 : vector<16x1xi32>
    %cst_108 = arith.constant 0.000000e+00 : f32
    %215 = vector.shape_cast %214 : vector<16x1xi1> to vector<16x1xi1>
    %216 = vector.broadcast %215 : vector<16x1xi1> to vector<16x256xi1>
    %217 = vector.broadcast %cst_108 : f32 to vector<16x256xf32>
    %218 = arith.select %216, %212, %217 : vector<16x256xi1>, vector<16x256xf32>
    %219 = arith.addf %210, %218 : vector<16x256xf32>
    %220 = vector.broadcast %209 : vector<1x256xf32> to vector<16x256xf32>
    %221 = arith.addf %219, %220 : vector<16x256xf32>
    %222 = vector.extract_strided_slice %221 {offsets = [0, 128], sizes = [16, 128], strides = [1, 1]} : vector<16x256xf32> to vector<16x128xf32>
    %cst_109 = arith.constant 0.000000e+00 : f32
    %223 = vector.broadcast %cst_109 : f32 to vector<16x128xf32>
    %224 = arith.subf %223, %222 : vector<16x128xf32>
    %225 = math.exp %224 : vector<16x128xf32>
    %cst_110 = arith.constant 1.000000e+00 : f32
    %226 = vector.broadcast %cst_110 : f32 to vector<16x128xf32>
    %227 = arith.addf %226, %225 : vector<16x128xf32>
    %228 = tpu.reciprocal %227 {approx = true} : vector<16x128xf32> -> vector<16x128xf32>
    %229 = vector.extract_strided_slice %221 {offsets = [0, 0], sizes = [16, 128], strides = [1, 1]} : vector<16x256xf32> to vector<16x128xf32>
    %230 = math.tanh %229 : vector<16x128xf32>
    %231 = arith.mulf %230, %228 : vector<16x128xf32>
    %232 = arith.truncf %231 : vector<16x128xf32> to vector<16x128xbf16>
    %c0_111 = arith.constant 0 : index
    %c896 = arith.constant 896 : index
    %233 = vector.load %arg29[%c0_111, %c896] : memref<16x1408xbf16, #tpu.memory_space<vmem>>, vector<16x128xbf16>
    tpu.vector_store %arg29[%c0_111, %c896], %232 {strides = array<i32>} : memref<16x1408xbf16, #tpu.memory_space<vmem>>, vector<16x128xbf16>,
    %c0_112 = arith.constant 0 : index
    %c0_113 = arith.constant 0 : index
    %234 = vector.load %arg29[%c0_112, %c0_113] : memref<16x1408xbf16, #tpu.memory_space<vmem>>, vector<16x1024xbf16>
    %c0_114 = arith.constant 0 : index
    %c0_115 = arith.constant 0 : index
    %235 = vector.load %arg21[%c0_114, %c0_115] : memref<1024x256xbf16, #tpu.memory_space<vmem>>, vector<1024x256xbf16>
    %c0_116 = arith.constant 0 : index
    %c0_117 = arith.constant 0 : index
    %236 = vector.load %arg22[%c0_116, %c0_117] : memref<1024x256xbf16, #tpu.memory_space<vmem>>, vector<1024x256xbf16>
    %c0_118 = arith.constant 0 : index
    %c0_119 = arith.constant 0 : index
    %237 = vector.load %arg23[%c0_118, %c0_119] : memref<1x256xf32, #tpu.memory_space<vmem>>, vector<1x256xf32>
    %cst_120 = arith.constant dense<0.000000e+00> : vector<16x256xf32>
    %238 = tpu.matmul %234, %235, %cst_120 {dimension_numbers = #tpu.dot_dimension_numbers<[1], [0], [0], [1], [0, 0, 1, 1], [], []>} : vector<16x1024xbf16>, vector<1024x256xbf16>, vector<16x256xf32> -> vector<16x256xf32>
    %cst_121 = arith.constant dense<0.000000e+00> : vector<16x256xf32>
    %239 = tpu.matmul %234, %236, %cst_121 {dimension_numbers = #tpu.dot_dimension_numbers<[1], [0], [0], [1], [0, 0, 1, 1], [], []>} : vector<16x1024xbf16>, vector<1024x256xbf16>, vector<16x256xf32> -> vector<16x256xf32>
    %c4_i32_122 = arith.constant 4 : i32
    %240 = tpu.dynamic_rotate %239 by %c4_i32_122 dim 0 : vector<16x256xf32>, i32 -> vector<16x256xf32>
    %c4_i32_123 = arith.constant 4 : i32
    %241 = vector.broadcast %c4_i32_123 : i32 to vector<16x1xi32>
    %242 = arith.cmpi sge, %15, %241 : vector<16x1xi32>
    %cst_124 = arith.constant 0.000000e+00 : f32
    %243 = vector.shape_cast %242 : vector<16x1xi1> to vector<16x1xi1>
    %244 = vector.broadcast %243 : vector<16x1xi1> to vector<16x256xi1>
    %245 = vector.broadcast %cst_124 : f32 to vector<16x256xf32>
    %246 = arith.select %244, %240, %245 : vector<16x256xi1>, vector<16x256xf32>
    %247 = arith.addf %238, %246 : vector<16x256xf32>
    %248 = vector.broadcast %237 : vector<1x256xf32> to vector<16x256xf32>
    %249 = arith.addf %247, %248 : vector<16x256xf32>
    %250 = vector.extract_strided_slice %249 {offsets = [0, 128], sizes = [16, 128], strides = [1, 1]} : vector<16x256xf32> to vector<16x128xf32>
    %cst_125 = arith.constant 0.000000e+00 : f32
    %251 = vector.broadcast %cst_125 : f32 to vector<16x128xf32>
    %252 = arith.subf %251, %250 : vector<16x128xf32>
    %253 = math.exp %252 : vector<16x128xf32>
    %cst_126 = arith.constant 1.000000e+00 : f32
    %254 = vector.broadcast %cst_126 : f32 to vector<16x128xf32>
    %255 = arith.addf %254, %253 : vector<16x128xf32>
    %256 = tpu.reciprocal %255 {approx = true} : vector<16x128xf32> -> vector<16x128xf32>
    %257 = vector.extract_strided_slice %249 {offsets = [0, 0], sizes = [16, 128], strides = [1, 1]} : vector<16x256xf32> to vector<16x128xf32>
    %258 = math.tanh %257 : vector<16x128xf32>
    %259 = arith.mulf %258, %256 : vector<16x128xf32>
    %260 = arith.truncf %259 : vector<16x128xf32> to vector<16x128xbf16>
    %c0_127 = arith.constant 0 : index
    %c1024 = arith.constant 1024 : index
    %261 = vector.load %arg29[%c0_127, %c1024] : memref<16x1408xbf16, #tpu.memory_space<vmem>>, vector<16x128xbf16>
    tpu.vector_store %arg29[%c0_127, %c1024], %260 {strides = array<i32>} : memref<16x1408xbf16, #tpu.memory_space<vmem>>, vector<16x128xbf16>,
    %c0_128 = arith.constant 0 : index
    %c0_129 = arith.constant 0 : index
    %262 = vector.load %arg29[%c0_128, %c0_129] : memref<16x1408xbf16, #tpu.memory_space<vmem>>, vector<16x1152xbf16>
    %c0_130 = arith.constant 0 : index
    %c0_131 = arith.constant 0 : index
    %263 = vector.load %arg24[%c0_130, %c0_131] : memref<1152x1280xbf16, #tpu.memory_space<vmem>>, vector<1152x1280xbf16>
    %c0_132 = arith.constant 0 : index
    %c0_133 = arith.constant 0 : index
    %264 = vector.load %arg25[%c0_132, %c0_133] : memref<1x1280xf32, #tpu.memory_space<vmem>>, vector<1x1280xf32>
    %cst_134 = arith.constant dense<0.000000e+00> : vector<16x1280xf32>
    %265 = tpu.matmul %262, %263, %cst_134 {dimension_numbers = #tpu.dot_dimension_numbers<[1], [0], [0], [1], [0, 0, 1, 1], [], []>} : vector<16x1152xbf16>, vector<1152x1280xbf16>, vector<16x1280xf32> -> vector<16x1280xf32>
    %266 = vector.broadcast %264 : vector<1x1280xf32> to vector<16x1280xf32>
    %267 = arith.addf %265, %266 : vector<16x1280xf32>
    %268 = vector.extract_strided_slice %267 {offsets = [0, 0], sizes = [16, 512], strides = [1, 1]} : vector<16x1280xf32> to vector<16x512xf32>
    %269 = arith.truncf %268 : vector<16x512xf32> to vector<16x512xbf16>
    %270 = vector.extract_strided_slice %267 {offsets = [0, 512], sizes = [16, 512], strides = [1, 1]} : vector<16x1280xf32> to vector<16x512xf32>
    %271 = arith.truncf %270 : vector<16x512xf32> to vector<16x512xbf16>
    %272 = vector.extract_strided_slice %267 {offsets = [0, 1024], sizes = [16, 256], strides = [1, 1]} : vector<16x1280xf32> to vector<16x256xf32>
    %273 = arith.truncf %272 : vector<16x256xf32> to vector<16x256xbf16>
    %cst_135 = arith.constant dense<0.000000e+00> : vector<16x16xf32>
    %274 = tpu.matmul %269, %271, %cst_135 {dimension_numbers = #tpu.dot_dimension_numbers<[1], [1], [0], [0], [0, 0, 1, 0], [], []>} : vector<16x512xbf16>, vector<16x512xbf16>, vector<16x16xf32> -> vector<16x16xf32>
    %275 = tpu.iota {dimensions = array<i32: 0>} : vector<16x16xi32>
    %276 = tpu.iota {dimensions = array<i32: 1>} : vector<16x16xi32>
    %277 = arith.subi %275, %276 : vector<16x16xi32>
    %c0_i32_136 = arith.constant 0 : i32
    %278 = vector.broadcast %c0_i32_136 : i32 to vector<16x16xi32>
    %279 = arith.cmpi sge, %277, %278 : vector<16x16xi32>
    %280 = vector.broadcast %15 : vector<16x1xi32> to vector<16x16xi32>
    %281 = arith.cmpi sle, %277, %280 : vector<16x16xi32>
    %282 = arith.andi %279, %281 : vector<16x16xi1>
    %cst_137 = arith.constant 0.0441941731 : f32
    %283 = vector.broadcast %cst_137 : f32 to vector<16x16xf32>
    %284 = arith.mulf %274, %283 : vector<16x16xf32>
    %cst_138 = arith.constant -1.000000e+30 : f32
    %285 = vector.broadcast %cst_138 : f32 to vector<16x16xf32>
    %286 = arith.select %282, %284, %285 : vector<16x16xi1>, vector<16x16xf32>
    %cst_139 = arith.constant dense<0xFF800000> : vector<16xf32>
    %287 = vector.multi_reduction <maximumf>, %286, %cst_139 [1] : vector<16x16xf32> to vector<16xf32>
    %288 = vector.shape_cast %287 : vector<16xf32> to vector<16x1xf32>
    %289 = vector.broadcast %288 : vector<16x1xf32> to vector<16x16xf32>
    %290 = arith.subf %286, %289 : vector<16x16xf32>
    %291 = math.exp %290 : vector<16x16xf32>
    %cst_140 = arith.constant dense<0.000000e+00> : vector<16xf32>
    %292 = vector.multi_reduction <add>, %291, %cst_140 [1] : vector<16x16xf32> to vector<16xf32>
    %293 = vector.shape_cast %292 : vector<16xf32> to vector<16x1xf32>
    %294 = tpu.reciprocal %293 {approx = true} : vector<16x1xf32> -> vector<16x1xf32>
    %295 = vector.broadcast %294 : vector<16x1xf32> to vector<16x16xf32>
    %296 = arith.mulf %291, %295 : vector<16x16xf32>
    %297 = arith.truncf %296 : vector<16x16xf32> to vector<16x16xbf16>
    %cst_141 = arith.constant dense<0.000000e+00> : vector<16x256xf32>
    %298 = tpu.matmul %297, %273, %cst_141 {dimension_numbers = #tpu.dot_dimension_numbers<[1], [0], [0], [1], [0, 0, 1, 1], [], []>} : vector<16x16xbf16>, vector<16x256xbf16>, vector<16x256xf32> -> vector<16x256xf32>
    %299 = arith.truncf %298 : vector<16x256xf32> to vector<16x256xbf16>
    %c0_142 = arith.constant 0 : index
    %c1152 = arith.constant 1152 : index
    %300 = vector.load %arg29[%c0_142, %c1152] : memref<16x1408xbf16, #tpu.memory_space<vmem>>, vector<16x256xbf16>
    tpu.vector_store %arg29[%c0_142, %c1152], %299 {strides = array<i32>} : memref<16x1408xbf16, #tpu.memory_space<vmem>>, vector<16x256xbf16>,
    %c0_143 = arith.constant 0 : index
    %c0_144 = arith.constant 0 : index
    %301 = vector.load %arg26[%c0_143, %c0_144] : memref<1408x128xbf16, #tpu.memory_space<vmem>>, vector<1408x128xbf16>
    %c0_145 = arith.constant 0 : index
    %c0_146 = arith.constant 0 : index
    %302 = vector.load %arg27[%c0_145, %c0_146] : memref<1x128xf32, #tpu.memory_space<vmem>>, vector<1x128xf32>
    %c0_147 = arith.constant 0 : index
    %c0_148 = arith.constant 0 : index
    %303 = vector.load %arg29[%c0_147, %c0_148] : memref<16x1408xbf16, #tpu.memory_space<vmem>>, vector<16x1408xbf16>
    %cst_149 = arith.constant dense<0.000000e+00> : vector<16x128xf32>
    %304 = tpu.matmul %303, %301, %cst_149 {dimension_numbers = #tpu.dot_dimension_numbers<[1], [0], [0], [1], [0, 0, 1, 1], [], []>} : vector<16x1408xbf16>, vector<1408x128xbf16>, vector<16x128xf32> -> vector<16x128xf32>
    %305 = vector.broadcast %302 : vector<1x128xf32> to vector<16x128xf32>
    %306 = arith.addf %304, %305 : vector<16x128xf32>
    %c0_150 = arith.constant 0 : index
    %c0_151 = arith.constant 0 : index
    %307 = vector.load %arg28[%c0_150, %c0_151] : memref<16x128xf32, #tpu.memory_space<vmem>>, vector<16x128xf32>
    tpu.vector_store %arg28[%c0_150, %c0_151], %306 {strides = array<i32>} : memref<16x128xf32, #tpu.memory_space<vmem>>, vector<16x128xf32>,
    return
  }
  func.func @transform_0(%arg0: i32) -> (i32, i32) {
    %c0_i32 = arith.constant 0 : i32
    %c0_i32_0 = arith.constant 0 : i32
    return %arg0, %c0_i32 : i32, i32
  }
  func.func @transform_1(%arg0: i32) -> (i32, i32) {
    %c0_i32 = arith.constant 0 : i32
    %c0_i32_0 = arith.constant 0 : i32
    %c0_i32_1 = arith.constant 0 : i32
    return %c0_i32, %c0_i32_0 : i32, i32
  }
  func.func @transform_2(%arg0: i32) -> (i32, i32) {
    %c0_i32 = arith.constant 0 : i32
    %c0_i32_0 = arith.constant 0 : i32
    %c0_i32_1 = arith.constant 0 : i32
    return %c0_i32, %c0_i32_0 : i32, i32
  }
  func.func @transform_3(%arg0: i32) -> (i32, i32) {
    %c0_i32 = arith.constant 0 : i32
    %c0_i32_0 = arith.constant 0 : i32
    %c0_i32_1 = arith.constant 0 : i32
    return %c0_i32, %c0_i32_0 : i32, i32
  }
  func.func @transform_4(%arg0: i32) -> (i32, i32) {
    %c0_i32 = arith.constant 0 : i32
    %c0_i32_0 = arith.constant 0 : i32
    %c0_i32_1 = arith.constant 0 : i32
    return %c0_i32, %c0_i32_0 : i32, i32
  }
  func.func @transform_5(%arg0: i32) -> (i32, i32) {
    %c0_i32 = arith.constant 0 : i32
    %c0_i32_0 = arith.constant 0 : i32
    %c0_i32_1 = arith.constant 0 : i32
    return %c0_i32, %c0_i32_0 : i32, i32
  }
  func.func @transform_6(%arg0: i32) -> (i32, i32) {
    %c0_i32 = arith.constant 0 : i32
    %c0_i32_0 = arith.constant 0 : i32
    %c0_i32_1 = arith.constant 0 : i32
    return %c0_i32, %c0_i32_0 : i32, i32
  }
  func.func @transform_7(%arg0: i32) -> (i32, i32) {
    %c0_i32 = arith.constant 0 : i32
    %c0_i32_0 = arith.constant 0 : i32
    %c0_i32_1 = arith.constant 0 : i32
    return %c0_i32, %c0_i32_0 : i32, i32
  }
  func.func @transform_8(%arg0: i32) -> (i32, i32) {
    %c0_i32 = arith.constant 0 : i32
    %c0_i32_0 = arith.constant 0 : i32
    %c0_i32_1 = arith.constant 0 : i32
    return %c0_i32, %c0_i32_0 : i32, i32
  }
  func.func @transform_9(%arg0: i32) -> (i32, i32) {
    %c0_i32 = arith.constant 0 : i32
    %c0_i32_0 = arith.constant 0 : i32
    %c0_i32_1 = arith.constant 0 : i32
    return %c0_i32, %c0_i32_0 : i32, i32
  }
  func.func @transform_10(%arg0: i32) -> (i32, i32) {
    %c0_i32 = arith.constant 0 : i32
    %c0_i32_0 = arith.constant 0 : i32
    %c0_i32_1 = arith.constant 0 : i32
    return %c0_i32, %c0_i32_0 : i32, i32
  }
  func.func @transform_11(%arg0: i32) -> (i32, i32) {
    %c0_i32 = arith.constant 0 : i32
    %c0_i32_0 = arith.constant 0 : i32
    %c0_i32_1 = arith.constant 0 : i32
    return %c0_i32, %c0_i32_0 : i32, i32
  }
  func.func @transform_12(%arg0: i32) -> (i32, i32) {
    %c0_i32 = arith.constant 0 : i32
    %c0_i32_0 = arith.constant 0 : i32
    %c0_i32_1 = arith.constant 0 : i32
    return %c0_i32, %c0_i32_0 : i32, i32
  }
  func.func @transform_13(%arg0: i32) -> (i32, i32) {
    %c0_i32 = arith.constant 0 : i32
    %c0_i32_0 = arith.constant 0 : i32
    %c0_i32_1 = arith.constant 0 : i32
    return %c0_i32, %c0_i32_0 : i32, i32
  }
  func.func @transform_14(%arg0: i32) -> (i32, i32) {
    %c0_i32 = arith.constant 0 : i32
    %c0_i32_0 = arith.constant 0 : i32
    %c0_i32_1 = arith.constant 0 : i32
    return %c0_i32, %c0_i32_0 : i32, i32
  }
  func.func @transform_15(%arg0: i32) -> (i32, i32) {
    %c0_i32 = arith.constant 0 : i32
    %c0_i32_0 = arith.constant 0 : i32
    %c0_i32_1 = arith.constant 0 : i32
    return %c0_i32, %c0_i32_0 : i32, i32
  }
  func.func @transform_16(%arg0: i32) -> (i32, i32) {
    %c0_i32 = arith.constant 0 : i32
    %c0_i32_0 = arith.constant 0 : i32
    %c0_i32_1 = arith.constant 0 : i32
    return %c0_i32, %c0_i32_0 : i32, i32
  }
  func.func @transform_17(%arg0: i32) -> (i32, i32) {
    %c0_i32 = arith.constant 0 : i32
    %c0_i32_0 = arith.constant 0 : i32
    %c0_i32_1 = arith.constant 0 : i32
    return %c0_i32, %c0_i32_0 : i32, i32
  }
  func.func @transform_18(%arg0: i32) -> (i32, i32) {
    %c0_i32 = arith.constant 0 : i32
    %c0_i32_0 = arith.constant 0 : i32
    %c0_i32_1 = arith.constant 0 : i32
    return %c0_i32, %c0_i32_0 : i32, i32
  }
  func.func @transform_19(%arg0: i32) -> (i32, i32) {
    %c0_i32 = arith.constant 0 : i32
    %c0_i32_0 = arith.constant 0 : i32
    %c0_i32_1 = arith.constant 0 : i32
    return %c0_i32, %c0_i32_0 : i32, i32
  }
  func.func @transform_20(%arg0: i32) -> (i32, i32) {
    %c0_i32 = arith.constant 0 : i32
    %c0_i32_0 = arith.constant 0 : i32
    %c0_i32_1 = arith.constant 0 : i32
    return %c0_i32, %c0_i32_0 : i32, i32
  }
  func.func @transform_21(%arg0: i32) -> (i32, i32) {
    %c0_i32 = arith.constant 0 : i32
    %c0_i32_0 = arith.constant 0 : i32
    %c0_i32_1 = arith.constant 0 : i32
    return %c0_i32, %c0_i32_0 : i32, i32
  }
  func.func @transform_22(%arg0: i32) -> (i32, i32) {
    %c0_i32 = arith.constant 0 : i32
    %c0_i32_0 = arith.constant 0 : i32
    %c0_i32_1 = arith.constant 0 : i32
    return %c0_i32, %c0_i32_0 : i32, i32
  }
  func.func @transform_23(%arg0: i32) -> (i32, i32) {
    %c0_i32 = arith.constant 0 : i32
    %c0_i32_0 = arith.constant 0 : i32
    %c0_i32_1 = arith.constant 0 : i32
    return %c0_i32, %c0_i32_0 : i32, i32
  }
  func.func @transform_24(%arg0: i32) -> (i32, i32) {
    %c0_i32 = arith.constant 0 : i32
    %c0_i32_0 = arith.constant 0 : i32
    %c0_i32_1 = arith.constant 0 : i32
    return %c0_i32, %c0_i32_0 : i32, i32
  }
  func.func @transform_25(%arg0: i32) -> (i32, i32) {
    %c0_i32 = arith.constant 0 : i32
    %c0_i32_0 = arith.constant 0 : i32
    %c0_i32_1 = arith.constant 0 : i32
    return %c0_i32, %c0_i32_0 : i32, i32
  }
  func.func @transform_26(%arg0: i32) -> (i32, i32) {
    %c0_i32 = arith.constant 0 : i32
    %c0_i32_0 = arith.constant 0 : i32
    %c0_i32_1 = arith.constant 0 : i32
    return %c0_i32, %c0_i32_0 : i32, i32
  }
  func.func @transform_27(%arg0: i32) -> (i32, i32) {
    %c0_i32 = arith.constant 0 : i32
    %c0_i32_0 = arith.constant 0 : i32
    return %arg0, %c0_i32 : i32, i32
  }
}

</mosaic_0001>

<bundles_post_ra>
// kernel: omniglot_forward.1
= control target key start
LH: loop header
LB: loop body
LE: loop exit
PB: predicated region body
PF: predicated region fallthrough
CT: control target
= control target key end

     0   :  { %s23928_s0 = inlined_call_operand.vmem [shape: f32[16,128], index: 0, kind: input, shape index: {}]   ;;  %s23929_s1 = inlined_call_operand.vmem [shape: bf16[128,160], index: 1, kind: input, shape index: {}]   ;;  %s23930_s2 = inlined_call_operand.hbm [shape: f32[1,160], index: 2, kind: input, shape index: {}]   ;;  %s23931_s3 = inlined_call_operand.hbm [shape: bf16[256,256], index: 3, kind: input, shape index: {}]   ;;  %s23932_s4 = inlined_call_operand.hbm [shape: bf16[256,256], index: 4, kind: input, shape index: {}]   ;;  %s23933_s5 = inlined_call_operand.hbm [shape: f32[1,256], index: 5, kind: input, shape index: {}]   ;;  %s23934_s6 = inlined_call_operand.hbm [shape: bf16[384,256], index: 6, kind: input, shape index: {}]   ;;  %s23935_s7 = inlined_call_operand.hbm [shape: bf16[384,256], index: 7, kind: input, shape index: {}]   ;;  %s23936_s8 = inlined_call_operand.hbm [shape: f32[1,256], index: 8, kind: input, shape index: {}]   ;;  %s23937_s9 = inlined_call_operand.hbm [shape: bf16[512,256], index: 9, kind: input, shape index: {}]   ;;  %s23938_s10 = inlined_call_operand.hbm [shape: bf16[512,256], index: 10, kind: input, shape index: {}]   ;;  %s23939_s11 = inlined_call_operand.hbm [shape: f32[1,256], index: 11, kind: input, shape index: {}]   ;;  %s23940_s12 = inlined_call_operand.hbm [shape: bf16[640,640], index: 12, kind: input, shape index: {}]   ;;  %s23941_s13 = inlined_call_operand.hbm [shape: f32[1,640], index: 13, kind: input, shape index: {}]   ;;  %s23942_s14 = inlined_call_operand.hbm [shape: bf16[768,256], index: 14, kind: input, shape index: {}]   ;;  %s23943_s15 = inlined_call_operand.hbm [shape: bf16[768,256], index: 15, kind: input, shape index: {}]   ;;  %s23944_s16 = inlined_call_operand.hbm [shape: f32[1,256], index: 16, kind: input, shape index: {}]   ;;  %s23945_s17 = inlined_call_operand.hbm [shape: bf16[896,256], index: 17, kind: input, shape index: {}]   ;;  %s23946_s18 = inlined_call_operand.hbm [shape: bf16[896,256], index: 18, kind: input, shape index: {}]   ;;  %s23947_s19 = inlined_call_operand.hbm [shape: f32[1,256], index: 19, kind: input, shape index: {}]   ;;  %s23948_s20 = inlined_call_operand.hbm [shape: bf16[1024,256], index: 20, kind: input, shape index: {}]   ;;  %s23949_s21 = inlined_call_operand.hbm [shape: bf16[1024,256], index: 21, kind: input, shape index: {}]   ;;  %s23950_s22 = inlined_call_operand.hbm [shape: f32[1,256], index: 22, kind: input, shape index: {}]   ;;  %s23951_s23 = inlined_call_operand.hbm [shape: bf16[1152,1280], index: 23, kind: input, shape index: {}]   ;;  %s23952_s24 = inlined_call_operand.hbm [shape: f32[1,1280], index: 24, kind: input, shape index: {}]   ;;  %s23953_s25 = inlined_call_operand.hbm [shape: bf16[1408,128], index: 25, kind: input, shape index: {}]   ;;  %s23954_s26 = inlined_call_operand.hbm [shape: f32[1,128], index: 26, kind: input, shape index: {}]   ;;  %s23955_s27 = inlined_call_operand.vmem [shape: f32[16,128], index: 27, kind: output, shape index: {}]  }
   0x1   :  { %23959 = sst [smem:[#allocation54_spill]] %s23928_s0 }
   0x2   :  { %23960 = sst [smem:[#allocation55_spill]] %s23929_s1 }
   0x3   :  { %23961 = sst [smem:[#allocation56_spill]] %s23930_s2 }
   0x4   :  { %23962 = sst [smem:[#allocation57_spill]] %s23931_s3 }
   0x5   :  { %23963 = sst [smem:[#allocation58_spill]] %s23932_s4 }
   0x6   :  { %23964 = sst [smem:[#allocation59_spill]] %s23933_s5 }
   0x7   :  { %23965 = sst [smem:[#allocation60_spill]] %s23934_s6 }
   0x8   :  { %23966 = sst [smem:[#allocation61_spill]] %s23935_s7 }
   0x9   :  { %23967 = sst [smem:[#allocation62_spill]] %s23936_s8 }
   0xa   :  { %23968 = sst [smem:[#allocation63_spill]] %s23937_s9 }
   0xb   :  { %23969 = sst [smem:[#allocation64_spill]] %s23938_s10 }
   0xc   :  { %23970 = sst [smem:[#allocation65_spill]] %s23939_s11 }
   0xd   :  { %23971 = sst [smem:[#allocation66_spill]] %s23955_s27 }
   0xe   :  { %32 = vsyncpa [#allocation4], 0 }
   0xf   :  { %33 = vsyncpa [#allocation6], 0 }
  0x10   :  { %34 = vsyncpa [#allocation9], 0 }
  0x11   :  { %35 = vsyncpa [#allocation12], 0 }
  0x12   :  { %36 = vsyncpa [#allocation15], 0 }
  0x13   :  { %37 = vsyncpa [#allocation18], 0 }
  0x14   :  { %38 = vsyncpa [#allocation21], 0 }
  0x15   :  { %39 = vsyncpa [#allocation24], 0 }
  0x16   :  { %40 = vsyncpa [#allocation27], 0 }
  0x17   :  { %41 = vsyncpa [#allocation30], 0 }
  0x18   :  { %42 = vsyncpa [#allocation33], 0 }
  0x19   :  { %43 = vsyncpa [#allocation36], 0 }
  0x1a   :  { %44 = vsyncpa [#allocation39], 0  ;;  %s22955_s7 = smov [#allocation5]  }
  0x1b   :  { %s64_s4 = sshll.u32 %s22955_s7, 4  ;;  %s65_s4 = int_to_ptr.vmem [resolvable:$true] %s64_s4 }
  0x1c   :  { %s22437_s8 = scalar_lea.vmem %s65_s4, 4096  ;;  %p22442_p1 = scmp.lt.s32.totalorder %s65_s4, %s65_s4 }
  0x1d   :  { %p22438_p0 = scmp.ne.s32.totalorder %s65_s4, %s22437_s8  ;;  %p22443_p2 = scmp.lt.s32.totalorder %s22437_s8, %s22437_s8 }
  0x1f   :  { %p22444_p3 = por %p22443_p2, %p22442_p1 }
  0x21   :  { %p22445_p4 = pnand %p22444_p3, %p22438_p0 }
  0x23   :  { %22448 = shalt.err (!%p22445_p4)
}
  0x24   :  { %s22956_s30 = smov 128   ;;  %s22957_s9 = smov 8  }
  0x25   :  { %s23972_s0 = sld [smem:[#allocation57_spill]]  ;;  %s22958_s10 = smov [#allocation8]  }
  0x26   :  { %s89_s29 = sshll.u32 %s22958_s10, 4  ;;  %s22959_s1 = smov [#allocation11]   ;;  %s90_s29 = int_to_ptr.vmem [resolvable:$true] %s89_s29 }
  0x27   :  { %s110_s6 = sshll.u32 %s22959_s1, 4  ;;  %s22457_s11 = scalar_lea.vmem %s90_s29, 32  ;;  %s111_s6 = int_to_ptr.vmem [resolvable:$true] %s110_s6 }
  0x28   :  { %p22458_p5 = scmp.ne.s32.totalorder %s90_s29, %s22457_s11  ;;  %p22462_p6 = scmp.lt.s32.totalorder %s90_s29, %s90_s29 }
  0x29   :  { %p22463_p7 = scmp.lt.s32.totalorder %s22457_s11, %s22457_s11 }
  0x2b   :  { %70 = dma.hbm_to_vmem [thread:$0]  %s23972_s0, 4096, %s65_s4, [#allocation6], %s22956_s30, %s22956_s30, %s22957_s9  }
  0x2c   :  { %p22464_p8 = por %p22463_p7, %p22462_p6 }
  0x2e   :  { %p22465_p9 = pnand %p22464_p8, %p22458_p5 }
  0x30   :  { %22468 = shalt.err (!%p22465_p9)
}
  0x31   :  { %s23973_s7 = sld [smem:[#allocation59_spill]]  ;;  %s22477_s8 = scalar_lea.vmem %s111_s6, 6144 }
  0x32   :  { %p22478_p10 = scmp.ne.s32.totalorder %s111_s6, %s22477_s8  ;;  %p22482_p11 = scmp.lt.s32.totalorder %s111_s6, %s111_s6 }
  0x33   :  { %p22483_p12 = scmp.lt.s32.totalorder %s22477_s8, %s22477_s8 }
  0x35   :  { %p22484_p13 = por %p22483_p12, %p22482_p11 }
  0x37   :  { %92 = dma.hbm_to_vmem [thread:$0]  %s23973_s7, 32, %s90_s29, [#allocation9]  }
  0x38   :  { %p22485_p0 = pnand %p22484_p13, %p22478_p10 }
  0x3a   :  { %22488 = shalt.err (!%p22485_p0)
}
  0x3b   :  { %s23974_s28 = sld [smem:[#allocation61_spill]]  ;;  %s22960_s0 = smov [#allocation14]  }
  0x3c   :  { %s132_s10 = sshll.u32 %s22960_s0, 4  ;;  %s22961_s1 = smov [#allocation17]   ;;  %s133_s10 = int_to_ptr.vmem [resolvable:$true] %s132_s10 }
  0x3d   :  { %s157_s29 = sshll.u32 %s22961_s1, 4  ;;  %s22497_s11 = scalar_lea.vmem %s133_s10, 8192  ;;  %s158_s29 = int_to_ptr.vmem [resolvable:$true] %s157_s29 }
  0x3e   :  { %p22498_p1 = scmp.ne.s32.totalorder %s133_s10, %s22497_s11  ;;  %p22502_p2 = scmp.lt.s32.totalorder %s133_s10, %s133_s10 }
  0x3f   :  { %p22503_p3 = scmp.lt.s32.totalorder %s22497_s11, %s22497_s11 }
  0x41   :  { %116 = dma.hbm_to_vmem [thread:$0]  %s23974_s28, 6144, %s111_s6, [#allocation12], %s22956_s30, %s22956_s30, %s22957_s9  }
  0x42   :  { %p22504_p4 = por %p22503_p3, %p22502_p2 }
  0x44   :  { %p22505_p5 = pnand %p22504_p4, %p22498_p1 }
  0x46   :  { %22508 = shalt.err (!%p22505_p5)
}
  0x47   :  { %s23975_s7 = sld [smem:[#allocation63_spill]]  ;;  %s22517_s6 = scalar_lea.vmem %s158_s29, 32 }
  0x48   :  { %p22518_p6 = scmp.ne.s32.totalorder %s158_s29, %s22517_s6  ;;  %p22522_p7 = scmp.lt.s32.totalorder %s158_s29, %s158_s29 }
  0x49   :  { %p22523_p8 = scmp.lt.s32.totalorder %s22517_s6, %s22517_s6 }
  0x4b   :  { %p22524_p9 = por %p22523_p8, %p22522_p7 }
  0x4d   :  { %138 = dma.hbm_to_vmem [thread:$0]  %s23975_s7, 8192, %s133_s10, [#allocation15], %s22956_s30, %s22956_s30, %s22957_s9  }
  0x4e   :  { %p22525_p10 = pnand %p22524_p9, %p22518_p6 }
  0x50   :  { %22528 = shalt.err (!%p22525_p10)
}
  0x51   :  { %s23976_s5 = sld [smem:[#allocation65_spill]]  ;;  %s22962_s28 = smov [#allocation20]  }
  0x52   :  { %s179_s0 = sshll.u32 %s22962_s28, 4  ;;  %s22963_s1 = smov [#allocation23]   ;;  %s180_s0 = int_to_ptr.vmem [resolvable:$true] %s179_s0 }
  0x53   :  { %s200_s11 = sshll.u32 %s22963_s1, 4  ;;  %s22537_s27 = scalar_lea.vmem %s180_s0, 80  ;;  %s201_s11 = int_to_ptr.vmem [resolvable:$true] %s200_s11 }
  0x54   :  { %p22538_p11 = scmp.ne.s32.totalorder %s180_s0, %s22537_s27  ;;  %s22541_s10 = scalar_lea.vmem %s180_s0, 96 }
  0x55   :  { %p22542_p12 = scmp.lt.s32.totalorder %s180_s0, %s180_s0  ;;  %p22543_p13 = scmp.lt.s32.totalorder %s22541_s10, %s22537_s27 }
  0x57   :  { %160 = dma.hbm_to_vmem [thread:$0]  %s23976_s5, 32, %s158_s29, [#allocation18]  }
  0x58   :  { %p22544_p0 = por %p22543_p13, %p22542_p12 }
  0x5a   :  { %p22545_p1 = pnand %p22544_p0, %p22538_p11 }
  0x5c   :  { %22548 = shalt.err (!%p22545_p1)
}
  0x5d   :  { %182 = dma.hbm_to_vmem [thread:$0]  %s23941_s13, 80, %s180_s0, [#allocation21]  }
  0x5e   :  { %s22557_s7 = scalar_lea.vmem %s201_s11, 12288  ;;  %p22562_p3 = scmp.lt.s32.totalorder %s201_s11, %s201_s11 }
  0x5f   :  { %p22558_p2 = scmp.ne.s32.totalorder %s201_s11, %s22557_s7  ;;  %p22563_p4 = scmp.lt.s32.totalorder %s22557_s7, %s22557_s7 }
  0x61   :  { %p22564_p5 = por %p22563_p4, %p22562_p3 }
  0x63   :  { %p22565_p6 = pnand %p22564_p5, %p22558_p2 }
  0x65   :  { %22568 = shalt.err (!%p22565_p6)
}
  0x66   :  { %206 = dma.hbm_to_vmem [thread:$0]  %s23943_s15, 12288, %s201_s11, [#allocation24], %s22956_s30, %s22956_s30, %s22957_s9  }
  0x67   :  { %s22964_s6 = smov [#allocation26]   ;;  %s22965_s4 = smov [#allocation29]  }
  0x68   :  { %s222_s8 = sshll.u32 %s22964_s6, 4  ;;  %s247_s13 = sshll.u32 %s22965_s4, 4  ;;  %s223_s8 = int_to_ptr.vmem [resolvable:$true] %s222_s8  ;;  %s248_s13 = int_to_ptr.vmem [resolvable:$true] %s247_s13 }
  0x69   :  { %s22577_s5 = scalar_lea.vmem %s223_s8, 14336  ;;  %p22582_p8 = scmp.lt.s32.totalorder %s223_s8, %s223_s8 }
  0x6a   :  { %p22578_p7 = scmp.ne.s32.totalorder %s223_s8, %s22577_s5  ;;  %p22583_p9 = scmp.lt.s32.totalorder %s22577_s5, %s22577_s5 }
  0x6c   :  { %p22584_p10 = por %p22583_p9, %p22582_p8 }
  0x6e   :  { %p22585_p11 = pnand %p22584_p10, %p22578_p7 }
  0x70   :  { %22588 = shalt.err (!%p22585_p11)
}
  0x71   :  { %228 = dma.hbm_to_vmem [thread:$0]  %s23945_s17, 14336, %s223_s8, [#allocation27], %s22956_s30, %s22956_s30, %s22957_s9  }
  0x72   :  { %s22597_s15 = scalar_lea.vmem %s248_s13, 32  ;;  %p22602_p13 = scmp.lt.s32.totalorder %s248_s13, %s248_s13 }
  0x73   :  { %p22598_p12 = scmp.ne.s32.totalorder %s248_s13, %s22597_s15  ;;  %p22603_p0 = scmp.lt.s32.totalorder %s22597_s15, %s22597_s15 }
  0x75   :  { %p22604_p1 = por %p22603_p0, %p22602_p13 }
  0x77   :  { %p22605_p2 = pnand %p22604_p1, %p22598_p12 }
  0x79   :  { %22608 = shalt.err (!%p22605_p2)
}
  0x7a   :  { %250 = dma.hbm_to_vmem [thread:$0]  %s23947_s19, 32, %s248_s13, [#allocation30]  }
  0x7b   :  { %s22966_s10 = smov [#allocation32]   ;;  %s22967_s3 = smov [#allocation35]  }
  0x7c   :  { %s268_s2 = sshll.u32 %s22966_s10, 4  ;;  %s290_s7 = sshll.u32 %s22967_s3, 4  ;;  %s269_s2 = int_to_ptr.vmem [resolvable:$true] %s268_s2  ;;  %s291_s7 = int_to_ptr.vmem [resolvable:$true] %s290_s7 }
  0x7d   :  { %s22617_s29 = scalar_lea.vmem %s269_s2, 16384  ;;  %p22622_p4 = scmp.lt.s32.totalorder %s269_s2, %s269_s2 }
  0x7e   :  { %p22618_p3 = scmp.ne.s32.totalorder %s269_s2, %s22617_s29  ;;  %p22623_p5 = scmp.lt.s32.totalorder %s22617_s29, %s22617_s29 }
  0x80   :  { %p22624_p6 = por %p22623_p5, %p22622_p4 }
  0x82   :  { %p22625_p7 = pnand %p22624_p6, %p22618_p3 }
  0x84   :  { %22628 = shalt.err (!%p22625_p7)
}
  0x85   :  { %274 = dma.hbm_to_vmem [thread:$0]  %s23949_s21, 16384, %s269_s2, [#allocation33], %s22956_s30, %s22956_s30, %s22957_s9  }
  0x86   :  { %s22637_s19 = scalar_lea.vmem %s291_s7, 92160  ;;  %p22642_p9 = scmp.lt.s32.totalorder %s291_s7, %s291_s7 }
  0x87   :  { %p22638_p8 = scmp.ne.s32.totalorder %s291_s7, %s22637_s19  ;;  %p22643_p10 = scmp.lt.s32.totalorder %s22637_s19, %s22637_s19 }
  0x89   :  { %p22644_p11 = por %p22643_p10, %p22642_p9 }
  0x8b   :  { %p22645_p12 = pnand %p22644_p11, %p22638_p8 }
  0x8d   :  { %22648 = shalt.err (!%p22645_p12)
}
  0x8e   :  { %s22968_s6 = smov 640   ;;  %s22969_s8 = smov 40  }
  0x8f   :  { %296 = dma.hbm_to_vmem [thread:$0]  %s23951_s23, 92160, %s291_s7, [#allocation36], %s22968_s6, %s22968_s6, %s22969_s8  }
  0x90   :  { %s22970_s5 = smov [#allocation38]  }
  0x91   :  { %s312_s28 = sshll.u32 %s22970_s5, 4  ;;  %s313_s28 = int_to_ptr.vmem [resolvable:$true] %s312_s28 }
  0x92   :  { %s22657_s0 = scalar_lea.vmem %s313_s28, 11264  ;;  %p22662_p0 = scmp.lt.s32.totalorder %s313_s28, %s313_s28 }
  0x93   :  { %p22658_p13 = scmp.ne.s32.totalorder %s313_s28, %s22657_s0  ;;  %p22663_p1 = scmp.lt.s32.totalorder %s22657_s0, %s22657_s0 }
  0x95   :  { %p22664_p2 = por %p22663_p1, %p22662_p0 }
  0x97   :  { %p22665_p3 = pnand %p22664_p2, %p22658_p13 }
  0x99   :  { %22668 = shalt.err (!%p22665_p3)
}
  0x9a   :  { %s22971_s21 = smov 64   ;;  %s22972_s15 = smov 4  }
  0x9b   :  { %318 = dma.hbm_to_vmem [thread:$0]  %s23953_s25, 11264, %s313_s28, [#allocation39], %s22971_s21, %s22971_s21, %s22972_s15  }
  0x9c   :  { %s22973_s10 = smov [#allocation3]   ;;  %s22974_s2 = smov [#allocation7]  }
  0x9d   :  { %s55_s23 = sshll.u32 %s22973_s10, 4  ;;  %s76_s3 = sshll.u32 %s22974_s2, 4  ;;  %s56_s23 = int_to_ptr.vmem [resolvable:$true] %s55_s23  ;;  %s77_s3 = int_to_ptr.vmem [resolvable:$true] %s76_s3 }
  0x9e   :  { %s22677_s7 = scalar_lea.vmem %s56_s23, 32  ;;  %p22682_p5 = scmp.lt.s32.totalorder %s56_s23, %s56_s23 }
  0x9f   :  { %p22678_p4 = scmp.ne.s32.totalorder %s56_s23, %s22677_s7  ;;  %p22683_p6 = scmp.lt.s32.totalorder %s22677_s7, %s22677_s7 }
  0xa1   :  { %p22684_p7 = por %p22683_p6, %p22682_p5 }
  0xa3   :  { %p22685_p8 = pnand %p22684_p7, %p22678_p4 }
  0xa5   :  { %22688 = shalt.err (!%p22685_p8)
}
  0xa6   :  { %s23977_s27 = sld [smem:[#allocation56_spill]]  ;;  %s22697_s19 = scalar_lea.vmem %s77_s3, 4096 }
  0xa7   :  { %p22698_p9 = scmp.ne.s32.totalorder %s77_s3, %s22697_s19  ;;  %p22702_p10 = scmp.lt.s32.totalorder %s77_s3, %s77_s3 }
  0xa8   :  { %p22703_p11 = scmp.lt.s32.totalorder %s22697_s19, %s22697_s19 }
  0xaa   :  { %p22704_p12 = por %p22703_p11, %p22702_p10 }
  0xac   :  { %58 = dma.hbm_to_vmem [thread:$0]  %s23977_s27, 32, %s56_s23, [#allocation4]  }
  0xad   :  { %p22705_p13 = pnand %p22704_p12, %p22698_p9 }
  0xaf   :  { %22708 = shalt.err (!%p22705_p13)
}
  0xb0   :  { %s23978_s8 = sld [smem:[#allocation58_spill]]  ;;  %s22975_s4 = smov [#allocation10]  }
  0xb1   :  { %s98_s13 = sshll.u32 %s22975_s4, 4  ;;  %s22976_s5 = smov [#allocation13]   ;;  %s99_s13 = int_to_ptr.vmem [resolvable:$true] %s98_s13 }
  0xb2   :  { %s123_s28 = sshll.u32 %s22976_s5, 4  ;;  %s22717_s0 = scalar_lea.vmem %s99_s13, 6144  ;;  %s124_s28 = int_to_ptr.vmem [resolvable:$true] %s123_s28 }
  0xb3   :  { %p22718_p0 = scmp.ne.s32.totalorder %s99_s13, %s22717_s0  ;;  %p22722_p1 = scmp.lt.s32.totalorder %s99_s13, %s99_s13 }
  0xb4   :  { %p22723_p2 = scmp.lt.s32.totalorder %s22717_s0, %s22717_s0 }
  0xb6   :  { %82 = dma.hbm_to_vmem [thread:$0]  %s23978_s8, 4096, %s77_s3, [#allocation6], %s22956_s30, %s22956_s30, %s22957_s9  }
  0xb7   :  { %p22724_p3 = por %p22723_p2, %p22722_p1 }
  0xb9   :  { %p22725_p4 = pnand %p22724_p3, %p22718_p0 }
  0xbb   :  { %22728 = shalt.err (!%p22725_p4)
}
  0xbc   :  { %s23979_s11 = sld [smem:[#allocation60_spill]]  ;;  %s22737_s10 = scalar_lea.vmem %s124_s28, 32 }
  0xbd   :  { %p22738_p5 = scmp.ne.s32.totalorder %s124_s28, %s22737_s10  ;;  %p22742_p6 = scmp.lt.s32.totalorder %s124_s28, %s124_s28 }
  0xbe   :  { %p22743_p7 = scmp.lt.s32.totalorder %s22737_s10, %s22737_s10 }
  0xc0   :  { %p22744_p8 = por %p22743_p7, %p22742_p6 }
  0xc2   :  { %104 = dma.hbm_to_vmem [thread:$0]  %s23979_s11, 6144, %s99_s13, [#allocation9], %s22956_s30, %s22956_s30, %s22957_s9  }
  0xc3   :  { %p22745_p9 = pnand %p22744_p8, %p22738_p5 }
  0xc5   :  { %22748 = shalt.err (!%p22745_p9)
}
  0xc6   :  { %s23980_s3 = sld [smem:[#allocation62_spill]]  ;;  %s22977_s7 = smov [#allocation16]  }
  0xc7   :  { %s144_s29 = sshll.u32 %s22977_s7, 4  ;;  %s22978_s17 = smov [#allocation19]   ;;  %s145_s29 = int_to_ptr.vmem [resolvable:$true] %s144_s29 }
  0xc8   :  { %s166_s27 = sshll.u32 %s22978_s17, 4  ;;  %s22757_s19 = scalar_lea.vmem %s145_s29, 8192  ;;  %s167_s27 = int_to_ptr.vmem [resolvable:$true] %s166_s27 }
  0xc9   :  { %p22758_p10 = scmp.ne.s32.totalorder %s145_s29, %s22757_s19  ;;  %p22762_p11 = scmp.lt.s32.totalorder %s145_s29, %s145_s29 }
  0xca   :  { %p22763_p12 = scmp.lt.s32.totalorder %s22757_s19, %s22757_s19 }
  0xcc   :  { %126 = dma.hbm_to_vmem [thread:$0]  %s23980_s3, 32, %s124_s28, [#allocation12]  }
  0xcd   :  { %p22764_p13 = por %p22763_p12, %p22762_p11 }
  0xcf   :  { %p22765_p0 = pnand %p22764_p13, %p22758_p10 }
  0xd1   :  { %22768 = shalt.err (!%p22765_p0)
}
  0xd2   :  { %s23981_s8 = sld [smem:[#allocation64_spill]]  ;;  %s22777_s4 = scalar_lea.vmem %s167_s27, 25600 }
  0xd3   :  { %p22778_p1 = scmp.ne.s32.totalorder %s167_s27, %s22777_s4  ;;  %p22782_p2 = scmp.lt.s32.totalorder %s167_s27, %s167_s27 }
  0xd4   :  { %p22783_p3 = scmp.lt.s32.totalorder %s22777_s4, %s22777_s4 }
  0xd6   :  { %p22784_p4 = por %p22783_p3, %p22782_p2 }
  0xd8   :  { %150 = dma.hbm_to_vmem [thread:$0]  %s23981_s8, 8192, %s145_s29, [#allocation15], %s22956_s30, %s22956_s30, %s22957_s9  }
  0xd9   :  { %p22785_p5 = pnand %p22784_p4, %p22778_p1 }
  0xdb   :  { %22788 = shalt.err (!%p22785_p5)
}
  0xdc   :  { %s22979_s13 = smov 320   ;;  %s22980_s5 = smov 20  }
  0xdd   :  { %172 = dma.hbm_to_vmem [thread:$0]  %s23940_s12, 25600, %s167_s27, [#allocation18], %s22979_s13, %s22979_s13, %s22980_s5  }
  0xde   :  { %s22981_s15 = smov [#allocation22]   ;;  %s22982_s11 = smov [#allocation25]  }
  0xdf   :  { %s188_s1 = sshll.u32 %s22981_s15, 4  ;;  %s213_s10 = sshll.u32 %s22982_s11, 4  ;;  %s189_s1 = int_to_ptr.vmem [resolvable:$true] %s188_s1  ;;  %s214_s10 = int_to_ptr.vmem [resolvable:$true] %s213_s10 }
  0xe0   :  { %s22797_s23 = scalar_lea.vmem %s189_s1, 12288  ;;  %p22802_p7 = scmp.lt.s32.totalorder %s189_s1, %s189_s1 }
  0xe1   :  { %p22798_p6 = scmp.ne.s32.totalorder %s189_s1, %s22797_s23  ;;  %p22803_p8 = scmp.lt.s32.totalorder %s22797_s23, %s22797_s23 }
  0xe3   :  { %p22804_p9 = por %p22803_p8, %p22802_p7 }
  0xe5   :  { %p22805_p10 = pnand %p22804_p9, %p22798_p6 }
  0xe7   :  { %22808 = shalt.err (!%p22805_p10)
}
  0xe8   :  { %194 = dma.hbm_to_vmem [thread:$0]  %s23942_s14, 12288, %s189_s1, [#allocation21], %s22956_s30, %s22956_s30, %s22957_s9  }
  0xe9   :  { %s22817_s12 = scalar_lea.vmem %s214_s10, 32  ;;  %p22822_p12 = scmp.lt.s32.totalorder %s214_s10, %s214_s10 }
  0xea   :  { %p22818_p11 = scmp.ne.s32.totalorder %s214_s10, %s22817_s12  ;;  %p22823_p13 = scmp.lt.s32.totalorder %s22817_s12, %s22817_s12 }
  0xec   :  { %p22824_p0 = por %p22823_p13, %p22822_p12 }
  0xee   :  { %p22825_p1 = pnand %p22824_p0, %p22818_p11 }
  0xf0   :  { %22828 = shalt.err (!%p22825_p1)
}
  0xf1   :  { %216 = dma.hbm_to_vmem [thread:$0]  %s23944_s16, 32, %s214_s10, [#allocation24]  }
  0xf2   :  { %s22983_s17 = smov [#allocation28]   ;;  %s22984_s19 = smov [#allocation31]  }
  0xf3   :  { %s234_s27 = sshll.u32 %s22983_s17, 4  ;;  %s256_s25 = sshll.u32 %s22984_s19, 4  ;;  %s235_s27 = int_to_ptr.vmem [resolvable:$true] %s234_s27  ;;  %s257_s25 = int_to_ptr.vmem [resolvable:$true] %s256_s25 }
  0xf4   :  { %s22837_s6 = scalar_lea.vmem %s235_s27, 14336  ;;  %p22842_p3 = scmp.lt.s32.totalorder %s235_s27, %s235_s27 }
  0xf5   :  { %p22838_p2 = scmp.ne.s32.totalorder %s235_s27, %s22837_s6  ;;  %p22843_p4 = scmp.lt.s32.totalorder %s22837_s6, %s22837_s6 }
  0xf7   :  { %p22844_p5 = por %p22843_p4, %p22842_p3 }
  0xf9   :  { %p22845_p6 = pnand %p22844_p5, %p22838_p2 }
  0xfb   :  { %22848 = shalt.err (!%p22845_p6)
}
  0xfc   :  { %240 = dma.hbm_to_vmem [thread:$0]  %s23946_s18, 14336, %s235_s27, [#allocation27], %s22956_s30, %s22956_s30, %s22957_s9  }
  0xfd   :  { %s22857_s16 = scalar_lea.vmem %s257_s25, 16384  ;;  %p22862_p8 = scmp.lt.s32.totalorder %s257_s25, %s257_s25 }
  0xfe   :  { %p22858_p7 = scmp.ne.s32.totalorder %s257_s25, %s22857_s16  ;;  %p22863_p9 = scmp.lt.s32.totalorder %s22857_s16, %s22857_s16 }
 0x100   :  { %p22864_p10 = por %p22863_p9, %p22862_p8 }
 0x102   :  { %p22865_p11 = pnand %p22864_p10, %p22858_p7 }
 0x104   :  { %22868 = shalt.err (!%p22865_p11)
}
 0x105   :  { %262 = dma.hbm_to_vmem [thread:$0]  %s23948_s20, 16384, %s257_s25, [#allocation30], %s22956_s30, %s22956_s30, %s22957_s9  }
 0x106   :  { %s22985_s5 = smov [#allocation34]   ;;  %s22986_s0 = smov [#allocation37]  }
 0x107   :  { %s281_s28 = sshll.u32 %s22985_s5, 4  ;;  %s303_s15 = sshll.u32 %s22986_s0, 4  ;;  %s282_s28 = int_to_ptr.vmem [resolvable:$true] %s281_s28  ;;  %s304_s15 = int_to_ptr.vmem [resolvable:$true] %s303_s15 }
 0x108   :  { %s22877_s18 = scalar_lea.vmem %s282_s28, 32  ;;  %p22882_p13 = scmp.lt.s32.totalorder %s282_s28, %s282_s28 }
 0x109   :  { %p22878_p12 = scmp.ne.s32.totalorder %s282_s28, %s22877_s18  ;;  %p22883_p0 = scmp.lt.s32.totalorder %s22877_s18, %s22877_s18 }
 0x10b   :  { %p22884_p1 = por %p22883_p0, %p22882_p13 }
 0x10d   :  { %p22885_p2 = pnand %p22884_p1, %p22878_p12 }
 0x10f   :  { %22888 = shalt.err (!%p22885_p2)
}
 0x110   :  { %284 = dma.hbm_to_vmem [thread:$0]  %s23950_s22, 32, %s282_s28, [#allocation33]  }
 0x111   :  { %s22897_s10 = scalar_lea.vmem %s304_s15, 160  ;;  %p22902_p4 = scmp.lt.s32.totalorder %s304_s15, %s304_s15 }
 0x112   :  { %p22898_p3 = scmp.ne.s32.totalorder %s304_s15, %s22897_s10  ;;  %p22903_p5 = scmp.lt.s32.totalorder %s22897_s10, %s22897_s10 }
 0x114   :  { %p22904_p6 = por %p22903_p5, %p22902_p4 }
 0x116   :  { %p22905_p7 = pnand %p22904_p6, %p22898_p3 }
 0x118   :  { %22908 = shalt.err (!%p22905_p7)
}
 0x119   :  { %306 = dma.hbm_to_vmem [thread:$0]  %s23952_s24, 160, %s304_s15, [#allocation36]  }
 0x11a   :  { %s22987_s9 = smov [#allocation40]  }
 0x11b   :  { %s325_s23 = sshll.u32 %s22987_s9, 4  ;;  %s326_s23 = int_to_ptr.vmem [resolvable:$true] %s325_s23 }
 0x11c   :  { %s22917_s2 = scalar_lea.vmem %s326_s23, 16  ;;  %s22921_s3 = scalar_lea.vmem %s326_s23, 32 }
 0x11d   :  { %p22918_p8 = scmp.ne.s32.totalorder %s326_s23, %s22917_s2  ;;  %p22922_p9 = scmp.lt.s32.totalorder %s326_s23, %s326_s23 }
 0x11e   :  { %p22923_p10 = scmp.lt.s32.totalorder %s22921_s3, %s22917_s2 }
 0x120   :  { %p22924_p11 = por %p22923_p10, %p22922_p9 }
 0x122   :  { %p22925_p12 = pnand %p22924_p11, %p22918_p8 }
 0x124   :  { %22928 = shalt.err (!%p22925_p12)
}
 0x125   :  { %328 = dma.hbm_to_vmem [thread:$0]  %s23954_s26, 16, %s326_s23, [#allocation39]  }
 0x126   :  { %22929 = dma.done.wait [#allocation4], 32  }
 0x127   :  { %22930 = vsyncadd [#allocation4], 4294967264 }
 0x128   :  { %22931 = dma.done.wait [#allocation6], 8192  }
 0x129   :  { %22932 = vsyncadd [#allocation6], 4294959104 }
 0x12a   :  { %22933 = dma.done.wait [#allocation9], 6176  }
 0x12b   :  { %22934 = vsyncadd [#allocation9], 4294961120 }
 0x12c   :  { %22935 = dma.done.wait [#allocation12], 6176  }
 0x12d   :  { %22936 = vsyncadd [#allocation12], 4294961120 }
 0x12e   :  { %22937 = dma.done.wait [#allocation15], 16384  }
 0x12f   :  { %22938 = vsyncadd [#allocation15], 4294950912 }
 0x130   :  { %22939 = dma.done.wait [#allocation18], 25632  }
 0x131   :  { %22940 = vsyncadd [#allocation18], 4294941664 }
 0x132   :  { %22941 = dma.done.wait [#allocation21], 12368  }
 0x133   :  { %22942 = vsyncadd [#allocation21], 4294954928 }
 0x134   :  { %22943 = dma.done.wait [#allocation24], 12320  }
 0x135   :  { %22944 = vsyncadd [#allocation24], 4294954976 }
 0x136   :  { %22945 = dma.done.wait [#allocation27], 28672  }
 0x137   :  { %22946 = vsyncadd [#allocation27], 4294938624 }
 0x138   :  { %22947 = dma.done.wait [#allocation30], 16416  }
 0x139   :  { %22948 = vsyncadd [#allocation30], 4294950880 }
 0x13a   :  { %22949 = dma.done.wait [#allocation33], 16416  }
 0x13b   :  { %22950 = vsyncadd [#allocation33], 4294950880 }
 0x13c   :  { %22951 = dma.done.wait [#allocation36], 92320  }
 0x13d   :  { %22952 = vsyncadd [#allocation36], 4294874976 }
 0x13e   :  { %22953 = dma.done.wait [#allocation39], 11280  }
 0x13f   :  { %22954 = vsyncadd [#allocation39], 4294956016  ;;  %v22988_v0 = vmov 0   ;;  %s23982_s7 = sld [smem:[#allocation55_spill]]  ;;  %v420_v22 = vlaneseq  ;;  %v453_v24 = vld [vmem:[#allocation3] sm:$0x3] }
 0x140   :  { %583 = vmatprep.mubr.bf16.mxu0 %v22988_v0  ;;  %s23983_s1 = sld [smem:[#allocation54_spill]]  ;;  %v22989_v25 = vmov 0.0   ;;  %vm22990_vm0 = vmmov 0   ;;  %vm599_vm1 = vcmask 523264   ;;  %vm661_vm11 = vcmask 130048   ;;  %v22238_v53 = vld [vmem:[#allocation38 + $0x78] sm:$0xff]  }
 0x141   :  { %v23299_v23 = vshrl.u32 %v420_v22, 7  ;;  %19235 = vmatprep.subr.bf16.mxu1 %v22989_v25  ;;  %19237 = vmatprep.mubr.msk.bf16.mxu1 %vm22990_vm0, %v22989_v25  ;;  %v648_v44 = vand.u32 127, %v420_v22  ;;  %v19387_v22 = vld [vmem:[#allocation5 + $0x20] ss:$8 sps:$4 sm:$0xff]   ;;  %vm417_vm12 = vcmask 1043712   ;;  %vm737_vm13 = vcmask 257024  }
 0x142   :  { %418 = vst.msk [vmem:[#allocation2 + $0x4] sm:$0xf] %vm417_vm12, %v22988_v0  ;;  %419 = vst.msk [vmem:[#allocation2 + $0x30] sm:$0xf] %vm417_vm12, %v22988_v0  ;;  %s23988_s14 = sld [smem:[#allocation66_spill]] }
 0x143   :  { %v23303_v26 = vsub.s32 0, %v23299_v23  ;;  %v23310_v34 = vsub.s32 1, %v23299_v23  ;;  %v422_v42 = vadd.s32 8, %v23299_v23  ;;  %v16972_v45 = vadd.s32 4294967290, %v23299_v23 }
 0x144   :  { %vm429_vm3 = vcmp.ge.s32.totalorder %v23299_v23, 6  ;;  %v649_v47 = vsub.s32 %v23299_v23, %v648_v44  ;;  %vm1024_vm14 = vcmp.lt.s32.totalorder %v23299_v23, 1 }
 0x145   :  { %v19329_v1 = vld [vmem:[%s23982_s7 + $0x74] ss:$8 sps:$4 sm:$0xff]   ;;  %v19331_v2 = vld [vmem:[%s23982_s7 + $0x70] ss:$8 sps:$4 sm:$0xff]   ;;  %v19332_v3 = vld [vmem:[%s23982_s7 + $0x64] ss:$8 sps:$4 sm:$0xff]   ;;  %v458_v28 = vrot.slane %v453_v24, %v23303_v26  ;;  %v462_v38 = vrot.slane %v453_v24, %v23310_v34  ;;  %v23321_v48 = vsel %vm429_vm3, %v16972_v45, %v23299_v23  ;;  %v650_v50 = vsub.s32 %v422_v42, %v648_v44 }
 0x146   :  { %551 = vmatprep.subr.bf16.mxu0 %v19329_v1  ;;  %v19334_v4 = vld [vmem:[%s23982_s7 + $0x60] ss:$8 sps:$4 sm:$0xff]   ;;  %v19335_v5 = vld [vmem:[%s23982_s7 + $0x54] ss:$8 sps:$4 sm:$0xff]   ;;  %v19337_v6 = vld [vmem:[%s23982_s7 + $0x50] ss:$8 sps:$4 sm:$0xff]   ;;  %vm653_vm6 = vcmp.le.s32.totalorder %v649_v47, %v23321_v48 }
 0x147   :  { %552 = vmatpush1.bf16.msra.mxu0 %v19331_v2  ;;  %v19338_v7 = vld [vmem:[%s23982_s7 + $0x44] ss:$8 sps:$4 sm:$0xff]   ;;  %v19340_v8 = vld [vmem:[%s23982_s7 + $0x40] ss:$8 sps:$4 sm:$0xff]   ;;  %v19341_v10 = vld [vmem:[%s23982_s7 + $0x34] ss:$8 sps:$4 sm:$0xff]  }
 0x148   :  { %553 = vmatprep.subr.bf16.mxu0 %v19332_v3  ;;  %v405_v9 = vld [vmem:[%s23983_s1] sm:$0xff]  ;;  %v406_v11 = vld [vmem:[%s23983_s1 + $0x8] sm:$0xff]  ;;  %v19343_v14 = vld [vmem:[%s23982_s7 + $0x30] ss:$8 sps:$4 sm:$0xff]   ;;  %v16971_v43 = vadd.s32 4294967284, %v422_v42  ;;  %vm424_vm2 = vcmp.ge.s32.totalorder %v422_v42, 12 }
 0x149   :  { %v19037_v12 = vpack.c.bf16 %v405_v9, %v405_v9  ;;  %v19038_v13 = vpack.c.bf16 %v406_v11, %v406_v11  ;;  %v19344_v15 = vld [vmem:[%s23982_s7 + $0x24] ss:$8 sps:$4 sm:$0xff]   ;;  %v19346_v16 = vld [vmem:[%s23982_s7 + $0x20] ss:$8 sps:$4 sm:$0xff]   ;;  %v19347_v17 = vld [vmem:[%s23982_s7 + $0x14] ss:$8 sps:$4 sm:$0xff]  }
 0x14a   :  { %v19349_v18 = vld [vmem:[%s23982_s7 + $0x10] ss:$8 sps:$4 sm:$0xff]   ;;  %v19350_v19 = vld [vmem:[%s23982_s7 + $0x4] ss:$8 sps:$4 sm:$0xff]   ;;  %v19352_v20 = vld [vmem:[%s23982_s7] ss:$8 sps:$4 sm:$0xff]   ;;  %v428_v46 = vsel %vm424_vm2, %v16971_v43, %v422_v42 }
 0x14b   :  { %554 = vmatpush1.bf16.msra.mxu0 %v19334_v4  ;;  %415 = vst [vmem:[#allocation2] sm:$0xf] %v19037_v12  ;;  %416 = vst [vmem:[#allocation2 + $0x2c] sm:$0xf] %v19038_v13  ;;  %v16973_v49 = vadd.s32 4294967290, %v428_v46  ;;  %vm430_vm4 = vcmp.ge.s32.totalorder %v428_v46, 6 }
 0x14c   :  { %555 = vmatprep.subr.bf16.mxu0 %v19335_v5  ;;  %vm651_vm5 = vcmp.ge.s32.totalorder %v649_v47, 0  ;;  %vm652_vm8 = vcmp.ge.s32.totalorder %v650_v50, 0  ;;  %v19356_v11 = vld [vmem:[#allocation7 + $0x74] ss:$8 sps:$4 sm:$0xff]   ;;  %v19357_v12 = vld [vmem:[#allocation5 + $0x70] ss:$8 sps:$4 sm:$0xff]  }
 0x14d   :  { %v23324_v51 = vsel %vm430_vm4, %v16973_v49, %v428_v46  ;;  %vm23326_vm7 = vmand %vm651_vm5, %vm653_vm6  ;;  %v19359_v13 = vld [vmem:[#allocation5 + $0x74] ss:$8 sps:$4 sm:$0xff]   ;;  %v19389_v24 = vld [vmem:[#allocation5 + $0x24] ss:$8 sps:$4 sm:$0xff]   ;;  %vm1029_vm15 = vcmp.ge.s32.totalorder %v23321_v48, 1  ;;  %vm1728_vm2 = vcmp.lt.s32.totalorder %v23299_v23, 2 }
 0x14e   :  { %vm654_vm9 = vcmp.le.s32.totalorder %v650_v50, %v23324_v51  ;;  %v19354_v46 = vld [vmem:[#allocation7 + $0x70] ss:$8 sps:$4 sm:$0xff]   ;;  %v19362_v49 = vld [vmem:[#allocation7 + $0x64] ss:$8 sps:$4 sm:$0xff]   ;;  %v19360_v50 = vld [vmem:[#allocation7 + $0x60] ss:$8 sps:$4 sm:$0xff]  }
 0x14f   :  { %556 = vmatpush1.bf16.msra.mxu0 %v19337_v6  ;;  %vm23331_vm10 = vmand %vm652_vm8, %vm654_vm9  ;;  %vm1733_vm3 = vcmp.ge.s32.totalorder %v23321_v48, 2  ;;  %vm1734_vm4 = vcmp.ge.s32.totalorder %v23324_v51, 2  ;;  %vm2671_vm5 = vcmp.lt.s32.totalorder %v23299_v23, 4  ;;  %vm2676_vm6 = vcmp.ge.s32.totalorder %v23321_v48, 4 }
 0x150   :  { %557 = vmatprep.subr.bf16.mxu0 %v19338_v7  ;;  %vm2677_vm8 = vcmp.ge.s32.totalorder %v23324_v51, 4 }
 0x152   :  { %v19353_v21 = vld [vmem:[#allocation2] ss:$44 sps:$4 sm:$0xff]  }
 0x153   :  { %558 = vmatpush1.bf16.msra.mxu0 %v19340_v8 }
 0x154   :  { %559 = vmatprep.subr.bf16.mxu0 %v19341_v10 }
 0x157   :  { %560 = vmatpush1.bf16.msra.mxu0 %v19343_v14  ;;  %v19363_v14 = vld [vmem:[#allocation5 + $0x60] ss:$8 sps:$4 sm:$0xff]  }
 0x158   :  { %561 = vmatprep.subr.bf16.mxu0 %v19344_v15  ;;  %v19365_v15 = vld [vmem:[#allocation5 + $0x64] ss:$8 sps:$4 sm:$0xff]  }
 0x15b   :  { %562 = vmatpush1.bf16.msra.mxu0 %v19346_v16  ;;  %v19369_v16 = vld [vmem:[#allocation5 + $0x50] ss:$8 sps:$4 sm:$0xff]  }
 0x15c   :  { %563 = vmatprep.subr.bf16.mxu0 %v19347_v17  ;;  %v19371_v17 = vld [vmem:[#allocation5 + $0x54] ss:$8 sps:$4 sm:$0xff]  }
 0x15f   :  { %564 = vmatpush1.bf16.msra.mxu0 %v19349_v18  ;;  %v19375_v18 = vld [vmem:[#allocation5 + $0x40] ss:$8 sps:$4 sm:$0xff]  }
 0x160   :  { %565 = vmatprep.subr.bf16.mxu0 %v19350_v19  ;;  %v19377_v19 = vld [vmem:[#allocation5 + $0x44] ss:$8 sps:$4 sm:$0xff]  }
 0x163   :  { %566 = vmatpush1.bf16.msra.mxu0 %v19352_v20  ;;  %v19381_v20 = vld [vmem:[#allocation5 + $0x30] ss:$8 sps:$4 sm:$0xff]  }
 0x164   :  { %1199 = vmatprep.subr.bf16.mxu0 %v19359_v13  ;;  %v19431_v13 = vld [vmem:[#allocation5 + $0xb4] ss:$8 sps:$4 sm:$0xff]  }
 0x166   :  { %584 = vmatmul.mubr.bf16.vlgmr.msra.gmra.mxu0 %v19353_v21  ;;  %v19383_v21 = vld [vmem:[#allocation5 + $0x34] ss:$8 sps:$4 sm:$0xff]  }
 0x167   :  { %1200 = vmatpush1.bf16.msra.mxu0 %v19357_v12  ;;  %v19426_v12 = vld [vmem:[#allocation7 + $0xb0] ss:$8 sps:$4 sm:$0xff]  }
 0x168   :  { %1201 = vmatprep.subr.bf16.mxu0 %v19365_v15  ;;  %v19434_v15 = vld [vmem:[#allocation7 + $0xa4] ss:$8 sps:$4 sm:$0xff]  }
 0x16b   :  { %1202 = vmatpush1.bf16.msra.mxu0 %v19363_v14  ;;  %v19429_v14 = vld [vmem:[#allocation5 + $0xb0] ss:$8 sps:$4 sm:$0xff]  }
 0x16c   :  { %1203 = vmatprep.subr.bf16.mxu0 %v19371_v17  ;;  %v19437_v17 = vld [vmem:[#allocation5 + $0xa4] ss:$8 sps:$4 sm:$0xff]  }
 0x16f   :  { %1204 = vmatpush1.bf16.msra.mxu0 %v19369_v16  ;;  %v19432_v16 = vld [vmem:[#allocation7 + $0xa0] ss:$8 sps:$4 sm:$0xff]  }
 0x170   :  { %1205 = vmatprep.subr.bf16.mxu0 %v19377_v19  ;;  %v19440_v19 = vld [vmem:[#allocation7 + $0x94] ss:$8 sps:$4 sm:$0xff]  }
 0x173   :  { %1206 = vmatpush1.bf16.msra.mxu0 %v19375_v18  ;;  %v19435_v18 = vld [vmem:[#allocation5 + $0xa0] ss:$8 sps:$4 sm:$0xff]  }
 0x174   :  { %1207 = vmatprep.subr.bf16.mxu0 %v19383_v21  ;;  %v19441_v21 = vld [vmem:[#allocation5 + $0x90] ss:$8 sps:$4 sm:$0xff]  }
 0x177   :  { %1208 = vmatpush1.bf16.msra.mxu0 %v19381_v20  ;;  %v19438_v20 = vld [vmem:[#allocation7 + $0x90] ss:$8 sps:$4 sm:$0xff]  }
 0x178   :  { %1209 = vmatprep.subr.bf16.mxu0 %v19389_v24  ;;  %v19446_v24 = vld [vmem:[#allocation7 + $0x84] ss:$8 sps:$4 sm:$0xff]  }
 0x17b   :  { %1210 = vmatpush1.bf16.msra.mxu0 %v19387_v22  ;;  %v19443_v22 = vld [vmem:[#allocation5 + $0x94] ss:$8 sps:$4 sm:$0xff]  }
 0x226   :  { %v585_v27 = vpop.f32.mrf.mxu0 }
 0x227   :  { %v586_v31 = vadd.f32 %v585_v27, %v458_v28  ;;  %v19393_v27 = vld [vmem:[#allocation5 + $0x10] ss:$8 sps:$4 sm:$0xff]  }
 0x228   :  { %v587_v29 = vpop.f32.mrf.mxu0 }
 0x229   :  { %v588_v40 = vadd.f32 %v587_v29, %v462_v38  ;;  %v19399_v29 = vld [vmem:[#allocation5] ss:$8 sps:$4 sm:$0xff]  }
 0x22a   :  { %v589_v30 = vpop.f32.mrf.mxu0 }
 0x22b   :  { %v590_v32 = vadd.f32 %v589_v30, %v458_v28  ;;  %v19395_v28 = vld [vmem:[#allocation5 + $0x14] ss:$8 sps:$4 sm:$0xff]   ;;  %v19401_v30 = vld [vmem:[#allocation5 + $0x4] ss:$8 sps:$4 sm:$0xff]  }
 0x22c   :  { %v591_v36 = vpop.f32.mrf.mxu0  ;;  %1211 = vmatprep.subr.bf16.mxu0 %v19395_v28  ;;  %v19449_v28 = vld [vmem:[#allocation5 + $0x84] ss:$8 sps:$4 sm:$0xff]  }
 0x22d   :  { %v594_v33 = vpack.c.bf16 %v590_v32, %v586_v31  ;;  %v592_v39 = vadd.f32 %v591_v36, %v462_v38  ;;  %1212 = vmatpush1.bf16.msra.mxu0 %v19393_v27  ;;  %v19405_v31 = vld [vmem:[#allocation5 + $0xf0] ss:$8 sps:$4 sm:$0xff]   ;;  %v19407_v32 = vld [vmem:[#allocation5 + $0xf4] ss:$8 sps:$4 sm:$0xff]   ;;  %v19423_v38 = vld [vmem:[#allocation5 + $0xc0] ss:$8 sps:$4 sm:$0xff]  }
 0x22e   :  { %1213 = vmatprep.subr.bf16.mxu0 %v19401_v30  ;;  %v19417_v36 = vld [vmem:[#allocation5 + $0xd0] ss:$8 sps:$4 sm:$0xff]   ;;  %v19444_v27 = vld [vmem:[#allocation7 + $0x80] ss:$8 sps:$4 sm:$0xff]  }
 0x22f   :  { %597 = vrot.lane.b32.xlu0 %v594_v33, %s22971_s21  ;;  %v595_v41 = vpack.c.bf16 %v592_v39, %v588_v40  ;;  %v19425_v39 = vld [vmem:[#allocation5 + $0xc4] ss:$8 sps:$4 sm:$0xff]   ;;  %v19455_v30 = vld [vmem:[#allocation11 + $0x74] ss:$8 sps:$4 sm:$0xff]  }
 0x231   :  { %1214 = vmatpush1.bf16.msra.mxu0 %v19399_v29  ;;  %v19447_v29 = vld [vmem:[#allocation5 + $0x80] ss:$8 sps:$4 sm:$0xff]  }
 0x232   :  { %1215 = vmatprep.subr.bf16.mxu0 %v19407_v32 }
 0x235   :  { %1216 = vmatpush2.bf16.msra.mxu0 %v19405_v31 }
 0x2a1   :  { %v598_v35 = vpop.permute.xlu0 %597 }
 0x2a2   :  { %v604_v37 = vsel %vm599_vm1, %v598_v35, 0  ;;  %v19413_v35 = vld [vmem:[#allocation5 + $0xe4] ss:$8 sps:$4 sm:$0xff]  }
 0x2a3   :  { %19236 = vmatpush3.bf16.xpose.msra.mxu1 %v604_v37  ;;  %1217 = vmatprep.subr.bf16.mxu0 %v19413_v35  ;;  %v19419_v37 = vld [vmem:[#allocation5 + $0xd4] ss:$8 sps:$4 sm:$0xff]  }
 0x2a4   :  { %19241 = vmatprep.subr.bf16.mxu1 %v22989_v25 }
 0x2aa   :  { %19238 = vmatmul.mubr.msk.bf16.vlgmr.msra.gmra.mxu1 %vm599_vm1, %v594_v33  ;;  %v19411_v33 = vld [vmem:[#allocation5 + $0xe0] ss:$8 sps:$4 sm:$0xff]   ;;  %vm1030_vm1 = vcmp.ge.s32.totalorder %v23324_v51, 1 }
 0x2ab   :  { %19242 = vmatpush3.bf16.msra.mxu1 %v595_v41  ;;  %19243 = vmatprep.mubr.msk.bf16.mxu1 %vm22990_vm0, %v22989_v25 }
 0x2ac   :  { %977 = vmatprep.subr.bf16.mxu1 %v19356_v11  ;;  %1218 = vmatpush2.bf16.msra.mxu0 %v19411_v33  ;;  %v19428_v11 = vld [vmem:[#allocation7 + $0xb4] ss:$8 sps:$4 sm:$0xff]  }
 0x2ad   :  { %1219 = vmatprep.subr.bf16.mxu0 %v19419_v37 }
 0x2b0   :  { %1220 = vmatpush2.bf16.msra.mxu0 %v19417_v36 }
 0x2b1   :  { %1221 = vmatprep.subr.bf16.mxu0 %v19425_v39  ;;  %v23354_v39 = vld [vmem:[#allocation2] ss:$44 sps:$4 sm:$0xff]  }
 0x2b4   :  { %1222 = vmatpush2.bf16.msra.mxu0 %v19423_v38  ;;  %v19453_v38 = vld [vmem:[#allocation11 + $0x70] ss:$8 sps:$4 sm:$0xff]  }
 0x2b5   :  { %1223 = vmatprep.subr.bf16.mxu0 %v19431_v13  ;;  %v19506_v13 = vld [vmem:[#allocation10 + $0x174] ss:$8 sps:$4 sm:$0xff]  }
 0x2b8   :  { %1224 = vmatpush2.bf16.msra.mxu0 %v19429_v14  ;;  %v19501_v14 = vld [vmem:[#allocation11 + $0x170] ss:$8 sps:$4 sm:$0xff]  }
 0x2b9   :  { %1225 = vmatprep.subr.bf16.mxu0 %v19437_v17  ;;  %v19512_v17 = vld [vmem:[#allocation10 + $0x164] ss:$8 sps:$4 sm:$0xff]  }
 0x2bc   :  { %1226 = vmatpush2.bf16.msra.mxu0 %v19435_v18  ;;  %v19507_v18 = vld [vmem:[#allocation11 + $0x160] ss:$8 sps:$4 sm:$0xff]  }
 0x2bd   :  { %1227 = vmatprep.subr.bf16.mxu0 %v19443_v22  ;;  %v19513_v22 = vld [vmem:[#allocation11 + $0x150] ss:$8 sps:$4 sm:$0xff]  }
 0x2c0   :  { %1228 = vmatpush2.bf16.msra.mxu0 %v19441_v21  ;;  %v19518_v21 = vld [vmem:[#allocation10 + $0x154] ss:$8 sps:$4 sm:$0xff]  }
 0x2c1   :  { %1229 = vmatprep.subr.bf16.mxu0 %v19449_v28  ;;  %v19524_v28 = vld [vmem:[#allocation10 + $0x144] ss:$8 sps:$4 sm:$0xff]  }
 0x2c4   :  { %1230 = vmatpush2.bf16.msra.mxu0 %v19447_v29  ;;  %v19519_v29 = vld [vmem:[#allocation11 + $0x140] ss:$8 sps:$4 sm:$0xff]  }
 0x36a   :  { %v640_v54 = vpop.f32.mrf.mxu1 }
 0x36b   :  { %v657_v55 = vmul.f32 0.125, %v640_v54  ;;  %v19368_v54 = vld [vmem:[#allocation7 + $0x54] ss:$8 sps:$4 sm:$0xff]  }
 0x36c   :  { %v19239_v56 = vpop.f32.mrf.mxu1 }
 0x36d   :  { %v659_v57 = vsel %vm23326_vm7, %v657_v55, -1e+30  ;;  %v19366_v55 = vld [vmem:[#allocation7 + $0x50] ss:$8 sps:$4 sm:$0xff]   ;;  %v19374_v56 = vld [vmem:[#allocation7 + $0x44] ss:$8 sps:$4 sm:$0xff]  }
 0x36e   :  { %v643_v58 = vpop.f32.mrf.mxu1  ;;  %v662_v59 = vsel %vm661_vm11, %v659_v57, -inf }
 0x36f   :  { %v658_v60 = vmul.f32 0.125, %v643_v58  ;;  %663 = vmax.xlane.f32.xlu0 %v662_v59  ;;  %v19380_v58 = vld [vmem:[#allocation7 + $0x34] ss:$8 sps:$4 sm:$0xff]   ;;  %v19378_v59 = vld [vmem:[#allocation7 + $0x30] ss:$8 sps:$4 sm:$0xff]  }
 0x370   :  { %v19240_v61 = vpop.f32.mrf.mxu1 }
 0x371   :  { %v660_v62 = vsel %vm23331_vm10, %v658_v60, -1e+30  ;;  %v19386_v60 = vld [vmem:[#allocation7 + $0x24] ss:$8 sps:$4 sm:$0xff]   ;;  %v19384_v61 = vld [vmem:[#allocation7 + $0x20] ss:$8 sps:$4 sm:$0xff]  }
 0x372   :  { %v665_v63 = vsel %vm661_vm11, %v660_v62, -inf }
 0x373   :  { %666 = vmax.xlane.f32.xlu1 %v665_v63  ;;  %v19390_v63 = vld [vmem:[#allocation7 + $0x10] ss:$8 sps:$4 sm:$0xff]  }
 0x3f8   :  { %v664_v1 = vpop.xlane.xlu0 %663 }
 0x3f9   :  { %v668_v2 = vsub.f32 %v659_v57, %v664_v1  ;;  %v19372_v57 = vld [vmem:[#allocation7 + $0x40] ss:$8 sps:$4 sm:$0xff]   ;;  %v19398_v1 = vld [vmem:[#allocation7 + $0x4] ss:$8 sps:$4 sm:$0xff]  }
 0x3fb   :  { %v670_v3 = vmul.f32 1.442695, %v668_v2  ;;  %v19396_v2 = vld [vmem:[#allocation7] ss:$8 sps:$4 sm:$0xff]  }
 0x3fc   :  { %v667_v4 = vpop.xlane.xlu1 %666 }
 0x3fd   :  { %22304 = vpow2.f32 %v670_v3  ;;  %v669_v5 = vsub.f32 %v660_v62, %v667_v4  ;;  %v19392_v62 = vld [vmem:[#allocation7 + $0x14] ss:$8 sps:$4 sm:$0xff]   ;;  %v19402_v4 = vld [vmem:[#allocation7 + $0xf0] ss:$8 sps:$4 sm:$0xff]  }
 0x3fe   :  { %v19404_v3 = vld [vmem:[#allocation7 + $0xf4] ss:$8 sps:$4 sm:$0xff]  }
 0x3ff   :  { %v672_v6 = vmul.f32 1.442695, %v669_v5  ;;  %v19410_v5 = vld [vmem:[#allocation7 + $0xe4] ss:$8 sps:$4 sm:$0xff]  }
 0x401   :  { %22306 = vpow2.f32 %v672_v6  ;;  %v19408_v6 = vld [vmem:[#allocation7 + $0xe0] ss:$8 sps:$4 sm:$0xff]  }
 0x40a   :  { %v23341_v7 = vpop.eup %22304 }
 0x40b   :  { %v674_v8 = vsel %vm661_vm11, %v23341_v7, 0.0 }
 0x40c   :  { %675 = vadd.xlane.f32.xlu1 %v674_v8  ;;  %v19414_v8 = vld [vmem:[#allocation7 + $0xd0] ss:$8 sps:$4 sm:$0xff]  }
 0x40e   :  { %v23345_v9 = vpop.eup %22306 }
 0x40f   :  { %v677_v10 = vsel %vm661_vm11, %v23345_v9, 0.0 }
 0x410   :  { %678 = vadd.xlane.f32.xlu1 %v677_v10  ;;  %v19420_v10 = vld [vmem:[#allocation7 + $0xc0] ss:$8 sps:$4 sm:$0xff]  }
 0x495   :  { %v676_v40 = vpop.xlane.xlu1 %675 }
 0x496   :  { %22308 = vrcp.f32 %v676_v40 }
 0x499   :  { %v679_v41 = vpop.xlane.xlu1 %678 }
 0x49a   :  { %22310 = vrcp.f32 %v679_v41  ;;  %v19458_v41 = vld [vmem:[#allocation11 + $0x64] ss:$8 sps:$4 sm:$0xff]  }
 0x4a3   :  { %v22309_v42 = vpop.eup %22308 }
 0x4a4   :  { %v682_v44 = vmul.f32 %v22309_v42, %v23341_v7  ;;  %v19416_v7 = vld [vmem:[#allocation7 + $0xd4] ss:$8 sps:$4 sm:$0xff]   ;;  %v19456_v42 = vld [vmem:[#allocation11 + $0x60] ss:$8 sps:$4 sm:$0xff]  }
 0x4a7   :  { %v22311_v43 = vpop.eup %22310 }
 0x4a8   :  { %v683_v45 = vmul.f32 %v22311_v43, %v23345_v9  ;;  %v19422_v9 = vld [vmem:[#allocation7 + $0xc4] ss:$8 sps:$4 sm:$0xff]   ;;  %v19461_v43 = vld [vmem:[#allocation11 + $0x54] ss:$8 sps:$4 sm:$0xff]  }
 0x4aa   :  { %v684_v47 = vpack.c.bf16 %v683_v45, %v682_v44  ;;  %v19459_v44 = vld [vmem:[#allocation11 + $0x50] ss:$8 sps:$4 sm:$0xff]   ;;  %v19464_v45 = vld [vmem:[#allocation11 + $0x44] ss:$8 sps:$4 sm:$0xff]  }
 0x4ac   :  { %19244 = vmatmul.mubr.msk.bf16.vlgmr.msra.gmra.mxu1 %vm661_vm11, %v684_v47  ;;  %v19467_v47 = vld [vmem:[#allocation11 + $0x34] ss:$8 sps:$4 sm:$0xff]  }
 0x4ad   :  { %978 = vmatpush1.bf16.msra.mxu1 %v19354_v46  ;;  %v19462_v46 = vld [vmem:[#allocation11 + $0x40] ss:$8 sps:$4 sm:$0xff]  }
 0x4ae   :  { %979 = vmatprep.subr.bf16.mxu1 %v19362_v49  ;;  %v19465_v49 = vld [vmem:[#allocation11 + $0x30] ss:$8 sps:$4 sm:$0xff]  }
 0x4b1   :  { %980 = vmatpush1.bf16.msra.mxu1 %v19360_v50  ;;  %v19470_v50 = vld [vmem:[#allocation11 + $0x24] ss:$8 sps:$4 sm:$0xff]  }
 0x4b2   :  { %981 = vmatprep.subr.bf16.mxu1 %v19368_v54  ;;  %v19468_v54 = vld [vmem:[#allocation11 + $0x20] ss:$8 sps:$4 sm:$0xff]  }
 0x4b5   :  { %982 = vmatpush1.bf16.msra.mxu1 %v19366_v55  ;;  %v19473_v55 = vld [vmem:[#allocation11 + $0x14] ss:$8 sps:$4 sm:$0xff]  }
 0x4b6   :  { %983 = vmatprep.subr.bf16.mxu1 %v19374_v56  ;;  %v19471_v56 = vld [vmem:[#allocation11 + $0x10] ss:$8 sps:$4 sm:$0xff]  }
 0x4b9   :  { %984 = vmatpush1.bf16.msra.mxu1 %v19372_v57  ;;  %v19476_v57 = vld [vmem:[#allocation11 + $0x4] ss:$8 sps:$4 sm:$0xff]  }
 0x4ba   :  { %985 = vmatprep.subr.bf16.mxu1 %v19380_v58  ;;  %v19474_v58 = vld [vmem:[#allocation11] ss:$8 sps:$4 sm:$0xff]  }
 0x4bd   :  { %986 = vmatpush1.bf16.msra.mxu1 %v19378_v59  ;;  %v19479_v59 = vld [vmem:[#allocation11 + $0xf4] ss:$8 sps:$4 sm:$0xff]  }
 0x4be   :  { %987 = vmatprep.subr.bf16.mxu1 %v19386_v60  ;;  %v19477_v60 = vld [vmem:[#allocation11 + $0xf0] ss:$8 sps:$4 sm:$0xff]  }
 0x4c1   :  { %988 = vmatpush1.bf16.msra.mxu1 %v19384_v61  ;;  %v19482_v61 = vld [vmem:[#allocation11 + $0xe4] ss:$8 sps:$4 sm:$0xff]  }
 0x4c2   :  { %989 = vmatprep.subr.bf16.mxu1 %v19392_v62  ;;  %v19480_v62 = vld [vmem:[#allocation11 + $0xe0] ss:$8 sps:$4 sm:$0xff]  }
 0x4c5   :  { %990 = vmatpush1.bf16.msra.mxu1 %v19390_v63  ;;  %v19485_v63 = vld [vmem:[#allocation11 + $0xd4] ss:$8 sps:$4 sm:$0xff]  }
 0x4c6   :  { %991 = vmatprep.subr.bf16.mxu1 %v19398_v1  ;;  %v19483_v1 = vld [vmem:[#allocation11 + $0xd0] ss:$8 sps:$4 sm:$0xff]  }
 0x4c9   :  { %992 = vmatpush1.bf16.msra.mxu1 %v19396_v2  ;;  %v19488_v2 = vld [vmem:[#allocation11 + $0xc4] ss:$8 sps:$4 sm:$0xff]  }
 0x4ca   :  { %993 = vmatprep.subr.bf16.mxu1 %v19404_v3  ;;  %v19486_v3 = vld [vmem:[#allocation11 + $0xc0] ss:$8 sps:$4 sm:$0xff]  }
 0x4cd   :  { %994 = vmatpush2.bf16.msra.mxu1 %v19402_v4  ;;  %v19491_v4 = vld [vmem:[#allocation11 + $0xb4] ss:$8 sps:$4 sm:$0xff]  }
 0x4ce   :  { %995 = vmatprep.subr.bf16.mxu1 %v19410_v5  ;;  %v19489_v5 = vld [vmem:[#allocation11 + $0xb0] ss:$8 sps:$4 sm:$0xff]  }
 0x4d1   :  { %996 = vmatpush2.bf16.msra.mxu1 %v19408_v6  ;;  %v19494_v6 = vld [vmem:[#allocation11 + $0xa4] ss:$8 sps:$4 sm:$0xff]  }
 0x4d2   :  { %997 = vmatprep.subr.bf16.mxu1 %v19416_v7  ;;  %v19492_v7 = vld [vmem:[#allocation11 + $0xa0] ss:$8 sps:$4 sm:$0xff]  }
 0x4d5   :  { %998 = vmatpush2.bf16.msra.mxu1 %v19414_v8  ;;  %v19497_v8 = vld [vmem:[#allocation11 + $0x94] ss:$8 sps:$4 sm:$0xff]  }
 0x4d6   :  { %999 = vmatprep.subr.bf16.mxu1 %v19422_v9  ;;  %v19495_v9 = vld [vmem:[#allocation11 + $0x90] ss:$8 sps:$4 sm:$0xff]  }
 0x4d9   :  { %1000 = vmatpush2.bf16.msra.mxu1 %v19420_v10  ;;  %v19500_v10 = vld [vmem:[#allocation11 + $0x84] ss:$8 sps:$4 sm:$0xff]  }
 0x4da   :  { %1001 = vmatprep.subr.bf16.mxu1 %v19428_v11  ;;  %v19498_v11 = vld [vmem:[#allocation11 + $0x80] ss:$8 sps:$4 sm:$0xff]  }
 0x4dd   :  { %1002 = vmatpush2.bf16.msra.mxu1 %v19426_v12  ;;  %v19503_v12 = vld [vmem:[#allocation11 + $0x174] ss:$8 sps:$4 sm:$0xff]  }
 0x4de   :  { %1003 = vmatprep.subr.bf16.mxu1 %v19434_v15  ;;  %v19504_v15 = vld [vmem:[#allocation10 + $0x170] ss:$8 sps:$4 sm:$0xff]   ;;  %1681 = vmatprep.subr.bf16.mxu0 %v19503_v12 }
 0x4e1   :  { %1004 = vmatpush2.bf16.msra.mxu1 %v19432_v16  ;;  %v19509_v16 = vld [vmem:[#allocation11 + $0x164] ss:$8 sps:$4 sm:$0xff]  }
 0x4e2   :  { %1005 = vmatprep.subr.bf16.mxu1 %v19440_v19  ;;  %v19510_v19 = vld [vmem:[#allocation10 + $0x160] ss:$8 sps:$4 sm:$0xff]  }
 0x4e5   :  { %1006 = vmatpush2.bf16.msra.mxu1 %v19438_v20  ;;  %v19515_v20 = vld [vmem:[#allocation11 + $0x154] ss:$8 sps:$4 sm:$0xff]  }
 0x4e6   :  { %1007 = vmatprep.subr.bf16.mxu1 %v19446_v24  ;;  %v19516_v24 = vld [vmem:[#allocation10 + $0x150] ss:$8 sps:$4 sm:$0xff]  }
 0x4e9   :  { %1008 = vmatpush2.bf16.msra.mxu1 %v19444_v27  ;;  %v19521_v27 = vld [vmem:[#allocation11 + $0x144] ss:$8 sps:$4 sm:$0xff]  }
 0x4ea   :  { %1638 = vmatprep.subr.bf16.mxu1 %v19455_v30  ;;  %v19522_v30 = vld [vmem:[#allocation10 + $0x140] ss:$8 sps:$4 sm:$0xff]  }
 0x56c   :  { %v722_v31 = vpop.f32.mrf.mxu1 }
 0x56d   :  { %v19039_v32 = vpack.c.bf16 %v722_v31, %v722_v31  ;;  %v19527_v31 = vld [vmem:[#allocation11 + $0x134] ss:$8 sps:$4 sm:$0xff]  }
 0x56e   :  { %v19245_v33 = vpop.f32.mrf.mxu1 }
 0x56f   :  { %738 = vst.msk [vmem:[#allocation2 + $0x4] sm:$0xf] %vm737_vm13, %v19039_v32  ;;  %v19530_v32 = vld [vmem:[#allocation10 + $0x134] ss:$8 sps:$4 sm:$0xff]   ;;  %v19525_v33 = vld [vmem:[#allocation11 + $0x130] ss:$8 sps:$4 sm:$0xff]  }
 0x570   :  { %v725_v35 = vpop.f32.mrf.mxu1 }
 0x571   :  { %v19040_v36 = vpack.c.bf16 %v725_v35, %v725_v35  ;;  %v19528_v35 = vld [vmem:[#allocation10 + $0x130] ss:$8 sps:$4 sm:$0xff]  }
 0x572   :  { %v19246_v37 = vpop.f32.mrf.mxu1 }
 0x573   :  { %739 = vst.msk [vmem:[#allocation2 + $0x30] sm:$0xf] %vm737_vm13, %v19040_v36  ;;  %v19533_v36 = vld [vmem:[#allocation11 + $0x124] ss:$8 sps:$4 sm:$0xff]  }
 0x574   :  { %v19536_v37 = vld [vmem:[#allocation10 + $0x124] ss:$8 sps:$4 sm:$0xff]  }
 0x57a   :  { %v23356_v40 = vld [vmem:[#allocation2 + $0x4] ss:$44 sps:$4 sm:$0xff]  }
 0x57b   :  { %1009 = vmatprep.mubr.bf16.mxu1 %v23356_v40  ;;  %1231 = vmatprep.mubr.bf16.mxu0 %v23356_v40 }
 0x57c   :  { %1010 = vmatmul.mubr.bf16.vlgmr.msra.gmra.mxu1 %v23354_v39  ;;  %1232 = vmatmul.mubr.bf16.vlgmr.msra.gmra.mxu0 %v23354_v39 }
 0x57d   :  { %1639 = vmatpush1.bf16.msra.mxu1 %v19453_v38  ;;  %1670 = vmatprep.mubr.bf16.mxu1 %v23356_v40  ;;  %v19531_v38 = vld [vmem:[#allocation11 + $0x120] ss:$8 sps:$4 sm:$0xff]  }
 0x57e   :  { %1640 = vmatprep.subr.bf16.mxu1 %v19458_v41  ;;  %1713 = vmatprep.mubr.bf16.mxu0 %v22988_v0  ;;  %v19534_v41 = vld [vmem:[#allocation10 + $0x120] ss:$8 sps:$4 sm:$0xff]  }
 0x57f   :  { %1682 = vmatpush1.bf16.msra.mxu0 %v19501_v14 }
 0x580   :  { %1683 = vmatprep.subr.bf16.mxu0 %v19509_v16 }
 0x581   :  { %1641 = vmatpush1.bf16.msra.mxu1 %v19456_v42  ;;  %v19539_v42 = vld [vmem:[#allocation11 + $0x114] ss:$8 sps:$4 sm:$0xff]  }
 0x582   :  { %1642 = vmatprep.subr.bf16.mxu1 %v19461_v43  ;;  %v19542_v43 = vld [vmem:[#allocation10 + $0x114] ss:$8 sps:$4 sm:$0xff]  }
 0x583   :  { %1684 = vmatpush1.bf16.msra.mxu0 %v19507_v18 }
 0x584   :  { %1685 = vmatprep.subr.bf16.mxu0 %v19515_v20 }
 0x585   :  { %1643 = vmatpush1.bf16.msra.mxu1 %v19459_v44  ;;  %v19537_v44 = vld [vmem:[#allocation11 + $0x110] ss:$8 sps:$4 sm:$0xff]  }
 0x586   :  { %1644 = vmatprep.subr.bf16.mxu1 %v19464_v45  ;;  %v19540_v45 = vld [vmem:[#allocation10 + $0x110] ss:$8 sps:$4 sm:$0xff]  }
 0x587   :  { %1686 = vmatpush1.bf16.msra.mxu0 %v19513_v22 }
 0x588   :  { %1687 = vmatprep.subr.bf16.mxu0 %v19521_v27 }
 0x589   :  { %1645 = vmatpush1.bf16.msra.mxu1 %v19462_v46  ;;  %v19545_v46 = vld [vmem:[#allocation11 + $0x104] ss:$8 sps:$4 sm:$0xff]  }
 0x58a   :  { %1646 = vmatprep.subr.bf16.mxu1 %v19467_v47  ;;  %v19543_v47 = vld [vmem:[#allocation11 + $0x100] ss:$8 sps:$4 sm:$0xff]  }
 0x58b   :  { %1688 = vmatpush1.bf16.msra.mxu0 %v19519_v29 }
 0x58c   :  { %1689 = vmatprep.subr.bf16.mxu0 %v19527_v31 }
 0x58d   :  { %1647 = vmatpush1.bf16.msra.mxu1 %v19465_v49  ;;  %v19546_v49 = vld [vmem:[#allocation10 + $0x100] ss:$8 sps:$4 sm:$0xff]  }
 0x58e   :  { %1648 = vmatprep.subr.bf16.mxu1 %v19470_v50  ;;  %v19548_v50 = vld [vmem:[#allocation10 + $0x104] ss:$8 sps:$4 sm:$0xff]  }
 0x58f   :  { %1690 = vmatpush1.bf16.msra.mxu0 %v19525_v33 }
 0x590   :  { %1691 = vmatprep.subr.bf16.mxu0 %v19533_v36 }
 0x591   :  { %1649 = vmatpush1.bf16.msra.mxu1 %v19468_v54  ;;  %v19551_v54 = vld [vmem:[#allocation10 + $0x74] ss:$8 sps:$4 sm:$0xff]  }
 0x592   :  { %1650 = vmatprep.subr.bf16.mxu1 %v19473_v55  ;;  %v19554_v55 = vld [vmem:[#allocation16 + $0x74] ss:$8 sps:$4 sm:$0xff]  }
 0x593   :  { %1692 = vmatpush1.bf16.msra.mxu0 %v19531_v38 }
 0x594   :  { %1693 = vmatprep.subr.bf16.mxu0 %v19539_v42 }
 0x595   :  { %1651 = vmatpush1.bf16.msra.mxu1 %v19471_v56 }
 0x596   :  { %1652 = vmatprep.subr.bf16.mxu1 %v19476_v57 }
 0x597   :  { %1694 = vmatpush1.bf16.msra.mxu0 %v19537_v44 }
 0x598   :  { %1695 = vmatprep.subr.bf16.mxu0 %v19545_v46  ;;  %v19549_v46 = vld [vmem:[#allocation10 + $0x70] ss:$8 sps:$4 sm:$0xff]  }
 0x599   :  { %1653 = vmatpush1.bf16.msra.mxu1 %v19474_v58 }
 0x59a   :  { %1654 = vmatprep.subr.bf16.mxu1 %v19479_v59 }
 0x59b   :  { %1696 = vmatpush1.bf16.msra.mxu0 %v19543_v47  ;;  %v19552_v47 = vld [vmem:[#allocation16 + $0x70] ss:$8 sps:$4 sm:$0xff]  }
 0x59c   :  { %1983 = vmatprep.subr.bf16.mxu0 %v19551_v54  ;;  %v19561_v54 = vld [vmem:[#allocation16 + $0x64] ss:$8 sps:$4 sm:$0xff]  }
 0x59d   :  { %1655 = vmatpush2.bf16.msra.mxu1 %v19477_v60 }
 0x59e   :  { %1656 = vmatprep.subr.bf16.mxu1 %v19482_v61 }
 0x5a1   :  { %1657 = vmatpush2.bf16.msra.mxu1 %v19480_v62 }
 0x5a2   :  { %1658 = vmatprep.subr.bf16.mxu1 %v19485_v63 }
 0x5a5   :  { %1659 = vmatpush2.bf16.msra.mxu1 %v19483_v1 }
 0x5a6   :  { %1660 = vmatprep.subr.bf16.mxu1 %v19488_v2  ;;  %v806_v2 = vld [vmem:[#allocation8] sm:$0x3] }
 0x5a7   :  { %v1246_v27 = vrot.slane %v806_v2, %v23303_v26 }
 0x5a9   :  { %1661 = vmatpush2.bf16.msra.mxu1 %v19486_v3 }
 0x5aa   :  { %1662 = vmatprep.subr.bf16.mxu1 %v19491_v4 }
 0x5ad   :  { %1663 = vmatpush2.bf16.msra.mxu1 %v19489_v5  ;;  %v1250_v5 = vrot.slane %v806_v2, %v23310_v34  ;;  %v19576_v2 = vld [vmem:[#allocation10 + $0x34] ss:$8 sps:$4 sm:$0xff]  }
 0x5ae   :  { %1664 = vmatprep.subr.bf16.mxu1 %v19494_v6 }
 0x5b1   :  { %1665 = vmatpush2.bf16.msra.mxu1 %v19492_v7 }
 0x5b2   :  { %1666 = vmatprep.subr.bf16.mxu1 %v19497_v8 }
 0x5b5   :  { %1667 = vmatpush2.bf16.msra.mxu1 %v19495_v9 }
 0x5b6   :  { %1668 = vmatprep.subr.bf16.mxu1 %v19500_v10 }
 0x5b9   :  { %1669 = vmatpush2.bf16.msra.mxu1 %v19498_v11 }
 0x5ba   :  { %2026 = vmatprep.subr.bf16.mxu1 %v19506_v13 }
 0x5bc   :  { %1671 = vmatmul.mubr.bf16.vlgmr.msra.gmra.mxu1 %v23354_v39 }
 0x5bd   :  { %2058 = vmatprep.mubr.bf16.mxu1 %v22988_v0  ;;  %2027 = vmatpush1.bf16.msra.mxu1 %v19504_v15 }
 0x5be   :  { %2028 = vmatprep.subr.bf16.mxu1 %v19512_v17 }
 0x5c1   :  { %2029 = vmatpush1.bf16.msra.mxu1 %v19510_v19 }
 0x5c2   :  { %2030 = vmatprep.subr.bf16.mxu1 %v19518_v21 }
 0x5c5   :  { %2031 = vmatpush1.bf16.msra.mxu1 %v19516_v24 }
 0x5c6   :  { %2032 = vmatprep.subr.bf16.mxu1 %v19524_v28 }
 0x5c9   :  { %2033 = vmatpush1.bf16.msra.mxu1 %v19522_v30 }
 0x5ca   :  { %2034 = vmatprep.subr.bf16.mxu1 %v19530_v32 }
 0x5cd   :  { %2035 = vmatpush1.bf16.msra.mxu1 %v19528_v35 }
 0x5ce   :  { %2036 = vmatprep.subr.bf16.mxu1 %v19536_v37 }
 0x5d1   :  { %2037 = vmatpush1.bf16.msra.mxu1 %v19534_v41 }
 0x5d2   :  { %2038 = vmatprep.subr.bf16.mxu1 %v19542_v43 }
 0x5d5   :  { %2039 = vmatpush1.bf16.msra.mxu1 %v19540_v45 }
 0x5d6   :  { %2040 = vmatprep.subr.bf16.mxu1 %v19548_v50  ;;  %v19558_v50 = vld [vmem:[#allocation10 + $0x64] ss:$8 sps:$4 sm:$0xff]  }
 0x5d9   :  { %2041 = vmatpush1.bf16.msra.mxu1 %v19546_v49 }
 0x5da   :  { %2581 = vmatprep.subr.bf16.mxu1 %v19554_v55  ;;  %v19556_v55 = vld [vmem:[#allocation10 + $0x60] ss:$8 sps:$4 sm:$0xff]  }
 0x63c   :  { %v1011_v56 = vpop.f32.mrf.mxu1  ;;  %v1233_v57 = vpop.f32.mrf.mxu0 }
 0x63d   :  { %v1020_v16 = vrot.slane %v1011_v56, 7  ;;  %v19559_v56 = vld [vmem:[#allocation16 + $0x60] ss:$8 sps:$4 sm:$0xff]  }
 0x63e   :  { %v1013_v58 = vpop.f32.mrf.mxu1  ;;  %v1235_v59 = vpop.f32.mrf.mxu0 }
 0x63f   :  { %v1021_v63 = vrot.slane %v1013_v58, 7  ;;  %v19567_v58 = vld [vmem:[#allocation16 + $0x54] ss:$8 sps:$4 sm:$0xff]  }
 0x640   :  { %v1015_v60 = vpop.f32.mrf.mxu1  ;;  %v1237_v61 = vpop.f32.mrf.mxu0 }
 0x641   :  { %v1022_v13 = vrot.slane %v1015_v60, 7  ;;  %v19565_v60 = vld [vmem:[#allocation16 + $0x50] ss:$8 sps:$4 sm:$0xff]  }
 0x642   :  { %v1017_v62 = vpop.f32.mrf.mxu1  ;;  %v1239_v8 = vpop.f32.mrf.mxu0 }
 0x643   :  { %v1023_v1 = vrot.slane %v1017_v62, 7  ;;  %v1027_v19 = vsel %vm1024_vm14, %v1022_v13, %v1020_v16  ;;  %v1025_v20 = vsel %vm1024_vm14, %v1020_v16, %v1022_v13  ;;  %v19573_v62 = vld [vmem:[#allocation16 + $0x44] ss:$8 sps:$4 sm:$0xff]   ;;  %v19589_v13 = vld [vmem:[#allocation16 + $0x10] ss:$8 sps:$4 sm:$0xff]  }
 0x644   :  { %v1035_v21 = vsel %vm1029_vm15, %v1027_v19, 0.0  ;;  %v1037_v22 = vsel %vm1030_vm1, %v1025_v20, 0.0  ;;  %v19592_v16 = vld [vmem:[#allocation10] ss:$8 sps:$4 sm:$0xff]   ;;  %v19598_v20 = vld [vmem:[#allocation10 + $0xf0] ss:$8 sps:$4 sm:$0xff]  }
 0x645   :  { %v1028_v3 = vsel %vm1024_vm14, %v1023_v1, %v1021_v63  ;;  %v1026_v4 = vsel %vm1024_vm14, %v1021_v63, %v1023_v1  ;;  %v1234_v24 = vadd.f32 %v1233_v57, %v1035_v21  ;;  %v1238_v28 = vadd.f32 %v1237_v61, %v1037_v22  ;;  %v19564_v57 = vld [vmem:[#allocation10 + $0x54] ss:$8 sps:$4 sm:$0xff]   ;;  %v19570_v61 = vld [vmem:[#allocation10 + $0x44] ss:$8 sps:$4 sm:$0xff]   ;;  %v19568_v63 = vld [vmem:[#allocation10 + $0x40] ss:$8 sps:$4 sm:$0xff]  }
 0x646   :  { %v1036_v6 = vsel %vm1029_vm15, %v1028_v3, 0.0  ;;  %v1038_v7 = vsel %vm1030_vm1, %v1026_v4, 0.0  ;;  %v19571_v1 = vld [vmem:[#allocation16 + $0x40] ss:$8 sps:$4 sm:$0xff]   ;;  %v19579_v3 = vld [vmem:[#allocation16 + $0x34] ss:$8 sps:$4 sm:$0xff]  }
 0x647   :  { %v1236_v9 = vadd.f32 %v1235_v59, %v1036_v6  ;;  %v1240_v10 = vadd.f32 %v1239_v8, %v1038_v7  ;;  %v1253_v29 = vadd.f32 %v1246_v27, %v1234_v24  ;;  %v1255_v30 = vadd.f32 %v1246_v27, %v1238_v28  ;;  %v19562_v59 = vld [vmem:[#allocation10 + $0x50] ss:$8 sps:$4 sm:$0xff]   ;;  %v19582_v6 = vld [vmem:[#allocation10 + $0x24] ss:$8 sps:$4 sm:$0xff]   ;;  %v19580_v8 = vld [vmem:[#allocation10 + $0x20] ss:$8 sps:$4 sm:$0xff]  }
 0x648   :  { %v19574_v4 = vld [vmem:[#allocation10 + $0x30] ss:$8 sps:$4 sm:$0xff]   ;;  %v19606_v22 = vld [vmem:[#allocation10 + $0xe4] ss:$8 sps:$4 sm:$0xff]   ;;  %v19604_v27 = vld [vmem:[#allocation10 + $0xe0] ss:$8 sps:$4 sm:$0xff]  }
 0x649   :  { %v1254_v11 = vadd.f32 %v1250_v5, %v1236_v9  ;;  %v1256_v12 = vadd.f32 %v1250_v5, %v1240_v10  ;;  %v19577_v5 = vld [vmem:[#allocation16 + $0x30] ss:$8 sps:$4 sm:$0xff]   ;;  %v19585_v7 = vld [vmem:[#allocation16 + $0x24] ss:$8 sps:$4 sm:$0xff]   ;;  %v19583_v9 = vld [vmem:[#allocation16 + $0x20] ss:$8 sps:$4 sm:$0xff]  }
 0x64a   :  { %v19588_v10 = vld [vmem:[#allocation10 + $0x14] ss:$8 sps:$4 sm:$0xff]   ;;  %v19609_v24 = vld [vmem:[#allocation16 + $0xe4] ss:$8 sps:$4 sm:$0xff]   ;;  %v19607_v28 = vld [vmem:[#allocation16 + $0xe0] ss:$8 sps:$4 sm:$0xff]  }
 0x64b   :  { %v1257_v14 = vsub.f32 0.0, %v1254_v11  ;;  %v1258_v15 = vsub.f32 0.0, %v1256_v12  ;;  %v19591_v11 = vld [vmem:[#allocation16 + $0x14] ss:$8 sps:$4 sm:$0xff]   ;;  %v19601_v21 = vld [vmem:[#allocation16 + $0xf0] ss:$8 sps:$4 sm:$0xff]  }
 0x64c   :  { %v19586_v12 = vld [vmem:[#allocation10 + $0x10] ss:$8 sps:$4 sm:$0xff]  }
 0x64d   :  { %v1259_v17 = vmul.f32 1.442695, %v1257_v14  ;;  %v1261_v18 = vmul.f32 1.442695, %v1258_v15  ;;  %v19594_v14 = vld [vmem:[#allocation10 + $0x4] ss:$8 sps:$4 sm:$0xff]  }
 0x64e   :  { %v19597_v15 = vld [vmem:[#allocation16 + $0x4] ss:$8 sps:$4 sm:$0xff]   ;;  %v19603_v19 = vld [vmem:[#allocation16 + $0xf4] ss:$8 sps:$4 sm:$0xff]  }
 0x64f   :  { %22312 = vpow2.f32 %v1259_v17  ;;  %v19595_v17 = vld [vmem:[#allocation16] ss:$8 sps:$4 sm:$0xff]  }
 0x650   :  { %22314 = vpow2.f32 %v1261_v18  ;;  %v19600_v18 = vld [vmem:[#allocation10 + $0xf4] ss:$8 sps:$4 sm:$0xff]  }
 0x651   :  { %22316 = vtanh.f32 %v1253_v29  ;;  %v19612_v29 = vld [vmem:[#allocation10 + $0xd4] ss:$8 sps:$4 sm:$0xff]  }
 0x652   :  { %22318 = vtanh.f32 %v1255_v30  ;;  %v19615_v30 = vld [vmem:[#allocation16 + $0xd4] ss:$8 sps:$4 sm:$0xff]  }
 0x65c   :  { %v22313_v31 = vpop.eup %22312 }
 0x65d   :  { %v22315_v32 = vpop.eup %22314  ;;  %v1263_v33 = vadd.f32 1.0, %v22313_v31  ;;  %v19610_v31 = vld [vmem:[#allocation10 + $0xd0] ss:$8 sps:$4 sm:$0xff]  }
 0x65e   :  { %v1264_v35 = vadd.f32 1.0, %v22315_v32  ;;  %v22317_v36 = vpop.eup %22316  ;;  %v19613_v32 = vld [vmem:[#allocation16 + $0xd0] ss:$8 sps:$4 sm:$0xff]  }
 0x65f   :  { %22320 = vrcp.f32 %v1263_v33  ;;  %v22319_v37 = vpop.eup %22318  ;;  %v19618_v33 = vld [vmem:[#allocation10 + $0xc4] ss:$8 sps:$4 sm:$0xff]  }
 0x660   :  { %22322 = vrcp.f32 %v1264_v35  ;;  %v19621_v35 = vld [vmem:[#allocation16 + $0xc4] ss:$8 sps:$4 sm:$0xff]  }
 0x66c   :  { %v22321_v38 = vpop.eup %22320 }
 0x66d   :  { %v22323_v41 = vpop.eup %22322  ;;  %v1269_v42 = vmul.f32 %v22321_v38, %v22317_v36  ;;  %v19616_v36 = vld [vmem:[#allocation10 + $0xc0] ss:$8 sps:$4 sm:$0xff]   ;;  %v19624_v38 = vld [vmem:[#allocation10 + $0xb4] ss:$8 sps:$4 sm:$0xff]  }
 0x66e   :  { %v1270_v43 = vmul.f32 %v22323_v41, %v22319_v37  ;;  %v19619_v37 = vld [vmem:[#allocation16 + $0xc0] ss:$8 sps:$4 sm:$0xff]   ;;  %v19627_v41 = vld [vmem:[#allocation16 + $0xb4] ss:$8 sps:$4 sm:$0xff]  }
 0x66f   :  { %v19041_v44 = vpack.c.bf16 %v1269_v42, %v1269_v42  ;;  %v19622_v42 = vld [vmem:[#allocation10 + $0xb0] ss:$8 sps:$4 sm:$0xff]  }
 0x670   :  { %v19042_v45 = vpack.c.bf16 %v1270_v43, %v1270_v43  ;;  %v19625_v43 = vld [vmem:[#allocation16 + $0xb0] ss:$8 sps:$4 sm:$0xff]  }
 0x671   :  { %1279 = vst [vmem:[#allocation2 + $0x8] sm:$0xf] %v19041_v44  ;;  %v19630_v44 = vld [vmem:[#allocation10 + $0xa4] ss:$8 sps:$4 sm:$0xff]  }
 0x672   :  { %1280 = vst [vmem:[#allocation2 + $0x34] sm:$0xf] %v19042_v45  ;;  %v19633_v45 = vld [vmem:[#allocation16 + $0xa4] ss:$8 sps:$4 sm:$0xff]  }
 0x679   :  { %v19555_v49 = vld [vmem:[#allocation2 + $0x8] ss:$44 sps:$4 sm:$0xff]  }
 0x67a   :  { %1714 = vmatmul.mubr.bf16.vlgmr.msra.gmra.mxu0 %v19555_v49  ;;  %2059 = vmatmul.mubr.bf16.vlgmr.msra.gmra.mxu1 %v19555_v49  ;;  %v19636_v49 = vld [vmem:[#allocation10 + $0x94] ss:$8 sps:$4 sm:$0xff]  }
 0x67b   :  { %1984 = vmatpush1.bf16.msra.mxu0 %v19549_v46  ;;  %2582 = vmatpush1.bf16.msra.mxu1 %v19552_v47  ;;  %v19628_v46 = vld [vmem:[#allocation10 + $0xa0] ss:$8 sps:$4 sm:$0xff]  }
 0x67c   :  { %2015 = vmatprep.mubr.bf16.mxu0 %v23356_v40  ;;  %2613 = vmatprep.mubr.bf16.mxu1 %v23356_v40  ;;  %v19631_v47 = vld [vmem:[#allocation16 + $0xa0] ss:$8 sps:$4 sm:$0xff]  }
 0x67d   :  { %1985 = vmatprep.subr.bf16.mxu0 %v19558_v50  ;;  %2583 = vmatprep.subr.bf16.mxu1 %v19561_v54  ;;  %v19639_v50 = vld [vmem:[#allocation16 + $0x94] ss:$8 sps:$4 sm:$0xff]  }
 0x67e   :  { %v19634_v54 = vld [vmem:[#allocation10 + $0x90] ss:$8 sps:$4 sm:$0xff]  }
 0x67f   :  { %1986 = vmatpush1.bf16.msra.mxu0 %v19556_v55  ;;  %2584 = vmatpush1.bf16.msra.mxu1 %v19559_v56  ;;  %v19637_v55 = vld [vmem:[#allocation16 + $0x90] ss:$8 sps:$4 sm:$0xff]   ;;  %v19642_v56 = vld [vmem:[#allocation10 + $0x84] ss:$8 sps:$4 sm:$0xff]  }
 0x680   :  { %1987 = vmatprep.subr.bf16.mxu0 %v19564_v57  ;;  %2585 = vmatprep.subr.bf16.mxu1 %v19567_v58  ;;  %v19645_v57 = vld [vmem:[#allocation16 + $0x84] ss:$8 sps:$4 sm:$0xff]  }
 0x681   :  { %v19640_v58 = vld [vmem:[#allocation10 + $0x80] ss:$8 sps:$4 sm:$0xff]  }
 0x683   :  { %1988 = vmatpush1.bf16.msra.mxu0 %v19562_v59  ;;  %2586 = vmatpush1.bf16.msra.mxu1 %v19565_v60  ;;  %v19643_v59 = vld [vmem:[#allocation16 + $0x80] ss:$8 sps:$4 sm:$0xff]   ;;  %v19648_v60 = vld [vmem:[#allocation14 + $0x74] ss:$8 sps:$4 sm:$0xff]  }
 0x684   :  { %1989 = vmatprep.subr.bf16.mxu0 %v19570_v61  ;;  %2587 = vmatprep.subr.bf16.mxu1 %v19573_v62  ;;  %v19646_v61 = vld [vmem:[#allocation14 + $0x70] ss:$8 sps:$4 sm:$0xff]   ;;  %v19651_v62 = vld [vmem:[#allocation14 + $0x64] ss:$8 sps:$4 sm:$0xff]  }
 0x687   :  { %1990 = vmatpush1.bf16.msra.mxu0 %v19568_v63  ;;  %2588 = vmatpush1.bf16.msra.mxu1 %v19571_v1  ;;  %v19649_v63 = vld [vmem:[#allocation14 + $0x60] ss:$8 sps:$4 sm:$0xff]   ;;  %v19654_v1 = vld [vmem:[#allocation14 + $0x54] ss:$8 sps:$4 sm:$0xff]  }
 0x688   :  { %1991 = vmatprep.subr.bf16.mxu0 %v19576_v2  ;;  %2589 = vmatprep.subr.bf16.mxu1 %v19579_v3  ;;  %v19652_v2 = vld [vmem:[#allocation14 + $0x50] ss:$8 sps:$4 sm:$0xff]   ;;  %v19657_v3 = vld [vmem:[#allocation14 + $0x44] ss:$8 sps:$4 sm:$0xff]  }
 0x68b   :  { %1992 = vmatpush1.bf16.msra.mxu0 %v19574_v4  ;;  %2590 = vmatpush1.bf16.msra.mxu1 %v19577_v5  ;;  %v19655_v4 = vld [vmem:[#allocation14 + $0x40] ss:$8 sps:$4 sm:$0xff]   ;;  %v19745_v5 = vld [vmem:[#allocation16 + $0x170] ss:$8 sps:$4 sm:$0xff]  }
 0x68c   :  { %1993 = vmatprep.subr.bf16.mxu0 %v19582_v6  ;;  %2591 = vmatprep.subr.bf16.mxu1 %v19585_v7  ;;  %v19747_v6 = vld [vmem:[#allocation16 + $0x174] ss:$8 sps:$4 sm:$0xff]  }
 0x68d   :  { %v19660_v7 = vld [vmem:[#allocation14 + $0x34] ss:$8 sps:$4 sm:$0xff]  }
 0x68f   :  { %1994 = vmatpush1.bf16.msra.mxu0 %v19580_v8  ;;  %2592 = vmatpush1.bf16.msra.mxu1 %v19583_v9  ;;  %v19658_v8 = vld [vmem:[#allocation14 + $0x30] ss:$8 sps:$4 sm:$0xff]   ;;  %v19663_v9 = vld [vmem:[#allocation14 + $0x24] ss:$8 sps:$4 sm:$0xff]  }
 0x690   :  { %1995 = vmatprep.subr.bf16.mxu0 %v19588_v10  ;;  %2593 = vmatprep.subr.bf16.mxu1 %v19591_v11  ;;  %v19666_v10 = vld [vmem:[#allocation14 + $0x14] ss:$8 sps:$4 sm:$0xff]   ;;  %v19664_v11 = vld [vmem:[#allocation14 + $0x10] ss:$8 sps:$4 sm:$0xff]  }
 0x693   :  { %1996 = vmatpush1.bf16.msra.mxu0 %v19586_v12  ;;  %2594 = vmatpush1.bf16.msra.mxu1 %v19589_v13  ;;  %v19669_v12 = vld [vmem:[#allocation14 + $0x4] ss:$8 sps:$4 sm:$0xff]   ;;  %v19667_v13 = vld [vmem:[#allocation14] ss:$8 sps:$4 sm:$0xff]  }
 0x694   :  { %1997 = vmatprep.subr.bf16.mxu0 %v19594_v14  ;;  %2595 = vmatprep.subr.bf16.mxu1 %v19597_v15  ;;  %v19672_v14 = vld [vmem:[#allocation14 + $0xf4] ss:$8 sps:$4 sm:$0xff]   ;;  %v19670_v15 = vld [vmem:[#allocation14 + $0xf0] ss:$8 sps:$4 sm:$0xff]  }
 0x697   :  { %1998 = vmatpush1.bf16.msra.mxu0 %v19592_v16  ;;  %2596 = vmatpush1.bf16.msra.mxu1 %v19595_v17  ;;  %v19675_v16 = vld [vmem:[#allocation14 + $0xe4] ss:$8 sps:$4 sm:$0xff]   ;;  %v19673_v17 = vld [vmem:[#allocation14 + $0xe0] ss:$8 sps:$4 sm:$0xff]  }
 0x698   :  { %1999 = vmatprep.subr.bf16.mxu0 %v19600_v18  ;;  %2597 = vmatprep.subr.bf16.mxu1 %v19603_v19  ;;  %v19678_v18 = vld [vmem:[#allocation14 + $0xd4] ss:$8 sps:$4 sm:$0xff]   ;;  %v19676_v19 = vld [vmem:[#allocation14 + $0xd0] ss:$8 sps:$4 sm:$0xff]  }
 0x69b   :  { %2000 = vmatpush2.bf16.msra.mxu0 %v19598_v20  ;;  %2598 = vmatpush2.bf16.msra.mxu1 %v19601_v21  ;;  %v19681_v20 = vld [vmem:[#allocation14 + $0xc4] ss:$8 sps:$4 sm:$0xff]   ;;  %v19679_v21 = vld [vmem:[#allocation14 + $0xc0] ss:$8 sps:$4 sm:$0xff]  }
 0x69c   :  { %2001 = vmatprep.subr.bf16.mxu0 %v19606_v22  ;;  %2599 = vmatprep.subr.bf16.mxu1 %v19609_v24  ;;  %v19684_v22 = vld [vmem:[#allocation14 + $0xb4] ss:$8 sps:$4 sm:$0xff]   ;;  %v19682_v24 = vld [vmem:[#allocation14 + $0xb0] ss:$8 sps:$4 sm:$0xff]  }
 0x69f   :  { %2002 = vmatpush2.bf16.msra.mxu0 %v19604_v27  ;;  %2600 = vmatpush2.bf16.msra.mxu1 %v19607_v28  ;;  %v19687_v27 = vld [vmem:[#allocation14 + $0xa4] ss:$8 sps:$4 sm:$0xff]   ;;  %v19685_v28 = vld [vmem:[#allocation14 + $0xa0] ss:$8 sps:$4 sm:$0xff]  }
 0x6a0   :  { %2003 = vmatprep.subr.bf16.mxu0 %v19612_v29  ;;  %2601 = vmatprep.subr.bf16.mxu1 %v19615_v30  ;;  %v19690_v29 = vld [vmem:[#allocation14 + $0x94] ss:$8 sps:$4 sm:$0xff]   ;;  %v19688_v30 = vld [vmem:[#allocation14 + $0x90] ss:$8 sps:$4 sm:$0xff]  }
 0x6a3   :  { %2004 = vmatpush2.bf16.msra.mxu0 %v19610_v31  ;;  %2602 = vmatpush2.bf16.msra.mxu1 %v19613_v32  ;;  %v19693_v31 = vld [vmem:[#allocation14 + $0x84] ss:$8 sps:$4 sm:$0xff]   ;;  %v19691_v32 = vld [vmem:[#allocation14 + $0x80] ss:$8 sps:$4 sm:$0xff]  }
 0x6a4   :  { %2005 = vmatprep.subr.bf16.mxu0 %v19618_v33  ;;  %2603 = vmatprep.subr.bf16.mxu1 %v19621_v35  ;;  %v19696_v33 = vld [vmem:[#allocation19 + $0x11c] ss:$20 sps:$4 sm:$0xff]   ;;  %v19694_v35 = vld [vmem:[#allocation19 + $0x118] ss:$20 sps:$4 sm:$0xff]  }
 0x6a7   :  { %2006 = vmatpush2.bf16.msra.mxu0 %v19616_v36  ;;  %2604 = vmatpush2.bf16.msra.mxu1 %v19619_v37  ;;  %v19702_v36 = vld [vmem:[#allocation19 + $0xf4] ss:$20 sps:$4 sm:$0xff]  }
 0x6a8   :  { %2007 = vmatprep.subr.bf16.mxu0 %v19624_v38  ;;  %2605 = vmatprep.subr.bf16.mxu1 %v19627_v41  ;;  %v19750_v37 = vld [vmem:[#allocation16 + $0x164] ss:$8 sps:$4 sm:$0xff]   ;;  %v19748_v41 = vld [vmem:[#allocation16 + $0x160] ss:$8 sps:$4 sm:$0xff]  }
 0x6a9   :  { %v23392_v38 = vld [vmem:[#allocation2 + $0x4] ss:$44 sps:$4 sm:$0xff]  }
 0x6ab   :  { %2008 = vmatpush2.bf16.msra.mxu0 %v19622_v42  ;;  %2606 = vmatpush2.bf16.msra.mxu1 %v19625_v43  ;;  %v19700_v42 = vld [vmem:[#allocation19 + $0xf0] ss:$20 sps:$4 sm:$0xff]   ;;  %v19705_v43 = vld [vmem:[#allocation19 + $0xcc] ss:$20 sps:$4 sm:$0xff]  }
 0x6ac   :  { %2009 = vmatprep.subr.bf16.mxu0 %v19630_v44  ;;  %2607 = vmatprep.subr.bf16.mxu1 %v19633_v45  ;;  %v19753_v44 = vld [vmem:[#allocation16 + $0x154] ss:$8 sps:$4 sm:$0xff]   ;;  %v19751_v45 = vld [vmem:[#allocation16 + $0x150] ss:$8 sps:$4 sm:$0xff]  }
 0x6af   :  { %2010 = vmatpush2.bf16.msra.mxu0 %v19628_v46  ;;  %2608 = vmatpush2.bf16.msra.mxu1 %v19631_v47  ;;  %v19703_v46 = vld [vmem:[#allocation19 + $0xc8] ss:$20 sps:$4 sm:$0xff]   ;;  %v19708_v47 = vld [vmem:[#allocation19 + $0xa4] ss:$20 sps:$4 sm:$0xff]  }
 0x6b0   :  { %2011 = vmatprep.subr.bf16.mxu0 %v19636_v49  ;;  %2609 = vmatprep.subr.bf16.mxu1 %v19639_v50  ;;  %v19756_v49 = vld [vmem:[#allocation16 + $0x144] ss:$8 sps:$4 sm:$0xff]   ;;  %v19754_v50 = vld [vmem:[#allocation16 + $0x140] ss:$8 sps:$4 sm:$0xff]  }
 0x6b3   :  { %2012 = vmatpush2.bf16.msra.mxu0 %v19634_v54  ;;  %2610 = vmatpush2.bf16.msra.mxu1 %v19637_v55  ;;  %v19711_v54 = vld [vmem:[#allocation19 + $0x7c] ss:$20 sps:$4 sm:$0xff]  }
 0x6b4   :  { %2013 = vmatprep.subr.bf16.mxu0 %v19642_v56  ;;  %2611 = vmatprep.subr.bf16.mxu1 %v19645_v57  ;;  %v19759_v55 = vld [vmem:[#allocation16 + $0x134] ss:$8 sps:$4 sm:$0xff]   ;;  %v19757_v56 = vld [vmem:[#allocation16 + $0x130] ss:$8 sps:$4 sm:$0xff]  }
 0x6b5   :  { %v19709_v57 = vld [vmem:[#allocation19 + $0x78] ss:$20 sps:$4 sm:$0xff]  }
 0x6b7   :  { %2014 = vmatpush2.bf16.msra.mxu0 %v19640_v58  ;;  %2612 = vmatpush2.bf16.msra.mxu1 %v19643_v59  ;;  %v19714_v58 = vld [vmem:[#allocation19 + $0x54] ss:$20 sps:$4 sm:$0xff]  }
 0x6b8   :  { %3006 = vmatprep.subr.bf16.mxu1 %v19648_v60  ;;  %2624 = vmatprep.subr.bf16.mxu0 %v19747_v6  ;;  %v19762_v59 = vld [vmem:[#allocation16 + $0x124] ss:$8 sps:$4 sm:$0xff]   ;;  %v19760_v60 = vld [vmem:[#allocation16 + $0x120] ss:$8 sps:$4 sm:$0xff]  }
 0x6b9   :  { %v19718_v6 = vld [vmem:[#allocation19] ss:$20 sps:$4 sm:$0xff]  }
 0x6ba   :  { %2016 = vmatmul.mubr.bf16.vlgmr.msra.gmra.mxu0 %v23354_v39  ;;  %2614 = vmatmul.mubr.bf16.vlgmr.msra.gmra.mxu1 %v23354_v39 }
 0x6bb   :  { %3007 = vmatpush1.bf16.msra.mxu1 %v19646_v61  ;;  %3038 = vmatprep.mubr.bf16.mxu1 %v23356_v40  ;;  %v19661_v40 = vld [vmem:[#allocation14 + $0x20] ss:$8 sps:$4 sm:$0xff]  }
 0x6bc   :  { %3008 = vmatprep.subr.bf16.mxu1 %v19651_v62  ;;  %2625 = vmatpush1.bf16.msra.mxu0 %v19745_v5  ;;  %v19712_v61 = vld [vmem:[#allocation19 + $0x50] ss:$20 sps:$4 sm:$0xff]   ;;  %v19717_v62 = vld [vmem:[#allocation19 + $0x2c] ss:$20 sps:$4 sm:$0xff]  }
 0x6bd   :  { %2626 = vmatprep.subr.bf16.mxu0 %v19750_v37  ;;  %v19766_v5 = vld [vmem:[#allocation16 + $0x100] ss:$8 sps:$4 sm:$0xff]   ;;  %v19792_v37 = vld [vmem:[#allocation16 + $0x184] ss:$8 sps:$4 sm:$0xff]  }
 0x6bf   :  { %3009 = vmatpush1.bf16.msra.mxu1 %v19649_v63  ;;  %v19765_v63 = vld [vmem:[#allocation16 + $0x114] ss:$8 sps:$4 sm:$0xff]  }
 0x6c0   :  { %3010 = vmatprep.subr.bf16.mxu1 %v19654_v1  ;;  %2627 = vmatpush1.bf16.msra.mxu0 %v19748_v41  ;;  %v19763_v1 = vld [vmem:[#allocation16 + $0x110] ss:$8 sps:$4 sm:$0xff]   ;;  %v19739_v41 = vld [vmem:[#allocation19 + $0x168] ss:$20 sps:$4 sm:$0xff]  }
 0x6c1   :  { %2628 = vmatprep.subr.bf16.mxu0 %v19753_v44  ;;  %v19742_v44 = vld [vmem:[#allocation19 + $0x140] ss:$20 sps:$4 sm:$0xff]  }
 0x6c3   :  { %3011 = vmatpush1.bf16.msra.mxu1 %v19652_v2  ;;  %v19715_v2 = vld [vmem:[#allocation19 + $0x28] ss:$20 sps:$4 sm:$0xff]  }
 0x6c4   :  { %3012 = vmatprep.subr.bf16.mxu1 %v19657_v3  ;;  %2629 = vmatpush1.bf16.msra.mxu0 %v19751_v45  ;;  %v19720_v3 = vld [vmem:[#allocation19 + $0x4] ss:$20 sps:$4 sm:$0xff]  }
 0x6c5   :  { %2630 = vmatprep.subr.bf16.mxu0 %v19756_v49  ;;  %v19798_v45 = vld [vmem:[#allocation14 + $0x174] ss:$8 sps:$4 sm:$0xff]   ;;  %v1672_v49 = vpop.f32.mrf.mxu1 }
 0x6c7   :  { %3013 = vmatpush1.bf16.msra.mxu1 %v19655_v4  ;;  %v19768_v4 = vld [vmem:[#allocation16 + $0x104] ss:$8 sps:$4 sm:$0xff]  }
 0x6c8   :  { %3014 = vmatprep.subr.bf16.mxu1 %v19660_v7  ;;  %2631 = vmatpush1.bf16.msra.mxu0 %v19754_v50  ;;  %v19723_v7 = vld [vmem:[#allocation19 + $0x25c] ss:$20 sps:$4 sm:$0xff]  }
 0x6c9   :  { %2632 = vmatprep.subr.bf16.mxu0 %v19759_v55 }
 0x6cb   :  { %3015 = vmatpush1.bf16.msra.mxu1 %v19658_v8  ;;  %v19771_v8 = vld [vmem:[#allocation16 + $0x1f4] ss:$8 sps:$4 sm:$0xff]  }
 0x6cc   :  { %3016 = vmatprep.subr.bf16.mxu1 %v19663_v9  ;;  %2633 = vmatpush1.bf16.msra.mxu0 %v19757_v56  ;;  %v19769_v9 = vld [vmem:[#allocation16 + $0x1f0] ss:$8 sps:$4 sm:$0xff]  }
 0x6cd   :  { %2634 = vmatprep.subr.bf16.mxu0 %v19762_v59 }
 0x6cf   :  { %3017 = vmatpush1.bf16.msra.mxu1 %v19661_v40  ;;  %v19721_v40 = vld [vmem:[#allocation19 + $0x258] ss:$20 sps:$4 sm:$0xff]  }
 0x6d0   :  { %3018 = vmatprep.subr.bf16.mxu1 %v19666_v10  ;;  %2635 = vmatpush1.bf16.msra.mxu0 %v19760_v60  ;;  %v19726_v10 = vld [vmem:[#allocation19 + $0x234] ss:$20 sps:$4 sm:$0xff]  }
 0x6d1   :  { %2636 = vmatprep.subr.bf16.mxu0 %v19765_v63 }
 0x6d3   :  { %3019 = vmatpush1.bf16.msra.mxu1 %v19664_v11  ;;  %v19774_v11 = vld [vmem:[#allocation16 + $0x1e4] ss:$8 sps:$4 sm:$0xff]  }
 0x6d4   :  { %3020 = vmatprep.subr.bf16.mxu1 %v19669_v12  ;;  %2637 = vmatpush1.bf16.msra.mxu0 %v19763_v1  ;;  %v19772_v12 = vld [vmem:[#allocation16 + $0x1e0] ss:$8 sps:$4 sm:$0xff]  }
 0x6d5   :  { %2638 = vmatprep.subr.bf16.mxu0 %v19768_v4 }
 0x6d7   :  { %3021 = vmatpush1.bf16.msra.mxu1 %v19667_v13  ;;  %v19724_v13 = vld [vmem:[#allocation19 + $0x230] ss:$20 sps:$4 sm:$0xff]  }
 0x6d8   :  { %3022 = vmatprep.subr.bf16.mxu1 %v19672_v14  ;;  %2639 = vmatpush1.bf16.msra.mxu0 %v19766_v5  ;;  %v19729_v14 = vld [vmem:[#allocation19 + $0x20c] ss:$20 sps:$4 sm:$0xff]  }
 0x6d9   :  { %2640 = vmatprep.subr.bf16.mxu0 %v19771_v8 }
 0x6db   :  { %3023 = vmatpush2.bf16.msra.mxu1 %v19670_v15  ;;  %v19777_v15 = vld [vmem:[#allocation16 + $0x1d4] ss:$8 sps:$4 sm:$0xff]  }
 0x6dc   :  { %3024 = vmatprep.subr.bf16.mxu1 %v19675_v16  ;;  %2641 = vmatpush2.bf16.msra.mxu0 %v19769_v9  ;;  %v19775_v16 = vld [vmem:[#allocation16 + $0x1d0] ss:$8 sps:$4 sm:$0xff]  }
 0x6dd   :  { %2642 = vmatprep.subr.bf16.mxu0 %v19774_v11 }
 0x6df   :  { %3025 = vmatpush2.bf16.msra.mxu1 %v19673_v17  ;;  %v19727_v17 = vld [vmem:[#allocation19 + $0x208] ss:$20 sps:$4 sm:$0xff]  }
 0x6e0   :  { %3026 = vmatprep.subr.bf16.mxu1 %v19678_v18  ;;  %2643 = vmatpush2.bf16.msra.mxu0 %v19772_v12  ;;  %v19732_v18 = vld [vmem:[#allocation19 + $0x1e4] ss:$20 sps:$4 sm:$0xff]  }
 0x6e1   :  { %2644 = vmatprep.subr.bf16.mxu0 %v19777_v15 }
 0x6e3   :  { %3027 = vmatpush2.bf16.msra.mxu1 %v19676_v19  ;;  %v19780_v19 = vld [vmem:[#allocation16 + $0x1c4] ss:$8 sps:$4 sm:$0xff]  }
 0x6e4   :  { %3028 = vmatprep.subr.bf16.mxu1 %v19681_v20  ;;  %2645 = vmatpush2.bf16.msra.mxu0 %v19775_v16  ;;  %v19778_v20 = vld [vmem:[#allocation16 + $0x1c0] ss:$8 sps:$4 sm:$0xff]  }
 0x6e5   :  { %2646 = vmatprep.subr.bf16.mxu0 %v19780_v19 }
 0x6e7   :  { %3029 = vmatpush2.bf16.msra.mxu1 %v19679_v21  ;;  %v19730_v21 = vld [vmem:[#allocation19 + $0x1e0] ss:$20 sps:$4 sm:$0xff]  }
 0x6e8   :  { %3030 = vmatprep.subr.bf16.mxu1 %v19684_v22  ;;  %v19735_v22 = vld [vmem:[#allocation19 + $0x1bc] ss:$20 sps:$4 sm:$0xff]   ;;  %2647 = vmatpush2.bf16.msra.mxu0 %v19778_v20 }
 0x6eb   :  { %3031 = vmatpush2.bf16.msra.mxu1 %v19682_v24  ;;  %v19783_v24 = vld [vmem:[#allocation16 + $0x1b4] ss:$8 sps:$4 sm:$0xff]  }
 0x6ec   :  { %3032 = vmatprep.subr.bf16.mxu1 %v19687_v27  ;;  %v19781_v27 = vld [vmem:[#allocation16 + $0x1b0] ss:$8 sps:$4 sm:$0xff]   ;;  %2648 = vmatprep.subr.bf16.mxu0 %v19783_v24 }
 0x6ed   :  { %2649 = vmatpush2.bf16.msra.mxu0 %v19781_v27 }
 0x6ef   :  { %3033 = vmatpush2.bf16.msra.mxu1 %v19685_v28  ;;  %v19733_v28 = vld [vmem:[#allocation19 + $0x1b8] ss:$20 sps:$4 sm:$0xff]  }
 0x6f0   :  { %3034 = vmatprep.subr.bf16.mxu1 %v19690_v29  ;;  %v19738_v29 = vld [vmem:[#allocation19 + $0x194] ss:$20 sps:$4 sm:$0xff]  }
 0x6f3   :  { %3035 = vmatpush2.bf16.msra.mxu1 %v19688_v30  ;;  %v19786_v30 = vld [vmem:[#allocation16 + $0x1a4] ss:$8 sps:$4 sm:$0xff]  }
 0x6f4   :  { %3036 = vmatprep.subr.bf16.mxu1 %v19693_v31  ;;  %v19784_v31 = vld [vmem:[#allocation16 + $0x1a0] ss:$8 sps:$4 sm:$0xff]   ;;  %2650 = vmatprep.subr.bf16.mxu0 %v19786_v30 }
 0x6f5   :  { %2651 = vmatpush2.bf16.msra.mxu0 %v19784_v31 }
 0x6f7   :  { %3037 = vmatpush2.bf16.msra.mxu1 %v19691_v32  ;;  %v19736_v32 = vld [vmem:[#allocation19 + $0x190] ss:$20 sps:$4 sm:$0xff]  }
 0x6f8   :  { %4470 = vmatprep.subr.bf16.mxu1 %v19696_v33  ;;  %v19741_v33 = vld [vmem:[#allocation19 + $0x16c] ss:$20 sps:$4 sm:$0xff]  }
 0x6fa   :  { %3039 = vmatmul.mubr.bf16.vlgmr.msra.gmra.mxu1 %v23354_v39  ;;  %v19706_v39 = vld [vmem:[#allocation19 + $0xa0] ss:$20 sps:$4 sm:$0xff]  }
 0x6fb   :  { %4471 = vmatpush1.bf16.msra.mxu1 %v19694_v35  ;;  %4502 = vmatprep.mubr.bf16.mxu1 %v23392_v38  ;;  %v19789_v35 = vld [vmem:[#allocation16 + $0x194] ss:$8 sps:$4 sm:$0xff]  }
 0x6fc   :  { %4472 = vmatprep.subr.bf16.mxu1 %v19702_v36  ;;  %v19787_v36 = vld [vmem:[#allocation16 + $0x190] ss:$8 sps:$4 sm:$0xff]   ;;  %2652 = vmatprep.subr.bf16.mxu0 %v19789_v35 }
 0x6fd   :  { %2653 = vmatpush2.bf16.msra.mxu0 %v19787_v36 }
 0x6fe   :  { %2654 = vmatprep.subr.bf16.mxu0 %v19792_v37 }
 0x6ff   :  { %4473 = vmatpush1.bf16.msra.mxu1 %v19700_v42  ;;  %v19744_v42 = vld [vmem:[#allocation19 + $0x144] ss:$20 sps:$4 sm:$0xff]  }
 0x700   :  { %4474 = vmatprep.subr.bf16.mxu1 %v19705_v43  ;;  %v19790_v43 = vld [vmem:[#allocation16 + $0x180] ss:$8 sps:$4 sm:$0xff]  }
 0x701   :  { %2655 = vmatpush2.bf16.msra.mxu0 %v19790_v43 }
 0x702   :  { %3049 = vmatprep.subr.bf16.mxu0 %v19798_v45 }
 0x703   :  { %4475 = vmatpush1.bf16.msra.mxu1 %v19703_v46  ;;  %v23396_v46 = vld [vmem:[#allocation2] ss:$44 sps:$4 sm:$0xff]  }
 0x704   :  { %4476 = vmatprep.subr.bf16.mxu1 %v19708_v47 }
 0x707   :  { %4477 = vmatpush1.bf16.msra.mxu1 %v19706_v39  ;;  %v1674_v39 = vpop.f32.mrf.mxu1 }
 0x708   :  { %4478 = vmatprep.subr.bf16.mxu1 %v19711_v54 }
 0x709   :  { %v1676_v55 = vpop.f32.mrf.mxu1 }
 0x70b   :  { %4479 = vmatpush1.bf16.msra.mxu1 %v19709_v57  ;;  %v1678_v57 = vpop.f32.mrf.mxu1 }
 0x70c   :  { %4480 = vmatprep.subr.bf16.mxu1 %v19714_v58 }
 0x70f   :  { %4481 = vmatpush1.bf16.msra.mxu1 %v19712_v61 }
 0x710   :  { %4482 = vmatprep.subr.bf16.mxu1 %v19717_v62 }
 0x713   :  { %4483 = vmatpush1.bf16.msra.mxu1 %v19715_v2 }
 0x714   :  { %4484 = vmatprep.subr.bf16.mxu1 %v19720_v3  ;;  %v1381_v3 = vld [vmem:[#allocation13] sm:$0x3] }
 0x715   :  { %v2073_v36 = vrot.slane %v1381_v3, %v23303_v26 }
 0x717   :  { %4485 = vmatpush1.bf16.msra.mxu1 %v19718_v6 }
 0x718   :  { %4486 = vmatprep.subr.bf16.mxu1 %v19723_v7  ;;  %v2077_v7 = vrot.slane %v1381_v3, %v23310_v34  ;;  %v19802_v3 = vld [vmem:[#allocation14 + $0x150] ss:$8 sps:$4 sm:$0xff]  }
 0x71b   :  { %4487 = vmatpush2.bf16.msra.mxu1 %v19721_v40 }
 0x71c   :  { %4488 = vmatprep.subr.bf16.mxu1 %v19726_v10 }
 0x71f   :  { %4489 = vmatpush2.bf16.msra.mxu1 %v19724_v13 }
 0x720   :  { %4490 = vmatprep.subr.bf16.mxu1 %v19729_v14 }
 0x723   :  { %4491 = vmatpush2.bf16.msra.mxu1 %v19727_v17 }
 0x724   :  { %4492 = vmatprep.subr.bf16.mxu1 %v19732_v18 }
 0x727   :  { %4493 = vmatpush2.bf16.msra.mxu1 %v19730_v21 }
 0x728   :  { %4494 = vmatprep.subr.bf16.mxu1 %v19735_v22 }
 0x72b   :  { %4495 = vmatpush2.bf16.msra.mxu1 %v19733_v28 }
 0x72c   :  { %4496 = vmatprep.subr.bf16.mxu1 %v19738_v29 }
 0x72f   :  { %4497 = vmatpush2.bf16.msra.mxu1 %v19736_v32 }
 0x730   :  { %4498 = vmatprep.subr.bf16.mxu1 %v19741_v33 }
 0x733   :  { %4499 = vmatpush2.bf16.msra.mxu1 %v19739_v41 }
 0x734   :  { %4500 = vmatprep.subr.bf16.mxu1 %v19744_v42 }
 0x737   :  { %4501 = vmatpush2.bf16.msra.mxu1 %v19742_v44 }
 0x73a   :  { %4503 = vmatmul.mubr.bf16.vlgmr.msra.gmra.mxu1 %v23396_v46  ;;  %v1715_v47 = vpop.f32.mrf.mxu0  ;;  %v2060_v61 = vpop.f32.mrf.mxu1 }
 0x73b   :  { %4588 = vmatprep.mubr.bf16.mxu1 %v22988_v0  ;;  %v1716_v12 = vadd.f32 %v1715_v47, %v1672_v49 }
 0x73c   :  { %v1717_v50 = vpop.f32.mrf.mxu0  ;;  %v2062_v1 = vpop.f32.mrf.mxu1 }
 0x73d   :  { %v1718_v59 = vadd.f32 %v1717_v50, %v1674_v39  ;;  %v1724_v21 = vrot.slane %v1716_v12, 6  ;;  %v19817_v12 = vld [vmem:[#allocation14 + $0x100] ss:$8 sps:$4 sm:$0xff]  }
 0x73e   :  { %v1719_v54 = vpop.f32.mrf.mxu0  ;;  %v2064_v40 = vpop.f32.mrf.mxu1 }
 0x73f   :  { %v1725_v62 = vrot.slane %v1718_v59, 6  ;;  %v1720_v9 = vadd.f32 %v1719_v54, %v1676_v55 }
 0x740   :  { %v1721_v56 = vpop.f32.mrf.mxu0  ;;  %v2066_v18 = vpop.f32.mrf.mxu1 }
 0x741   :  { %v1722_v58 = vadd.f32 %v1721_v56, %v1678_v57  ;;  %v1726_v17 = vrot.slane %v1720_v9, 6  ;;  %v19811_v9 = vld [vmem:[#allocation14 + $0x120] ss:$8 sps:$4 sm:$0xff]  }
 0x743   :  { %v1727_v60 = vrot.slane %v1722_v58, 6  ;;  %v1731_v27 = vsel %vm1728_vm2, %v1726_v17, %v1724_v21  ;;  %v1729_v32 = vsel %vm1728_vm2, %v1724_v21, %v1726_v17  ;;  %v19828_v17 = vld [vmem:[#allocation14 + $0x1d4] ss:$8 sps:$4 sm:$0xff]  }
 0x744   :  { %v1739_v29 = vsel %vm1733_vm3, %v1731_v27, 0.0  ;;  %v1741_v33 = vsel %vm1734_vm4, %v1729_v32, 0.0  ;;  %v19834_v21 = vld [vmem:[#allocation14 + $0x1b4] ss:$8 sps:$4 sm:$0xff]   ;;  %v19835_v27 = vld [vmem:[#allocation14 + $0x1a0] ss:$8 sps:$4 sm:$0xff]  }
 0x745   :  { %v1732_v63 = vsel %vm1728_vm2, %v1727_v60, %v1725_v62  ;;  %v1730_v8 = vsel %vm1728_vm2, %v1725_v62, %v1727_v60  ;;  %v19796_v60 = vld [vmem:[#allocation14 + $0x170] ss:$8 sps:$4 sm:$0xff]  }
 0x746   :  { %v1740_v4 = vsel %vm1733_vm3, %v1732_v63, 0.0  ;;  %v1742_v13 = vsel %vm1734_vm4, %v1730_v8, 0.0  ;;  %v19801_v63 = vld [vmem:[#allocation14 + $0x164] ss:$8 sps:$4 sm:$0xff]   ;;  %v19846_v32 = vld [vmem:[#allocation19 + $0x39c] ss:$20 sps:$4 sm:$0xff]  }
 0x747   :  { %v19813_v8 = vld [vmem:[#allocation14 + $0x124] ss:$8 sps:$4 sm:$0xff]  }
 0x77a   :  { %v2017_v2 = vpop.f32.mrf.mxu0 }
 0x77b   :  { %v2018_v31 = vadd.f32 %v2017_v2, %v1739_v29  ;;  %v19804_v2 = vld [vmem:[#allocation14 + $0x154] ss:$8 sps:$4 sm:$0xff]   ;;  %v19838_v29 = vld [vmem:[#allocation14 + $0x190] ss:$8 sps:$4 sm:$0xff]  }
 0x77c   :  { %v2019_v5 = vpop.f32.mrf.mxu0 }
 0x77d   :  { %v2020_v6 = vadd.f32 %v2019_v5, %v1740_v4  ;;  %v2061_v35 = vadd.f32 %v2060_v61, %v2018_v31  ;;  %v23421_v61 = vld [vmem:[#allocation2 + $0x8] ss:$44 sps:$4 sm:$0xff]  }
 0x77e   :  { %v2021_v10 = vpop.f32.mrf.mxu0  ;;  %v19807_v4 = vld [vmem:[#allocation14 + $0x144] ss:$8 sps:$4 sm:$0xff]   ;;  %v19805_v5 = vld [vmem:[#allocation14 + $0x140] ss:$8 sps:$4 sm:$0xff]  }
 0x77f   :  { %v2063_v11 = vadd.f32 %v2062_v1, %v2020_v6  ;;  %v2022_v37 = vadd.f32 %v2021_v10, %v1741_v33  ;;  %v2080_v41 = vadd.f32 %v2073_v36, %v2061_v35  ;;  %v19799_v1 = vld [vmem:[#allocation14 + $0x160] ss:$8 sps:$4 sm:$0xff]   ;;  %v19810_v6 = vld [vmem:[#allocation14 + $0x134] ss:$8 sps:$4 sm:$0xff]   ;;  %v19814_v10 = vld [vmem:[#allocation14 + $0x110] ss:$8 sps:$4 sm:$0xff]  }
 0x780   :  { %v2023_v14 = vpop.f32.mrf.mxu0  ;;  %v19841_v31 = vld [vmem:[#allocation14 + $0x180] ss:$8 sps:$4 sm:$0xff]   ;;  %v19844_v33 = vld [vmem:[#allocation19 + $0x398] ss:$20 sps:$4 sm:$0xff]  }
 0x781   :  { %v2081_v15 = vadd.f32 %v2077_v7, %v2063_v11  ;;  %v2024_v16 = vadd.f32 %v2023_v14, %v1742_v13  ;;  %v2065_v42 = vadd.f32 %v2064_v40, %v2022_v37  ;;  %v19816_v40 = vld [vmem:[#allocation14 + $0x114] ss:$8 sps:$4 sm:$0xff]   ;;  %v19819_v11 = vld [vmem:[#allocation14 + $0x104] ss:$8 sps:$4 sm:$0xff]   ;;  %v19820_v14 = vld [vmem:[#allocation14 + $0x1f0] ss:$8 sps:$4 sm:$0xff]  }
 0x782   :  { %v19822_v13 = vld [vmem:[#allocation14 + $0x1f4] ss:$8 sps:$4 sm:$0xff]   ;;  %v19852_v37 = vld [vmem:[#allocation19 + $0x34c] ss:$20 sps:$4 sm:$0xff]  }
 0x783   :  { %v2084_v19 = vsub.f32 0.0, %v2081_v15  ;;  %v2067_v20 = vadd.f32 %v2066_v18, %v2024_v16  ;;  %v2082_v45 = vadd.f32 %v2073_v36, %v2065_v42  ;;  %v19825_v15 = vld [vmem:[#allocation14 + $0x1e4] ss:$8 sps:$4 sm:$0xff]   ;;  %v19823_v16 = vld [vmem:[#allocation14 + $0x1e0] ss:$8 sps:$4 sm:$0xff]  }
 0x784   :  { %v19826_v18 = vld [vmem:[#allocation14 + $0x1d0] ss:$8 sps:$4 sm:$0xff]  }
 0x785   :  { %v2086_v22 = vmul.f32 1.442695, %v2084_v19  ;;  %v2083_v24 = vadd.f32 %v2077_v7, %v2067_v20  ;;  %v19808_v7 = vld [vmem:[#allocation14 + $0x130] ss:$8 sps:$4 sm:$0xff]   ;;  %v19831_v19 = vld [vmem:[#allocation14 + $0x1c4] ss:$8 sps:$4 sm:$0xff]  }
 0x786   :  { %v19829_v20 = vld [vmem:[#allocation14 + $0x1c0] ss:$8 sps:$4 sm:$0xff]  }
 0x787   :  { %22324 = vpow2.f32 %v2086_v22  ;;  %v2085_v28 = vsub.f32 0.0, %v2083_v24  ;;  %v19832_v22 = vld [vmem:[#allocation14 + $0x1b0] ss:$8 sps:$4 sm:$0xff]   ;;  %v19837_v24 = vld [vmem:[#allocation14 + $0x1a4] ss:$8 sps:$4 sm:$0xff]  }
 0x788   :  { %v19849_v35 = vld [vmem:[#allocation19 + $0x374] ss:$20 sps:$4 sm:$0xff]   ;;  %v19847_v36 = vld [vmem:[#allocation19 + $0x370] ss:$20 sps:$4 sm:$0xff]  }
 0x789   :  { %v2088_v30 = vmul.f32 1.442695, %v2085_v28  ;;  %v19840_v28 = vld [vmem:[#allocation14 + $0x194] ss:$8 sps:$4 sm:$0xff]  }
 0x78a   :  { %v19855_v42 = vld [vmem:[#allocation19 + $0x324] ss:$20 sps:$4 sm:$0xff]  }
 0x78b   :  { %22326 = vpow2.f32 %v2088_v30  ;;  %v19843_v30 = vld [vmem:[#allocation14 + $0x184] ss:$8 sps:$4 sm:$0xff]  }
 0x78c   :  { %22328 = vtanh.f32 %v2080_v41  ;;  %v19850_v41 = vld [vmem:[#allocation19 + $0x348] ss:$20 sps:$4 sm:$0xff]  }
 0x794   :  { %v22325_v43 = vpop.eup %22324 }
 0x795   :  { %v2090_v44 = vadd.f32 1.0, %v22325_v43  ;;  %v19853_v43 = vld [vmem:[#allocation19 + $0x320] ss:$20 sps:$4 sm:$0xff]  }
 0x797   :  { %22330 = vrcp.f32 %v2090_v44  ;;  %v19858_v44 = vld [vmem:[#allocation19 + $0x2fc] ss:$20 sps:$4 sm:$0xff]  }
 0x798   :  { %v22327_v47 = vpop.eup %22326  ;;  %22332 = vtanh.f32 %v2082_v45  ;;  %v19856_v45 = vld [vmem:[#allocation19 + $0x2f8] ss:$20 sps:$4 sm:$0xff]  }
 0x799   :  { %v2091_v49 = vadd.f32 1.0, %v22327_v47  ;;  %v22329_v50 = vpop.eup %22328  ;;  %v19861_v47 = vld [vmem:[#allocation19 + $0x2d4] ss:$20 sps:$4 sm:$0xff]  }
 0x79b   :  { %22334 = vrcp.f32 %v2091_v49  ;;  %v19859_v49 = vld [vmem:[#allocation19 + $0x2d0] ss:$20 sps:$4 sm:$0xff]  }
 0x7a4   :  { %v22331_v39 = vpop.eup %22330 }
 0x7a5   :  { %v2096_v54 = vmul.f32 %v22331_v39, %v22329_v50  ;;  %v22333_v55 = vpop.eup %22332  ;;  %v19864_v50 = vld [vmem:[#allocation19 + $0x2ac] ss:$20 sps:$4 sm:$0xff]   ;;  %v19862_v39 = vld [vmem:[#allocation19 + $0x2a8] ss:$20 sps:$4 sm:$0xff]  }
 0x7a7   :  { %v19043_v56 = vpack.c.bf16 %v2096_v54, %v2096_v54  ;;  %v19867_v54 = vld [vmem:[#allocation19 + $0x284] ss:$20 sps:$4 sm:$0xff]  }
 0x7a8   :  { %v22335_v57 = vpop.eup %22334 }
 0x7a9   :  { %2106 = vst [vmem:[#allocation2 + $0xc] sm:$0xf] %v19043_v56  ;;  %v2097_v58 = vmul.f32 %v22335_v57, %v22333_v55  ;;  %v19865_v55 = vld [vmem:[#allocation19 + $0x280] ss:$20 sps:$4 sm:$0xff]   ;;  %v19870_v56 = vld [vmem:[#allocation19 + $0x4dc] ss:$20 sps:$4 sm:$0xff]  }
 0x7aa   :  { %v19868_v57 = vld [vmem:[#allocation19 + $0x4d8] ss:$20 sps:$4 sm:$0xff]  }
 0x7ab   :  { %v19044_v59 = vpack.c.bf16 %v2097_v58, %v2097_v58  ;;  %v19873_v58 = vld [vmem:[#allocation19 + $0x4b4] ss:$20 sps:$4 sm:$0xff]  }
 0x7ad   :  { %2107 = vst [vmem:[#allocation2 + $0x38] sm:$0xf] %v19044_v59  ;;  %v19871_v59 = vld [vmem:[#allocation19 + $0x4b0] ss:$20 sps:$4 sm:$0xff]  }
 0x7b4   :  { %v23423_v62 = vld [vmem:[#allocation2 + $0xc] ss:$44 sps:$4 sm:$0xff]  }
 0x7b5   :  { %2656 = vmatprep.mubr.bf16.mxu0 %v23423_v62 }
 0x7b6   :  { %2657 = vmatmul.mubr.bf16.vlgmr.msra.gmra.mxu0 %v23421_v61 }
 0x7b7   :  { %3050 = vmatpush1.bf16.msra.mxu0 %v19796_v60  ;;  %3081 = vmatprep.mubr.bf16.mxu0 %v23423_v62  ;;  %v19876_v60 = vld [vmem:[#allocation19 + $0x48c] ss:$20 sps:$4 sm:$0xff]  }
 0x7b8   :  { %3051 = vmatprep.subr.bf16.mxu0 %v19801_v63  ;;  %v19874_v63 = vld [vmem:[#allocation19 + $0x488] ss:$20 sps:$4 sm:$0xff]  }
 0x7bb   :  { %3052 = vmatpush1.bf16.msra.mxu0 %v19799_v1  ;;  %v19879_v1 = vld [vmem:[#allocation19 + $0x464] ss:$20 sps:$4 sm:$0xff]  }
 0x7bc   :  { %3053 = vmatprep.subr.bf16.mxu0 %v19804_v2  ;;  %v19877_v2 = vld [vmem:[#allocation19 + $0x460] ss:$20 sps:$4 sm:$0xff]  }
 0x7bf   :  { %3054 = vmatpush1.bf16.msra.mxu0 %v19802_v3  ;;  %v19882_v3 = vld [vmem:[#allocation19 + $0x43c] ss:$20 sps:$4 sm:$0xff]  }
 0x7c0   :  { %3055 = vmatprep.subr.bf16.mxu0 %v19807_v4  ;;  %v19880_v4 = vld [vmem:[#allocation19 + $0x438] ss:$20 sps:$4 sm:$0xff]  }
 0x7c3   :  { %3056 = vmatpush1.bf16.msra.mxu0 %v19805_v5  ;;  %v19885_v5 = vld [vmem:[#allocation19 + $0x414] ss:$20 sps:$4 sm:$0xff]  }
 0x7c4   :  { %3057 = vmatprep.subr.bf16.mxu0 %v19810_v6  ;;  %v19883_v6 = vld [vmem:[#allocation19 + $0x410] ss:$20 sps:$4 sm:$0xff]  }
 0x7c7   :  { %3058 = vmatpush1.bf16.msra.mxu0 %v19808_v7  ;;  %v19888_v7 = vld [vmem:[#allocation19 + $0x3ec] ss:$20 sps:$4 sm:$0xff]  }
 0x7c8   :  { %3059 = vmatprep.subr.bf16.mxu0 %v19813_v8  ;;  %v19886_v8 = vld [vmem:[#allocation19 + $0x3e8] ss:$20 sps:$4 sm:$0xff]  }
 0x7cb   :  { %3060 = vmatpush1.bf16.msra.mxu0 %v19811_v9  ;;  %v19891_v9 = vld [vmem:[#allocation19 + $0x3c4] ss:$20 sps:$4 sm:$0xff]  }
 0x7cc   :  { %3061 = vmatprep.subr.bf16.mxu0 %v19816_v40  ;;  %v19889_v40 = vld [vmem:[#allocation19 + $0x3c0] ss:$20 sps:$4 sm:$0xff]  }
 0x7cf   :  { %3062 = vmatpush1.bf16.msra.mxu0 %v19814_v10  ;;  %v19894_v10 = vld [vmem:[#allocation19 + $0x124] ss:$20 sps:$4 sm:$0xff]  }
 0x7d0   :  { %3063 = vmatprep.subr.bf16.mxu0 %v19819_v11  ;;  %v19892_v11 = vld [vmem:[#allocation19 + $0x120] ss:$20 sps:$4 sm:$0xff]  }
 0x7d3   :  { %3064 = vmatpush1.bf16.msra.mxu0 %v19817_v12  ;;  %v19897_v12 = vld [vmem:[#allocation19 + $0xfc] ss:$20 sps:$4 sm:$0xff]  }
 0x7d4   :  { %3065 = vmatprep.subr.bf16.mxu0 %v19822_v13  ;;  %v19895_v13 = vld [vmem:[#allocation19 + $0xf8] ss:$20 sps:$4 sm:$0xff]  }
 0x7d7   :  { %3066 = vmatpush2.bf16.msra.mxu0 %v19820_v14  ;;  %v19900_v14 = vld [vmem:[#allocation19 + $0xd4] ss:$20 sps:$4 sm:$0xff]  }
 0x7d8   :  { %3067 = vmatprep.subr.bf16.mxu0 %v19825_v15  ;;  %v19898_v15 = vld [vmem:[#allocation19 + $0xd0] ss:$20 sps:$4 sm:$0xff]  }
 0x7db   :  { %3068 = vmatpush2.bf16.msra.mxu0 %v19823_v16  ;;  %v19903_v16 = vld [vmem:[#allocation19 + $0xac] ss:$20 sps:$4 sm:$0xff]  }
 0x7dc   :  { %3069 = vmatprep.subr.bf16.mxu0 %v19828_v17  ;;  %v19901_v17 = vld [vmem:[#allocation19 + $0xa8] ss:$20 sps:$4 sm:$0xff]  }
 0x7df   :  { %3070 = vmatpush2.bf16.msra.mxu0 %v19826_v18  ;;  %v19906_v18 = vld [vmem:[#allocation19 + $0x84] ss:$20 sps:$4 sm:$0xff]  }
 0x7e0   :  { %3071 = vmatprep.subr.bf16.mxu0 %v19831_v19  ;;  %v19904_v19 = vld [vmem:[#allocation19 + $0x80] ss:$20 sps:$4 sm:$0xff]  }
 0x7e3   :  { %3072 = vmatpush2.bf16.msra.mxu0 %v19829_v20  ;;  %v19909_v20 = vld [vmem:[#allocation19 + $0x5c] ss:$20 sps:$4 sm:$0xff]  }
 0x7e4   :  { %3073 = vmatprep.subr.bf16.mxu0 %v19834_v21  ;;  %v19907_v21 = vld [vmem:[#allocation19 + $0x58] ss:$20 sps:$4 sm:$0xff]  }
 0x7e7   :  { %3074 = vmatpush2.bf16.msra.mxu0 %v19832_v22  ;;  %v19912_v22 = vld [vmem:[#allocation19 + $0x34] ss:$20 sps:$4 sm:$0xff]  }
 0x7e8   :  { %3075 = vmatprep.subr.bf16.mxu0 %v19837_v24  ;;  %v19915_v24 = vld [vmem:[#allocation19 + $0xc] ss:$20 sps:$4 sm:$0xff]  }
 0x7eb   :  { %3076 = vmatpush2.bf16.msra.mxu0 %v19835_v27  ;;  %v19942_v27 = vld [vmem:[#allocation19 + $0x61c] ss:$20 sps:$4 sm:$0xff]  }
 0x7ec   :  { %3077 = vmatprep.subr.bf16.mxu0 %v19840_v28  ;;  %v19940_v28 = vld [vmem:[#allocation19 + $0x618] ss:$20 sps:$4 sm:$0xff]   ;;  %4556 = vmatprep.subr.bf16.mxu1 %v19942_v27 }
 0x7ed   :  { %4557 = vmatpush1.bf16.msra.mxu1 %v19940_v28 }
 0x7ef   :  { %3078 = vmatpush2.bf16.msra.mxu0 %v19838_v29  ;;  %v19913_v29 = vld [vmem:[#allocation19 + $0x8] ss:$20 sps:$4 sm:$0xff]  }
 0x7f0   :  { %3079 = vmatprep.subr.bf16.mxu0 %v19843_v30  ;;  %v19918_v30 = vld [vmem:[#allocation19 + $0x264] ss:$20 sps:$4 sm:$0xff]  }
 0x7f3   :  { %3080 = vmatpush2.bf16.msra.mxu0 %v19841_v31  ;;  %v19948_v31 = vld [vmem:[#allocation19 + $0x5f4] ss:$20 sps:$4 sm:$0xff]  }
 0x7f4   :  { %4513 = vmatprep.subr.bf16.mxu0 %v19846_v32  ;;  %v19946_v32 = vld [vmem:[#allocation19 + $0x5f0] ss:$20 sps:$4 sm:$0xff]   ;;  %4558 = vmatprep.subr.bf16.mxu1 %v19948_v31 }
 0x7f5   :  { %4559 = vmatpush1.bf16.msra.mxu1 %v19946_v32 }
 0x7f6   :  { %3082 = vmatmul.mubr.bf16.vlgmr.msra.gmra.mxu0 %v23421_v61 }
 0x7f7   :  { %4514 = vmatpush1.bf16.msra.mxu0 %v19844_v33  ;;  %4545 = vmatprep.mubr.bf16.mxu0 %v23423_v62  ;;  %v19916_v33 = vld [vmem:[#allocation19 + $0x260] ss:$20 sps:$4 sm:$0xff]  }
 0x7f8   :  { %4515 = vmatprep.subr.bf16.mxu0 %v19849_v35  ;;  %v19921_v35 = vld [vmem:[#allocation19 + $0x23c] ss:$20 sps:$4 sm:$0xff]  }
 0x7fb   :  { %4516 = vmatpush1.bf16.msra.mxu0 %v19847_v36  ;;  %v19954_v36 = vld [vmem:[#allocation19 + $0x5cc] ss:$20 sps:$4 sm:$0xff]  }
 0x7fc   :  { %4517 = vmatprep.subr.bf16.mxu0 %v19852_v37  ;;  %v19952_v37 = vld [vmem:[#allocation19 + $0x5c8] ss:$20 sps:$4 sm:$0xff]   ;;  %4560 = vmatprep.subr.bf16.mxu1 %v19954_v36 }
 0x7fd   :  { %4561 = vmatpush1.bf16.msra.mxu1 %v19952_v37 }
 0x7ff   :  { %4518 = vmatpush1.bf16.msra.mxu0 %v19850_v41  ;;  %v19919_v41 = vld [vmem:[#allocation19 + $0x238] ss:$20 sps:$4 sm:$0xff]  }
 0x800   :  { %4519 = vmatprep.subr.bf16.mxu0 %v19855_v42  ;;  %v19924_v42 = vld [vmem:[#allocation19 + $0x214] ss:$20 sps:$4 sm:$0xff]  }
 0x803   :  { %4520 = vmatpush1.bf16.msra.mxu0 %v19853_v43  ;;  %v19960_v43 = vld [vmem:[#allocation19 + $0x5a4] ss:$20 sps:$4 sm:$0xff]  }
 0x804   :  { %4521 = vmatprep.subr.bf16.mxu0 %v19858_v44  ;;  %v19958_v44 = vld [vmem:[#allocation19 + $0x5a0] ss:$20 sps:$4 sm:$0xff]   ;;  %4562 = vmatprep.subr.bf16.mxu1 %v19960_v43 }
 0x805   :  { %4563 = vmatpush1.bf16.msra.mxu1 %v19958_v44 }
 0x807   :  { %4522 = vmatpush1.bf16.msra.mxu0 %v19856_v45  ;;  %v19922_v45 = vld [vmem:[#allocation19 + $0x210] ss:$20 sps:$4 sm:$0xff]  }
 0x808   :  { %4523 = vmatprep.subr.bf16.mxu0 %v19861_v47  ;;  %v19927_v47 = vld [vmem:[#allocation19 + $0x1ec] ss:$20 sps:$4 sm:$0xff]  }
 0x80b   :  { %4524 = vmatpush1.bf16.msra.mxu0 %v19859_v49  ;;  %v19966_v49 = vld [vmem:[#allocation19 + $0x57c] ss:$20 sps:$4 sm:$0xff]  }
 0x80c   :  { %4525 = vmatprep.subr.bf16.mxu0 %v19864_v50  ;;  %v19964_v50 = vld [vmem:[#allocation19 + $0x578] ss:$20 sps:$4 sm:$0xff]   ;;  %4564 = vmatprep.subr.bf16.mxu1 %v19966_v49  ;;  %v2240_v49 = vld [vmem:[#allocation17] sm:$0x3] }
 0x80d   :  { %4565 = vmatpush1.bf16.msra.mxu1 %v19964_v50 }
 0x80f   :  { %4526 = vmatpush1.bf16.msra.mxu0 %v19862_v39  ;;  %v19925_v39 = vld [vmem:[#allocation19 + $0x1e8] ss:$20 sps:$4 sm:$0xff]  }
 0x810   :  { %4527 = vmatprep.subr.bf16.mxu0 %v19867_v54  ;;  %v19930_v54 = vld [vmem:[#allocation19 + $0x1c4] ss:$20 sps:$4 sm:$0xff]  }
 0x813   :  { %4528 = vmatpush1.bf16.msra.mxu0 %v19865_v55  ;;  %v19972_v55 = vld [vmem:[#allocation19 + $0x554] ss:$20 sps:$4 sm:$0xff]  }
 0x814   :  { %4529 = vmatprep.subr.bf16.mxu0 %v19870_v56  ;;  %v19970_v56 = vld [vmem:[#allocation19 + $0x550] ss:$20 sps:$4 sm:$0xff]   ;;  %4566 = vmatprep.subr.bf16.mxu1 %v19972_v55 }
 0x815   :  { %4567 = vmatpush1.bf16.msra.mxu1 %v19970_v56 }
 0x817   :  { %4530 = vmatpush2.bf16.msra.mxu0 %v19868_v57  ;;  %v19928_v57 = vld [vmem:[#allocation19 + $0x1c0] ss:$20 sps:$4 sm:$0xff]  }
 0x818   :  { %4531 = vmatprep.subr.bf16.mxu0 %v19873_v58  ;;  %v19933_v58 = vld [vmem:[#allocation19 + $0x19c] ss:$20 sps:$4 sm:$0xff]  }
 0x81b   :  { %4532 = vmatpush2.bf16.msra.mxu0 %v19871_v59  ;;  %v19978_v59 = vld [vmem:[#allocation19 + $0x52c] ss:$20 sps:$4 sm:$0xff]  }
 0x81c   :  { %4533 = vmatprep.subr.bf16.mxu0 %v19876_v60  ;;  %v19976_v60 = vld [vmem:[#allocation19 + $0x528] ss:$20 sps:$4 sm:$0xff]   ;;  %4568 = vmatprep.subr.bf16.mxu1 %v19978_v59 }
 0x81d   :  { %4569 = vmatpush1.bf16.msra.mxu1 %v19976_v60 }
 0x81f   :  { %4534 = vmatpush2.bf16.msra.mxu0 %v19874_v63  ;;  %v19931_v63 = vld [vmem:[#allocation19 + $0x198] ss:$20 sps:$4 sm:$0xff]  }
 0x820   :  { %4535 = vmatprep.subr.bf16.mxu0 %v19879_v1  ;;  %v19984_v1 = vld [vmem:[#allocation19 + $0x504] ss:$20 sps:$4 sm:$0xff]  }
 0x821   :  { %4570 = vmatprep.subr.bf16.mxu1 %v19984_v1 }
 0x823   :  { %4536 = vmatpush2.bf16.msra.mxu0 %v19877_v2  ;;  %v19936_v2 = vld [vmem:[#allocation19 + $0x174] ss:$20 sps:$4 sm:$0xff]  }
 0x824   :  { %4537 = vmatprep.subr.bf16.mxu0 %v19882_v3  ;;  %v19982_v3 = vld [vmem:[#allocation19 + $0x500] ss:$20 sps:$4 sm:$0xff]  }
 0x825   :  { %4571 = vmatpush1.bf16.msra.mxu1 %v19982_v3 }
 0x827   :  { %4538 = vmatpush2.bf16.msra.mxu0 %v19880_v4  ;;  %v19990_v4 = vld [vmem:[#allocation19 + $0x3a4] ss:$20 sps:$4 sm:$0xff]  }
 0x828   :  { %4539 = vmatprep.subr.bf16.mxu0 %v19885_v5  ;;  %v19934_v5 = vld [vmem:[#allocation19 + $0x170] ss:$20 sps:$4 sm:$0xff]   ;;  %4642 = vmatprep.subr.bf16.mxu1 %v19990_v4 }
 0x82b   :  { %4540 = vmatpush2.bf16.msra.mxu0 %v19883_v6  ;;  %v19939_v6 = vld [vmem:[#allocation19 + $0x14c] ss:$20 sps:$4 sm:$0xff]  }
 0x82c   :  { %4541 = vmatprep.subr.bf16.mxu0 %v19888_v7  ;;  %v19937_v7 = vld [vmem:[#allocation19 + $0x148] ss:$20 sps:$4 sm:$0xff]  }
 0x82f   :  { %4542 = vmatpush2.bf16.msra.mxu0 %v19886_v8  ;;  %v19945_v8 = vld [vmem:[#allocation19 + $0x624] ss:$20 sps:$4 sm:$0xff]  }
 0x830   :  { %4543 = vmatprep.subr.bf16.mxu0 %v19891_v9  ;;  %v19943_v9 = vld [vmem:[#allocation19 + $0x620] ss:$20 sps:$4 sm:$0xff]  }
 0x833   :  { %4544 = vmatpush2.bf16.msra.mxu0 %v19889_v40  ;;  %v19951_v40 = vld [vmem:[#allocation19 + $0x5fc] ss:$20 sps:$4 sm:$0xff]  }
 0x834   :  { %4599 = vmatprep.subr.bf16.mxu0 %v19894_v10  ;;  %v19949_v10 = vld [vmem:[#allocation19 + $0x5f8] ss:$20 sps:$4 sm:$0xff]  }
 0x836   :  { %4546 = vmatmul.mubr.bf16.vlgmr.msra.gmra.mxu0 %v23421_v61 }
 0x837   :  { %4600 = vmatpush1.bf16.msra.mxu0 %v19892_v11  ;;  %4631 = vmatprep.mubr.bf16.mxu0 %v23392_v38  ;;  %v19910_v38 = vld [vmem:[#allocation19 + $0x30] ss:$20 sps:$4 sm:$0xff]   ;;  %v19957_v11 = vld [vmem:[#allocation19 + $0x5d4] ss:$20 sps:$4 sm:$0xff]  }
 0x838   :  { %4601 = vmatprep.subr.bf16.mxu0 %v19897_v12  ;;  %v19955_v12 = vld [vmem:[#allocation19 + $0x5d0] ss:$20 sps:$4 sm:$0xff]  }
 0x83b   :  { %4602 = vmatpush1.bf16.msra.mxu0 %v19895_v13  ;;  %v19963_v13 = vld [vmem:[#allocation19 + $0x5ac] ss:$20 sps:$4 sm:$0xff]  }
 0x83c   :  { %4603 = vmatprep.subr.bf16.mxu0 %v19900_v14  ;;  %v19961_v14 = vld [vmem:[#allocation19 + $0x5a8] ss:$20 sps:$4 sm:$0xff]  }
 0x83f   :  { %4604 = vmatpush1.bf16.msra.mxu0 %v19898_v15  ;;  %v19969_v15 = vld [vmem:[#allocation19 + $0x584] ss:$20 sps:$4 sm:$0xff]  }
 0x840   :  { %4605 = vmatprep.subr.bf16.mxu0 %v19903_v16  ;;  %v19967_v16 = vld [vmem:[#allocation19 + $0x580] ss:$20 sps:$4 sm:$0xff]  }
 0x843   :  { %4606 = vmatpush1.bf16.msra.mxu0 %v19901_v17  ;;  %v19975_v17 = vld [vmem:[#allocation19 + $0x55c] ss:$20 sps:$4 sm:$0xff]  }
 0x844   :  { %4607 = vmatprep.subr.bf16.mxu0 %v19906_v18  ;;  %v19981_v18 = vld [vmem:[#allocation19 + $0x534] ss:$20 sps:$4 sm:$0xff]  }
 0x847   :  { %4608 = vmatpush1.bf16.msra.mxu0 %v19904_v19  ;;  %v19979_v19 = vld [vmem:[#allocation19 + $0x530] ss:$20 sps:$4 sm:$0xff]  }
 0x848   :  { %4609 = vmatprep.subr.bf16.mxu0 %v19909_v20  ;;  %v19987_v20 = vld [vmem:[#allocation19 + $0x50c] ss:$20 sps:$4 sm:$0xff]  }
 0x84b   :  { %4610 = vmatpush1.bf16.msra.mxu0 %v19907_v21  ;;  %v19985_v21 = vld [vmem:[#allocation19 + $0x508] ss:$20 sps:$4 sm:$0xff]  }
 0x84c   :  { %4611 = vmatprep.subr.bf16.mxu0 %v19912_v22  ;;  %v19991_v22 = vld [vmem:[#allocation19 + $0x4e8] ss:$20 sps:$4 sm:$0xff]  }
 0x84f   :  { %4612 = vmatpush1.bf16.msra.mxu0 %v19910_v38 }
 0x850   :  { %4613 = vmatprep.subr.bf16.mxu0 %v19915_v24  ;;  %v2615_v24 = vpop.f32.mrf.mxu1 }
 0x852   :  { %v2617_v28 = vpop.f32.mrf.mxu1 }
 0x853   :  { %4614 = vmatpush1.bf16.msra.mxu0 %v19913_v29 }
 0x854   :  { %4615 = vmatprep.subr.bf16.mxu0 %v19918_v30  ;;  %v2619_v30 = vpop.f32.mrf.mxu1 }
 0x856   :  { %v2621_v32 = vpop.f32.mrf.mxu1 }
 0x857   :  { %4616 = vmatpush2.bf16.msra.mxu0 %v19916_v33 }
 0x858   :  { %4617 = vmatprep.subr.bf16.mxu0 %v19921_v35  ;;  %v3040_v37 = vpop.f32.mrf.mxu1 }
 0x85a   :  { %v3042_v43 = vpop.f32.mrf.mxu1 }
 0x85b   :  { %4618 = vmatpush2.bf16.msra.mxu0 %v19919_v41 }
 0x85c   :  { %4619 = vmatprep.subr.bf16.mxu0 %v19924_v42 }
 0x85f   :  { %4620 = vmatpush2.bf16.msra.mxu0 %v19922_v45 }
 0x860   :  { %4621 = vmatprep.subr.bf16.mxu0 %v19927_v47  ;;  %v3044_v47 = vpop.f32.mrf.mxu1 }
 0x862   :  { %v3046_v59 = vpop.f32.mrf.mxu1 }
 0x863   :  { %4622 = vmatpush2.bf16.msra.mxu0 %v19925_v39 }
 0x864   :  { %4623 = vmatprep.subr.bf16.mxu0 %v19930_v54  ;;  %v3100_v54 = vrot.slane %v2240_v49, %v23310_v34 }
 0x867   :  { %4624 = vmatpush2.bf16.msra.mxu0 %v19928_v57 }
 0x868   :  { %4625 = vmatprep.subr.bf16.mxu0 %v19933_v58 }
 0x86b   :  { %4626 = vmatpush2.bf16.msra.mxu0 %v19931_v63 }
 0x86c   :  { %4627 = vmatprep.subr.bf16.mxu0 %v19936_v2 }
 0x86f   :  { %4628 = vmatpush2.bf16.msra.mxu0 %v19934_v5 }
 0x870   :  { %4629 = vmatprep.subr.bf16.mxu0 %v19939_v6 }
 0x873   :  { %4630 = vmatpush2.bf16.msra.mxu0 %v19937_v7 }
 0x874   :  { %4685 = vmatprep.subr.bf16.mxu0 %v19945_v8 }
 0x876   :  { %4632 = vmatmul.mubr.bf16.vlgmr.msra.gmra.mxu0 %v23396_v46  ;;  %v19973_v46 = vld [vmem:[#allocation19 + $0x558] ss:$20 sps:$4 sm:$0xff]   ;;  %v2658_v38 = vpop.f32.mrf.mxu0 }
 0x877   :  { %4686 = vmatpush1.bf16.msra.mxu0 %v19943_v9  ;;  %4717 = vmatprep.mubr.bf16.mxu0 %v22988_v0  ;;  %v2659_v60 = vadd.f32 %v2658_v38, %v2615_v24 }
 0x878   :  { %4687 = vmatprep.subr.bf16.mxu0 %v19951_v40  ;;  %v2660_v27 = vpop.f32.mrf.mxu0 }
 0x879   :  { %v2661_v35 = vadd.f32 %v2660_v27, %v2617_v28  ;;  %v2667_v7 = vrot.slane %v2659_v60, 4 }
 0x87a   :  { %v2662_v29 = vpop.f32.mrf.mxu0 }
 0x87b   :  { %4688 = vmatpush1.bf16.msra.mxu0 %v19949_v10  ;;  %v2668_v41 = vrot.slane %v2661_v35, 4  ;;  %v2663_v55 = vadd.f32 %v2662_v29, %v2619_v30 }
 0x87c   :  { %4689 = vmatprep.subr.bf16.mxu0 %v19957_v11  ;;  %v2664_v31 = vpop.f32.mrf.mxu0 }
 0x87d   :  { %v2665_v33 = vadd.f32 %v2664_v31, %v2621_v32  ;;  %v2669_v3 = vrot.slane %v2663_v55, 4  ;;  %v20002_v55 = vld [vmem:[#allocation19 + $0x498] ss:$20 sps:$4 sm:$0xff]  }
 0x87f   :  { %4690 = vmatpush1.bf16.msra.mxu0 %v19955_v12  ;;  %v2670_v36 = vrot.slane %v2665_v33, 4  ;;  %v2674_v40 = vsel %vm2671_vm5, %v2669_v3, %v2667_v7 }
 0x880   :  { %4691 = vmatprep.subr.bf16.mxu0 %v19963_v13  ;;  %v2682_v11 = vsel %vm2676_vm6, %v2674_v40, 0.0  ;;  %v2672_v13 = vsel %vm2671_vm5, %v2667_v7, %v2669_v3  ;;  %v20011_v7 = vld [vmem:[#allocation19 + $0x304] ss:$20 sps:$4 sm:$0xff]   ;;  %v20009_v40 = vld [vmem:[#allocation19 + $0x300] ss:$20 sps:$4 sm:$0xff]  }
 0x881   :  { %v2675_v42 = vsel %vm2671_vm5, %v2670_v36, %v2668_v41  ;;  %v2673_v45 = vsel %vm2671_vm5, %v2668_v41, %v2670_v36  ;;  %v19988_v36 = vld [vmem:[#allocation19 + $0x3a0] ss:$20 sps:$4 sm:$0xff]  }
 0x882   :  { %v2683_v44 = vsel %vm2676_vm6, %v2675_v42, 0.0  ;;  %v2685_v57 = vsel %vm2677_vm8, %v2673_v45, 0.0  ;;  %v23455_v41 = vld [vmem:[#allocation20] sm:$0x1f]  ;;  %v4504_v42 = vpop.f32.mrf.mxu1 }
 0x883   :  { %4692 = vmatpush1.bf16.msra.mxu0 %v19961_v14  ;;  %v3043_v39 = vadd.f32 %v3042_v43, %v2683_v44  ;;  %v3047_v2 = vadd.f32 %v3046_v59, %v2685_v57  ;;  %v3041_v14 = vadd.f32 %v3040_v37, %v2682_v11  ;;  %v19993_v37 = vld [vmem:[#allocation19 + $0x3a8] ss:$20 sps:$4 sm:$0xff]   ;;  %v19997_v45 = vld [vmem:[#allocation19 + $0x4c0] ss:$20 sps:$4 sm:$0xff]   ;;  %v19999_v57 = vld [vmem:[#allocation19 + $0x350] ss:$20 sps:$4 sm:$0xff]  }
 0x884   :  { %4693 = vmatprep.subr.bf16.mxu0 %v19969_v15  ;;  %v2684_v15 = vsel %vm2677_vm8, %v2672_v13, 0.0  ;;  %v19996_v44 = vld [vmem:[#allocation19 + $0x37c] ss:$20 sps:$4 sm:$0xff]   ;;  %v20014_v13 = vld [vmem:[#allocation19 + $0x2d8] ss:$20 sps:$4 sm:$0xff]  }
 0x885   :  { %v20016_v11 = vld [vmem:[#allocation19 + $0x2dc] ss:$20 sps:$4 sm:$0xff]  }
 0x887   :  { %4694 = vmatpush1.bf16.msra.mxu0 %v19967_v16 }
 0x888   :  { %4695 = vmatprep.subr.bf16.mxu0 %v19975_v17  ;;  %v3096_v17 = vrot.slane %v2240_v49, %v23303_v26  ;;  %v19994_v49 = vld [vmem:[#allocation19 + $0x378] ss:$20 sps:$4 sm:$0xff]  }
 0x88b   :  { %4696 = vmatpush1.bf16.msra.mxu0 %v19973_v46  ;;  %v3045_v46 = vadd.f32 %v3044_v47, %v2684_v15  ;;  %v3382_v47 = vrot.slane %v23455_v41, %v23303_v26  ;;  %v20021_v15 = vld [vmem:[#allocation19 + $0x2b4] ss:$20 sps:$4 sm:$0xff]  }
 0x88c   :  { %4697 = vmatprep.subr.bf16.mxu0 %v19981_v18 }
 0x88f   :  { %4698 = vmatpush1.bf16.msra.mxu0 %v19979_v19 }
 0x890   :  { %4699 = vmatprep.subr.bf16.mxu0 %v19987_v20 }
 0x893   :  { %4700 = vmatpush1.bf16.msra.mxu0 %v19985_v21 }
 0x894   :  { %19083 = vmatprep.subr.bf16.mxu0 %v19991_v22 }
 0x8b6   :  { %v3083_v50 = vpop.f32.mrf.mxu0 }
 0x8b7   :  { %v3084_v16 = vadd.f32 %v3083_v50, %v3041_v14  ;;  %v19998_v50 = vld [vmem:[#allocation19 + $0x380] ss:$20 sps:$4 sm:$0xff]  }
 0x8b8   :  { %v3085_v56 = vpop.f32.mrf.mxu0  ;;  %v20018_v14 = vld [vmem:[#allocation19 + $0x2e0] ss:$20 sps:$4 sm:$0xff]  }
 0x8b9   :  { %v3086_v58 = vadd.f32 %v3085_v56, %v3043_v39  ;;  %v3103_v18 = vadd.f32 %v3096_v17, %v3084_v16  ;;  %v23463_v39 = vpop.f32.mrf.mxu1  ;;  %v4505_v56 = vadd.f32 %v4504_v42, %v3382_v47  ;;  %v20022_v16 = vld [vmem:[#allocation19 + $0x3f8] ss:$20 sps:$4 sm:$0xff]   ;;  %v20047_v42 = vld [vmem:[#allocation19 + $0x3f0] ss:$20 sps:$4 sm:$0xff]  }
 0x8ba   :  { %v3087_v63 = vpop.f32.mrf.mxu0 }
 0x8bb   :  { %v3104_v1 = vadd.f32 %v3100_v54, %v3086_v58  ;;  %v3088_v19 = vadd.f32 %v3087_v63, %v3045_v46  ;;  %v20003_v58 = vld [vmem:[#allocation19 + $0x358] ss:$20 sps:$4 sm:$0xff]   ;;  %v4508_v59 = vpop.f32.mrf.mxu1 }
 0x8bc   :  { %v3089_v4 = vpop.f32.mrf.mxu0  ;;  %v20006_v63 = vld [vmem:[#allocation19 + $0x32c] ss:$20 sps:$4 sm:$0xff]  }
 0x8bd   :  { %v3107_v5 = vsub.f32 0.0, %v3104_v1  ;;  %v3090_v6 = vadd.f32 %v3089_v4, %v3047_v2  ;;  %v3105_v22 = vadd.f32 %v3096_v17, %v3088_v19  ;;  %v20007_v1 = vld [vmem:[#allocation19 + $0x470] ss:$20 sps:$4 sm:$0xff]   ;;  %v20004_v4 = vld [vmem:[#allocation19 + $0x328] ss:$20 sps:$4 sm:$0xff]  }
 0x8be   :  { %v20019_v17 = vld [vmem:[#allocation19 + $0x2b0] ss:$20 sps:$4 sm:$0xff]   ;;  %v20023_v46 = vld [vmem:[#allocation19 + $0x2b8] ss:$20 sps:$4 sm:$0xff]  }
 0x8bf   :  { %v3109_v8 = vmul.f32 1.442695, %v3107_v5  ;;  %v3106_v9 = vadd.f32 %v3100_v54, %v3090_v6  ;;  %v20001_v54 = vld [vmem:[#allocation19 + $0x354] ss:$20 sps:$4 sm:$0xff]   ;;  %v20008_v5 = vld [vmem:[#allocation19 + $0x330] ss:$20 sps:$4 sm:$0xff]  }
 0x8c0   :  { %v20027_v19 = vld [vmem:[#allocation19 + $0x3d0] ss:$20 sps:$4 sm:$0xff]  }
 0x8c1   :  { %22336 = vpow2.f32 %v3109_v8  ;;  %v3108_v10 = vsub.f32 0.0, %v3106_v9  ;;  %v20012_v8 = vld [vmem:[#allocation19 + $0x448] ss:$20 sps:$4 sm:$0xff]  }
 0x8c3   :  { %v3111_v12 = vmul.f32 1.442695, %v3108_v10  ;;  %v20013_v10 = vld [vmem:[#allocation19 + $0x308] ss:$20 sps:$4 sm:$0xff]  }
 0x8c5   :  { %22338 = vpow2.f32 %v3111_v12  ;;  %v20017_v12 = vld [vmem:[#allocation19 + $0x420] ss:$20 sps:$4 sm:$0xff]  }
 0x8c6   :  { %22340 = vtanh.f32 %v3103_v18  ;;  %v20026_v18 = vld [vmem:[#allocation19 + $0x28c] ss:$20 sps:$4 sm:$0xff]  }
 0x8ce   :  { %v22337_v20 = vpop.eup %22336 }
 0x8cf   :  { %v3113_v21 = vadd.f32 1.0, %v22337_v20  ;;  %v20024_v20 = vld [vmem:[#allocation19 + $0x288] ss:$20 sps:$4 sm:$0xff]  }
 0x8d1   :  { %22342 = vrcp.f32 %v3113_v21  ;;  %v20028_v21 = vld [vmem:[#allocation19 + $0x290] ss:$20 sps:$4 sm:$0xff]  }
 0x8d2   :  { %v22339_v38 = vpop.eup %22338  ;;  %22344 = vtanh.f32 %v3105_v22  ;;  %v20031_v22 = vld [vmem:[#allocation19 + $0x4e4] ss:$20 sps:$4 sm:$0xff]  }
 0x8d3   :  { %v3114_v24 = vadd.f32 1.0, %v22339_v38  ;;  %v22341_v27 = vpop.eup %22340  ;;  %v20029_v38 = vld [vmem:[#allocation19 + $0x4e0] ss:$20 sps:$4 sm:$0xff]  }
 0x8d5   :  { %22346 = vrcp.f32 %v3114_v24  ;;  %v20034_v24 = vld [vmem:[#allocation19 + $0x4bc] ss:$20 sps:$4 sm:$0xff]  }
 0x8de   :  { %v22343_v28 = vpop.eup %22342 }
 0x8df   :  { %v3119_v29 = vmul.f32 %v22343_v28, %v22341_v27  ;;  %v22345_v30 = vpop.eup %22344  ;;  %v20032_v27 = vld [vmem:[#allocation19 + $0x4b8] ss:$20 sps:$4 sm:$0xff]   ;;  %v20037_v28 = vld [vmem:[#allocation19 + $0x494] ss:$20 sps:$4 sm:$0xff]  }
 0x8e1   :  { %v19045_v31 = vpack.c.bf16 %v3119_v29, %v3119_v29  ;;  %v20035_v29 = vld [vmem:[#allocation19 + $0x490] ss:$20 sps:$4 sm:$0xff]  }
 0x8e2   :  { %v22347_v32 = vpop.eup %22346 }
 0x8e3   :  { %3129 = vst [vmem:[#allocation2 + $0x10] sm:$0xf] %v19045_v31  ;;  %v3120_v33 = vmul.f32 %v22347_v32, %v22345_v30  ;;  %v20040_v30 = vld [vmem:[#allocation19 + $0x46c] ss:$20 sps:$4 sm:$0xff]   ;;  %v20038_v31 = vld [vmem:[#allocation19 + $0x468] ss:$20 sps:$4 sm:$0xff]  }
 0x8e4   :  { %v20043_v32 = vld [vmem:[#allocation19 + $0x444] ss:$20 sps:$4 sm:$0xff]  }
 0x8e5   :  { %v19046_v35 = vpack.c.bf16 %v3120_v33, %v3120_v33  ;;  %v20041_v33 = vld [vmem:[#allocation19 + $0x440] ss:$20 sps:$4 sm:$0xff]  }
 0x8e7   :  { %3130 = vst [vmem:[#allocation2 + $0x3c] sm:$0xf] %v19046_v35  ;;  %v20046_v35 = vld [vmem:[#allocation19 + $0x41c] ss:$20 sps:$4 sm:$0xff]  }
 0x8ee   :  { %v23457_v43 = vld [vmem:[#allocation2 + $0x10] ss:$44 sps:$4 sm:$0xff]  }
 0x8ef   :  { %4589 = vmatmul.mubr.bf16.vlgmr.msra.gmra.mxu1 %v23457_v43  ;;  %4718 = vmatmul.mubr.bf16.vlgmr.msra.gmra.mxu0 %v23457_v43 }
 0x8f0   :  { %4643 = vmatpush1.bf16.msra.mxu1 %v19988_v36  ;;  %19084 = vmatpush3.bf16.msra.mxu0 %v19993_v37  ;;  %v20044_v36 = vld [vmem:[#allocation19 + $0x418] ss:$20 sps:$4 sm:$0xff]   ;;  %v20049_v37 = vld [vmem:[#allocation19 + $0x3f4] ss:$20 sps:$4 sm:$0xff]  }
 0x8f1   :  { %4674 = vmatprep.mubr.bf16.mxu1 %v23423_v62  ;;  %4801 = vmatprep.mubr.bf16.mxu0 %v23423_v62  ;;  %v4509_v62 = vadd.f32 %v4508_v59, %v3382_v47  ;;  %v20053_v47 = vld [vmem:[#allocation19 + $0x268] ss:$20 sps:$4 sm:$0xff]   ;;  %v20060_v59 = vld [vmem:[#allocation19 + $0xb0] ss:$20 sps:$4 sm:$0xff]  }
 0x8f2   :  { %4644 = vmatprep.subr.bf16.mxu1 %v19996_v44  ;;  %19085 = vmatprep.subr.bf16.mxu0 %v19997_v45  ;;  %v20052_v44 = vld [vmem:[#allocation19 + $0x3cc] ss:$20 sps:$4 sm:$0xff]   ;;  %v20050_v45 = vld [vmem:[#allocation19 + $0x3c8] ss:$20 sps:$4 sm:$0xff]  }
 0x8f4   :  { %4645 = vmatpush1.bf16.msra.mxu1 %v19994_v49  ;;  %19086 = vmatpush3.bf16.msra.mxu0 %v19998_v50  ;;  %v20054_v49 = vld [vmem:[#allocation19 + $0x128] ss:$20 sps:$4 sm:$0xff]   ;;  %v20055_v50 = vld [vmem:[#allocation19 + $0x240] ss:$20 sps:$4 sm:$0xff]  }
 0x8f5   :  { %4646 = vmatprep.subr.bf16.mxu1 %v20001_v54  ;;  %19087 = vmatprep.subr.bf16.mxu0 %v20002_v55  ;;  %v22400_v54 = vld [vmem:[#allocation2 + $0x4] ss:$44 sps:$4 sm:$0xff]   ;;  %v20056_v55 = vld [vmem:[#allocation19 + $0x100] ss:$20 sps:$4 sm:$0xff]  }
 0x8f6   :  { %v4547_v60 = vpop.f32.mrf.mxu0 }
 0x8f7   :  { %v23467_v2 = vadd.f32 %v4547_v60, %v4505_v56  ;;  %v20057_v56 = vld [vmem:[#allocation19 + $0x218] ss:$20 sps:$4 sm:$0xff]   ;;  %v20061_v60 = vld [vmem:[#allocation19 + $0x1c8] ss:$20 sps:$4 sm:$0xff]  }
 0x8f8   :  { %v23469_v3 = vpop.f32.mrf.mxu0  ;;  %4647 = vmatpush1.bf16.msra.mxu1 %v19999_v57  ;;  %19088 = vmatpush3.bf16.msra.mxu0 %v20003_v58  ;;  %v20058_v57 = vld [vmem:[#allocation19 + $0xd8] ss:$20 sps:$4 sm:$0xff]   ;;  %v20059_v58 = vld [vmem:[#allocation19 + $0x1f0] ss:$20 sps:$4 sm:$0xff]  }
 0x8f9   :  { %4648 = vmatprep.subr.bf16.mxu1 %v20006_v63  ;;  %19089 = vmatprep.subr.bf16.mxu0 %v20007_v1  ;;  %v20062_v63 = vld [vmem:[#allocation19 + $0x88] ss:$20 sps:$4 sm:$0xff]   ;;  %v20063_v1 = vld [vmem:[#allocation19 + $0x1a0] ss:$20 sps:$4 sm:$0xff]  }
 0x8fa   :  { %v4551_v6 = vpop.f32.mrf.mxu0 }
 0x8fb   :  { %v23471_v9 = vadd.f32 %v4551_v6, %v4509_v62  ;;  %v20065_v62 = vld [vmem:[#allocation19 + $0x178] ss:$20 sps:$4 sm:$0xff]   ;;  %v20068_v6 = vld [vmem:[#allocation19 + $0x10] ss:$20 sps:$4 sm:$0xff]  }
 0x8fc   :  { %4649 = vmatpush1.bf16.msra.mxu1 %v20004_v4  ;;  %19090 = vmatpush3.bf16.msra.mxu0 %v20008_v5  ;;  %v20066_v4 = vld [vmem:[#allocation19 + $0x38] ss:$20 sps:$4 sm:$0xff]   ;;  %v20067_v5 = vld [vmem:[#allocation19 + $0x150] ss:$20 sps:$4 sm:$0xff]  }
 0x8fd   :  { %4650 = vmatprep.subr.bf16.mxu1 %v20011_v7  ;;  %19091 = vmatprep.subr.bf16.mxu0 %v20012_v8  ;;  %v20069_v7 = vld [vmem:[#allocation19 + $0x628] ss:$20 sps:$4 sm:$0xff]   ;;  %v22401_v8 = vld [vmem:[#allocation2] ss:$44 sps:$4 sm:$0xff]  }
 0x900   :  { %4651 = vmatpush1.bf16.msra.mxu1 %v20009_v40  ;;  %19092 = vmatpush3.bf16.msra.mxu0 %v20013_v10  ;;  %v20070_v40 = vld [vmem:[#allocation19 + $0x600] ss:$20 sps:$4 sm:$0xff]   ;;  %v20071_v10 = vld [vmem:[#allocation19 + $0x5d8] ss:$20 sps:$4 sm:$0xff]  }
 0x901   :  { %4652 = vmatprep.subr.bf16.mxu1 %v20016_v11  ;;  %19093 = vmatprep.subr.bf16.mxu0 %v20017_v12  ;;  %v20072_v11 = vld [vmem:[#allocation19 + $0x5b0] ss:$20 sps:$4 sm:$0xff]   ;;  %v20073_v12 = vld [vmem:[#allocation19 + $0x588] ss:$20 sps:$4 sm:$0xff]  }
 0x904   :  { %4653 = vmatpush1.bf16.msra.mxu1 %v20014_v13  ;;  %19094 = vmatpush3.bf16.msra.mxu0 %v20018_v14  ;;  %v20074_v13 = vld [vmem:[#allocation19 + $0x560] ss:$20 sps:$4 sm:$0xff]   ;;  %v20075_v14 = vld [vmem:[#allocation19 + $0x538] ss:$20 sps:$4 sm:$0xff]  }
 0x905   :  { %4654 = vmatprep.subr.bf16.mxu1 %v20021_v15  ;;  %19095 = vmatprep.subr.bf16.mxu0 %v20022_v16  ;;  %v20076_v15 = vld [vmem:[#allocation19 + $0x510] ss:$20 sps:$4 sm:$0xff]  }
 0x906   :  { %v20079_v16 = vld [vmem:[#allocation23 + $0x174] ss:$8 sps:$4 sm:$0xff]  }
 0x908   :  { %4655 = vmatpush1.bf16.msra.mxu1 %v20019_v17  ;;  %19096 = vmatpush3.bf16.msra.mxu0 %v20023_v46  ;;  %v20077_v17 = vld [vmem:[#allocation23 + $0x170] ss:$8 sps:$4 sm:$0xff]   ;;  %v20085_v46 = vld [vmem:[#allocation23 + $0x164] ss:$8 sps:$4 sm:$0xff]  }
 0x909   :  { %4656 = vmatprep.subr.bf16.mxu1 %v20026_v18  ;;  %19097 = vmatprep.subr.bf16.mxu0 %v20027_v19  ;;  %v23485_v18 = vld [vmem:[#allocation2 + $0xc] ss:$44 sps:$4 sm:$0xff]  }
 0x90a   :  { %v20083_v19 = vld [vmem:[#allocation23 + $0x160] ss:$8 sps:$4 sm:$0xff]  }
 0x90c   :  { %4657 = vmatpush1.bf16.msra.mxu1 %v20024_v20  ;;  %19098 = vmatpush3.bf16.msra.mxu0 %v20028_v21  ;;  %v20088_v20 = vld [vmem:[#allocation23 + $0x154] ss:$8 sps:$4 sm:$0xff]   ;;  %v20086_v21 = vld [vmem:[#allocation23 + $0x150] ss:$8 sps:$4 sm:$0xff]  }
 0x90d   :  { %4658 = vmatprep.subr.bf16.mxu1 %v20031_v22  ;;  %v20091_v22 = vld [vmem:[#allocation23 + $0x144] ss:$8 sps:$4 sm:$0xff]  }
 0x90f   :  { %4802 = vmatmul.mubr.bf16.vlgmr.msra.gmra.mxu0 %v23421_v61 }
 0x910   :  { %4659 = vmatpush2.bf16.msra.mxu1 %v20029_v38  ;;  %v20089_v38 = vld [vmem:[#allocation23 + $0x140] ss:$8 sps:$4 sm:$0xff]  }
 0x911   :  { %4660 = vmatprep.subr.bf16.mxu1 %v20034_v24  ;;  %v20094_v24 = vld [vmem:[#allocation23 + $0x134] ss:$8 sps:$4 sm:$0xff]  }
 0x914   :  { %4661 = vmatpush2.bf16.msra.mxu1 %v20032_v27  ;;  %v20092_v27 = vld [vmem:[#allocation23 + $0x130] ss:$8 sps:$4 sm:$0xff]  }
 0x915   :  { %4662 = vmatprep.subr.bf16.mxu1 %v20037_v28  ;;  %v20097_v28 = vld [vmem:[#allocation23 + $0x124] ss:$8 sps:$4 sm:$0xff]  }
 0x918   :  { %4663 = vmatpush2.bf16.msra.mxu1 %v20035_v29  ;;  %v20100_v29 = vld [vmem:[#allocation23 + $0x114] ss:$8 sps:$4 sm:$0xff]  }
 0x919   :  { %4664 = vmatprep.subr.bf16.mxu1 %v20040_v30  ;;  %v20098_v30 = vld [vmem:[#allocation23 + $0x110] ss:$8 sps:$4 sm:$0xff]  }
 0x91c   :  { %4665 = vmatpush2.bf16.msra.mxu1 %v20038_v31  ;;  %v20103_v31 = vld [vmem:[#allocation23 + $0x104] ss:$8 sps:$4 sm:$0xff]  }
 0x91d   :  { %4666 = vmatprep.subr.bf16.mxu1 %v20043_v32  ;;  %v20101_v32 = vld [vmem:[#allocation23 + $0x100] ss:$8 sps:$4 sm:$0xff]  }
 0x920   :  { %4667 = vmatpush2.bf16.msra.mxu1 %v20041_v33  ;;  %v20106_v33 = vld [vmem:[#allocation23 + $0x1f4] ss:$8 sps:$4 sm:$0xff]  }
 0x921   :  { %4668 = vmatprep.subr.bf16.mxu1 %v20046_v35  ;;  %v20104_v35 = vld [vmem:[#allocation23 + $0x1f0] ss:$8 sps:$4 sm:$0xff]  }
 0x924   :  { %4669 = vmatpush2.bf16.msra.mxu1 %v20044_v36  ;;  %v20109_v36 = vld [vmem:[#allocation23 + $0x1e4] ss:$8 sps:$4 sm:$0xff]  }
 0x925   :  { %4670 = vmatprep.subr.bf16.mxu1 %v20049_v37  ;;  %v20107_v37 = vld [vmem:[#allocation23 + $0x1e0] ss:$8 sps:$4 sm:$0xff]  }
 0x928   :  { %4671 = vmatpush2.bf16.msra.mxu1 %v20047_v42  ;;  %v20112_v42 = vld [vmem:[#allocation23 + $0x1d4] ss:$8 sps:$4 sm:$0xff]  }
 0x929   :  { %4672 = vmatprep.subr.bf16.mxu1 %v20052_v44  ;;  %v20110_v44 = vld [vmem:[#allocation23 + $0x1d0] ss:$8 sps:$4 sm:$0xff]  }
 0x92c   :  { %4673 = vmatpush2.bf16.msra.mxu1 %v20050_v45  ;;  %v20115_v45 = vld [vmem:[#allocation23 + $0x1c4] ss:$8 sps:$4 sm:$0xff]  }
 0x92d   :  { %19061 = vmatprep.subr.bf16.mxu1 %v20053_v47  ;;  %v20113_v47 = vld [vmem:[#allocation23 + $0x1c0] ss:$8 sps:$4 sm:$0xff]  }
 0x92f   :  { %4675 = vmatmul.mubr.bf16.vlgmr.msra.gmra.mxu1 %v23421_v61  ;;  %v20064_v61 = vld [vmem:[#allocation19 + $0x60] ss:$20 sps:$4 sm:$0xff]  }
 0x930   :  { %19062 = vmatpush3.bf16.msra.mxu1 %v20054_v49  ;;  %4760 = vmatprep.mubr.bf16.mxu1 %v22400_v54  ;;  %v20118_v49 = vld [vmem:[#allocation23 + $0x1b4] ss:$8 sps:$4 sm:$0xff]   ;;  %v20121_v54 = vld [vmem:[#allocation23 + $0x1a4] ss:$8 sps:$4 sm:$0xff]  }
 0x931   :  { %19063 = vmatprep.subr.bf16.mxu1 %v20055_v50  ;;  %v20116_v50 = vld [vmem:[#allocation23 + $0x1b0] ss:$8 sps:$4 sm:$0xff]  }
 0x934   :  { %19064 = vmatpush3.bf16.msra.mxu1 %v20056_v55  ;;  %v20119_v55 = vld [vmem:[#allocation23 + $0x1a0] ss:$8 sps:$4 sm:$0xff]  }
 0x935   :  { %19065 = vmatprep.subr.bf16.mxu1 %v20057_v56  ;;  %v20124_v56 = vld [vmem:[#allocation23 + $0x194] ss:$8 sps:$4 sm:$0xff]  }
 0x938   :  { %19066 = vmatpush3.bf16.msra.mxu1 %v20058_v57  ;;  %v20122_v57 = vld [vmem:[#allocation23 + $0x190] ss:$8 sps:$4 sm:$0xff]  }
 0x939   :  { %19067 = vmatprep.subr.bf16.mxu1 %v20059_v58  ;;  %v20127_v58 = vld [vmem:[#allocation23 + $0x184] ss:$8 sps:$4 sm:$0xff]  }
 0x93c   :  { %19068 = vmatpush3.bf16.msra.mxu1 %v20060_v59  ;;  %v20125_v59 = vld [vmem:[#allocation23 + $0x180] ss:$8 sps:$4 sm:$0xff]  }
 0x93d   :  { %19069 = vmatprep.subr.bf16.mxu1 %v20061_v60  ;;  %v20130_v60 = vld [vmem:[#allocation22 + $0x74] ss:$8 sps:$4 sm:$0xff]  }
 0x940   :  { %19070 = vmatpush3.bf16.msra.mxu1 %v20062_v63  ;;  %v20128_v63 = vld [vmem:[#allocation22 + $0x70] ss:$8 sps:$4 sm:$0xff]  }
 0x941   :  { %19071 = vmatprep.subr.bf16.mxu1 %v20063_v1  ;;  %v4510_v1 = vpop.f32.mrf.mxu1 }
 0x944   :  { %19072 = vmatpush3.bf16.msra.mxu1 %v20064_v61  ;;  %v20080_v61 = vld [vmem:[#allocation2 + $0x8] ss:$44 sps:$4 sm:$0xff]  }
 0x945   :  { %19073 = vmatprep.subr.bf16.mxu1 %v20065_v62  ;;  %v20136_v62 = vld [vmem:[#allocation22 + $0x64] ss:$8 sps:$4 sm:$0xff]  }
 0x948   :  { %19074 = vmatpush3.bf16.msra.mxu1 %v20066_v4  ;;  %v3386_v4 = vrot.slane %v23455_v41, %v23310_v34 }
 0x949   :  { %19075 = vmatprep.subr.bf16.mxu1 %v20067_v5  ;;  %v23491_v5 = vld [vmem:[#allocation2 + $0x4] ss:$44 sps:$4 sm:$0xff]  }
 0x94c   :  { %19076 = vmatpush3.bf16.msra.mxu1 %v20068_v6 }
 0x94d   :  { %19247 = vmatprep.subr.bf16.mxu1 %v22989_v25 }
 0x94f   :  { %4761 = vmatmul.mubr.bf16.vlgmr.msra.gmra.mxu1 %v22401_v8  ;;  %v20134_v8 = vld [vmem:[#allocation22 + $0x60] ss:$8 sps:$4 sm:$0xff]  }
 0x950   :  { %19248 = vmatpush3.bf16.msra.mxu1 %v20069_v7  ;;  %19263 = vmatprep.mubr.msk.bf16.mxu1 %vm22990_vm0, %v22989_v25 }
 0x951   :  { %19249 = vmatprep.subr.bf16.mxu1 %v22989_v25 }
 0x954   :  { %19250 = vmatpush3.bf16.msra.mxu1 %v20070_v40  ;;  %v4553_v40 = vpop.f32.mrf.mxu0 }
 0x955   :  { %19251 = vmatprep.subr.bf16.mxu1 %v22989_v25 }
 0x958   :  { %19252 = vmatpush3.bf16.msra.mxu1 %v20071_v10 }
 0x959   :  { %19253 = vmatprep.subr.bf16.mxu1 %v22989_v25 }
 0x95c   :  { %19254 = vmatpush3.bf16.msra.mxu1 %v20072_v11  ;;  %v20139_v11 = vld [vmem:[#allocation22 + $0x54] ss:$8 sps:$4 sm:$0xff]  }
 0x95d   :  { %19255 = vmatprep.subr.bf16.mxu1 %v22989_v25 }
 0x960   :  { %19256 = vmatpush3.bf16.msra.mxu1 %v20073_v12  ;;  %v4507_v12 = vadd.f32 %v23463_v39, %v3386_v4  ;;  %v20140_v39 = vld [vmem:[#allocation22 + $0x40] ss:$8 sps:$4 sm:$0xff]  }
 0x961   :  { %19257 = vmatprep.subr.bf16.mxu1 %v22989_v25 }
 0x964   :  { %19258 = vmatpush3.bf16.msra.mxu1 %v20074_v13  ;;  %v4511_v13 = vadd.f32 %v4510_v1, %v3386_v4  ;;  %v3393_v1 = vsub.s32 3, %v23299_v23  ;;  %v23506_v4 = vld [vmem:[#allocation2] ss:$44 sps:$4 sm:$0xff]  }
 0x965   :  { %19259 = vmatprep.subr.bf16.mxu1 %v22989_v25 }
 0x968   :  { %19260 = vmatpush3.bf16.msra.mxu1 %v20075_v14 }
 0x969   :  { %19261 = vmatprep.subr.bf16.mxu1 %v22989_v25 }
 0x96c   :  { %19262 = vmatpush3.bf16.msra.mxu1 %v20076_v15  ;;  %v4550_v15 = vadd.f32 %v23469_v3, %v4507_v12  ;;  %v20143_v3 = vld [vmem:[#allocation22 + $0x30] ss:$8 sps:$4 sm:$0xff]  }
 0x96d   :  { %5730 = vmatprep.subr.bf16.mxu1 %v20079_v16  ;;  %v4554_v16 = vadd.f32 %v4553_v40, %v4511_v13 }
 0x96f   :  { %19264 = vmatmul.mubr.bf16.vlgmr.msra.gmra.mxu1 %v23457_v43  ;;  %v20095_v43 = vld [vmem:[#allocation23 + $0x120] ss:$8 sps:$4 sm:$0xff]  }
 0x970   :  { %5731 = vmatpush1.bf16.msra.mxu1 %v20077_v17  ;;  %5762 = vmatprep.mubr.bf16.mxu1 %v23485_v18 }
 0x971   :  { %5732 = vmatprep.subr.bf16.mxu1 %v20085_v46 }
 0x974   :  { %5733 = vmatpush1.bf16.msra.mxu1 %v20083_v19  ;;  %v20142_v19 = vld [vmem:[#allocation22 + $0x44] ss:$8 sps:$4 sm:$0xff]  }
 0x975   :  { %5734 = vmatprep.subr.bf16.mxu1 %v20088_v20 }
 0x978   :  { %5735 = vmatpush1.bf16.msra.mxu1 %v20086_v21 }
 0x979   :  { %5736 = vmatprep.subr.bf16.mxu1 %v20091_v22 }
 0x97c   :  { %5737 = vmatpush1.bf16.msra.mxu1 %v20089_v38 }
 0x97d   :  { %5738 = vmatprep.subr.bf16.mxu1 %v20094_v24  ;;  %v20145_v24 = vld [vmem:[#allocation22 + $0x34] ss:$8 sps:$4 sm:$0xff]  }
 0x980   :  { %5739 = vmatpush1.bf16.msra.mxu1 %v20092_v27  ;;  %v20146_v27 = vld [vmem:[#allocation22 + $0x20] ss:$8 sps:$4 sm:$0xff]  }
 0x981   :  { %5740 = vmatprep.subr.bf16.mxu1 %v20097_v28  ;;  %v20151_v28 = vld [vmem:[#allocation22 + $0x14] ss:$8 sps:$4 sm:$0xff]  }
 0x984   :  { %5741 = vmatpush1.bf16.msra.mxu1 %v20095_v43  ;;  %v20149_v43 = vld [vmem:[#allocation22 + $0x10] ss:$8 sps:$4 sm:$0xff]  }
 0x985   :  { %5742 = vmatprep.subr.bf16.mxu1 %v20100_v29  ;;  %v20154_v29 = vld [vmem:[#allocation22 + $0x4] ss:$8 sps:$4 sm:$0xff]  }
 0x988   :  { %5743 = vmatpush1.bf16.msra.mxu1 %v20098_v30  ;;  %v20152_v30 = vld [vmem:[#allocation22] ss:$8 sps:$4 sm:$0xff]  }
 0x989   :  { %5744 = vmatprep.subr.bf16.mxu1 %v20103_v31  ;;  %v20157_v31 = vld [vmem:[#allocation22 + $0xf4] ss:$8 sps:$4 sm:$0xff]  }
 0x98c   :  { %5745 = vmatpush1.bf16.msra.mxu1 %v20101_v32  ;;  %v20155_v32 = vld [vmem:[#allocation22 + $0xf0] ss:$8 sps:$4 sm:$0xff]  }
 0x98d   :  { %5746 = vmatprep.subr.bf16.mxu1 %v20106_v33  ;;  %v20160_v33 = vld [vmem:[#allocation22 + $0xe4] ss:$8 sps:$4 sm:$0xff]  }
 0x990   :  { %5747 = vmatpush2.bf16.msra.mxu1 %v20104_v35  ;;  %v20158_v35 = vld [vmem:[#allocation22 + $0xe0] ss:$8 sps:$4 sm:$0xff]  }
 0x991   :  { %5748 = vmatprep.subr.bf16.mxu1 %v20109_v36  ;;  %v20163_v36 = vld [vmem:[#allocation22 + $0xd4] ss:$8 sps:$4 sm:$0xff]  }
 0x994   :  { %5749 = vmatpush2.bf16.msra.mxu1 %v20107_v37  ;;  %v20161_v37 = vld [vmem:[#allocation22 + $0xd0] ss:$8 sps:$4 sm:$0xff]  }
 0x995   :  { %5750 = vmatprep.subr.bf16.mxu1 %v20112_v42  ;;  %v20166_v42 = vld [vmem:[#allocation22 + $0xc4] ss:$8 sps:$4 sm:$0xff]  }
 0x998   :  { %5751 = vmatpush2.bf16.msra.mxu1 %v20110_v44  ;;  %v20164_v44 = vld [vmem:[#allocation22 + $0xc0] ss:$8 sps:$4 sm:$0xff]  }
 0x999   :  { %5752 = vmatprep.subr.bf16.mxu1 %v20115_v45  ;;  %v20169_v45 = vld [vmem:[#allocation22 + $0xb4] ss:$8 sps:$4 sm:$0xff]  }
 0x99c   :  { %5753 = vmatpush2.bf16.msra.mxu1 %v20113_v47  ;;  %v20167_v47 = vld [vmem:[#allocation22 + $0xb0] ss:$8 sps:$4 sm:$0xff]  }
 0x99d   :  { %5754 = vmatprep.subr.bf16.mxu1 %v20118_v49  ;;  %v4633_v49 = vpop.f32.mrf.mxu0 }
 0x9a0   :  { %5755 = vmatpush2.bf16.msra.mxu1 %v20116_v50  ;;  %v20172_v50 = vld [vmem:[#allocation22 + $0xa4] ss:$8 sps:$4 sm:$0xff]  }
 0x9a1   :  { %5756 = vmatprep.subr.bf16.mxu1 %v20121_v54  ;;  %v20170_v54 = vld [vmem:[#allocation22 + $0xa0] ss:$8 sps:$4 sm:$0xff]  }
 0x9a4   :  { %5757 = vmatpush2.bf16.msra.mxu1 %v20119_v55  ;;  %v4635_v55 = vpop.f32.mrf.mxu0 }
 0x9a5   :  { %5758 = vmatprep.subr.bf16.mxu1 %v20124_v56  ;;  %v20175_v56 = vld [vmem:[#allocation22 + $0x94] ss:$8 sps:$4 sm:$0xff]  }
 0x9a8   :  { %5759 = vmatpush2.bf16.msra.mxu1 %v20122_v57  ;;  %v20173_v57 = vld [vmem:[#allocation22 + $0x90] ss:$8 sps:$4 sm:$0xff]  }
 0x9a9   :  { %5760 = vmatprep.subr.bf16.mxu1 %v20127_v58  ;;  %v4637_v58 = vpop.f32.mrf.mxu0 }
 0x9ac   :  { %5761 = vmatpush2.bf16.msra.mxu1 %v20125_v59  ;;  %v20178_v59 = vld [vmem:[#allocation22 + $0x84] ss:$8 sps:$4 sm:$0xff]  }
 0x9ad   :  { %6308 = vmatprep.subr.bf16.mxu1 %v20130_v60  ;;  %v20176_v60 = vld [vmem:[#allocation22 + $0x80] ss:$8 sps:$4 sm:$0xff]  }
 0x9af   :  { %5763 = vmatmul.mubr.bf16.vlgmr.msra.gmra.mxu1 %v20080_v61  ;;  %v4590_v6 = vpop.f32.mrf.mxu1  ;;  %v3389_v61 = vsub.s32 2, %v23299_v23 }
 0x9b0   :  { %v23494_v7 = vadd.f32 %v4590_v6, %v23467_v2  ;;  %6309 = vmatpush1.bf16.msra.mxu1 %v20128_v63  ;;  %6340 = vmatprep.mubr.bf16.mxu1 %v23491_v5  ;;  %v20137_v2 = vld [vmem:[#allocation22 + $0x50] ss:$8 sps:$4 sm:$0xff]   ;;  %v4639_v63 = vpop.f32.mrf.mxu0  ;;  %v3394_v6 = vrot.slane %v23455_v41, %v3393_v1 }
 0x9b1   :  { %v4592_v10 = vpop.f32.mrf.mxu1  ;;  %6310 = vmatprep.subr.bf16.mxu1 %v20136_v62 }
 0x9b2   :  { %v4593_v20 = vadd.f32 %v4592_v10, %v4550_v15  ;;  %v4719_v62 = vpop.f32.mrf.mxu0  ;;  %v4636_v12 = vadd.f32 %v4635_v55, %v3394_v6 }
 0x9b3   :  { %v4594_v14 = vpop.f32.mrf.mxu1 }
 0x9b4   :  { %v23500_v17 = vadd.f32 %v4594_v14, %v23471_v9  ;;  %6311 = vmatpush1.bf16.msra.mxu1 %v20134_v8  ;;  %v20148_v9 = vld [vmem:[#allocation22 + $0x24] ss:$8 sps:$4 sm:$0xff]   ;;  %v3390_v8 = vrot.slane %v23455_v41, %v3389_v61  ;;  %v4721_v40 = vpop.f32.mrf.mxu0 }
 0x9b5   :  { %v4596_v46 = vpop.f32.mrf.mxu1  ;;  %6312 = vmatprep.subr.bf16.mxu1 %v20139_v11 }
 0x9b6   :  { %v4851_v21 = vpack.c.bf16 %v23500_v17, %v23494_v7  ;;  %v4597_v22 = vadd.f32 %v4596_v46, %v4554_v16  ;;  %v4638_v13 = vadd.f32 %v4637_v58, %v3390_v8  ;;  %v4634_v14 = vadd.f32 %v4633_v49, %v3390_v8  ;;  %v4723_v15 = vpop.f32.mrf.mxu0 }
 0x9b8   :  { %v4852_v38 = vpack.c.bf16 %v4597_v22, %v4593_v20  ;;  %6313 = vmatpush1.bf16.msra.mxu1 %v20137_v2  ;;  %v4640_v2 = vadd.f32 %v4639_v63, %v3394_v6 }
 0x9b9   :  { %6314 = vmatprep.subr.bf16.mxu1 %v20142_v19 }
 0x9ba   :  { %4888 = vmatprep.mubr.bf16.mxu0 %v4852_v38 }
 0x9bc   :  { %6315 = vmatpush1.bf16.msra.mxu1 %v20140_v39  ;;  %v4725_v39 = vpop.f32.mrf.mxu0 }
 0x9bd   :  { %6316 = vmatprep.subr.bf16.mxu1 %v20145_v24 }
 0x9c0   :  { %6317 = vmatpush1.bf16.msra.mxu1 %v20143_v3 }
 0x9c1   :  { %6318 = vmatprep.subr.bf16.mxu1 %v20148_v9 }
 0x9c4   :  { %6319 = vmatpush1.bf16.msra.mxu1 %v20146_v27 }
 0x9c5   :  { %6320 = vmatprep.subr.bf16.mxu1 %v20151_v28 }
 0x9c8   :  { %6321 = vmatpush1.bf16.msra.mxu1 %v20149_v43 }
 0x9c9   :  { %6322 = vmatprep.subr.bf16.mxu1 %v20154_v29 }
 0x9cc   :  { %6323 = vmatpush1.bf16.msra.mxu1 %v20152_v30 }
 0x9cd   :  { %6324 = vmatprep.subr.bf16.mxu1 %v20157_v31 }
 0x9cf   :  { %v19099_v31 = vpop.f32.mrf.mxu0 }
 0x9d0   :  { %6325 = vmatpush2.bf16.msra.mxu1 %v20155_v32 }
 0x9d1   :  { %6326 = vmatprep.subr.bf16.mxu1 %v20160_v33  ;;  %v19100_v33 = vpop.f32.mrf.mxu0 }
 0x9d2   :  { %v19101_v49 = vadd.f32 %v19100_v33, %v19099_v31  ;;  %v20250_v31 = vld [vmem:[#allocation22 + $0x244] ss:$8 sps:$4 sm:$0xff]   ;;  %v20256_v33 = vld [vmem:[#allocation22 + $0x234] ss:$8 sps:$4 sm:$0xff]  }
 0x9d4   :  { %6327 = vmatpush2.bf16.msra.mxu1 %v20158_v35  ;;  %v3397_v35 = vsub.s32 4, %v23299_v23 }
 0x9d5   :  { %6328 = vmatprep.subr.bf16.mxu1 %v20163_v36 }
 0x9d8   :  { %6329 = vmatpush2.bf16.msra.mxu1 %v20161_v37  ;;  %v19102_v37 = vpop.f32.mrf.mxu0 }
 0x9d9   :  { %6330 = vmatprep.subr.bf16.mxu1 %v20166_v42  ;;  %v3398_v42 = vrot.slane %v23455_v41, %v3397_v35 }
 0x9da   :  { %v19103_v7 = vpop.f32.mrf.mxu0 }
 0x9dc   :  { %6331 = vmatpush2.bf16.msra.mxu1 %v20164_v44 }
 0x9dd   :  { %6332 = vmatprep.subr.bf16.mxu1 %v20169_v45 }
 0x9e0   :  { %6333 = vmatpush2.bf16.msra.mxu1 %v20167_v47 }
 0x9e1   :  { %6334 = vmatprep.subr.bf16.mxu1 %v20172_v50  ;;  %v19104_v50 = vadd.f32 %v19103_v7, %v19102_v37  ;;  %v20262_v37 = vld [vmem:[#allocation22 + $0x224] ss:$8 sps:$4 sm:$0xff]  }
 0x9e2   :  { %v20274_v7 = vld [vmem:[#allocation22 + $0x204] ss:$8 sps:$4 sm:$0xff]  }
 0x9e4   :  { %6335 = vmatpush2.bf16.msra.mxu1 %v20170_v54 }
 0x9e5   :  { %6336 = vmatprep.subr.bf16.mxu1 %v20175_v56 }
 0x9e8   :  { %6337 = vmatpush2.bf16.msra.mxu1 %v20173_v57 }
 0x9e9   :  { %6338 = vmatprep.subr.bf16.mxu1 %v20178_v59 }
 0x9ec   :  { %6339 = vmatpush2.bf16.msra.mxu1 %v20176_v60 }
 0x9ef   :  { %v4676_v10 = vpop.f32.mrf.mxu1  ;;  %6341 = vmatmul.mubr.bf16.vlgmr.msra.gmra.mxu1 %v23506_v4 }
 0x9f0   :  { %v4677_v20 = vadd.f32 %v4676_v10, %v4634_v14 }
 0x9f1   :  { %v4678_v11 = vpop.f32.mrf.mxu1 }
 0x9f2   :  { %v4679_v46 = vadd.f32 %v4678_v11, %v4636_v12  ;;  %v4720_v27 = vadd.f32 %v4719_v62, %v4677_v20 }
 0x9f3   :  { %v4680_v16 = vpop.f32.mrf.mxu1 }
 0x9f4   :  { %v4681_v19 = vadd.f32 %v4680_v16, %v4638_v13  ;;  %v4722_v3 = vadd.f32 %v4721_v40, %v4679_v46 }
 0x9f5   :  { %v4682_v22 = vpop.f32.mrf.mxu1 }
 0x9f6   :  { %v4683_v38 = vadd.f32 %v4682_v22, %v4640_v2  ;;  %v4724_v24 = vadd.f32 %v4723_v15, %v4681_v19 }
 0x9f8   :  { %v4726_v9 = vadd.f32 %v4725_v39, %v4683_v38  ;;  %v4853_v43 = vpack.c.bf16 %v4724_v24, %v4720_v27  ;;  %v20232_v27 = vld [vmem:[#allocation22 + $0x274] ss:$8 sps:$4 sm:$0xff]  }
 0x9f9   :  { %6394 = vmatprep.subr.bf16.mxu1 %v20232_v27  ;;  %v20209_v27 = vld [vmem:[#allocation23 + $0xd0] ss:$8 sps:$4 sm:$0xff]  }
 0x9fa   :  { %v4854_v28 = vpack.c.bf16 %v4726_v9, %v4722_v3  ;;  %v20181_v3 = vld [vmem:[#allocation23 + $0x74] ss:$8 sps:$4 sm:$0xff]   ;;  %v20230_v9 = vld [vmem:[#allocation22 + $0x270] ss:$8 sps:$4 sm:$0xff]  }
 0x9fb   :  { %6395 = vmatpush1.bf16.msra.mxu1 %v20230_v9  ;;  %v20211_v9 = vld [vmem:[#allocation23 + $0xd4] ss:$8 sps:$4 sm:$0xff]  }
 0x9fc   :  { %4870 = vmatprep.subr.bf16.mxu0 %v4854_v28  ;;  %v20238_v28 = vld [vmem:[#allocation22 + $0x264] ss:$8 sps:$4 sm:$0xff]  }
 0x9fd   :  { %4871 = vmatpush1.bf16.xpose.msra.mxu0 %v4853_v43  ;;  %v20236_v43 = vld [vmem:[#allocation22 + $0x260] ss:$8 sps:$4 sm:$0xff]   ;;  %6396 = vmatprep.subr.bf16.mxu1 %v20238_v28  ;;  %v20214_v28 = vld [vmem:[#allocation23 + $0xc4] ss:$8 sps:$4 sm:$0xff]  }
 0x9fe   :  { %19267 = vmatprep.subr.bf16.mxu0 %v22989_v25 }
 0x9ff   :  { %6397 = vmatpush1.bf16.msra.mxu1 %v20236_v43  ;;  %v20212_v43 = vld [vmem:[#allocation23 + $0xc0] ss:$8 sps:$4 sm:$0xff]  }
 0xa04   :  { %4889 = vmatmul.mubr.bf16.vlgmr.msra.gmra.mxu0 %v4851_v21 }
 0xa05   :  { %19269 = vmatprep.mubr.msk.bf16.mxu0 %vm22990_vm0, %v22989_v25 }
 0xa0f   :  { %v19077_v29 = vpop.f32.mrf.mxu1 }
 0xa11   :  { %v19078_v30 = vpop.f32.mrf.mxu1 }
 0xa12   :  { %v19079_v44 = vadd.f32 %v19078_v30, %v19077_v29  ;;  %v20244_v29 = vld [vmem:[#allocation22 + $0x254] ss:$8 sps:$4 sm:$0xff]   ;;  %v20242_v30 = vld [vmem:[#allocation22 + $0x250] ss:$8 sps:$4 sm:$0xff]  }
 0xa13   :  { %v19080_v32 = vpop.f32.mrf.mxu1  ;;  %6398 = vmatprep.subr.bf16.mxu1 %v20244_v29  ;;  %v20217_v29 = vld [vmem:[#allocation23 + $0xb4] ss:$8 sps:$4 sm:$0xff]  }
 0xa14   :  { %v4763_v17 = vadd.f32 %v19079_v44, %v3398_v42  ;;  %6399 = vmatpush1.bf16.msra.mxu1 %v20242_v30  ;;  %v20268_v44 = vld [vmem:[#allocation22 + $0x214] ss:$8 sps:$4 sm:$0xff]   ;;  %v20215_v30 = vld [vmem:[#allocation23 + $0xb0] ss:$8 sps:$4 sm:$0xff]  }
 0xa15   :  { %v19081_v36 = vpop.f32.mrf.mxu1  ;;  %6400 = vmatprep.subr.bf16.mxu1 %v20250_v31  ;;  %v20220_v31 = vld [vmem:[#allocation23 + $0xa4] ss:$8 sps:$4 sm:$0xff]  }
 0xa16   :  { %v19082_v45 = vadd.f32 %v19081_v36, %v19080_v32  ;;  %v4804_v55 = vadd.f32 %v19101_v49, %v4763_v17  ;;  %v20248_v32 = vld [vmem:[#allocation22 + $0x240] ss:$8 sps:$4 sm:$0xff]   ;;  %v20254_v36 = vld [vmem:[#allocation22 + $0x230] ss:$8 sps:$4 sm:$0xff]   ;;  %v20286_v49 = vld [vmem:[#allocation22 + $0x2e4] ss:$8 sps:$4 sm:$0xff]  }
 0xa17   :  { %v20272_v17 = vld [vmem:[#allocation22 + $0x200] ss:$8 sps:$4 sm:$0xff]  }
 0xa18   :  { %v4766_v21 = vadd.f32 %v19082_v45, %v3398_v42  ;;  %6401 = vmatpush1.bf16.msra.mxu1 %v20248_v32  ;;  %v20260_v42 = vld [vmem:[#allocation22 + $0x220] ss:$8 sps:$4 sm:$0xff]   ;;  %v20266_v45 = vld [vmem:[#allocation22 + $0x210] ss:$8 sps:$4 sm:$0xff]  }
 0xa19   :  { %6402 = vmatprep.subr.bf16.mxu1 %v20256_v33  ;;  %v20218_v32 = vld [vmem:[#allocation23 + $0xa0] ss:$8 sps:$4 sm:$0xff]   ;;  %v20223_v33 = vld [vmem:[#allocation23 + $0x94] ss:$8 sps:$4 sm:$0xff]  }
 0xa1a   :  { %v4807_v56 = vadd.f32 %v19104_v50, %v4766_v21  ;;  %v20280_v21 = vld [vmem:[#allocation22 + $0x2f4] ss:$8 sps:$4 sm:$0xff]   ;;  %v20284_v50 = vld [vmem:[#allocation22 + $0x2e0] ss:$8 sps:$4 sm:$0xff]  }
 0xa1c   :  { %6403 = vmatpush1.bf16.msra.mxu1 %v20254_v36  ;;  %v20221_v36 = vld [vmem:[#allocation23 + $0x90] ss:$8 sps:$4 sm:$0xff]  }
 0xa1d   :  { %6404 = vmatprep.subr.bf16.mxu1 %v20262_v37  ;;  %v20226_v37 = vld [vmem:[#allocation23 + $0x84] ss:$8 sps:$4 sm:$0xff]  }
 0xa20   :  { %6405 = vmatpush1.bf16.msra.mxu1 %v20260_v42  ;;  %v20224_v42 = vld [vmem:[#allocation23 + $0x80] ss:$8 sps:$4 sm:$0xff]  }
 0xa21   :  { %6406 = vmatprep.subr.bf16.mxu1 %v20268_v44  ;;  %v20229_v44 = vld [vmem:[#allocation23 + $0x274] ss:$8 sps:$4 sm:$0xff]  }
 0xa24   :  { %6407 = vmatpush1.bf16.msra.mxu1 %v20266_v45  ;;  %v20227_v45 = vld [vmem:[#allocation23 + $0x270] ss:$8 sps:$4 sm:$0xff]  }
 0xa25   :  { %6408 = vmatprep.subr.bf16.mxu1 %v20274_v7  ;;  %v20235_v7 = vld [vmem:[#allocation23 + $0x264] ss:$8 sps:$4 sm:$0xff]  }
 0xa28   :  { %6409 = vmatpush1.bf16.msra.mxu1 %v20272_v17  ;;  %v20304_v17 = vld [vmem:[#allocation22 + $0x2b4] ss:$8 sps:$4 sm:$0xff]  }
 0xa29   :  { %6410 = vmatprep.subr.bf16.mxu1 %v20280_v21  ;;  %v20302_v21 = vld [vmem:[#allocation22 + $0x2b0] ss:$8 sps:$4 sm:$0xff]  }
 0xa2f   :  { %v4844_v47 = vpop.f32.mrf.mxu1 }
 0xa30   :  { %v4845_v58 = vadd.f32 %v4844_v47, %v4804_v55  ;;  %v20278_v47 = vld [vmem:[#allocation22 + $0x2f0] ss:$8 sps:$4 sm:$0xff]  }
 0xa31   :  { %v19265_v54 = vpop.f32.mrf.mxu1  ;;  %6411 = vmatpush2.bf16.msra.mxu1 %v20278_v47  ;;  %v20290_v55 = vld [vmem:[#allocation22 + $0x2d0] ss:$8 sps:$4 sm:$0xff]   ;;  %v20233_v47 = vld [vmem:[#allocation23 + $0x260] ss:$8 sps:$4 sm:$0xff]  }
 0xa32   :  { %6412 = vmatprep.subr.bf16.mxu1 %v20286_v49  ;;  %v20292_v54 = vld [vmem:[#allocation22 + $0x2d4] ss:$8 sps:$4 sm:$0xff]  }
 0xa33   :  { %v4847_v57 = vpop.f32.mrf.mxu1  ;;  %v20241_v49 = vld [vmem:[#allocation23 + $0x254] ss:$8 sps:$4 sm:$0xff]  }
 0xa34   :  { %v4848_v59 = vadd.f32 %v4847_v57, %v4807_v56  ;;  %v20298_v57 = vld [vmem:[#allocation22 + $0x2c4] ss:$8 sps:$4 sm:$0xff]  }
 0xa35   :  { %v19266_v60 = vpop.f32.mrf.mxu1  ;;  %6413 = vmatpush2.bf16.msra.mxu1 %v20284_v50  ;;  %v20310_v50 = vld [vmem:[#allocation22 + $0x2a4] ss:$8 sps:$4 sm:$0xff]  }
 0xa36   :  { %v4855_v63 = vpack.c.bf16 %v4848_v59, %v4845_v58  ;;  %6414 = vmatprep.subr.bf16.mxu1 %v20292_v54  ;;  %v20296_v58 = vld [vmem:[#allocation22 + $0x2c0] ss:$8 sps:$4 sm:$0xff]  }
 0xa37   :  { %v20308_v54 = vld [vmem:[#allocation22 + $0x2a0] ss:$8 sps:$4 sm:$0xff]  }
 0xa38   :  { %19268 = vmatpush3.bf16.msra.mxu0 %v4855_v63 }
 0xa39   :  { %5687 = vmatprep.subr.bf16.mxu0 %v20181_v3  ;;  %6415 = vmatpush2.bf16.msra.mxu1 %v20290_v55  ;;  %v20206_v3 = vld [vmem:[#allocation23 + $0xe0] ss:$8 sps:$4 sm:$0xff]   ;;  %v20239_v55 = vld [vmem:[#allocation23 + $0x250] ss:$8 sps:$4 sm:$0xff]  }
 0xa3a   :  { %6416 = vmatprep.subr.bf16.mxu1 %v20298_v57  ;;  %v20314_v57 = vld [vmem:[#allocation22 + $0x290] ss:$8 sps:$4 sm:$0xff]  }
 0xa3d   :  { %6417 = vmatpush2.bf16.msra.mxu1 %v20296_v58  ;;  %v20316_v58 = vld [vmem:[#allocation22 + $0x294] ss:$8 sps:$4 sm:$0xff]  }
 0xa3e   :  { %6418 = vmatprep.subr.bf16.mxu1 %v20304_v17  ;;  %v23544_v17 = vld [vmem:[#allocation2 + $0xc] ss:$44 sps:$4 sm:$0xff]  }
 0xa41   :  { %6419 = vmatpush2.bf16.msra.mxu1 %v20302_v21  ;;  %v20335_v21 = vld [vmem:[#allocation22 + $0x160] ss:$8 sps:$4 sm:$0xff]  }
 0xa42   :  { %6420 = vmatprep.subr.bf16.mxu1 %v20310_v50  ;;  %v20346_v50 = vld [vmem:[#allocation28 + $0x154] ss:$8 sps:$4 sm:$0xff]  }
 0xa45   :  { %6421 = vmatpush2.bf16.msra.mxu1 %v20308_v54  ;;  %v20341_v54 = vld [vmem:[#allocation22 + $0x150] ss:$8 sps:$4 sm:$0xff]  }
 0xa46   :  { %6422 = vmatprep.subr.bf16.mxu1 %v20316_v58  ;;  %v20347_v58 = vld [vmem:[#allocation22 + $0x140] ss:$8 sps:$4 sm:$0xff]  }
 0xa49   :  { %6423 = vmatpush2.bf16.msra.mxu1 %v20314_v57  ;;  %v20352_v57 = vld [vmem:[#allocation28 + $0x144] ss:$8 sps:$4 sm:$0xff]  }
 0xac4   :  { %v4890_v62 = vpop.f32.mrf.mxu0 }
 0xac5   :  { %v4897_v6 = vmul.f32 0.0625, %v4890_v62 }
 0xac6   :  { %v4892_v41 = vpop.f32.mrf.mxu0 }
 0xac7   :  { %v4899_v8 = vsel %vm23326_vm7, %v4897_v6, -1e+30  ;;  %v20179_v41 = vld [vmem:[#allocation23 + $0x70] ss:$8 sps:$4 sm:$0xff]  }
 0xac8   :  { %v4893_v40 = vpop.f32.mrf.mxu0  ;;  %v4901_v10 = vsel %vm661_vm11, %v4899_v8, -inf }
 0xac9   :  { %v4898_v11 = vmul.f32 0.0625, %v4893_v40  ;;  %4902 = vmax.xlane.f32.xlu1 %v4901_v10  ;;  %v20184_v40 = vld [vmem:[#allocation23 + $0x64] ss:$8 sps:$4 sm:$0xff]   ;;  %v20182_v10 = vld [vmem:[#allocation23 + $0x60] ss:$8 sps:$4 sm:$0xff]  }
 0xaca   :  { %v4895_v12 = vpop.f32.mrf.mxu0 }
 0xacb   :  { %v4900_v13 = vsel %vm23331_vm10, %v4898_v11, -1e+30  ;;  %v20187_v11 = vld [vmem:[#allocation23 + $0x54] ss:$8 sps:$4 sm:$0xff]   ;;  %v20185_v12 = vld [vmem:[#allocation23 + $0x50] ss:$8 sps:$4 sm:$0xff]  }
 0xacc   :  { %v4904_v14 = vsel %vm661_vm11, %v4900_v13, -inf }
 0xacd   :  { %4905 = vmax.xlane.f32.xlu1 %v4904_v14  ;;  %v20188_v14 = vld [vmem:[#allocation23 + $0x40] ss:$8 sps:$4 sm:$0xff]  }
 0xb52   :  { %v4903_v15 = vpop.xlane.xlu1 %4902 }
 0xb53   :  { %v4907_v16 = vsub.f32 %v4899_v8, %v4903_v15  ;;  %v20193_v15 = vld [vmem:[#allocation23 + $0x34] ss:$8 sps:$4 sm:$0xff]  }
 0xb55   :  { %v4909_v2 = vmul.f32 1.442695, %v4907_v16  ;;  %v20191_v16 = vld [vmem:[#allocation23 + $0x30] ss:$8 sps:$4 sm:$0xff]  }
 0xb56   :  { %v4906_v46 = vpop.xlane.xlu1 %4905 }
 0xb57   :  { %22348 = vpow2.f32 %v4909_v2  ;;  %v4908_v19 = vsub.f32 %v4900_v13, %v4906_v46  ;;  %v20190_v13 = vld [vmem:[#allocation23 + $0x44] ss:$8 sps:$4 sm:$0xff]   ;;  %v20194_v46 = vld [vmem:[#allocation23 + $0x20] ss:$8 sps:$4 sm:$0xff]  }
 0xb58   :  { %v20196_v2 = vld [vmem:[#allocation23 + $0x24] ss:$8 sps:$4 sm:$0xff]  }
 0xb59   :  { %v4911_v20 = vmul.f32 1.442695, %v4908_v19  ;;  %v20199_v19 = vld [vmem:[#allocation23 + $0x14] ss:$8 sps:$4 sm:$0xff]  }
 0xb5b   :  { %22350 = vpow2.f32 %v4911_v20  ;;  %v20202_v20 = vld [vmem:[#allocation23 + $0x4] ss:$8 sps:$4 sm:$0xff]  }
 0xb64   :  { %v22349_v22 = vpop.eup %22348 }
 0xb65   :  { %v4913_v38 = vsel %vm661_vm11, %v22349_v22, 0.0 }
 0xb66   :  { %4914 = vadd.xlane.f32.xlu1 %v4913_v38  ;;  %v20205_v38 = vld [vmem:[#allocation23 + $0xf4] ss:$8 sps:$4 sm:$0xff]  }
 0xb68   :  { %v22351_v39 = vpop.eup %22350 }
 0xb69   :  { %v4916_v24 = vsel %vm661_vm11, %v22351_v39, 0.0 }
 0xb6a   :  { %4917 = vadd.xlane.f32.xlu1 %v4916_v24  ;;  %v20208_v24 = vld [vmem:[#allocation23 + $0xe4] ss:$8 sps:$4 sm:$0xff]  }
 0xbef   :  { %v4915_v56 = vpop.xlane.xlu1 %4914 }
 0xbf0   :  { %22352 = vrcp.f32 %v4915_v56  ;;  %v20247_v56 = vld [vmem:[#allocation23 + $0x244] ss:$8 sps:$4 sm:$0xff]  }
 0xbf3   :  { %v4918_v59 = vpop.xlane.xlu1 %4917 }
 0xbf4   :  { %22354 = vrcp.f32 %v4918_v59  ;;  %v20245_v59 = vld [vmem:[#allocation23 + $0x240] ss:$8 sps:$4 sm:$0xff]  }
 0xbfd   :  { %v22353_v60 = vpop.eup %22352 }
 0xbfe   :  { %v4921_v62 = vmul.f32 %v22353_v60, %v22349_v22  ;;  %v20200_v22 = vld [vmem:[#allocation23] ss:$8 sps:$4 sm:$0xff]   ;;  %v20253_v60 = vld [vmem:[#allocation23 + $0x234] ss:$8 sps:$4 sm:$0xff]  }
 0xc01   :  { %v22355_v63 = vpop.eup %22354 }
 0xc02   :  { %v4922_v6 = vmul.f32 %v22355_v63, %v22351_v39  ;;  %v20203_v39 = vld [vmem:[#allocation23 + $0xf0] ss:$8 sps:$4 sm:$0xff]   ;;  %v20320_v63 = vld [vmem:[#allocation22 + $0x280] ss:$8 sps:$4 sm:$0xff]  }
 0xc04   :  { %v4923_v8 = vpack.c.bf16 %v4922_v6, %v4921_v62  ;;  %v20251_v62 = vld [vmem:[#allocation23 + $0x230] ss:$8 sps:$4 sm:$0xff]   ;;  %v20259_v6 = vld [vmem:[#allocation23 + $0x224] ss:$8 sps:$4 sm:$0xff]  }
 0xc06   :  { %19270 = vmatmul.mubr.msk.bf16.vlgmr.msra.gmra.mxu0 %vm661_vm11, %v4923_v8  ;;  %v20257_v8 = vld [vmem:[#allocation23 + $0x220] ss:$8 sps:$4 sm:$0xff]  }
 0xc07   :  { %5688 = vmatpush1.bf16.msra.mxu0 %v20179_v41  ;;  %5719 = vmatprep.mubr.bf16.mxu0 %v23491_v5  ;;  %v20197_v5 = vld [vmem:[#allocation23 + $0x10] ss:$8 sps:$4 sm:$0xff]  }
 0xc08   :  { %5689 = vmatprep.subr.bf16.mxu0 %v20184_v40  ;;  %v20331_v41 = vld [vmem:[#allocation28 + $0x174] ss:$8 sps:$4 sm:$0xff]  }
 0xc09   :  { %v20265_v40 = vld [vmem:[#allocation23 + $0x214] ss:$8 sps:$4 sm:$0xff]  }
 0xc0b   :  { %5690 = vmatpush1.bf16.msra.mxu0 %v20182_v10  ;;  %v20263_v10 = vld [vmem:[#allocation23 + $0x210] ss:$8 sps:$4 sm:$0xff]  }
 0xc0c   :  { %5691 = vmatprep.subr.bf16.mxu0 %v20187_v11  ;;  %v20271_v11 = vld [vmem:[#allocation23 + $0x204] ss:$8 sps:$4 sm:$0xff]  }
 0xc0f   :  { %5692 = vmatpush1.bf16.msra.mxu0 %v20185_v12  ;;  %v20269_v12 = vld [vmem:[#allocation23 + $0x200] ss:$8 sps:$4 sm:$0xff]  }
 0xc10   :  { %5693 = vmatprep.subr.bf16.mxu0 %v20190_v13  ;;  %v20277_v13 = vld [vmem:[#allocation23 + $0x2f4] ss:$8 sps:$4 sm:$0xff]  }
 0xc13   :  { %5694 = vmatpush1.bf16.msra.mxu0 %v20188_v14  ;;  %v20275_v14 = vld [vmem:[#allocation23 + $0x2f0] ss:$8 sps:$4 sm:$0xff]  }
 0xc14   :  { %5695 = vmatprep.subr.bf16.mxu0 %v20193_v15  ;;  %v20283_v15 = vld [vmem:[#allocation23 + $0x2e4] ss:$8 sps:$4 sm:$0xff]  }
 0xc17   :  { %5696 = vmatpush1.bf16.msra.mxu0 %v20191_v16  ;;  %v20281_v16 = vld [vmem:[#allocation23 + $0x2e0] ss:$8 sps:$4 sm:$0xff]  }
 0xc18   :  { %5697 = vmatprep.subr.bf16.mxu0 %v20196_v2  ;;  %v20289_v2 = vld [vmem:[#allocation23 + $0x2d4] ss:$8 sps:$4 sm:$0xff]  }
 0xc1b   :  { %5698 = vmatpush1.bf16.msra.mxu0 %v20194_v46  ;;  %v20287_v46 = vld [vmem:[#allocation23 + $0x2d0] ss:$8 sps:$4 sm:$0xff]  }
 0xc1c   :  { %5699 = vmatprep.subr.bf16.mxu0 %v20199_v19  ;;  %v20295_v19 = vld [vmem:[#allocation23 + $0x2c4] ss:$8 sps:$4 sm:$0xff]  }
 0xc1f   :  { %5700 = vmatpush1.bf16.msra.mxu0 %v20197_v5  ;;  %v20293_v5 = vld [vmem:[#allocation23 + $0x2c0] ss:$8 sps:$4 sm:$0xff]  }
 0xc20   :  { %5701 = vmatprep.subr.bf16.mxu0 %v20202_v20  ;;  %v20301_v20 = vld [vmem:[#allocation23 + $0x2b4] ss:$8 sps:$4 sm:$0xff]  }
 0xc23   :  { %5702 = vmatpush1.bf16.msra.mxu0 %v20200_v22  ;;  %v20299_v22 = vld [vmem:[#allocation23 + $0x2b0] ss:$8 sps:$4 sm:$0xff]  }
 0xc24   :  { %5703 = vmatprep.subr.bf16.mxu0 %v20205_v38  ;;  %v20307_v38 = vld [vmem:[#allocation23 + $0x2a4] ss:$8 sps:$4 sm:$0xff]  }
 0xc27   :  { %5704 = vmatpush2.bf16.msra.mxu0 %v20203_v39  ;;  %v20305_v39 = vld [vmem:[#allocation23 + $0x2a0] ss:$8 sps:$4 sm:$0xff]  }
 0xc28   :  { %5705 = vmatprep.subr.bf16.mxu0 %v20208_v24  ;;  %v20313_v24 = vld [vmem:[#allocation23 + $0x294] ss:$8 sps:$4 sm:$0xff]  }
 0xc2b   :  { %5706 = vmatpush2.bf16.msra.mxu0 %v20206_v3  ;;  %v20311_v3 = vld [vmem:[#allocation23 + $0x290] ss:$8 sps:$4 sm:$0xff]  }
 0xc2c   :  { %5707 = vmatprep.subr.bf16.mxu0 %v20211_v9  ;;  %v20319_v9 = vld [vmem:[#allocation23 + $0x284] ss:$8 sps:$4 sm:$0xff]  }
 0xc2f   :  { %5708 = vmatpush2.bf16.msra.mxu0 %v20209_v27  ;;  %v20317_v27 = vld [vmem:[#allocation23 + $0x280] ss:$8 sps:$4 sm:$0xff]  }
 0xc30   :  { %5709 = vmatprep.subr.bf16.mxu0 %v20214_v28  ;;  %v20328_v28 = vld [vmem:[#allocation22 + $0x174] ss:$8 sps:$4 sm:$0xff]  }
 0xc33   :  { %5710 = vmatpush2.bf16.msra.mxu0 %v20212_v43 }
 0xc34   :  { %5711 = vmatprep.subr.bf16.mxu0 %v20217_v29 }
 0xc37   :  { %5712 = vmatpush2.bf16.msra.mxu0 %v20215_v30 }
 0xc38   :  { %5713 = vmatprep.subr.bf16.mxu0 %v20220_v31 }
 0xc3b   :  { %5714 = vmatpush2.bf16.msra.mxu0 %v20218_v32 }
 0xc3c   :  { %5715 = vmatprep.subr.bf16.mxu0 %v20223_v33 }
 0xc3f   :  { %5716 = vmatpush2.bf16.msra.mxu0 %v20221_v36  ;;  %v20326_v36 = vld [vmem:[#allocation22 + $0x170] ss:$8 sps:$4 sm:$0xff]  }
 0xc40   :  { %5717 = vmatprep.subr.bf16.mxu0 %v20226_v37  ;;  %v20329_v37 = vld [vmem:[#allocation28 + $0x170] ss:$8 sps:$4 sm:$0xff]  }
 0xc43   :  { %5718 = vmatpush2.bf16.msra.mxu0 %v20224_v42  ;;  %v23536_v42 = vld [vmem:[#allocation2 + $0x10] ss:$44 sps:$4 sm:$0xff]  }
 0xc44   :  { %5773 = vmatprep.subr.bf16.mxu0 %v20229_v44 }
 0xc46   :  { %5720 = vmatmul.mubr.bf16.vlgmr.msra.gmra.mxu0 %v23506_v4  ;;  %v20322_v4 = vld [vmem:[#allocation22 + $0x284] ss:$8 sps:$4 sm:$0xff]  }
 0xc47   :  { %5774 = vmatpush1.bf16.msra.mxu0 %v20227_v45  ;;  %6424 = vmatprep.subr.bf16.mxu1 %v20322_v4  ;;  %v20337_v45 = vld [vmem:[#allocation22 + $0x164] ss:$8 sps:$4 sm:$0xff]   ;;  %v20358_v4 = vld [vmem:[#allocation28 + $0x134] ss:$8 sps:$4 sm:$0xff]  }
 0xc48   :  { %5775 = vmatprep.subr.bf16.mxu0 %v20235_v7  ;;  %6425 = vmatpush2.bf16.msra.mxu1 %v20320_v63  ;;  %v20340_v7 = vld [vmem:[#allocation28 + $0x164] ss:$8 sps:$4 sm:$0xff]   ;;  %v20356_v63 = vld [vmem:[#allocation28 + $0x130] ss:$8 sps:$4 sm:$0xff]  }
 0xc49   :  { %7348 = vmatprep.subr.bf16.mxu1 %v20331_v41  ;;  %v20359_v41 = vld [vmem:[#allocation22 + $0x120] ss:$8 sps:$4 sm:$0xff]  }
 0xc4b   :  { %5776 = vmatpush1.bf16.msra.mxu0 %v20233_v47  ;;  %v20338_v47 = vld [vmem:[#allocation28 + $0x160] ss:$8 sps:$4 sm:$0xff]  }
 0xc4c   :  { %5777 = vmatprep.subr.bf16.mxu0 %v20241_v49  ;;  %v20343_v49 = vld [vmem:[#allocation22 + $0x154] ss:$8 sps:$4 sm:$0xff]  }
 0xc4f   :  { %5778 = vmatpush1.bf16.msra.mxu0 %v20239_v55  ;;  %v20344_v55 = vld [vmem:[#allocation28 + $0x150] ss:$8 sps:$4 sm:$0xff]  }
 0xc50   :  { %5779 = vmatprep.subr.bf16.mxu0 %v20247_v56  ;;  %v20349_v56 = vld [vmem:[#allocation22 + $0x144] ss:$8 sps:$4 sm:$0xff]  }
 0xc53   :  { %5780 = vmatpush1.bf16.msra.mxu0 %v20245_v59  ;;  %v20350_v59 = vld [vmem:[#allocation28 + $0x140] ss:$8 sps:$4 sm:$0xff]  }
 0xc54   :  { %5781 = vmatprep.subr.bf16.mxu0 %v20253_v60  ;;  %v20353_v60 = vld [vmem:[#allocation22 + $0x130] ss:$8 sps:$4 sm:$0xff]  }
 0xc57   :  { %5782 = vmatpush1.bf16.msra.mxu0 %v20251_v62  ;;  %v20361_v62 = vld [vmem:[#allocation22 + $0x124] ss:$8 sps:$4 sm:$0xff]  }
 0xc58   :  { %5783 = vmatprep.subr.bf16.mxu0 %v20259_v6  ;;  %v20364_v6 = vld [vmem:[#allocation28 + $0x124] ss:$8 sps:$4 sm:$0xff]  }
 0xc5b   :  { %5784 = vmatpush1.bf16.msra.mxu0 %v20257_v8  ;;  %v20362_v8 = vld [vmem:[#allocation28 + $0x120] ss:$8 sps:$4 sm:$0xff]  }
 0xc5c   :  { %5785 = vmatprep.subr.bf16.mxu0 %v20265_v40  ;;  %v20367_v40 = vld [vmem:[#allocation22 + $0x114] ss:$8 sps:$4 sm:$0xff]  }
 0xc5f   :  { %5786 = vmatpush1.bf16.msra.mxu0 %v20263_v10  ;;  %v20370_v10 = vld [vmem:[#allocation28 + $0x114] ss:$8 sps:$4 sm:$0xff]  }
 0xc60   :  { %5787 = vmatprep.subr.bf16.mxu0 %v20271_v11  ;;  %v20365_v11 = vld [vmem:[#allocation22 + $0x110] ss:$8 sps:$4 sm:$0xff]  }
 0xc63   :  { %5788 = vmatpush1.bf16.msra.mxu0 %v20269_v12  ;;  %v20368_v12 = vld [vmem:[#allocation28 + $0x110] ss:$8 sps:$4 sm:$0xff]  }
 0xc64   :  { %5789 = vmatprep.subr.bf16.mxu0 %v20277_v13  ;;  %v20373_v13 = vld [vmem:[#allocation22 + $0x104] ss:$8 sps:$4 sm:$0xff]  }
 0xc67   :  { %5790 = vmatpush2.bf16.msra.mxu0 %v20275_v14  ;;  %v20376_v14 = vld [vmem:[#allocation28 + $0x104] ss:$8 sps:$4 sm:$0xff]  }
 0xc68   :  { %5791 = vmatprep.subr.bf16.mxu0 %v20283_v15  ;;  %v20371_v15 = vld [vmem:[#allocation22 + $0x100] ss:$8 sps:$4 sm:$0xff]  }
 0xc6b   :  { %5792 = vmatpush2.bf16.msra.mxu0 %v20281_v16  ;;  %v20374_v16 = vld [vmem:[#allocation28 + $0x100] ss:$8 sps:$4 sm:$0xff]  }
 0xc6c   :  { %5793 = vmatprep.subr.bf16.mxu0 %v20289_v2  ;;  %v20379_v2 = vld [vmem:[#allocation22 + $0x1f4] ss:$8 sps:$4 sm:$0xff]  }
 0xc6f   :  { %5794 = vmatpush2.bf16.msra.mxu0 %v20287_v46  ;;  %v20382_v46 = vld [vmem:[#allocation28 + $0x1f4] ss:$8 sps:$4 sm:$0xff]  }
 0xc70   :  { %5795 = vmatprep.subr.bf16.mxu0 %v20295_v19  ;;  %v20377_v19 = vld [vmem:[#allocation22 + $0x1f0] ss:$8 sps:$4 sm:$0xff]  }
 0xc73   :  { %5796 = vmatpush2.bf16.msra.mxu0 %v20293_v5  ;;  %v20380_v5 = vld [vmem:[#allocation28 + $0x1f0] ss:$8 sps:$4 sm:$0xff]  }
 0xc74   :  { %5797 = vmatprep.subr.bf16.mxu0 %v20301_v20  ;;  %v20385_v20 = vld [vmem:[#allocation22 + $0x1e4] ss:$8 sps:$4 sm:$0xff]  }
 0xc77   :  { %5798 = vmatpush2.bf16.msra.mxu0 %v20299_v22  ;;  %v20388_v22 = vld [vmem:[#allocation28 + $0x1e4] ss:$8 sps:$4 sm:$0xff]  }
 0xc78   :  { %5799 = vmatprep.subr.bf16.mxu0 %v20307_v38  ;;  %v20383_v38 = vld [vmem:[#allocation22 + $0x1e0] ss:$8 sps:$4 sm:$0xff]  }
 0xc7b   :  { %5800 = vmatpush2.bf16.msra.mxu0 %v20305_v39  ;;  %v20386_v39 = vld [vmem:[#allocation28 + $0x1e0] ss:$8 sps:$4 sm:$0xff]  }
 0xc7c   :  { %5801 = vmatprep.subr.bf16.mxu0 %v20313_v24  ;;  %v20391_v24 = vld [vmem:[#allocation22 + $0x1d4] ss:$8 sps:$4 sm:$0xff]  }
 0xc7f   :  { %5802 = vmatpush2.bf16.msra.mxu0 %v20311_v3  ;;  %v20394_v3 = vld [vmem:[#allocation28 + $0x1d4] ss:$8 sps:$4 sm:$0xff]  }
 0xc80   :  { %5803 = vmatprep.subr.bf16.mxu0 %v20319_v9  ;;  %v20389_v9 = vld [vmem:[#allocation22 + $0x1d0] ss:$8 sps:$4 sm:$0xff]  }
 0xc83   :  { %5804 = vmatpush2.bf16.msra.mxu0 %v20317_v27  ;;  %v20392_v27 = vld [vmem:[#allocation28 + $0x1d0] ss:$8 sps:$4 sm:$0xff]  }
 0xc84   :  { %6351 = vmatprep.subr.bf16.mxu0 %v20328_v28  ;;  %v20397_v28 = vld [vmem:[#allocation22 + $0x1c4] ss:$8 sps:$4 sm:$0xff]  }
 0xcc6   :  { %v4961_v43 = vpop.f32.mrf.mxu0 }
 0xcc7   :  { %v19047_v29 = vpack.c.bf16 %v4961_v43, %v4961_v43  ;;  %v20400_v43 = vld [vmem:[#allocation28 + $0x1c4] ss:$8 sps:$4 sm:$0xff]  }
 0xcc8   :  { %v19271_v30 = vpop.f32.mrf.mxu0 }
 0xcc9   :  { %4976 = vst [vmem:[#allocation2 + $0x14] sm:$0xf] %v19047_v29  ;;  %v20395_v29 = vld [vmem:[#allocation22 + $0x1c0] ss:$8 sps:$4 sm:$0xff]  }
 0xcca   :  { %v4964_v31 = vpop.f32.mrf.mxu0  ;;  %v20398_v30 = vld [vmem:[#allocation28 + $0x1c0] ss:$8 sps:$4 sm:$0xff]  }
 0xccb   :  { %v19048_v32 = vpack.c.bf16 %v4964_v31, %v4964_v31  ;;  %v20403_v31 = vld [vmem:[#allocation22 + $0x1b4] ss:$8 sps:$4 sm:$0xff]  }
 0xccc   :  { %v19272_v33 = vpop.f32.mrf.mxu0 }
 0xccd   :  { %4977 = vst [vmem:[#allocation2 + $0x40] sm:$0xf] %v19048_v32  ;;  %v20406_v32 = vld [vmem:[#allocation28 + $0x1b4] ss:$8 sps:$4 sm:$0xff]  }
 0xcce   :  { %v20401_v33 = vld [vmem:[#allocation22 + $0x1b0] ss:$8 sps:$4 sm:$0xff]  }
 0xcd4   :  { %v23538_v44 = vld [vmem:[#allocation2 + $0x14] ss:$44 sps:$4 sm:$0xff]  }
 0xcd5   :  { %5805 = vmatprep.mubr.bf16.mxu0 %v23538_v44  ;;  %6426 = vmatprep.mubr.bf16.mxu1 %v23538_v44 }
 0xcd6   :  { %5806 = vmatmul.mubr.bf16.vlgmr.msra.gmra.mxu0 %v23536_v42  ;;  %6427 = vmatmul.mubr.bf16.vlgmr.msra.gmra.mxu1 %v23536_v42 }
 0xcd7   :  { %6352 = vmatpush1.bf16.msra.mxu0 %v20326_v36  ;;  %7349 = vmatpush1.bf16.msra.mxu1 %v20329_v37  ;;  %v20404_v36 = vld [vmem:[#allocation28 + $0x1b0] ss:$8 sps:$4 sm:$0xff]   ;;  %v20409_v37 = vld [vmem:[#allocation22 + $0x1a4] ss:$8 sps:$4 sm:$0xff]  }
 0xcd8   :  { %6383 = vmatprep.mubr.bf16.mxu0 %v23485_v18  ;;  %7380 = vmatprep.mubr.bf16.mxu1 %v23544_v17  ;;  %v20355_v18 = vld [vmem:[#allocation22 + $0x134] ss:$8 sps:$4 sm:$0xff]  }
 0xcd9   :  { %6353 = vmatprep.subr.bf16.mxu0 %v20337_v45  ;;  %7350 = vmatprep.subr.bf16.mxu1 %v20340_v7  ;;  %v20412_v45 = vld [vmem:[#allocation28 + $0x1a4] ss:$8 sps:$4 sm:$0xff]  }
 0xcda   :  { %v20407_v7 = vld [vmem:[#allocation22 + $0x1a0] ss:$8 sps:$4 sm:$0xff]  }
 0xcdb   :  { %6354 = vmatpush1.bf16.msra.mxu0 %v20335_v21  ;;  %7351 = vmatpush1.bf16.msra.mxu1 %v20338_v47  ;;  %v20410_v21 = vld [vmem:[#allocation28 + $0x1a0] ss:$8 sps:$4 sm:$0xff]   ;;  %v20415_v47 = vld [vmem:[#allocation22 + $0x194] ss:$8 sps:$4 sm:$0xff]  }
 0xcdc   :  { %6355 = vmatprep.subr.bf16.mxu0 %v20343_v49  ;;  %7352 = vmatprep.subr.bf16.mxu1 %v20346_v50  ;;  %v20418_v49 = vld [vmem:[#allocation28 + $0x194] ss:$8 sps:$4 sm:$0xff]  }
 0xcdd   :  { %v20413_v50 = vld [vmem:[#allocation22 + $0x190] ss:$8 sps:$4 sm:$0xff]  }
 0xcdf   :  { %6356 = vmatpush1.bf16.msra.mxu0 %v20341_v54  ;;  %7353 = vmatpush1.bf16.msra.mxu1 %v20344_v55  ;;  %v20416_v54 = vld [vmem:[#allocation28 + $0x190] ss:$8 sps:$4 sm:$0xff]   ;;  %v20421_v55 = vld [vmem:[#allocation22 + $0x184] ss:$8 sps:$4 sm:$0xff]  }
 0xce0   :  { %6357 = vmatprep.subr.bf16.mxu0 %v20349_v56  ;;  %7354 = vmatprep.subr.bf16.mxu1 %v20352_v57  ;;  %v20424_v56 = vld [vmem:[#allocation28 + $0x184] ss:$8 sps:$4 sm:$0xff]  }
 0xce1   :  { %v20419_v57 = vld [vmem:[#allocation22 + $0x180] ss:$8 sps:$4 sm:$0xff]  }
 0xce3   :  { %6358 = vmatpush1.bf16.msra.mxu0 %v20347_v58  ;;  %7355 = vmatpush1.bf16.msra.mxu1 %v20350_v59  ;;  %v20422_v58 = vld [vmem:[#allocation28 + $0x180] ss:$8 sps:$4 sm:$0xff]   ;;  %v20427_v59 = vld [vmem:[#allocation28 + $0x74] ss:$8 sps:$4 sm:$0xff]  }
 0xce4   :  { %6359 = vmatprep.subr.bf16.mxu0 %v20355_v18  ;;  %7356 = vmatprep.subr.bf16.mxu1 %v20358_v4  ;;  %v20425_v18 = vld [vmem:[#allocation28 + $0x70] ss:$8 sps:$4 sm:$0xff]   ;;  %v23548_v4 = vld [vmem:[#allocation2 + $0x8] ss:$44 sps:$4 sm:$0xff]  }
 0xce7   :  { %6360 = vmatpush1.bf16.msra.mxu0 %v20353_v60  ;;  %7357 = vmatpush1.bf16.msra.mxu1 %v20356_v63  ;;  %v20433_v60 = vld [vmem:[#allocation28 + $0x64] ss:$8 sps:$4 sm:$0xff]   ;;  %v23550_v63 = vld [vmem:[#allocation2 + $0x4] ss:$44 sps:$4 sm:$0xff]  }
 0xce8   :  { %6361 = vmatprep.subr.bf16.mxu0 %v20361_v62  ;;  %7358 = vmatprep.subr.bf16.mxu1 %v20364_v6  ;;  %v22402_v62 = vld [vmem:[#allocation2 + $0x8] ss:$44 sps:$4 sm:$0xff]  }
 0xce9   :  { %v20431_v6 = vld [vmem:[#allocation28 + $0x60] ss:$8 sps:$4 sm:$0xff]  }
 0xceb   :  { %6362 = vmatpush1.bf16.msra.mxu0 %v20359_v41  ;;  %7359 = vmatpush1.bf16.msra.mxu1 %v20362_v8  ;;  %v20436_v41 = vld [vmem:[#allocation28 + $0x54] ss:$8 sps:$4 sm:$0xff]   ;;  %v20434_v8 = vld [vmem:[#allocation28 + $0x50] ss:$8 sps:$4 sm:$0xff]  }
 0xcec   :  { %6363 = vmatprep.subr.bf16.mxu0 %v20367_v40  ;;  %7360 = vmatprep.subr.bf16.mxu1 %v20370_v10  ;;  %v20439_v40 = vld [vmem:[#allocation28 + $0x44] ss:$8 sps:$4 sm:$0xff]   ;;  %v20437_v10 = vld [vmem:[#allocation28 + $0x40] ss:$8 sps:$4 sm:$0xff]  }
 0xcef   :  { %6364 = vmatpush1.bf16.msra.mxu0 %v20365_v11  ;;  %7361 = vmatpush1.bf16.msra.mxu1 %v20368_v12  ;;  %v20442_v11 = vld [vmem:[#allocation28 + $0x34] ss:$8 sps:$4 sm:$0xff]   ;;  %v20440_v12 = vld [vmem:[#allocation28 + $0x30] ss:$8 sps:$4 sm:$0xff]  }
 0xcf0   :  { %6365 = vmatprep.subr.bf16.mxu0 %v20373_v13  ;;  %7362 = vmatprep.subr.bf16.mxu1 %v20376_v14  ;;  %v20445_v13 = vld [vmem:[#allocation28 + $0x24] ss:$8 sps:$4 sm:$0xff]   ;;  %v20443_v14 = vld [vmem:[#allocation28 + $0x20] ss:$8 sps:$4 sm:$0xff]  }
 0xcf3   :  { %6366 = vmatpush1.bf16.msra.mxu0 %v20371_v15  ;;  %7363 = vmatpush1.bf16.msra.mxu1 %v20374_v16  ;;  %v20448_v15 = vld [vmem:[#allocation28 + $0x14] ss:$8 sps:$4 sm:$0xff]   ;;  %v20446_v16 = vld [vmem:[#allocation28 + $0x10] ss:$8 sps:$4 sm:$0xff]  }
 0xcf4   :  { %6367 = vmatprep.subr.bf16.mxu0 %v20379_v2  ;;  %7364 = vmatprep.subr.bf16.mxu1 %v20382_v46  ;;  %v20451_v2 = vld [vmem:[#allocation28 + $0x4] ss:$8 sps:$4 sm:$0xff]   ;;  %v20449_v46 = vld [vmem:[#allocation28] ss:$8 sps:$4 sm:$0xff]  }
 0xcf7   :  { %6368 = vmatpush2.bf16.msra.mxu0 %v20377_v19  ;;  %7365 = vmatpush2.bf16.msra.mxu1 %v20380_v5  ;;  %v20454_v19 = vld [vmem:[#allocation28 + $0xf4] ss:$8 sps:$4 sm:$0xff]   ;;  %v20452_v5 = vld [vmem:[#allocation28 + $0xf0] ss:$8 sps:$4 sm:$0xff]  }
 0xcf8   :  { %6369 = vmatprep.subr.bf16.mxu0 %v20385_v20  ;;  %7366 = vmatprep.subr.bf16.mxu1 %v20388_v22  ;;  %v20457_v20 = vld [vmem:[#allocation28 + $0xe4] ss:$8 sps:$4 sm:$0xff]   ;;  %v20455_v22 = vld [vmem:[#allocation28 + $0xe0] ss:$8 sps:$4 sm:$0xff]  }
 0xcfb   :  { %6370 = vmatpush2.bf16.msra.mxu0 %v20383_v38  ;;  %7367 = vmatpush2.bf16.msra.mxu1 %v20386_v39  ;;  %v20460_v38 = vld [vmem:[#allocation28 + $0xd4] ss:$8 sps:$4 sm:$0xff]   ;;  %v20458_v39 = vld [vmem:[#allocation28 + $0xd0] ss:$8 sps:$4 sm:$0xff]  }
 0xcfc   :  { %6371 = vmatprep.subr.bf16.mxu0 %v20391_v24  ;;  %7368 = vmatprep.subr.bf16.mxu1 %v20394_v3  ;;  %v20463_v24 = vld [vmem:[#allocation28 + $0xc4] ss:$8 sps:$4 sm:$0xff]   ;;  %v20461_v3 = vld [vmem:[#allocation28 + $0xc0] ss:$8 sps:$4 sm:$0xff]  }
 0xcff   :  { %6372 = vmatpush2.bf16.msra.mxu0 %v20389_v9  ;;  %7369 = vmatpush2.bf16.msra.mxu1 %v20392_v27  ;;  %v20466_v9 = vld [vmem:[#allocation28 + $0xb4] ss:$8 sps:$4 sm:$0xff]   ;;  %v20464_v27 = vld [vmem:[#allocation28 + $0xb0] ss:$8 sps:$4 sm:$0xff]  }
 0xd00   :  { %6373 = vmatprep.subr.bf16.mxu0 %v20397_v28  ;;  %7370 = vmatprep.subr.bf16.mxu1 %v20400_v43  ;;  %v20469_v28 = vld [vmem:[#allocation28 + $0xa4] ss:$8 sps:$4 sm:$0xff]   ;;  %v20467_v43 = vld [vmem:[#allocation28 + $0xa0] ss:$8 sps:$4 sm:$0xff]  }
 0xd03   :  { %6374 = vmatpush2.bf16.msra.mxu0 %v20395_v29  ;;  %7371 = vmatpush2.bf16.msra.mxu1 %v20398_v30  ;;  %v20472_v29 = vld [vmem:[#allocation28 + $0x94] ss:$8 sps:$4 sm:$0xff]   ;;  %v20470_v30 = vld [vmem:[#allocation28 + $0x90] ss:$8 sps:$4 sm:$0xff]  }
 0xd04   :  { %6375 = vmatprep.subr.bf16.mxu0 %v20403_v31  ;;  %7372 = vmatprep.subr.bf16.mxu1 %v20406_v32  ;;  %v20475_v31 = vld [vmem:[#allocation28 + $0x84] ss:$8 sps:$4 sm:$0xff]   ;;  %v20473_v32 = vld [vmem:[#allocation28 + $0x80] ss:$8 sps:$4 sm:$0xff]  }
 0xd07   :  { %6376 = vmatpush2.bf16.msra.mxu0 %v20401_v33  ;;  %7373 = vmatpush2.bf16.msra.mxu1 %v20404_v36  ;;  %v20478_v33 = vld [vmem:[#allocation28 + $0x274] ss:$8 sps:$4 sm:$0xff]   ;;  %v20476_v36 = vld [vmem:[#allocation28 + $0x270] ss:$8 sps:$4 sm:$0xff]  }
 0xd08   :  { %6377 = vmatprep.subr.bf16.mxu0 %v20409_v37  ;;  %7374 = vmatprep.subr.bf16.mxu1 %v20412_v45  ;;  %v23555_v37 = vld [vmem:[#allocation2] ss:$44 sps:$4 sm:$0xff]  }
 0xd09   :  { %v20481_v45 = vld [vmem:[#allocation28 + $0x264] ss:$8 sps:$4 sm:$0xff]  }
 0xd0b   :  { %6378 = vmatpush2.bf16.msra.mxu0 %v20407_v7  ;;  %7375 = vmatpush2.bf16.msra.mxu1 %v20410_v21  ;;  %v20479_v7 = vld [vmem:[#allocation28 + $0x260] ss:$8 sps:$4 sm:$0xff]   ;;  %v20484_v21 = vld [vmem:[#allocation28 + $0x254] ss:$8 sps:$4 sm:$0xff]  }
 0xd0c   :  { %6379 = vmatprep.subr.bf16.mxu0 %v20415_v47  ;;  %7376 = vmatprep.subr.bf16.mxu1 %v20418_v49  ;;  %v20482_v47 = vld [vmem:[#allocation28 + $0x250] ss:$8 sps:$4 sm:$0xff]   ;;  %v20487_v49 = vld [vmem:[#allocation28 + $0x244] ss:$8 sps:$4 sm:$0xff]  }
 0xd0f   :  { %6380 = vmatpush2.bf16.msra.mxu0 %v20413_v50  ;;  %7377 = vmatpush2.bf16.msra.mxu1 %v20416_v54  ;;  %v20485_v50 = vld [vmem:[#allocation28 + $0x240] ss:$8 sps:$4 sm:$0xff]   ;;  %v20490_v54 = vld [vmem:[#allocation28 + $0x234] ss:$8 sps:$4 sm:$0xff]  }
 0xd10   :  { %6381 = vmatprep.subr.bf16.mxu0 %v20421_v55  ;;  %7378 = vmatprep.subr.bf16.mxu1 %v20424_v56  ;;  %v20488_v55 = vld [vmem:[#allocation28 + $0x230] ss:$8 sps:$4 sm:$0xff]   ;;  %v20493_v56 = vld [vmem:[#allocation28 + $0x224] ss:$8 sps:$4 sm:$0xff]  }
 0xd13   :  { %6382 = vmatpush2.bf16.msra.mxu0 %v20419_v57  ;;  %7379 = vmatpush2.bf16.msra.mxu1 %v20422_v58  ;;  %v20491_v57 = vld [vmem:[#allocation28 + $0x220] ss:$8 sps:$4 sm:$0xff]   ;;  %v20496_v58 = vld [vmem:[#allocation28 + $0x214] ss:$8 sps:$4 sm:$0xff]  }
 0xd14   :  { %7305 = vmatprep.subr.bf16.mxu0 %v20427_v59  ;;  %v20499_v59 = vld [vmem:[#allocation28 + $0x204] ss:$8 sps:$4 sm:$0xff]  }
 0xd16   :  { %6384 = vmatmul.mubr.bf16.vlgmr.msra.gmra.mxu0 %v22402_v62  ;;  %7381 = vmatmul.mubr.bf16.vlgmr.msra.gmra.mxu1 %v23548_v4  ;;  %v20502_v62 = vld [vmem:[#allocation28 + $0x2f4] ss:$8 sps:$4 sm:$0xff]  }
 0xd17   :  { %7306 = vmatpush1.bf16.msra.mxu0 %v20425_v18  ;;  %7337 = vmatprep.mubr.bf16.mxu0 %v23550_v63  ;;  %v20497_v18 = vld [vmem:[#allocation28 + $0x200] ss:$8 sps:$4 sm:$0xff]  }
 0xd18   :  { %7307 = vmatprep.subr.bf16.mxu0 %v20433_v60  ;;  %7466 = vmatprep.mubr.bf16.mxu1 %v22988_v0  ;;  %v20574_v60 = vld [vmem:[#allocation28 + $0x374] ss:$8 sps:$4 sm:$0xff]  }
 0xd19   :  { %7434 = vmatprep.subr.bf16.mxu1 %v20574_v60  ;;  %v20545_v60 = vld [vmem:[#allocation26 + $0x100] ss:$8 sps:$4 sm:$0xff]  }
 0xd1b   :  { %7308 = vmatpush1.bf16.msra.mxu0 %v20431_v6  ;;  %v20572_v6 = vld [vmem:[#allocation28 + $0x370] ss:$8 sps:$4 sm:$0xff]  }
 0xd1c   :  { %7309 = vmatprep.subr.bf16.mxu0 %v20436_v41  ;;  %7435 = vmatpush1.bf16.msra.mxu1 %v20572_v6  ;;  %v20500_v41 = vld [vmem:[#allocation28 + $0x2f0] ss:$8 sps:$4 sm:$0xff]   ;;  %v20550_v6 = vld [vmem:[#allocation26 + $0x1f4] ss:$8 sps:$4 sm:$0xff]  }
 0xd1f   :  { %7310 = vmatpush1.bf16.msra.mxu0 %v20434_v8  ;;  %v20580_v8 = vld [vmem:[#allocation28 + $0x364] ss:$8 sps:$4 sm:$0xff]  }
 0xd20   :  { %7311 = vmatprep.subr.bf16.mxu0 %v20439_v40  ;;  %v20505_v40 = vld [vmem:[#allocation28 + $0x2e4] ss:$8 sps:$4 sm:$0xff]   ;;  %7436 = vmatprep.subr.bf16.mxu1 %v20580_v8 }
 0xd23   :  { %7312 = vmatpush1.bf16.msra.mxu0 %v20437_v10  ;;  %v20578_v10 = vld [vmem:[#allocation28 + $0x360] ss:$8 sps:$4 sm:$0xff]  }
 0xd24   :  { %7313 = vmatprep.subr.bf16.mxu0 %v20442_v11  ;;  %7437 = vmatpush1.bf16.msra.mxu1 %v20578_v10  ;;  %v20503_v11 = vld [vmem:[#allocation28 + $0x2e0] ss:$8 sps:$4 sm:$0xff]   ;;  %v5764_v10 = vpop.f32.mrf.mxu1 }
 0xd27   :  { %7314 = vmatpush1.bf16.msra.mxu0 %v20440_v12  ;;  %v20586_v12 = vld [vmem:[#allocation28 + $0x354] ss:$8 sps:$4 sm:$0xff]  }
 0xd28   :  { %7315 = vmatprep.subr.bf16.mxu0 %v20445_v13  ;;  %v20508_v13 = vld [vmem:[#allocation28 + $0x2d4] ss:$8 sps:$4 sm:$0xff]   ;;  %7438 = vmatprep.subr.bf16.mxu1 %v20586_v12 }
 0xd2b   :  { %7316 = vmatpush1.bf16.msra.mxu0 %v20443_v14  ;;  %v20584_v14 = vld [vmem:[#allocation28 + $0x350] ss:$8 sps:$4 sm:$0xff]  }
 0xd2c   :  { %7317 = vmatprep.subr.bf16.mxu0 %v20448_v15  ;;  %7439 = vmatpush1.bf16.msra.mxu1 %v20584_v14  ;;  %v20506_v15 = vld [vmem:[#allocation28 + $0x2d0] ss:$8 sps:$4 sm:$0xff]   ;;  %v5766_v14 = vpop.f32.mrf.mxu1 }
 0xd2f   :  { %7318 = vmatpush1.bf16.msra.mxu0 %v20446_v16  ;;  %v20592_v16 = vld [vmem:[#allocation28 + $0x344] ss:$8 sps:$4 sm:$0xff]  }
 0xd30   :  { %7319 = vmatprep.subr.bf16.mxu0 %v20451_v2  ;;  %v20511_v2 = vld [vmem:[#allocation28 + $0x2c4] ss:$8 sps:$4 sm:$0xff]   ;;  %7440 = vmatprep.subr.bf16.mxu1 %v20592_v16  ;;  %v20554_v16 = vld [vmem:[#allocation26 + $0x1d0] ss:$8 sps:$4 sm:$0xff]  }
 0xd33   :  { %7320 = vmatpush1.bf16.msra.mxu0 %v20449_v46  ;;  %v20590_v46 = vld [vmem:[#allocation28 + $0x340] ss:$8 sps:$4 sm:$0xff]  }
 0xd34   :  { %7321 = vmatprep.subr.bf16.mxu0 %v20454_v19  ;;  %7441 = vmatpush1.bf16.msra.mxu1 %v20590_v46  ;;  %v20509_v19 = vld [vmem:[#allocation28 + $0x2c0] ss:$8 sps:$4 sm:$0xff]   ;;  %v5768_v46 = vpop.f32.mrf.mxu1 }
 0xd37   :  { %7322 = vmatpush2.bf16.msra.mxu0 %v20452_v5  ;;  %v20598_v5 = vld [vmem:[#allocation28 + $0x334] ss:$8 sps:$4 sm:$0xff]  }
 0xd38   :  { %7323 = vmatprep.subr.bf16.mxu0 %v20457_v20  ;;  %v20514_v20 = vld [vmem:[#allocation28 + $0x2b4] ss:$8 sps:$4 sm:$0xff]   ;;  %7442 = vmatprep.subr.bf16.mxu1 %v20598_v5  ;;  %v20557_v5 = vld [vmem:[#allocation26 + $0x1c0] ss:$8 sps:$4 sm:$0xff]  }
 0xd3b   :  { %7324 = vmatpush2.bf16.msra.mxu0 %v20455_v22  ;;  %v20596_v22 = vld [vmem:[#allocation28 + $0x330] ss:$8 sps:$4 sm:$0xff]  }
 0xd3c   :  { %7325 = vmatprep.subr.bf16.mxu0 %v20460_v38  ;;  %7443 = vmatpush1.bf16.msra.mxu1 %v20596_v22  ;;  %v20512_v38 = vld [vmem:[#allocation28 + $0x2b0] ss:$8 sps:$4 sm:$0xff]   ;;  %v5770_v22 = vpop.f32.mrf.mxu1 }
 0xd3f   :  { %7326 = vmatpush2.bf16.msra.mxu0 %v20458_v39  ;;  %v20604_v39 = vld [vmem:[#allocation28 + $0x324] ss:$8 sps:$4 sm:$0xff]  }
 0xd40   :  { %7327 = vmatprep.subr.bf16.mxu0 %v20463_v24  ;;  %v20517_v24 = vld [vmem:[#allocation28 + $0x2a4] ss:$8 sps:$4 sm:$0xff]   ;;  %7444 = vmatprep.subr.bf16.mxu1 %v20604_v39  ;;  %v20560_v39 = vld [vmem:[#allocation26 + $0x1b0] ss:$8 sps:$4 sm:$0xff]  }
 0xd43   :  { %7328 = vmatpush2.bf16.msra.mxu0 %v20461_v3  ;;  %v20602_v3 = vld [vmem:[#allocation28 + $0x320] ss:$8 sps:$4 sm:$0xff]  }
 0xd44   :  { %7329 = vmatprep.subr.bf16.mxu0 %v20466_v9  ;;  %7445 = vmatpush1.bf16.msra.mxu1 %v20602_v3  ;;  %v20515_v9 = vld [vmem:[#allocation28 + $0x2a0] ss:$8 sps:$4 sm:$0xff]   ;;  %v20565_v3 = vld [vmem:[#allocation26 + $0x1a4] ss:$8 sps:$4 sm:$0xff]  }
 0xd47   :  { %7330 = vmatpush2.bf16.msra.mxu0 %v20464_v27  ;;  %v20610_v27 = vld [vmem:[#allocation28 + $0x314] ss:$8 sps:$4 sm:$0xff]  }
 0xd48   :  { %7331 = vmatprep.subr.bf16.mxu0 %v20469_v28  ;;  %v20520_v28 = vld [vmem:[#allocation28 + $0x294] ss:$8 sps:$4 sm:$0xff]   ;;  %7446 = vmatprep.subr.bf16.mxu1 %v20610_v27 }
 0xd4b   :  { %7332 = vmatpush2.bf16.msra.mxu0 %v20467_v43  ;;  %v20608_v43 = vld [vmem:[#allocation28 + $0x310] ss:$8 sps:$4 sm:$0xff]  }
 0xd4c   :  { %7333 = vmatprep.subr.bf16.mxu0 %v20472_v29  ;;  %v20616_v29 = vld [vmem:[#allocation28 + $0x304] ss:$8 sps:$4 sm:$0xff]   ;;  %7447 = vmatpush1.bf16.msra.mxu1 %v20608_v43 }
 0xd4d   :  { %7448 = vmatprep.subr.bf16.mxu1 %v20616_v29  ;;  %v20568_v29 = vld [vmem:[#allocation26 + $0x194] ss:$8 sps:$4 sm:$0xff]  }
 0xd4f   :  { %7334 = vmatpush2.bf16.msra.mxu0 %v20470_v30  ;;  %v20614_v30 = vld [vmem:[#allocation28 + $0x300] ss:$8 sps:$4 sm:$0xff]  }
 0xd50   :  { %7335 = vmatprep.subr.bf16.mxu0 %v20475_v31  ;;  %v20518_v31 = vld [vmem:[#allocation28 + $0x290] ss:$8 sps:$4 sm:$0xff]   ;;  %7449 = vmatpush1.bf16.msra.mxu1 %v20614_v30 }
 0xd53   :  { %7336 = vmatpush2.bf16.msra.mxu0 %v20473_v32  ;;  %v20622_v32 = vld [vmem:[#allocation26 + $0x74] ss:$8 sps:$4 sm:$0xff]  }
 0xd54   :  { %7391 = vmatprep.subr.bf16.mxu0 %v20478_v33  ;;  %v20523_v33 = vld [vmem:[#allocation28 + $0x284] ss:$8 sps:$4 sm:$0xff]   ;;  %8049 = vmatprep.subr.bf16.mxu1 %v20622_v32 }
 0xd56   :  { %7338 = vmatmul.mubr.bf16.vlgmr.msra.gmra.mxu0 %v23555_v37 }
 0xd57   :  { %7392 = vmatpush1.bf16.msra.mxu0 %v20476_v36  ;;  %7423 = vmatprep.mubr.bf16.mxu0 %v23538_v44  ;;  %v20494_v44 = vld [vmem:[#allocation28 + $0x210] ss:$8 sps:$4 sm:$0xff]   ;;  %v20521_v36 = vld [vmem:[#allocation28 + $0x280] ss:$8 sps:$4 sm:$0xff]  }
 0xd58   :  { %7393 = vmatprep.subr.bf16.mxu0 %v20481_v45  ;;  %v20526_v45 = vld [vmem:[#allocation26 + $0x174] ss:$8 sps:$4 sm:$0xff]  }
 0xd5b   :  { %7394 = vmatpush1.bf16.msra.mxu0 %v20479_v7  ;;  %v20524_v7 = vld [vmem:[#allocation26 + $0x170] ss:$8 sps:$4 sm:$0xff]  }
 0xd5c   :  { %7395 = vmatprep.subr.bf16.mxu0 %v20484_v21  ;;  %v20529_v21 = vld [vmem:[#allocation26 + $0x164] ss:$8 sps:$4 sm:$0xff]  }
 0xd5f   :  { %7396 = vmatpush1.bf16.msra.mxu0 %v20482_v47  ;;  %v20527_v47 = vld [vmem:[#allocation26 + $0x160] ss:$8 sps:$4 sm:$0xff]  }
 0xd60   :  { %7397 = vmatprep.subr.bf16.mxu0 %v20487_v49  ;;  %v20532_v49 = vld [vmem:[#allocation26 + $0x154] ss:$8 sps:$4 sm:$0xff]  }
 0xd63   :  { %7398 = vmatpush1.bf16.msra.mxu0 %v20485_v50  ;;  %v20530_v50 = vld [vmem:[#allocation26 + $0x150] ss:$8 sps:$4 sm:$0xff]  }
 0xd64   :  { %7399 = vmatprep.subr.bf16.mxu0 %v20490_v54  ;;  %v20535_v54 = vld [vmem:[#allocation26 + $0x144] ss:$8 sps:$4 sm:$0xff]  }
 0xd67   :  { %7400 = vmatpush1.bf16.msra.mxu0 %v20488_v55  ;;  %v20533_v55 = vld [vmem:[#allocation26 + $0x140] ss:$8 sps:$4 sm:$0xff]  }
 0xd68   :  { %7401 = vmatprep.subr.bf16.mxu0 %v20493_v56  ;;  %v20538_v56 = vld [vmem:[#allocation26 + $0x134] ss:$8 sps:$4 sm:$0xff]  }
 0xd6b   :  { %7402 = vmatpush1.bf16.msra.mxu0 %v20491_v57  ;;  %v20536_v57 = vld [vmem:[#allocation26 + $0x130] ss:$8 sps:$4 sm:$0xff]  }
 0xd6c   :  { %7403 = vmatprep.subr.bf16.mxu0 %v20496_v58  ;;  %v20541_v58 = vld [vmem:[#allocation26 + $0x124] ss:$8 sps:$4 sm:$0xff]  }
 0xd6f   :  { %7404 = vmatpush1.bf16.msra.mxu0 %v20494_v44  ;;  %v20544_v44 = vld [vmem:[#allocation26 + $0x114] ss:$8 sps:$4 sm:$0xff]  }
 0xd70   :  { %7405 = vmatprep.subr.bf16.mxu0 %v20499_v59  ;;  %v23561_v59 = vpop.f32.mrf.mxu0 }
 0xd73   :  { %7406 = vmatpush1.bf16.msra.mxu0 %v20497_v18  ;;  %v20547_v18 = vld [vmem:[#allocation26 + $0x104] ss:$8 sps:$4 sm:$0xff]  }
 0xd74   :  { %7407 = vmatprep.subr.bf16.mxu0 %v20502_v62  ;;  %v5723_v62 = vpop.f32.mrf.mxu0 }
 0xd75   :  { %v5767_v30 = vadd.f32 %v5766_v14, %v5723_v62 }
 0xd76   :  { %v5725_v8 = vpop.f32.mrf.mxu0 }
 0xd77   :  { %7408 = vmatpush2.bf16.msra.mxu0 %v20500_v41  ;;  %v20548_v41 = vld [vmem:[#allocation26 + $0x1f0] ss:$8 sps:$4 sm:$0xff]  }
 0xd78   :  { %7409 = vmatprep.subr.bf16.mxu0 %v20505_v40  ;;  %v20553_v40 = vld [vmem:[#allocation26 + $0x1e4] ss:$8 sps:$4 sm:$0xff]   ;;  %v5727_v12 = vpop.f32.mrf.mxu0 }
 0xd79   :  { %v5771_v27 = vadd.f32 %v5770_v22, %v5727_v12 }
 0xd7b   :  { %7410 = vmatpush2.bf16.msra.mxu0 %v20503_v11  ;;  %v20551_v11 = vld [vmem:[#allocation26 + $0x1e0] ss:$8 sps:$4 sm:$0xff]  }
 0xd7c   :  { %7411 = vmatprep.subr.bf16.mxu0 %v20508_v13  ;;  %v20556_v13 = vld [vmem:[#allocation26 + $0x1d4] ss:$8 sps:$4 sm:$0xff]  }
 0xd7f   :  { %7412 = vmatpush2.bf16.msra.mxu0 %v20506_v15 }
 0xd80   :  { %7413 = vmatprep.subr.bf16.mxu0 %v20511_v2  ;;  %v20559_v2 = vld [vmem:[#allocation26 + $0x1c4] ss:$8 sps:$4 sm:$0xff]  }
 0xd83   :  { %7414 = vmatpush2.bf16.msra.mxu0 %v20509_v19 }
 0xd84   :  { %7415 = vmatprep.subr.bf16.mxu0 %v20514_v20  ;;  %v20562_v20 = vld [vmem:[#allocation26 + $0x1b4] ss:$8 sps:$4 sm:$0xff]  }
 0xd87   :  { %7416 = vmatpush2.bf16.msra.mxu0 %v20512_v38 }
 0xd88   :  { %7417 = vmatprep.subr.bf16.mxu0 %v20517_v24  ;;  %v23563_v24 = vpop.f32.mrf.mxu1 }
 0xd8a   :  { %v6344_v43 = vpop.f32.mrf.mxu1 }
 0xd8b   :  { %7418 = vmatpush2.bf16.msra.mxu0 %v20515_v9 }
 0xd8c   :  { %7419 = vmatprep.subr.bf16.mxu0 %v20520_v28  ;;  %v20563_v28 = vld [vmem:[#allocation26 + $0x1a0] ss:$8 sps:$4 sm:$0xff]  }
 0xd8f   :  { %7420 = vmatpush2.bf16.msra.mxu0 %v20518_v31 }
 0xd90   :  { %7421 = vmatprep.subr.bf16.mxu0 %v20523_v33  ;;  %v20566_v33 = vld [vmem:[#allocation26 + $0x190] ss:$8 sps:$4 sm:$0xff]  }
 0xd93   :  { %7422 = vmatpush2.bf16.msra.mxu0 %v20521_v36  ;;  %v23565_v36 = vpop.f32.mrf.mxu1 }
 0xd94   :  { %8092 = vmatprep.subr.bf16.mxu0 %v20526_v45  ;;  %v20571_v45 = vld [vmem:[#allocation26 + $0x184] ss:$8 sps:$4 sm:$0xff]  }
 0xd96   :  { %7424 = vmatmul.mubr.bf16.vlgmr.msra.gmra.mxu0 %v23536_v42  ;;  %v20539_v42 = vld [vmem:[#allocation26 + $0x120] ss:$8 sps:$4 sm:$0xff]   ;;  %v5807_v15 = vpop.f32.mrf.mxu0 }
 0xd97   :  { %8093 = vmatpush1.bf16.msra.mxu0 %v20524_v7  ;;  %8124 = vmatprep.mubr.bf16.mxu0 %v23544_v17  ;;  %v20542_v17 = vld [vmem:[#allocation26 + $0x110] ss:$8 sps:$4 sm:$0xff]  }
 0xd98   :  { %8094 = vmatprep.subr.bf16.mxu0 %v20529_v21  ;;  %v5809_v19 = vpop.f32.mrf.mxu0 }
 0xd99   :  { %v5810_v32 = vadd.f32 %v5809_v19, %v5767_v30  ;;  %v20587_v19 = vld [vmem:[#allocation26 + $0x350] ss:$8 sps:$4 sm:$0xff]  }
 0xd9a   :  { %v5811_v38 = vpop.f32.mrf.mxu0 }
 0xd9b   :  { %8095 = vmatpush1.bf16.msra.mxu0 %v20527_v47  ;;  %v5817_v21 = vrot.slane %v5810_v32, 7  ;;  %v20569_v47 = vld [vmem:[#allocation26 + $0x180] ss:$8 sps:$4 sm:$0xff]  }
 0xd9c   :  { %8096 = vmatprep.subr.bf16.mxu0 %v20532_v49  ;;  %v5813_v9 = vpop.f32.mrf.mxu0  ;;  %v6348_v49 = vpop.f32.mrf.mxu1 }
 0xd9d   :  { %v5814_v31 = vadd.f32 %v5813_v9, %v5771_v27 }
 0xd9f   :  { %8097 = vmatpush1.bf16.msra.mxu0 %v20530_v50  ;;  %v5819_v7 = vrot.slane %v5814_v31, 7  ;;  %v20577_v50 = vld [vmem:[#allocation26 + $0x374] ss:$8 sps:$4 sm:$0xff]  }
 0xda0   :  { %8098 = vmatprep.subr.bf16.mxu0 %v20535_v54 }
 0xda1   :  { %v5823_v54 = vsel %vm1024_vm14, %v5819_v7, %v5817_v21 }
 0xda3   :  { %8099 = vmatpush1.bf16.msra.mxu0 %v20533_v55  ;;  %v23569_v55 = vpop.f32.mrf.mxu1 }
 0xda4   :  { %8100 = vmatprep.subr.bf16.mxu0 %v20538_v56  ;;  %v20575_v56 = vld [vmem:[#allocation26 + $0x370] ss:$8 sps:$4 sm:$0xff]  }
 0xda7   :  { %8101 = vmatpush1.bf16.msra.mxu0 %v20536_v57  ;;  %v5769_v57 = vadd.f32 %v5768_v46, %v5725_v8 }
 0xda8   :  { %8102 = vmatprep.subr.bf16.mxu0 %v20541_v58  ;;  %v5825_v58 = vsel %vm1029_vm15, %v5823_v54, 0.0  ;;  %v20605_v54 = vld [vmem:[#allocation26 + $0x320] ss:$8 sps:$4 sm:$0xff]  }
 0xdab   :  { %8103 = vmatpush1.bf16.msra.mxu0 %v20539_v42  ;;  %v20583_v42 = vld [vmem:[#allocation26 + $0x364] ss:$8 sps:$4 sm:$0xff]  }
 0xdac   :  { %8104 = vmatprep.subr.bf16.mxu0 %v20544_v44  ;;  %v5821_v44 = vsel %vm1024_vm14, %v5817_v21, %v5819_v7  ;;  %v20607_v21 = vld [vmem:[#allocation26 + $0x324] ss:$8 sps:$4 sm:$0xff]  }
 0xdad   :  { %v5827_v12 = vsel %vm1030_vm1, %v5821_v44, 0.0 }
 0xdae   :  { %v6349_v46 = vadd.f32 %v6348_v49, %v5827_v12 }
 0xdaf   :  { %8105 = vmatpush1.bf16.msra.mxu0 %v20542_v17  ;;  %v5765_v17 = vadd.f32 %v5764_v10, %v23561_v59 }
 0xdb0   :  { %8106 = vmatprep.subr.bf16.mxu0 %v20547_v18  ;;  %v6430_v18 = vpop.f32.mrf.mxu1 }
 0xdb1   :  { %v5808_v8 = vadd.f32 %v5807_v15, %v5765_v17  ;;  %v20595_v15 = vld [vmem:[#allocation26 + $0x344] ss:$8 sps:$4 sm:$0xff]  }
 0xdb2   :  { %v20619_v17 = vld [vmem:[#allocation26 + $0x304] ss:$8 sps:$4 sm:$0xff]  }
 0xdb3   :  { %8107 = vmatpush1.bf16.msra.mxu0 %v20545_v60  ;;  %v5812_v60 = vadd.f32 %v5811_v38, %v5769_v57  ;;  %v20613_v57 = vld [vmem:[#allocation26 + $0x314] ss:$8 sps:$4 sm:$0xff]  }
 0xdb4   :  { %8108 = vmatprep.subr.bf16.mxu0 %v20550_v6  ;;  %v6345_v6 = vadd.f32 %v6344_v43, %v5825_v58  ;;  %v20601_v43 = vld [vmem:[#allocation26 + $0x334] ss:$8 sps:$4 sm:$0xff]  }
 0xdb5   :  { %v5818_v10 = vrot.slane %v5812_v60, 7 }
 0xdb7   :  { %8109 = vmatpush2.bf16.msra.mxu0 %v20548_v41  ;;  %v20581_v41 = vld [vmem:[#allocation26 + $0x360] ss:$8 sps:$4 sm:$0xff]  }
 0xdb8   :  { %8110 = vmatprep.subr.bf16.mxu0 %v20553_v40  ;;  %v5176_v40 = vld [vmem:[#allocation25] sm:$0x3] }
 0xdb9   :  { %v6445_v59 = vrot.slane %v5176_v40, %v23310_v34 }
 0xdbb   :  { %8111 = vmatpush2.bf16.msra.mxu0 %v20551_v11 }
 0xdbc   :  { %8112 = vmatprep.subr.bf16.mxu0 %v20556_v13  ;;  %v20589_v13 = vld [vmem:[#allocation26 + $0x354] ss:$8 sps:$4 sm:$0xff]  }
 0xdbf   :  { %8113 = vmatpush2.bf16.msra.mxu0 %v20554_v16  ;;  %v6432_v16 = vpop.f32.mrf.mxu1 }
 0xdc0   :  { %8114 = vmatprep.subr.bf16.mxu0 %v20559_v2 }
 0xdc3   :  { %8115 = vmatpush2.bf16.msra.mxu0 %v20557_v5  ;;  %v5816_v5 = vrot.slane %v5808_v8, 7 }
 0xdc4   :  { %8116 = vmatprep.subr.bf16.mxu0 %v20562_v20 }
 0xdc5   :  { %v5820_v32 = vsel %vm1024_vm14, %v5816_v5, %v5818_v10 }
 0xdc7   :  { %8117 = vmatpush2.bf16.msra.mxu0 %v20560_v39  ;;  %v6434_v39 = vpop.f32.mrf.mxu1 }
 0xdc8   :  { %8118 = vmatprep.subr.bf16.mxu0 %v20565_v3  ;;  %v5822_v3 = vsel %vm1024_vm14, %v5818_v10, %v5816_v5  ;;  %v20629_v5 = vld [vmem:[#allocation26 + $0x64] ss:$8 sps:$4 sm:$0xff]  }
 0xdcb   :  { %8119 = vmatpush2.bf16.msra.mxu0 %v20563_v28  ;;  %v20593_v28 = vld [vmem:[#allocation26 + $0x340] ss:$8 sps:$4 sm:$0xff]  }
 0xdcc   :  { %8120 = vmatprep.subr.bf16.mxu0 %v20568_v29  ;;  %v5824_v29 = vsel %vm1029_vm15, %v5822_v3, 0.0  ;;  %v20633_v3 = vld [vmem:[#allocation26 + $0x50] ss:$8 sps:$4 sm:$0xff]  }
 0xdcd   :  { %v6343_v7 = vadd.f32 %v23563_v24, %v5824_v29  ;;  %v20611_v24 = vld [vmem:[#allocation26 + $0x310] ss:$8 sps:$4 sm:$0xff]   ;;  %v20642_v29 = vld [vmem:[#allocation32 + $0x40] ss:$8 sps:$4 sm:$0xff]  }
 0xdcf   :  { %8121 = vmatpush2.bf16.msra.mxu0 %v20566_v33 }
 0xdd0   :  { %8122 = vmatprep.subr.bf16.mxu0 %v20571_v45  ;;  %v20599_v45 = vld [vmem:[#allocation26 + $0x330] ss:$8 sps:$4 sm:$0xff]  }
 0xdd3   :  { %8123 = vmatpush2.bf16.msra.mxu0 %v20569_v47  ;;  %v5826_v47 = vsel %vm1030_vm1, %v5820_v32, 0.0  ;;  %v20648_v32 = vld [vmem:[#allocation32 + $0x30] ss:$8 sps:$4 sm:$0xff]  }
 0xdd4   :  { %8178 = vmatprep.subr.bf16.mxu0 %v20577_v50 }
 0xdd6   :  { %v6385_v62 = vpop.f32.mrf.mxu0  ;;  %8125 = vmatmul.mubr.bf16.vlgmr.msra.gmra.mxu0 %v23548_v4 }
 0xdd7   :  { %8179 = vmatpush1.bf16.msra.mxu0 %v20575_v56  ;;  %8210 = vmatprep.mubr.bf16.mxu0 %v22988_v0  ;;  %v6386_v50 = vadd.f32 %v6385_v62, %v6343_v7  ;;  %v6347_v56 = vadd.f32 %v23565_v36, %v5826_v47  ;;  %v20617_v62 = vld [vmem:[#allocation26 + $0x300] ss:$8 sps:$4 sm:$0xff]   ;;  %v20659_v47 = vld [vmem:[#allocation26 + $0x14] ss:$8 sps:$4 sm:$0xff]  }
 0xdd8   :  { %v6387_v11 = vpop.f32.mrf.mxu0  ;;  %8180 = vmatprep.subr.bf16.mxu0 %v20583_v42  ;;  %v6441_v42 = vrot.slane %v5176_v40, %v23303_v26  ;;  %v20651_v7 = vld [vmem:[#allocation26 + $0x20] ss:$8 sps:$4 sm:$0xff]  }
 0xdd9   :  { %v6388_v14 = vadd.f32 %v6387_v11, %v6345_v6  ;;  %v6429_v58 = vadd.f32 %v23569_v55, %v6386_v50  ;;  %v20657_v50 = vld [vmem:[#allocation26 + $0x10] ss:$8 sps:$4 sm:$0xff]  }
 0xdda   :  { %v6389_v2 = vpop.f32.mrf.mxu0 }
 0xddb   :  { %v6431_v4 = vadd.f32 %v6430_v18, %v6388_v14  ;;  %8181 = vmatpush1.bf16.msra.mxu0 %v20581_v41  ;;  %v6390_v44 = vadd.f32 %v6389_v2, %v6347_v56  ;;  %v6448_v18 = vadd.f32 %v6441_v42, %v6429_v58  ;;  %v20625_v41 = vld [vmem:[#allocation32 + $0x74] ss:$8 sps:$4 sm:$0xff]   ;;  %v20665_v56 = vld [vmem:[#allocation26 + $0x4] ss:$8 sps:$4 sm:$0xff]  }
 0xddc   :  { %v6391_v20 = vpop.f32.mrf.mxu0  ;;  %8182 = vmatprep.subr.bf16.mxu0 %v20589_v13  ;;  %v20663_v58 = vld [vmem:[#allocation26] ss:$8 sps:$4 sm:$0xff]  }
 0xddd   :  { %v6449_v22 = vadd.f32 %v6445_v59, %v6431_v4  ;;  %v6392_v38 = vadd.f32 %v6391_v20, %v6349_v46  ;;  %v6433_v60 = vadd.f32 %v6432_v16, %v6390_v44  ;;  %v20620_v4 = vld [vmem:[#allocation26 + $0x70] ss:$8 sps:$4 sm:$0xff]   ;;  %v20671_v44 = vld [vmem:[#allocation26 + $0xf4] ss:$8 sps:$4 sm:$0xff]  }
 0xdde   :  { %v20623_v46 = vld [vmem:[#allocation32 + $0x70] ss:$8 sps:$4 sm:$0xff]   ;;  %v20632_v20 = vld [vmem:[#allocation32 + $0x64] ss:$8 sps:$4 sm:$0xff]  }
 0xddf   :  { %v6452_v9 = vsub.f32 0.0, %v6449_v22  ;;  %v6435_v27 = vadd.f32 %v6434_v39, %v6392_v38  ;;  %8183 = vmatpush1.bf16.msra.mxu0 %v20587_v19  ;;  %v6450_v36 = vadd.f32 %v6441_v42, %v6433_v60  ;;  %v20630_v22 = vld [vmem:[#allocation32 + $0x60] ss:$8 sps:$4 sm:$0xff]   ;;  %v20635_v38 = vld [vmem:[#allocation26 + $0x54] ss:$8 sps:$4 sm:$0xff]  }
 0xde0   :  { %8184 = vmatprep.subr.bf16.mxu0 %v20595_v15  ;;  %v20627_v15 = vld [vmem:[#allocation26 + $0x60] ss:$8 sps:$4 sm:$0xff]   ;;  %v20677_v60 = vld [vmem:[#allocation26 + $0xe4] ss:$8 sps:$4 sm:$0xff]  }
 0xde1   :  { %v6454_v30 = vmul.f32 1.442695, %v6452_v9  ;;  %v6451_v31 = vadd.f32 %v6445_v59, %v6435_v27  ;;  %v20638_v39 = vld [vmem:[#allocation32 + $0x54] ss:$8 sps:$4 sm:$0xff]   ;;  %v20636_v9 = vld [vmem:[#allocation32 + $0x50] ss:$8 sps:$4 sm:$0xff]  }
 0xde2   :  { %v20641_v27 = vld [vmem:[#allocation26 + $0x44] ss:$8 sps:$4 sm:$0xff]  }
 0xde3   :  { %22356 = vpow2.f32 %v6454_v30  ;;  %v6453_v33 = vsub.f32 0.0, %v6451_v31  ;;  %8185 = vmatpush1.bf16.msra.mxu0 %v20593_v28  ;;  %v20644_v28 = vld [vmem:[#allocation32 + $0x44] ss:$8 sps:$4 sm:$0xff]   ;;  %v20647_v30 = vld [vmem:[#allocation26 + $0x34] ss:$8 sps:$4 sm:$0xff]  }
 0xde4   :  { %8186 = vmatprep.subr.bf16.mxu0 %v20601_v43  ;;  %v20639_v43 = vld [vmem:[#allocation26 + $0x40] ss:$8 sps:$4 sm:$0xff]   ;;  %v20645_v31 = vld [vmem:[#allocation26 + $0x30] ss:$8 sps:$4 sm:$0xff]  }
 0xde5   :  { %v6456_v49 = vmul.f32 1.442695, %v6453_v33  ;;  %v20653_v33 = vld [vmem:[#allocation26 + $0x24] ss:$8 sps:$4 sm:$0xff]  }
 0xde6   :  { %v20666_v42 = vld [vmem:[#allocation32] ss:$8 sps:$4 sm:$0xff]  }
 0xde7   :  { %22358 = vpow2.f32 %v6456_v49  ;;  %8187 = vmatpush1.bf16.msra.mxu0 %v20599_v45  ;;  %v20656_v45 = vld [vmem:[#allocation32 + $0x24] ss:$8 sps:$4 sm:$0xff]   ;;  %v20662_v49 = vld [vmem:[#allocation32 + $0x14] ss:$8 sps:$4 sm:$0xff]  }
 0xde8   :  { %8188 = vmatprep.subr.bf16.mxu0 %v20607_v21  ;;  %22360 = vtanh.f32 %v6448_v18  ;;  %v20654_v21 = vld [vmem:[#allocation32 + $0x20] ss:$8 sps:$4 sm:$0xff]   ;;  %v20672_v18 = vld [vmem:[#allocation32 + $0xf0] ss:$8 sps:$4 sm:$0xff]  }
 0xdeb   :  { %8189 = vmatpush1.bf16.msra.mxu0 %v20605_v54  ;;  %v20660_v54 = vld [vmem:[#allocation32 + $0x10] ss:$8 sps:$4 sm:$0xff]  }
 0xdec   :  { %8190 = vmatprep.subr.bf16.mxu0 %v20613_v57  ;;  %v20668_v57 = vld [vmem:[#allocation32 + $0x4] ss:$8 sps:$4 sm:$0xff]  }
 0xdef   :  { %8191 = vmatpush1.bf16.msra.mxu0 %v20611_v24  ;;  %v20674_v24 = vld [vmem:[#allocation32 + $0xf4] ss:$8 sps:$4 sm:$0xff]  }
 0xdf0   :  { %v22357_v6 = vpop.eup %22356  ;;  %8192 = vmatprep.subr.bf16.mxu0 %v20619_v17  ;;  %v20669_v17 = vld [vmem:[#allocation26 + $0xf0] ss:$8 sps:$4 sm:$0xff]  }
 0xdf1   :  { %v6458_v8 = vadd.f32 1.0, %v22357_v6  ;;  %v20675_v6 = vld [vmem:[#allocation26 + $0xe0] ss:$8 sps:$4 sm:$0xff]  }
 0xdf3   :  { %22362 = vrcp.f32 %v6458_v8  ;;  %8193 = vmatpush1.bf16.msra.mxu0 %v20617_v62  ;;  %v20680_v62 = vld [vmem:[#allocation32 + $0xe4] ss:$8 sps:$4 sm:$0xff]   ;;  %v20683_v8 = vld [vmem:[#allocation26 + $0xd4] ss:$8 sps:$4 sm:$0xff]  }
 0xdf4   :  { %v22359_v55 = vpop.eup %22358  ;;  %9205 = vmatprep.subr.bf16.mxu0 %v20625_v41  ;;  %22364 = vtanh.f32 %v6450_v36  ;;  %v20678_v41 = vld [vmem:[#allocation32 + $0xe0] ss:$8 sps:$4 sm:$0xff]   ;;  %v20686_v36 = vld [vmem:[#allocation32 + $0xd4] ss:$8 sps:$4 sm:$0xff]  }
 0xdf5   :  { %v6459_v40 = vadd.f32 1.0, %v22359_v55  ;;  %v22361_v11 = vpop.eup %22360  ;;  %v20681_v55 = vld [vmem:[#allocation26 + $0xd0] ss:$8 sps:$4 sm:$0xff]  }
 0xdf7   :  { %22366 = vrcp.f32 %v6459_v40  ;;  %v20684_v40 = vld [vmem:[#allocation32 + $0xd0] ss:$8 sps:$4 sm:$0xff]  }
 0xe00   :  { %v22363_v12 = vpop.eup %22362 }
 0xe01   :  { %v6464_v13 = vmul.f32 %v22363_v12, %v22361_v11  ;;  %v22365_v14 = vpop.eup %22364  ;;  %v20689_v11 = vld [vmem:[#allocation26 + $0xc4] ss:$8 sps:$4 sm:$0xff]  }
 0xe02   :  { %v20692_v12 = vld [vmem:[#allocation32 + $0xc4] ss:$8 sps:$4 sm:$0xff]  }
 0xe03   :  { %v19049_v59 = vpack.c.bf16 %v6464_v13, %v6464_v13  ;;  %v20687_v13 = vld [vmem:[#allocation26 + $0xc0] ss:$8 sps:$4 sm:$0xff]  }
 0xe04   :  { %v22367_v10 = vpop.eup %22366 }
 0xe05   :  { %6474 = vst [vmem:[#allocation2 + $0x18] sm:$0xf] %v19049_v59  ;;  %v6465_v16 = vmul.f32 %v22367_v10, %v22365_v14  ;;  %v20690_v14 = vld [vmem:[#allocation32 + $0xc0] ss:$8 sps:$4 sm:$0xff]   ;;  %v20695_v59 = vld [vmem:[#allocation26 + $0xb4] ss:$8 sps:$4 sm:$0xff]  }
 0xe06   :  { %v20698_v10 = vld [vmem:[#allocation32 + $0xb4] ss:$8 sps:$4 sm:$0xff]  }
 0xe07   :  { %v19050_v2 = vpack.c.bf16 %v6465_v16, %v6465_v16  ;;  %v20693_v16 = vld [vmem:[#allocation26 + $0xb0] ss:$8 sps:$4 sm:$0xff]  }
 0xe09   :  { %6475 = vst [vmem:[#allocation2 + $0x44] sm:$0xf] %v19050_v2  ;;  %v20696_v2 = vld [vmem:[#allocation32 + $0xb0] ss:$8 sps:$4 sm:$0xff]  }
 0xe10   :  { %v20626_v19 = vld [vmem:[#allocation2 + $0x18] ss:$44 sps:$4 sm:$0xff]  }
 0xe11   :  { %7467 = vmatmul.mubr.bf16.vlgmr.msra.gmra.mxu1 %v20626_v19  ;;  %8211 = vmatmul.mubr.bf16.vlgmr.msra.gmra.mxu0 %v20626_v19  ;;  %v20699_v19 = vld [vmem:[#allocation26 + $0xa0] ss:$8 sps:$4 sm:$0xff]  }
 0xe12   :  { %8050 = vmatpush1.bf16.msra.mxu1 %v20620_v4  ;;  %9206 = vmatpush1.bf16.msra.mxu0 %v20623_v46  ;;  %v20701_v4 = vld [vmem:[#allocation26 + $0xa4] ss:$8 sps:$4 sm:$0xff]  }
 0xe13   :  { %8081 = vmatprep.mubr.bf16.mxu1 %v23550_v63  ;;  %9237 = vmatprep.mubr.bf16.mxu0 %v23550_v63  ;;  %v20650_v63 = vld [vmem:[#allocation32 + $0x34] ss:$8 sps:$4 sm:$0xff]   ;;  %v20704_v46 = vld [vmem:[#allocation32 + $0xa4] ss:$8 sps:$4 sm:$0xff]  }
 0xe14   :  { %8051 = vmatprep.subr.bf16.mxu1 %v20629_v5  ;;  %9207 = vmatprep.subr.bf16.mxu0 %v20632_v20  ;;  %v20702_v5 = vld [vmem:[#allocation32 + $0xa0] ss:$8 sps:$4 sm:$0xff]   ;;  %v20707_v20 = vld [vmem:[#allocation26 + $0x94] ss:$8 sps:$4 sm:$0xff]  }
 0xe16   :  { %8052 = vmatpush1.bf16.msra.mxu1 %v20627_v15  ;;  %9208 = vmatpush1.bf16.msra.mxu0 %v20630_v22  ;;  %v20710_v15 = vld [vmem:[#allocation32 + $0x94] ss:$8 sps:$4 sm:$0xff]  }
 0xe17   :  { %8053 = vmatprep.subr.bf16.mxu1 %v20635_v38  ;;  %9209 = vmatprep.subr.bf16.mxu0 %v20638_v39  ;;  %v20705_v22 = vld [vmem:[#allocation26 + $0x90] ss:$8 sps:$4 sm:$0xff]   ;;  %v20713_v39 = vld [vmem:[#allocation26 + $0x84] ss:$8 sps:$4 sm:$0xff]  }
 0xe18   :  { %v20708_v38 = vld [vmem:[#allocation32 + $0x90] ss:$8 sps:$4 sm:$0xff]  }
 0xe1a   :  { %8054 = vmatpush1.bf16.msra.mxu1 %v20633_v3  ;;  %9210 = vmatpush1.bf16.msra.mxu0 %v20636_v9  ;;  %v20716_v3 = vld [vmem:[#allocation32 + $0x84] ss:$8 sps:$4 sm:$0xff]  }
 0xe1b   :  { %8055 = vmatprep.subr.bf16.mxu1 %v20641_v27  ;;  %9211 = vmatprep.subr.bf16.mxu0 %v20644_v28  ;;  %v20711_v9 = vld [vmem:[#allocation26 + $0x80] ss:$8 sps:$4 sm:$0xff]   ;;  %v20719_v28 = vld [vmem:[#allocation26 + $0x274] ss:$8 sps:$4 sm:$0xff]  }
 0xe1c   :  { %v20714_v27 = vld [vmem:[#allocation32 + $0x80] ss:$8 sps:$4 sm:$0xff]  }
 0xe1e   :  { %8056 = vmatpush1.bf16.msra.mxu1 %v20639_v43  ;;  %9212 = vmatpush1.bf16.msra.mxu0 %v20642_v29  ;;  %v20722_v43 = vld [vmem:[#allocation32 + $0x274] ss:$8 sps:$4 sm:$0xff]  }
 0xe1f   :  { %8057 = vmatprep.subr.bf16.mxu1 %v20647_v30  ;;  %9213 = vmatprep.subr.bf16.mxu0 %v20650_v63  ;;  %v20717_v29 = vld [vmem:[#allocation26 + $0x270] ss:$8 sps:$4 sm:$0xff]   ;;  %v20728_v63 = vld [vmem:[#allocation26 + $0x264] ss:$8 sps:$4 sm:$0xff]  }
 0xe20   :  { %v20720_v30 = vld [vmem:[#allocation32 + $0x270] ss:$8 sps:$4 sm:$0xff]  }
 0xe22   :  { %8058 = vmatpush1.bf16.msra.mxu1 %v20645_v31  ;;  %9214 = vmatpush1.bf16.msra.mxu0 %v20648_v32  ;;  %v20731_v31 = vld [vmem:[#allocation32 + $0x264] ss:$8 sps:$4 sm:$0xff]  }
 0xe23   :  { %8059 = vmatprep.subr.bf16.mxu1 %v20653_v33  ;;  %9215 = vmatprep.subr.bf16.mxu0 %v20656_v45  ;;  %v23597_v32 = vld [vmem:[#allocation2 + $0x14] ss:$44 sps:$4 sm:$0xff]   ;;  %v20726_v45 = vld [vmem:[#allocation26 + $0x260] ss:$8 sps:$4 sm:$0xff]  }
 0xe24   :  { %v22403_v33 = vld [vmem:[#allocation2 + $0x14] ss:$44 sps:$4 sm:$0xff]  }
 0xe26   :  { %8060 = vmatpush1.bf16.msra.mxu1 %v20651_v7  ;;  %9216 = vmatpush1.bf16.msra.mxu0 %v20654_v21  ;;  %v20729_v7 = vld [vmem:[#allocation32 + $0x260] ss:$8 sps:$4 sm:$0xff]   ;;  %v20734_v21 = vld [vmem:[#allocation26 + $0x254] ss:$8 sps:$4 sm:$0xff]  }
 0xe27   :  { %8061 = vmatprep.subr.bf16.mxu1 %v20659_v47  ;;  %9217 = vmatprep.subr.bf16.mxu0 %v20662_v49  ;;  %v20737_v47 = vld [vmem:[#allocation32 + $0x254] ss:$8 sps:$4 sm:$0xff]  }
 0xe28   :  { %v20732_v49 = vld [vmem:[#allocation26 + $0x250] ss:$8 sps:$4 sm:$0xff]  }
 0xe2a   :  { %8062 = vmatpush1.bf16.msra.mxu1 %v20657_v50  ;;  %9218 = vmatpush1.bf16.msra.mxu0 %v20660_v54  ;;  %v20735_v50 = vld [vmem:[#allocation32 + $0x250] ss:$8 sps:$4 sm:$0xff]   ;;  %v20743_v54 = vld [vmem:[#allocation32 + $0x244] ss:$8 sps:$4 sm:$0xff]  }
 0xe2b   :  { %8063 = vmatprep.subr.bf16.mxu1 %v20665_v56  ;;  %9219 = vmatprep.subr.bf16.mxu0 %v20668_v57  ;;  %v20738_v56 = vld [vmem:[#allocation26 + $0x240] ss:$8 sps:$4 sm:$0xff]  }
 0xe2c   :  { %v20741_v57 = vld [vmem:[#allocation32 + $0x240] ss:$8 sps:$4 sm:$0xff]  }
 0xe2e   :  { %8064 = vmatpush1.bf16.msra.mxu1 %v20663_v58  ;;  %9220 = vmatpush1.bf16.msra.mxu0 %v20666_v42  ;;  %v20746_v58 = vld [vmem:[#allocation26 + $0x234] ss:$8 sps:$4 sm:$0xff]  }
 0xe2f   :  { %8065 = vmatprep.subr.bf16.mxu1 %v20671_v44  ;;  %9221 = vmatprep.subr.bf16.mxu0 %v20674_v24  ;;  %v20749_v42 = vld [vmem:[#allocation32 + $0x234] ss:$8 sps:$4 sm:$0xff]   ;;  %v20747_v24 = vld [vmem:[#allocation32 + $0x230] ss:$8 sps:$4 sm:$0xff]  }
 0xe30   :  { %v20744_v44 = vld [vmem:[#allocation26 + $0x230] ss:$8 sps:$4 sm:$0xff]  }
 0xe32   :  { %8066 = vmatpush2.bf16.msra.mxu1 %v20669_v17  ;;  %9222 = vmatpush2.bf16.msra.mxu0 %v20672_v18  ;;  %v20752_v17 = vld [vmem:[#allocation26 + $0x224] ss:$8 sps:$4 sm:$0xff]  }
 0xe33   :  { %8067 = vmatprep.subr.bf16.mxu1 %v20677_v60  ;;  %9223 = vmatprep.subr.bf16.mxu0 %v20680_v62  ;;  %v20755_v18 = vld [vmem:[#allocation32 + $0x224] ss:$8 sps:$4 sm:$0xff]   ;;  %v20753_v62 = vld [vmem:[#allocation32 + $0x220] ss:$8 sps:$4 sm:$0xff]  }
 0xe34   :  { %v20750_v60 = vld [vmem:[#allocation26 + $0x220] ss:$8 sps:$4 sm:$0xff]  }
 0xe36   :  { %8068 = vmatpush2.bf16.msra.mxu1 %v20675_v6  ;;  %9224 = vmatpush2.bf16.msra.mxu0 %v20678_v41  ;;  %v20758_v6 = vld [vmem:[#allocation26 + $0x214] ss:$8 sps:$4 sm:$0xff]  }
 0xe37   :  { %8069 = vmatprep.subr.bf16.mxu1 %v20683_v8  ;;  %9225 = vmatprep.subr.bf16.mxu0 %v20686_v36  ;;  %v20761_v41 = vld [vmem:[#allocation32 + $0x214] ss:$8 sps:$4 sm:$0xff]   ;;  %v20759_v36 = vld [vmem:[#allocation32 + $0x210] ss:$8 sps:$4 sm:$0xff]  }
 0xe38   :  { %v20756_v8 = vld [vmem:[#allocation26 + $0x210] ss:$8 sps:$4 sm:$0xff]  }
 0xe3a   :  { %8070 = vmatpush2.bf16.msra.mxu1 %v20681_v55  ;;  %9226 = vmatpush2.bf16.msra.mxu0 %v20684_v40  ;;  %v20764_v55 = vld [vmem:[#allocation26 + $0x204] ss:$8 sps:$4 sm:$0xff]  }
 0xe3b   :  { %8071 = vmatprep.subr.bf16.mxu1 %v20689_v11  ;;  %9227 = vmatprep.subr.bf16.mxu0 %v20692_v12  ;;  %v20767_v40 = vld [vmem:[#allocation32 + $0x204] ss:$8 sps:$4 sm:$0xff]   ;;  %v20765_v12 = vld [vmem:[#allocation32 + $0x200] ss:$8 sps:$4 sm:$0xff]  }
 0xe3c   :  { %v20762_v11 = vld [vmem:[#allocation26 + $0x200] ss:$8 sps:$4 sm:$0xff]  }
 0xe3e   :  { %8072 = vmatpush2.bf16.msra.mxu1 %v20687_v13  ;;  %9228 = vmatpush2.bf16.msra.mxu0 %v20690_v14  ;;  %v20770_v13 = vld [vmem:[#allocation26 + $0x2f4] ss:$8 sps:$4 sm:$0xff]  }
 0xe3f   :  { %8073 = vmatprep.subr.bf16.mxu1 %v20695_v59  ;;  %9229 = vmatprep.subr.bf16.mxu0 %v20698_v10  ;;  %v20773_v14 = vld [vmem:[#allocation32 + $0x2f4] ss:$8 sps:$4 sm:$0xff]   ;;  %v20771_v10 = vld [vmem:[#allocation32 + $0x2f0] ss:$8 sps:$4 sm:$0xff]  }
 0xe40   :  { %v20768_v59 = vld [vmem:[#allocation26 + $0x2f0] ss:$8 sps:$4 sm:$0xff]  }
 0xe42   :  { %8074 = vmatpush2.bf16.msra.mxu1 %v20693_v16  ;;  %9230 = vmatpush2.bf16.msra.mxu0 %v20696_v2  ;;  %v20776_v16 = vld [vmem:[#allocation26 + $0x2e4] ss:$8 sps:$4 sm:$0xff]  }
 0xe43   :  { %8075 = vmatprep.subr.bf16.mxu1 %v20701_v4  ;;  %9231 = vmatprep.subr.bf16.mxu0 %v20704_v46  ;;  %v20779_v2 = vld [vmem:[#allocation32 + $0x2e4] ss:$8 sps:$4 sm:$0xff]   ;;  %v20777_v46 = vld [vmem:[#allocation32 + $0x2e0] ss:$8 sps:$4 sm:$0xff]  }
 0xe44   :  { %v20774_v4 = vld [vmem:[#allocation26 + $0x2e0] ss:$8 sps:$4 sm:$0xff]  }
 0xe46   :  { %8076 = vmatpush2.bf16.msra.mxu1 %v20699_v19  ;;  %9232 = vmatpush2.bf16.msra.mxu0 %v20702_v5  ;;  %v20782_v19 = vld [vmem:[#allocation26 + $0x2d4] ss:$8 sps:$4 sm:$0xff]  }
 0xe47   :  { %8077 = vmatprep.subr.bf16.mxu1 %v20707_v20  ;;  %9233 = vmatprep.subr.bf16.mxu0 %v20710_v15  ;;  %v20785_v5 = vld [vmem:[#allocation32 + $0x2d4] ss:$8 sps:$4 sm:$0xff]   ;;  %v20783_v15 = vld [vmem:[#allocation32 + $0x2d0] ss:$8 sps:$4 sm:$0xff]  }
 0xe48   :  { %v20780_v20 = vld [vmem:[#allocation26 + $0x2d0] ss:$8 sps:$4 sm:$0xff]  }
 0xe4a   :  { %8078 = vmatpush2.bf16.msra.mxu1 %v20705_v22  ;;  %9234 = vmatpush2.bf16.msra.mxu0 %v20708_v38  ;;  %v20788_v22 = vld [vmem:[#allocation26 + $0x2c4] ss:$8 sps:$4 sm:$0xff]  }
 0xe4b   :  { %8079 = vmatprep.subr.bf16.mxu1 %v20713_v39  ;;  %9235 = vmatprep.subr.bf16.mxu0 %v20716_v3  ;;  %v20791_v38 = vld [vmem:[#allocation32 + $0x2c4] ss:$8 sps:$4 sm:$0xff]   ;;  %v20789_v3 = vld [vmem:[#allocation32 + $0x2c0] ss:$8 sps:$4 sm:$0xff]  }
 0xe4c   :  { %v20786_v39 = vld [vmem:[#allocation26 + $0x2c0] ss:$8 sps:$4 sm:$0xff]  }
 0xe4e   :  { %8080 = vmatpush2.bf16.msra.mxu1 %v20711_v9  ;;  %9236 = vmatpush2.bf16.msra.mxu0 %v20714_v27  ;;  %v20794_v9 = vld [vmem:[#allocation26 + $0x2b4] ss:$8 sps:$4 sm:$0xff]  }
 0xe4f   :  { %8135 = vmatprep.subr.bf16.mxu1 %v20719_v28  ;;  %9291 = vmatprep.subr.bf16.mxu0 %v20722_v43  ;;  %v20797_v27 = vld [vmem:[#allocation32 + $0x2b4] ss:$8 sps:$4 sm:$0xff]   ;;  %v20795_v43 = vld [vmem:[#allocation32 + $0x2b0] ss:$8 sps:$4 sm:$0xff]  }
 0xe50   :  { %v20792_v28 = vld [vmem:[#allocation26 + $0x2b0] ss:$8 sps:$4 sm:$0xff]  }
 0xe51   :  { %8082 = vmatmul.mubr.bf16.vlgmr.msra.gmra.mxu1 %v23555_v37  ;;  %9238 = vmatmul.mubr.bf16.vlgmr.msra.gmra.mxu0 %v23555_v37  ;;  %v20740_v37 = vld [vmem:[#allocation26 + $0x244] ss:$8 sps:$4 sm:$0xff]  }
 0xe52   :  { %8136 = vmatpush1.bf16.msra.mxu1 %v20717_v29  ;;  %8167 = vmatprep.mubr.bf16.mxu1 %v22403_v33  ;;  %v20800_v29 = vld [vmem:[#allocation26 + $0x2a4] ss:$8 sps:$4 sm:$0xff]   ;;  %v20806_v33 = vld [vmem:[#allocation26 + $0x294] ss:$8 sps:$4 sm:$0xff]  }
 0xe53   :  { %9292 = vmatpush1.bf16.msra.mxu0 %v20720_v30  ;;  %9323 = vmatprep.mubr.bf16.mxu0 %v23597_v32  ;;  %v20803_v30 = vld [vmem:[#allocation32 + $0x2a4] ss:$8 sps:$4 sm:$0xff]  }
 0xe54   :  { %8137 = vmatprep.subr.bf16.mxu1 %v20728_v63  ;;  %9293 = vmatprep.subr.bf16.mxu0 %v20731_v31  ;;  %v20798_v63 = vld [vmem:[#allocation26 + $0x2a0] ss:$8 sps:$4 sm:$0xff]  }
 0xe55   :  { %v20801_v31 = vld [vmem:[#allocation32 + $0x2a0] ss:$8 sps:$4 sm:$0xff]  }
 0xe56   :  { %8138 = vmatpush1.bf16.msra.mxu1 %v20726_v45  ;;  %v20809_v45 = vld [vmem:[#allocation32 + $0x294] ss:$8 sps:$4 sm:$0xff]  }
 0xe57   :  { %9294 = vmatpush1.bf16.msra.mxu0 %v20729_v7  ;;  %8139 = vmatprep.subr.bf16.mxu1 %v20734_v21  ;;  %v20804_v7 = vld [vmem:[#allocation26 + $0x290] ss:$8 sps:$4 sm:$0xff]  }
 0xe58   :  { %9295 = vmatprep.subr.bf16.mxu0 %v20737_v47  ;;  %v20807_v21 = vld [vmem:[#allocation32 + $0x290] ss:$8 sps:$4 sm:$0xff]   ;;  %v20812_v47 = vld [vmem:[#allocation26 + $0x284] ss:$8 sps:$4 sm:$0xff]  }
 0xe5a   :  { %8140 = vmatpush1.bf16.msra.mxu1 %v20732_v49  ;;  %v20815_v49 = vld [vmem:[#allocation32 + $0x284] ss:$8 sps:$4 sm:$0xff]  }
 0xe5b   :  { %9296 = vmatpush1.bf16.msra.mxu0 %v20735_v50  ;;  %8141 = vmatprep.subr.bf16.mxu1 %v20740_v37  ;;  %v20810_v50 = vld [vmem:[#allocation26 + $0x280] ss:$8 sps:$4 sm:$0xff]  }
 0xe5c   :  { %9297 = vmatprep.subr.bf16.mxu0 %v20743_v54  ;;  %v20813_v37 = vld [vmem:[#allocation32 + $0x280] ss:$8 sps:$4 sm:$0xff]   ;;  %v20818_v54 = vld [vmem:[#allocation32 + $0x174] ss:$8 sps:$4 sm:$0xff]  }
 0xe5e   :  { %8142 = vmatpush1.bf16.msra.mxu1 %v20738_v56  ;;  %v20821_v56 = vld [vmem:[#allocation31 + $0x74] ss:$8 sps:$4 sm:$0xff]  }
 0xe5f   :  { %9298 = vmatpush1.bf16.msra.mxu0 %v20741_v57  ;;  %8143 = vmatprep.subr.bf16.mxu1 %v20746_v58  ;;  %v20816_v57 = vld [vmem:[#allocation32 + $0x170] ss:$8 sps:$4 sm:$0xff]  }
 0xe60   :  { %9299 = vmatprep.subr.bf16.mxu0 %v20749_v42  ;;  %v20819_v58 = vld [vmem:[#allocation31 + $0x70] ss:$8 sps:$4 sm:$0xff]  }
 0xe61   :  { %v23600_v42 = vld [vmem:[#allocation2 + $0x10] ss:$44 sps:$4 sm:$0xff]  }
 0xe62   :  { %8144 = vmatpush1.bf16.msra.mxu1 %v20744_v44  ;;  %v20827_v44 = vld [vmem:[#allocation32 + $0x164] ss:$8 sps:$4 sm:$0xff]  }
 0xe63   :  { %9300 = vmatpush1.bf16.msra.mxu0 %v20747_v24  ;;  %8145 = vmatprep.subr.bf16.mxu1 %v20752_v17  ;;  %v22404_v24 = vld [vmem:[#allocation2 + $0x10] ss:$44 sps:$4 sm:$0xff]   ;;  %v23602_v17 = vld [vmem:[#allocation2 + $0xc] ss:$44 sps:$4 sm:$0xff]  }
 0xe64   :  { %9301 = vmatprep.subr.bf16.mxu0 %v20755_v18  ;;  %v20830_v18 = vld [vmem:[#allocation31 + $0x64] ss:$8 sps:$4 sm:$0xff]  }
 0xe66   :  { %8146 = vmatpush1.bf16.msra.mxu1 %v20750_v60  ;;  %v20825_v60 = vld [vmem:[#allocation32 + $0x160] ss:$8 sps:$4 sm:$0xff]  }
 0xe67   :  { %9302 = vmatpush1.bf16.msra.mxu0 %v20753_v62  ;;  %8147 = vmatprep.subr.bf16.mxu1 %v20758_v6  ;;  %v20828_v62 = vld [vmem:[#allocation31 + $0x60] ss:$8 sps:$4 sm:$0xff]   ;;  %v20833_v6 = vld [vmem:[#allocation32 + $0x154] ss:$8 sps:$4 sm:$0xff]  }
 0xe68   :  { %9303 = vmatprep.subr.bf16.mxu0 %v20761_v41  ;;  %v22405_v41 = vld [vmem:[#allocation2 + $0x4] ss:$44 sps:$4 sm:$0xff]  }
 0xe6a   :  { %8148 = vmatpush1.bf16.msra.mxu1 %v20756_v8  ;;  %v20836_v8 = vld [vmem:[#allocation31 + $0x54] ss:$8 sps:$4 sm:$0xff]  }
 0xe6b   :  { %9304 = vmatpush1.bf16.msra.mxu0 %v20759_v36  ;;  %8149 = vmatprep.subr.bf16.mxu1 %v20764_v55  ;;  %v20831_v36 = vld [vmem:[#allocation32 + $0x150] ss:$8 sps:$4 sm:$0xff]  }
 0xe6c   :  { %9305 = vmatprep.subr.bf16.mxu0 %v20767_v40  ;;  %v20834_v55 = vld [vmem:[#allocation31 + $0x50] ss:$8 sps:$4 sm:$0xff]   ;;  %v20839_v40 = vld [vmem:[#allocation32 + $0x144] ss:$8 sps:$4 sm:$0xff]  }
 0xe6e   :  { %8150 = vmatpush1.bf16.msra.mxu1 %v20762_v11  ;;  %v20842_v11 = vld [vmem:[#allocation31 + $0x44] ss:$8 sps:$4 sm:$0xff]  }
 0xe6f   :  { %9306 = vmatpush1.bf16.msra.mxu0 %v20765_v12  ;;  %8151 = vmatprep.subr.bf16.mxu1 %v20770_v13  ;;  %v20837_v12 = vld [vmem:[#allocation32 + $0x140] ss:$8 sps:$4 sm:$0xff]  }
 0xe70   :  { %9307 = vmatprep.subr.bf16.mxu0 %v20773_v14  ;;  %v20840_v13 = vld [vmem:[#allocation31 + $0x40] ss:$8 sps:$4 sm:$0xff]   ;;  %v20845_v14 = vld [vmem:[#allocation32 + $0x134] ss:$8 sps:$4 sm:$0xff]  }
 0xe72   :  { %8152 = vmatpush2.bf16.msra.mxu1 %v20768_v59  ;;  %v20848_v59 = vld [vmem:[#allocation31 + $0x34] ss:$8 sps:$4 sm:$0xff]  }
 0xe73   :  { %9308 = vmatpush2.bf16.msra.mxu0 %v20771_v10  ;;  %8153 = vmatprep.subr.bf16.mxu1 %v20776_v16  ;;  %v20843_v10 = vld [vmem:[#allocation32 + $0x130] ss:$8 sps:$4 sm:$0xff]  }
 0xe74   :  { %9309 = vmatprep.subr.bf16.mxu0 %v20779_v2  ;;  %v20846_v16 = vld [vmem:[#allocation31 + $0x30] ss:$8 sps:$4 sm:$0xff]   ;;  %v20851_v2 = vld [vmem:[#allocation32 + $0x124] ss:$8 sps:$4 sm:$0xff]  }
 0xe76   :  { %8154 = vmatpush2.bf16.msra.mxu1 %v20774_v4  ;;  %v20854_v4 = vld [vmem:[#allocation31 + $0x24] ss:$8 sps:$4 sm:$0xff]  }
 0xe77   :  { %9310 = vmatpush2.bf16.msra.mxu0 %v20777_v46  ;;  %8155 = vmatprep.subr.bf16.mxu1 %v20782_v19  ;;  %v20849_v46 = vld [vmem:[#allocation32 + $0x120] ss:$8 sps:$4 sm:$0xff]  }
 0xe78   :  { %9311 = vmatprep.subr.bf16.mxu0 %v20785_v5  ;;  %v20852_v19 = vld [vmem:[#allocation31 + $0x20] ss:$8 sps:$4 sm:$0xff]   ;;  %v20857_v5 = vld [vmem:[#allocation32 + $0x114] ss:$8 sps:$4 sm:$0xff]  }
 0xe7a   :  { %8156 = vmatpush2.bf16.msra.mxu1 %v20780_v20  ;;  %v20860_v20 = vld [vmem:[#allocation31 + $0x14] ss:$8 sps:$4 sm:$0xff]  }
 0xe7b   :  { %9312 = vmatpush2.bf16.msra.mxu0 %v20783_v15  ;;  %8157 = vmatprep.subr.bf16.mxu1 %v20788_v22  ;;  %v20855_v15 = vld [vmem:[#allocation32 + $0x110] ss:$8 sps:$4 sm:$0xff]  }
 0xe7c   :  { %9313 = vmatprep.subr.bf16.mxu0 %v20791_v38  ;;  %v20858_v22 = vld [vmem:[#allocation31 + $0x10] ss:$8 sps:$4 sm:$0xff]   ;;  %v20863_v38 = vld [vmem:[#allocation32 + $0x104] ss:$8 sps:$4 sm:$0xff]  }
 0xe7e   :  { %8158 = vmatpush2.bf16.msra.mxu1 %v20786_v39  ;;  %v20866_v39 = vld [vmem:[#allocation31 + $0x4] ss:$8 sps:$4 sm:$0xff]  }
 0xe7f   :  { %9314 = vmatpush2.bf16.msra.mxu0 %v20789_v3  ;;  %8159 = vmatprep.subr.bf16.mxu1 %v20794_v9  ;;  %v20861_v3 = vld [vmem:[#allocation32 + $0x100] ss:$8 sps:$4 sm:$0xff]  }
 0xe80   :  { %9315 = vmatprep.subr.bf16.mxu0 %v20797_v27  ;;  %v20864_v9 = vld [vmem:[#allocation31] ss:$8 sps:$4 sm:$0xff]   ;;  %v20869_v27 = vld [vmem:[#allocation32 + $0x1f4] ss:$8 sps:$4 sm:$0xff]  }
 0xe82   :  { %8160 = vmatpush2.bf16.msra.mxu1 %v20792_v28  ;;  %v20872_v28 = vld [vmem:[#allocation31 + $0xf4] ss:$8 sps:$4 sm:$0xff]  }
 0xe83   :  { %9316 = vmatpush2.bf16.msra.mxu0 %v20795_v43  ;;  %8161 = vmatprep.subr.bf16.mxu1 %v20800_v29  ;;  %v20867_v43 = vld [vmem:[#allocation32 + $0x1f0] ss:$8 sps:$4 sm:$0xff]  }
 0xe84   :  { %9317 = vmatprep.subr.bf16.mxu0 %v20803_v30  ;;  %v20870_v29 = vld [vmem:[#allocation31 + $0xf0] ss:$8 sps:$4 sm:$0xff]   ;;  %v20875_v30 = vld [vmem:[#allocation32 + $0x1e4] ss:$8 sps:$4 sm:$0xff]  }
 0xe86   :  { %8162 = vmatpush2.bf16.msra.mxu1 %v20798_v63  ;;  %v20878_v63 = vld [vmem:[#allocation31 + $0xe4] ss:$8 sps:$4 sm:$0xff]  }
 0xe87   :  { %9318 = vmatpush2.bf16.msra.mxu0 %v20801_v31  ;;  %8163 = vmatprep.subr.bf16.mxu1 %v20806_v33  ;;  %v20873_v31 = vld [vmem:[#allocation32 + $0x1e0] ss:$8 sps:$4 sm:$0xff]  }
 0xe88   :  { %9319 = vmatprep.subr.bf16.mxu0 %v20809_v45  ;;  %v20876_v33 = vld [vmem:[#allocation31 + $0xe0] ss:$8 sps:$4 sm:$0xff]   ;;  %v20881_v45 = vld [vmem:[#allocation32 + $0x1d4] ss:$8 sps:$4 sm:$0xff]  }
 0xe8a   :  { %8164 = vmatpush2.bf16.msra.mxu1 %v20804_v7  ;;  %v20884_v7 = vld [vmem:[#allocation31 + $0xd4] ss:$8 sps:$4 sm:$0xff]  }
 0xe8b   :  { %9320 = vmatpush2.bf16.msra.mxu0 %v20807_v21  ;;  %8165 = vmatprep.subr.bf16.mxu1 %v20812_v47  ;;  %v20879_v21 = vld [vmem:[#allocation32 + $0x1d0] ss:$8 sps:$4 sm:$0xff]  }
 0xe8c   :  { %9321 = vmatprep.subr.bf16.mxu0 %v20815_v49  ;;  %v20882_v47 = vld [vmem:[#allocation31 + $0xd0] ss:$8 sps:$4 sm:$0xff]   ;;  %v20887_v49 = vld [vmem:[#allocation32 + $0x1c4] ss:$8 sps:$4 sm:$0xff]  }
 0xe8e   :  { %8166 = vmatpush2.bf16.msra.mxu1 %v20810_v50  ;;  %v20890_v50 = vld [vmem:[#allocation31 + $0xc4] ss:$8 sps:$4 sm:$0xff]  }
 0xe8f   :  { %9322 = vmatpush2.bf16.msra.mxu0 %v20813_v37  ;;  %9248 = vmatprep.subr.bf16.mxu1 %v20818_v54  ;;  %v20885_v37 = vld [vmem:[#allocation32 + $0x1c0] ss:$8 sps:$4 sm:$0xff]  }
 0xe90   :  { %10029 = vmatprep.subr.bf16.mxu0 %v20821_v56  ;;  %v20888_v54 = vld [vmem:[#allocation31 + $0xc0] ss:$8 sps:$4 sm:$0xff]   ;;  %v20893_v56 = vld [vmem:[#allocation32 + $0x1b4] ss:$8 sps:$4 sm:$0xff]  }
 0xe91   :  { %8168 = vmatmul.mubr.bf16.vlgmr.msra.gmra.mxu1 %v22404_v24  ;;  %v20899_v24 = vld [vmem:[#allocation32 + $0x1a4] ss:$8 sps:$4 sm:$0xff]  }
 0xe92   :  { %9324 = vmatmul.mubr.bf16.vlgmr.msra.gmra.mxu0 %v23600_v42  ;;  %9249 = vmatpush1.bf16.msra.mxu1 %v20816_v57  ;;  %v20896_v57 = vld [vmem:[#allocation31 + $0xb4] ss:$8 sps:$4 sm:$0xff]  }
 0xe93   :  { %9280 = vmatprep.mubr.bf16.mxu1 %v23602_v17  ;;  %10030 = vmatpush1.bf16.msra.mxu0 %v20819_v58  ;;  %v20891_v58 = vld [vmem:[#allocation32 + $0x1b0] ss:$8 sps:$4 sm:$0xff]  }
 0xe94   :  { %10061 = vmatprep.mubr.bf16.mxu0 %v22405_v41  ;;  %9250 = vmatprep.subr.bf16.mxu1 %v20827_v44  ;;  %v20894_v44 = vld [vmem:[#allocation31 + $0xb0] ss:$8 sps:$4 sm:$0xff]   ;;  %v20908_v41 = vld [vmem:[#allocation31 + $0x94] ss:$8 sps:$4 sm:$0xff]  }
 0xe95   :  { %10031 = vmatprep.subr.bf16.mxu0 %v20830_v18  ;;  %v20902_v18 = vld [vmem:[#allocation31 + $0xa4] ss:$8 sps:$4 sm:$0xff]  }
 0xe96   :  { %9251 = vmatpush1.bf16.msra.mxu1 %v20825_v60  ;;  %v20897_v60 = vld [vmem:[#allocation32 + $0x1a0] ss:$8 sps:$4 sm:$0xff]  }
 0xe97   :  { %10032 = vmatpush1.bf16.msra.mxu0 %v20828_v62  ;;  %9252 = vmatprep.subr.bf16.mxu1 %v20833_v6  ;;  %v20900_v62 = vld [vmem:[#allocation31 + $0xa0] ss:$8 sps:$4 sm:$0xff]   ;;  %v20905_v6 = vld [vmem:[#allocation32 + $0x194] ss:$8 sps:$4 sm:$0xff]  }
 0xe98   :  { %10033 = vmatprep.subr.bf16.mxu0 %v20836_v8  ;;  %v20903_v8 = vld [vmem:[#allocation32 + $0x190] ss:$8 sps:$4 sm:$0xff]  }
 0xe9a   :  { %9253 = vmatpush1.bf16.msra.mxu1 %v20831_v36  ;;  %v20906_v36 = vld [vmem:[#allocation31 + $0x90] ss:$8 sps:$4 sm:$0xff]  }
 0xe9b   :  { %10034 = vmatpush1.bf16.msra.mxu0 %v20834_v55  ;;  %9254 = vmatprep.subr.bf16.mxu1 %v20839_v40  ;;  %v20911_v55 = vld [vmem:[#allocation32 + $0x184] ss:$8 sps:$4 sm:$0xff]  }
 0xe9c   :  { %10035 = vmatprep.subr.bf16.mxu0 %v20842_v11  ;;  %v20914_v40 = vld [vmem:[#allocation31 + $0x84] ss:$8 sps:$4 sm:$0xff]   ;;  %v20909_v11 = vld [vmem:[#allocation32 + $0x180] ss:$8 sps:$4 sm:$0xff]  }
 0xe9e   :  { %9255 = vmatpush1.bf16.msra.mxu1 %v20837_v12  ;;  %v20912_v12 = vld [vmem:[#allocation31 + $0x80] ss:$8 sps:$4 sm:$0xff]  }
 0xe9f   :  { %10036 = vmatpush1.bf16.msra.mxu0 %v20840_v13  ;;  %9256 = vmatprep.subr.bf16.mxu1 %v20845_v14  ;;  %v20917_v13 = vld [vmem:[#allocation31 + $0x274] ss:$8 sps:$4 sm:$0xff]  }
 0xea0   :  { %10037 = vmatprep.subr.bf16.mxu0 %v20848_v59  ;;  %v21015_v14 = vld [vmem:[#allocation32 + $0x374] ss:$8 sps:$4 sm:$0xff]   ;;  %v21013_v59 = vld [vmem:[#allocation32 + $0x370] ss:$8 sps:$4 sm:$0xff]  }
 0xea2   :  { %9257 = vmatpush1.bf16.msra.mxu1 %v20843_v10  ;;  %v23606_v10 = vld [vmem:[#allocation2 + $0x8] ss:$44 sps:$4 sm:$0xff]  }
 0xea3   :  { %10038 = vmatpush1.bf16.msra.mxu0 %v20846_v16  ;;  %9258 = vmatprep.subr.bf16.mxu1 %v20851_v2  ;;  %v20915_v16 = vld [vmem:[#allocation31 + $0x270] ss:$8 sps:$4 sm:$0xff]   ;;  %v20920_v2 = vld [vmem:[#allocation31 + $0x264] ss:$8 sps:$4 sm:$0xff]  }
 0xea4   :  { %10039 = vmatprep.subr.bf16.mxu0 %v20854_v4  ;;  %v21022_v4 = vld [vmem:[#allocation32 + $0x364] ss:$8 sps:$4 sm:$0xff]  }
 0xea6   :  { %9259 = vmatpush1.bf16.msra.mxu1 %v20849_v46  ;;  %v22406_v46 = vld [vmem:[#allocation2] ss:$44 sps:$4 sm:$0xff]  }
 0xea7   :  { %10040 = vmatpush1.bf16.msra.mxu0 %v20852_v19  ;;  %9260 = vmatprep.subr.bf16.mxu1 %v20857_v5  ;;  %v21020_v19 = vld [vmem:[#allocation32 + $0x360] ss:$8 sps:$4 sm:$0xff]  }
 0xea8   :  { %10041 = vmatprep.subr.bf16.mxu0 %v20860_v20  ;;  %v20918_v5 = vld [vmem:[#allocation31 + $0x260] ss:$8 sps:$4 sm:$0xff]   ;;  %v20923_v20 = vld [vmem:[#allocation31 + $0x254] ss:$8 sps:$4 sm:$0xff]  }
 0xeaa   :  { %9261 = vmatpush1.bf16.msra.mxu1 %v20855_v15  ;;  %v21030_v15 = vld [vmem:[#allocation32 + $0x354] ss:$8 sps:$4 sm:$0xff]  }
 0xeab   :  { %10042 = vmatpush1.bf16.msra.mxu0 %v20858_v22  ;;  %9262 = vmatprep.subr.bf16.mxu1 %v20863_v38  ;;  %v21028_v22 = vld [vmem:[#allocation32 + $0x350] ss:$8 sps:$4 sm:$0xff]  }
 0xeac   :  { %10043 = vmatprep.subr.bf16.mxu0 %v20866_v39  ;;  %v20921_v38 = vld [vmem:[#allocation31 + $0x250] ss:$8 sps:$4 sm:$0xff]   ;;  %v20926_v39 = vld [vmem:[#allocation31 + $0x244] ss:$8 sps:$4 sm:$0xff]  }
 0xeae   :  { %9263 = vmatpush1.bf16.msra.mxu1 %v20861_v3  ;;  %v21036_v3 = vld [vmem:[#allocation32 + $0x344] ss:$8 sps:$4 sm:$0xff]  }
 0xeaf   :  { %10044 = vmatpush1.bf16.msra.mxu0 %v20864_v9  ;;  %9264 = vmatprep.subr.bf16.mxu1 %v20869_v27  ;;  %v21034_v9 = vld [vmem:[#allocation32 + $0x340] ss:$8 sps:$4 sm:$0xff]  }
 0xeb0   :  { %10045 = vmatprep.subr.bf16.mxu0 %v20872_v28  ;;  %v20924_v27 = vld [vmem:[#allocation31 + $0x240] ss:$8 sps:$4 sm:$0xff]   ;;  %v21042_v28 = vld [vmem:[#allocation32 + $0x334] ss:$8 sps:$4 sm:$0xff]  }
 0xeb2   :  { %9265 = vmatpush2.bf16.msra.mxu1 %v20867_v43  ;;  %v21040_v43 = vld [vmem:[#allocation32 + $0x330] ss:$8 sps:$4 sm:$0xff]  }
 0xeb3   :  { %10046 = vmatpush2.bf16.msra.mxu0 %v20870_v29  ;;  %9266 = vmatprep.subr.bf16.mxu1 %v20875_v30  ;;  %v20927_v29 = vld [vmem:[#allocation31 + $0x230] ss:$8 sps:$4 sm:$0xff]   ;;  %v20932_v30 = vld [vmem:[#allocation31 + $0x224] ss:$8 sps:$4 sm:$0xff]  }
 0xeb4   :  { %10047 = vmatprep.subr.bf16.mxu0 %v20878_v63  ;;  %v21048_v63 = vld [vmem:[#allocation32 + $0x324] ss:$8 sps:$4 sm:$0xff]  }
 0xeb6   :  { %9267 = vmatpush2.bf16.msra.mxu1 %v20873_v31  ;;  %v21046_v31 = vld [vmem:[#allocation32 + $0x320] ss:$8 sps:$4 sm:$0xff]  }
 0xeb7   :  { %10048 = vmatpush2.bf16.msra.mxu0 %v20876_v33  ;;  %9268 = vmatprep.subr.bf16.mxu1 %v20881_v45  ;;  %v20930_v33 = vld [vmem:[#allocation31 + $0x220] ss:$8 sps:$4 sm:$0xff]   ;;  %v20935_v45 = vld [vmem:[#allocation31 + $0x214] ss:$8 sps:$4 sm:$0xff]  }
 0xeb8   :  { %10049 = vmatprep.subr.bf16.mxu0 %v20884_v7  ;;  %v21054_v7 = vld [vmem:[#allocation32 + $0x314] ss:$8 sps:$4 sm:$0xff]  }
 0xeba   :  { %9269 = vmatpush2.bf16.msra.mxu1 %v20879_v21  ;;  %v21052_v21 = vld [vmem:[#allocation32 + $0x310] ss:$8 sps:$4 sm:$0xff]  }
 0xebb   :  { %10050 = vmatpush2.bf16.msra.mxu0 %v20882_v47  ;;  %9270 = vmatprep.subr.bf16.mxu1 %v20887_v49  ;;  %v20933_v47 = vld [vmem:[#allocation31 + $0x210] ss:$8 sps:$4 sm:$0xff]   ;;  %v20938_v49 = vld [vmem:[#allocation31 + $0x204] ss:$8 sps:$4 sm:$0xff]  }
 0xebc   :  { %10051 = vmatprep.subr.bf16.mxu0 %v20890_v50  ;;  %v21060_v50 = vld [vmem:[#allocation32 + $0x304] ss:$8 sps:$4 sm:$0xff]  }
 0xebe   :  { %9271 = vmatpush2.bf16.msra.mxu1 %v20885_v37  ;;  %v21058_v37 = vld [vmem:[#allocation32 + $0x300] ss:$8 sps:$4 sm:$0xff]  }
 0xebf   :  { %10052 = vmatpush2.bf16.msra.mxu0 %v20888_v54  ;;  %9272 = vmatprep.subr.bf16.mxu1 %v20893_v56  ;;  %v20936_v54 = vld [vmem:[#allocation31 + $0x200] ss:$8 sps:$4 sm:$0xff]   ;;  %v20941_v56 = vld [vmem:[#allocation31 + $0x2f4] ss:$8 sps:$4 sm:$0xff]  }
 0xec0   :  { %10053 = vmatprep.subr.bf16.mxu0 %v20896_v57  ;;  %v21066_v57 = vld [vmem:[#allocation32 + $0x3f4] ss:$8 sps:$4 sm:$0xff]  }
 0xec2   :  { %9273 = vmatpush2.bf16.msra.mxu1 %v20891_v58  ;;  %v21064_v58 = vld [vmem:[#allocation32 + $0x3f0] ss:$8 sps:$4 sm:$0xff]  }
 0xec3   :  { %10054 = vmatpush2.bf16.msra.mxu0 %v20894_v44  ;;  %9274 = vmatprep.subr.bf16.mxu1 %v20899_v24  ;;  %v20939_v44 = vld [vmem:[#allocation31 + $0x2f0] ss:$8 sps:$4 sm:$0xff]   ;;  %v20944_v24 = vld [vmem:[#allocation31 + $0x2e4] ss:$8 sps:$4 sm:$0xff]  }
 0xec4   :  { %10055 = vmatprep.subr.bf16.mxu0 %v20902_v18  ;;  %v21072_v18 = vld [vmem:[#allocation32 + $0x3e4] ss:$8 sps:$4 sm:$0xff]  }
 0xec6   :  { %9275 = vmatpush2.bf16.msra.mxu1 %v20897_v60  ;;  %v21070_v60 = vld [vmem:[#allocation32 + $0x3e0] ss:$8 sps:$4 sm:$0xff]  }
 0xec7   :  { %10056 = vmatpush2.bf16.msra.mxu0 %v20900_v62  ;;  %9276 = vmatprep.subr.bf16.mxu1 %v20905_v6  ;;  %v20942_v62 = vld [vmem:[#allocation31 + $0x2e0] ss:$8 sps:$4 sm:$0xff]   ;;  %v20947_v6 = vld [vmem:[#allocation31 + $0x2d4] ss:$8 sps:$4 sm:$0xff]  }
 0xec8   :  { %10057 = vmatprep.subr.bf16.mxu0 %v20908_v41  ;;  %v21078_v41 = vld [vmem:[#allocation32 + $0x3d4] ss:$8 sps:$4 sm:$0xff]  }
 0xeca   :  { %9277 = vmatpush2.bf16.msra.mxu1 %v20903_v8  ;;  %v21076_v8 = vld [vmem:[#allocation32 + $0x3d0] ss:$8 sps:$4 sm:$0xff]  }
 0xecb   :  { %10058 = vmatpush2.bf16.msra.mxu0 %v20906_v36  ;;  %9278 = vmatprep.subr.bf16.mxu1 %v20911_v55  ;;  %v20945_v36 = vld [vmem:[#allocation31 + $0x2d0] ss:$8 sps:$4 sm:$0xff]   ;;  %v20950_v55 = vld [vmem:[#allocation31 + $0x2c4] ss:$8 sps:$4 sm:$0xff]  }
 0xecc   :  { %10059 = vmatprep.subr.bf16.mxu0 %v20914_v40  ;;  %v21084_v40 = vld [vmem:[#allocation32 + $0x3c4] ss:$8 sps:$4 sm:$0xff]  }
 0xece   :  { %9279 = vmatpush2.bf16.msra.mxu1 %v20909_v11  ;;  %v21082_v11 = vld [vmem:[#allocation32 + $0x3c0] ss:$8 sps:$4 sm:$0xff]  }
 0xecf   :  { %10060 = vmatpush2.bf16.msra.mxu0 %v20912_v12  ;;  %9334 = vmatprep.subr.bf16.mxu1 %v21015_v14  ;;  %v20948_v12 = vld [vmem:[#allocation31 + $0x2c0] ss:$8 sps:$4 sm:$0xff]   ;;  %v21090_v14 = vld [vmem:[#allocation32 + $0x3b4] ss:$8 sps:$4 sm:$0xff]  }
 0xed0   :  { %10115 = vmatprep.subr.bf16.mxu0 %v20917_v13  ;;  %v20953_v13 = vld [vmem:[#allocation31 + $0x2b4] ss:$8 sps:$4 sm:$0xff]  }
 0xed1   :  { %9281 = vmatmul.mubr.bf16.vlgmr.msra.gmra.mxu1 %v23606_v10 }
 0xed2   :  { %10062 = vmatmul.mubr.bf16.vlgmr.msra.gmra.mxu0 %v22406_v46  ;;  %9335 = vmatpush1.bf16.msra.mxu1 %v21013_v59  ;;  %v21088_v59 = vld [vmem:[#allocation32 + $0x3b0] ss:$8 sps:$4 sm:$0xff]   ;;  %v21094_v46 = vld [vmem:[#allocation32 + $0x3a0] ss:$8 sps:$4 sm:$0xff]  }
 0xed3   :  { %10116 = vmatpush1.bf16.msra.mxu0 %v20915_v16  ;;  %10147 = vmatprep.mubr.bf16.mxu0 %v23597_v32  ;;  %v20929_v32 = vld [vmem:[#allocation31 + $0x234] ss:$8 sps:$4 sm:$0xff]   ;;  %v20951_v16 = vld [vmem:[#allocation31 + $0x2b0] ss:$8 sps:$4 sm:$0xff]  }
 0xed4   :  { %10117 = vmatprep.subr.bf16.mxu0 %v20920_v2  ;;  %9336 = vmatprep.subr.bf16.mxu1 %v21022_v4  ;;  %v20956_v2 = vld [vmem:[#allocation31 + $0x2a4] ss:$8 sps:$4 sm:$0xff]  }
 0xed5   :  { %v21096_v4 = vld [vmem:[#allocation32 + $0x3a4] ss:$8 sps:$4 sm:$0xff]  }
 0xed6   :  { %9337 = vmatpush1.bf16.msra.mxu1 %v21020_v19  ;;  %v20954_v19 = vld [vmem:[#allocation31 + $0x2a0] ss:$8 sps:$4 sm:$0xff]  }
 0xed7   :  { %10118 = vmatpush1.bf16.msra.mxu0 %v20918_v5  ;;  %9338 = vmatprep.subr.bf16.mxu1 %v21030_v15  ;;  %v20959_v5 = vld [vmem:[#allocation31 + $0x294] ss:$8 sps:$4 sm:$0xff]   ;;  %v21100_v15 = vld [vmem:[#allocation32 + $0x390] ss:$8 sps:$4 sm:$0xff]  }
 0xed8   :  { %10119 = vmatprep.subr.bf16.mxu0 %v20923_v20  ;;  %v21102_v20 = vld [vmem:[#allocation32 + $0x394] ss:$8 sps:$4 sm:$0xff]  }
 0xeda   :  { %9339 = vmatpush1.bf16.msra.mxu1 %v21028_v22  ;;  %v20957_v22 = vld [vmem:[#allocation31 + $0x290] ss:$8 sps:$4 sm:$0xff]  }
 0xedb   :  { %10120 = vmatpush1.bf16.msra.mxu0 %v20921_v38  ;;  %9340 = vmatprep.subr.bf16.mxu1 %v21036_v3  ;;  %v20962_v38 = vld [vmem:[#allocation31 + $0x284] ss:$8 sps:$4 sm:$0xff]   ;;  %v21106_v3 = vld [vmem:[#allocation32 + $0x380] ss:$8 sps:$4 sm:$0xff]  }
 0xedc   :  { %10121 = vmatprep.subr.bf16.mxu0 %v20926_v39  ;;  %v21108_v39 = vld [vmem:[#allocation32 + $0x384] ss:$8 sps:$4 sm:$0xff]  }
 0xede   :  { %9341 = vmatpush1.bf16.msra.mxu1 %v21034_v9  ;;  %v20960_v9 = vld [vmem:[#allocation31 + $0x280] ss:$8 sps:$4 sm:$0xff]  }
 0xedf   :  { %10122 = vmatpush1.bf16.msra.mxu0 %v20924_v27  ;;  %9342 = vmatprep.subr.bf16.mxu1 %v21042_v28  ;;  %v20965_v27 = vld [vmem:[#allocation35 + $0x234] ss:$40 sps:$4 sm:$0xff]   ;;  %v20963_v28 = vld [vmem:[#allocation35 + $0x230] ss:$40 sps:$4 sm:$0xff]  }
 0xee0   :  { %10123 = vmatprep.subr.bf16.mxu0 %v20929_v32  ;;  %v21117_v32 = vld [vmem:[#allocation31 + $0x174] ss:$8 sps:$4 sm:$0xff]  }
 0xee2   :  { %9343 = vmatpush1.bf16.msra.mxu1 %v21040_v43  ;;  %v20970_v43 = vld [vmem:[#allocation35 + $0x1e4] ss:$40 sps:$4 sm:$0xff]  }
 0xee3   :  { %10124 = vmatpush1.bf16.msra.mxu0 %v20927_v29  ;;  %9344 = vmatprep.subr.bf16.mxu1 %v21048_v63  ;;  %v20966_v29 = vld [vmem:[#allocation2 + $0x4] ss:$44 sps:$4 sm:$0xff]   ;;  %v20973_v63 = vld [vmem:[#allocation35 + $0x194] ss:$40 sps:$4 sm:$0xff]  }
 0xee4   :  { %10125 = vmatprep.subr.bf16.mxu0 %v20932_v30  ;;  %v20968_v30 = vld [vmem:[#allocation35 + $0x1e0] ss:$40 sps:$4 sm:$0xff]  }
 0xee6   :  { %9345 = vmatpush1.bf16.msra.mxu1 %v21046_v31  ;;  %v20971_v31 = vld [vmem:[#allocation35 + $0x190] ss:$40 sps:$4 sm:$0xff]  }
 0xee7   :  { %10126 = vmatpush1.bf16.msra.mxu0 %v20930_v33  ;;  %9346 = vmatprep.subr.bf16.mxu1 %v21054_v7  ;;  %v20976_v33 = vld [vmem:[#allocation35 + $0x144] ss:$40 sps:$4 sm:$0xff]   ;;  %v20979_v7 = vld [vmem:[#allocation35 + $0xf4] ss:$40 sps:$4 sm:$0xff]  }
 0xee8   :  { %10127 = vmatprep.subr.bf16.mxu0 %v20935_v45  ;;  %v20974_v45 = vld [vmem:[#allocation35 + $0x140] ss:$40 sps:$4 sm:$0xff]  }
 0xeea   :  { %9347 = vmatpush1.bf16.msra.mxu1 %v21052_v21  ;;  %v20977_v21 = vld [vmem:[#allocation35 + $0xf0] ss:$40 sps:$4 sm:$0xff]  }
 0xeeb   :  { %10128 = vmatpush1.bf16.msra.mxu0 %v20933_v47  ;;  %9348 = vmatprep.subr.bf16.mxu1 %v21060_v50  ;;  %v20982_v47 = vld [vmem:[#allocation35 + $0xa4] ss:$40 sps:$4 sm:$0xff]   ;;  %v20985_v50 = vld [vmem:[#allocation35 + $0x54] ss:$40 sps:$4 sm:$0xff]  }
 0xeec   :  { %10129 = vmatprep.subr.bf16.mxu0 %v20938_v49  ;;  %v23611_v49 = vpop.f32.mrf.mxu0 }
 0xeee   :  { %9349 = vmatpush1.bf16.msra.mxu1 %v21058_v37  ;;  %v23613_v37 = vpop.f32.mrf.mxu1 }
 0xeef   :  { %10130 = vmatpush1.bf16.msra.mxu0 %v20936_v54  ;;  %9350 = vmatprep.subr.bf16.mxu1 %v21066_v57  ;;  %v7341_v54 = vpop.f32.mrf.mxu0  ;;  %v20988_v57 = vld [vmem:[#allocation35 + $0x4] ss:$40 sps:$4 sm:$0xff]  }
 0xef0   :  { %10131 = vmatprep.subr.bf16.mxu0 %v20941_v56  ;;  %v20983_v56 = vld [vmem:[#allocation35 + $0x50] ss:$40 sps:$4 sm:$0xff]  }
 0xef2   :  { %9351 = vmatpush2.bf16.msra.mxu1 %v21064_v58  ;;  %v7384_v58 = vpop.f32.mrf.mxu1 }
 0xef3   :  { %10132 = vmatpush2.bf16.msra.mxu0 %v20939_v44  ;;  %9352 = vmatprep.subr.bf16.mxu1 %v21072_v18  ;;  %v7343_v44 = vpop.f32.mrf.mxu0  ;;  %v20991_v18 = vld [vmem:[#allocation35 + $0x4b4] ss:$40 sps:$4 sm:$0xff]  }
 0xef4   :  { %10133 = vmatprep.subr.bf16.mxu0 %v20944_v24  ;;  %v20986_v24 = vld [vmem:[#allocation35] ss:$40 sps:$4 sm:$0xff]  }
 0xef6   :  { %9353 = vmatpush2.bf16.msra.mxu1 %v21070_v60  ;;  %v7386_v60 = vpop.f32.mrf.mxu1 }
 0xef7   :  { %10134 = vmatpush2.bf16.msra.mxu0 %v20942_v62  ;;  %9354 = vmatprep.subr.bf16.mxu1 %v21078_v41  ;;  %v7345_v62 = vpop.f32.mrf.mxu0  ;;  %v20994_v41 = vld [vmem:[#allocation35 + $0x464] ss:$40 sps:$4 sm:$0xff]  }
 0xef8   :  { %10135 = vmatprep.subr.bf16.mxu0 %v20947_v6  ;;  %v20989_v6 = vld [vmem:[#allocation35 + $0x4b0] ss:$40 sps:$4 sm:$0xff]  }
 0xefa   :  { %9355 = vmatpush2.bf16.msra.mxu1 %v21076_v8  ;;  %v7388_v8 = vpop.f32.mrf.mxu1 }
 0xefb   :  { %10136 = vmatpush2.bf16.msra.mxu0 %v20945_v36  ;;  %9356 = vmatprep.subr.bf16.mxu1 %v21084_v40  ;;  %v7425_v36 = vpop.f32.mrf.mxu0  ;;  %v20992_v40 = vld [vmem:[#allocation35 + $0x460] ss:$40 sps:$4 sm:$0xff]  }
 0xefc   :  { %10137 = vmatprep.subr.bf16.mxu0 %v20950_v55  ;;  %v23615_v55 = vpop.f32.mrf.mxu1 }
 0xefe   :  { %9357 = vmatpush2.bf16.msra.mxu1 %v21082_v11  ;;  %v20997_v11 = vld [vmem:[#allocation35 + $0x414] ss:$40 sps:$4 sm:$0xff]  }
 0xeff   :  { %10138 = vmatpush2.bf16.msra.mxu0 %v20948_v12  ;;  %9358 = vmatprep.subr.bf16.mxu1 %v21090_v14  ;;  %v7427_v12 = vpop.f32.mrf.mxu0  ;;  %v20995_v14 = vld [vmem:[#allocation35 + $0x410] ss:$40 sps:$4 sm:$0xff]  }
 0xf00   :  { %10139 = vmatprep.subr.bf16.mxu0 %v20953_v13  ;;  %v7470_v13 = vpop.f32.mrf.mxu1 }
 0xf02   :  { %9359 = vmatpush2.bf16.msra.mxu1 %v21088_v59  ;;  %v21000_v59 = vld [vmem:[#allocation35 + $0x3c4] ss:$40 sps:$4 sm:$0xff]  }
 0xf03   :  { %10140 = vmatpush2.bf16.msra.mxu0 %v20951_v16  ;;  %9360 = vmatprep.subr.bf16.mxu1 %v21096_v4  ;;  %v7429_v16 = vpop.f32.mrf.mxu0  ;;  %v20998_v4 = vld [vmem:[#allocation35 + $0x3c0] ss:$40 sps:$4 sm:$0xff]  }
 0xf04   :  { %10141 = vmatprep.subr.bf16.mxu0 %v20956_v2  ;;  %v7472_v2 = vpop.f32.mrf.mxu1 }
 0xf06   :  { %9361 = vmatpush2.bf16.msra.mxu1 %v21094_v46  ;;  %v21003_v46 = vld [vmem:[#allocation35 + $0x374] ss:$40 sps:$4 sm:$0xff]  }
 0xf07   :  { %10142 = vmatpush2.bf16.msra.mxu0 %v20954_v19  ;;  %9362 = vmatprep.subr.bf16.mxu1 %v21102_v20  ;;  %v7431_v19 = vpop.f32.mrf.mxu0 }
 0xf08   :  { %10143 = vmatprep.subr.bf16.mxu0 %v20959_v5  ;;  %v7389_v5 = vadd.f32 %v7388_v8, %v7345_v62 }
 0xf09   :  { %v23617_v20 = vpop.f32.mrf.mxu0 }
 0xf0a   :  { %9363 = vmatpush2.bf16.msra.mxu1 %v21100_v15  ;;  %v7474_v15 = vpop.f32.mrf.mxu1 }
 0xf0b   :  { %10144 = vmatpush2.bf16.msra.mxu0 %v20957_v22  ;;  %9364 = vmatprep.subr.bf16.mxu1 %v21108_v39  ;;  %v21001_v22 = vld [vmem:[#allocation35 + $0x370] ss:$40 sps:$4 sm:$0xff]   ;;  %v7432_v39 = vadd.f32 %v7431_v19, %v7389_v5  ;;  %v21025_v19 = vld [vmem:[#allocation35 + $0xbe0] ss:$40 sps:$4 sm:$0xff]  }
 0xf0c   :  { %10145 = vmatprep.subr.bf16.mxu0 %v20962_v38  ;;  %v7385_v38 = vadd.f32 %v7384_v58, %v7341_v54  ;;  %v7383_v58 = vadd.f32 %v23613_v37, %v23611_v49 }
 0xf0e   :  { %9365 = vmatpush2.bf16.msra.mxu1 %v21106_v3  ;;  %v21006_v3 = vld [vmem:[#allocation35 + $0x324] ss:$40 sps:$4 sm:$0xff]  }
 0xf0f   :  { %10146 = vmatpush2.bf16.msra.mxu0 %v20960_v9  ;;  %10072 = vmatprep.subr.bf16.mxu1 %v21117_v32  ;;  %v7428_v9 = vadd.f32 %v7427_v12, %v7385_v38  ;;  %v8128_v32 = vpop.f32.mrf.mxu0  ;;  %v21027_v12 = vld [vmem:[#allocation35 + $0xbe4] ss:$40 sps:$4 sm:$0xff]  }
 0xf10   :  { %14670 = vmatprep.subr.bf16.mxu0 %v20965_v27  ;;  %v7475_v27 = vadd.f32 %v7474_v15, %v7432_v39 }
 0xf12   :  { %10148 = vmatmul.mubr.bf16.vlgmr.msra.gmra.mxu0 %v23600_v42  ;;  %v20980_v42 = vld [vmem:[#allocation35 + $0xa0] ss:$40 sps:$4 sm:$0xff]  }
 0xf13   :  { %14671 = vmatpush1.bf16.msra.mxu0 %v20963_v28  ;;  %14702 = vmatprep.mubr.bf16.mxu0 %v20966_v29  ;;  %v23619_v28 = vpop.f32.mrf.mxu1  ;;  %v7471_v29 = vadd.f32 %v7470_v13, %v7428_v9 }
 0xf14   :  { %14672 = vmatprep.subr.bf16.mxu0 %v20970_v43  ;;  %v21004_v43 = vld [vmem:[#allocation35 + $0x320] ss:$40 sps:$4 sm:$0xff]  }
 0xf17   :  { %14673 = vmatpush1.bf16.msra.mxu0 %v20968_v30  ;;  %v21009_v30 = vld [vmem:[#allocation35 + $0x2d4] ss:$40 sps:$4 sm:$0xff]  }
 0xf18   :  { %14674 = vmatprep.subr.bf16.mxu0 %v20973_v63  ;;  %v7480_v63 = vrot.slane %v7475_v27, 6 }
 0xf1b   :  { %14675 = vmatpush1.bf16.msra.mxu0 %v20971_v31  ;;  %v23621_v31 = vpop.f32.mrf.mxu0 }
 0xf1c   :  { %14676 = vmatprep.subr.bf16.mxu0 %v20976_v33  ;;  %v8085_v33 = vpop.f32.mrf.mxu1 }
 0xf1e   :  { %v23625_v54 = vpop.f32.mrf.mxu1 }
 0xf1f   :  { %14677 = vmatpush1.bf16.msra.mxu0 %v20974_v45  ;;  %v21007_v45 = vld [vmem:[#allocation35 + $0x2d0] ss:$40 sps:$4 sm:$0xff]  }
 0xf20   :  { %14678 = vmatprep.subr.bf16.mxu0 %v20979_v7  ;;  %v7478_v7 = vrot.slane %v7471_v29, 6  ;;  %v8089_v8 = vpop.f32.mrf.mxu1 }
 0xf23   :  { %14679 = vmatpush1.bf16.msra.mxu0 %v20977_v21  ;;  %v21012_v21 = vld [vmem:[#allocation35 + $0x284] ss:$40 sps:$4 sm:$0xff]  }
 0xf24   :  { %14680 = vmatprep.subr.bf16.mxu0 %v20982_v47  ;;  %v7484_v47 = vsel %vm1728_vm2, %v7480_v63, %v7478_v7 }
 0xf25   :  { %v7486_v62 = vsel %vm1733_vm3, %v7484_v47, 0.0 }
 0xf27   :  { %14681 = vmatpush1.bf16.msra.mxu0 %v20980_v42  ;;  %v7387_v42 = vadd.f32 %v7386_v60, %v7343_v44  ;;  %v7482_v44 = vsel %vm1728_vm2, %v7478_v7, %v7480_v63  ;;  %v7426_v60 = vadd.f32 %v7425_v36, %v7383_v58  ;;  %v6708_v36 = vld [vmem:[#allocation29] sm:$0x3]  ;;  %v21039_v63 = vld [vmem:[#allocation35 + $0xb44] ss:$40 sps:$4 sm:$0xff]  }
 0xf28   :  { %14682 = vmatprep.subr.bf16.mxu0 %v20985_v50  ;;  %v8132_v50 = vpop.f32.mrf.mxu0  ;;  %v7488_v13 = vsel %vm1734_vm4, %v7482_v44, 0.0  ;;  %v8229_v15 = vrot.slane %v6708_v36, %v23310_v34  ;;  %v21045_v58 = vld [vmem:[#allocation35 + $0xaf4] ss:$40 sps:$4 sm:$0xff]  }
 0xf29   :  { %v7469_v49 = vadd.f32 %v23615_v55, %v7426_v60  ;;  %v21033_v55 = vld [vmem:[#allocation35 + $0xb94] ss:$40 sps:$4 sm:$0xff]  }
 0xf2b   :  { %14683 = vmatpush1.bf16.msra.mxu0 %v20983_v56  ;;  %v21010_v56 = vld [vmem:[#allocation35 + $0x280] ss:$40 sps:$4 sm:$0xff]  }
 0xf2c   :  { %14684 = vmatprep.subr.bf16.mxu0 %v20988_v57  ;;  %v21019_v57 = vld [vmem:[#allocation35 + $0xc34] ss:$40 sps:$4 sm:$0xff]  }
 0xf2f   :  { %14685 = vmatpush1.bf16.msra.mxu0 %v20986_v24  ;;  %v7430_v24 = vadd.f32 %v7429_v16, %v7387_v42  ;;  %v8090_v16 = vadd.f32 %v8089_v8, %v7488_v13  ;;  %v21063_v13 = vld [vmem:[#allocation35 + $0xa04] ss:$40 sps:$4 sm:$0xff]  }
 0xf30   :  { %14686 = vmatprep.subr.bf16.mxu0 %v20991_v18  ;;  %v23629_v18 = vpop.f32.mrf.mxu0 }
 0xf31   :  { %v8133_v9 = vadd.f32 %v8132_v50, %v8090_v16  ;;  %v21037_v50 = vld [vmem:[#allocation35 + $0xb40] ss:$40 sps:$4 sm:$0xff]  }
 0xf32   :  { %v8214_v37 = vpop.f32.mrf.mxu0 }
 0xf33   :  { %14687 = vmatpush2.bf16.msra.mxu0 %v20989_v6  ;;  %v8086_v6 = vadd.f32 %v8085_v33, %v7486_v62 }
 0xf34   :  { %14688 = vmatprep.subr.bf16.mxu0 %v20994_v41  ;;  %v7473_v41 = vadd.f32 %v7472_v2, %v7430_v24  ;;  %v8216_v38 = vpop.f32.mrf.mxu0 }
 0xf36   :  { %v8218_v33 = vpop.f32.mrf.mxu0 }
 0xf37   :  { %14689 = vmatpush2.bf16.msra.mxu0 %v20992_v40  ;;  %v21017_v40 = vld [vmem:[#allocation35 + $0xc30] ss:$40 sps:$4 sm:$0xff]  }
 0xf38   :  { %14690 = vmatprep.subr.bf16.mxu0 %v20997_v11  ;;  %v21016_v11 = vld [vmem:[#allocation2] ss:$44 sps:$4 sm:$0xff]  }
 0xf3b   :  { %14691 = vmatpush2.bf16.msra.mxu0 %v20995_v14 }
 0xf3c   :  { %14692 = vmatprep.subr.bf16.mxu0 %v21000_v59  ;;  %v21023_v59 = vld [vmem:[#allocation2 + $0x14] ss:$44 sps:$4 sm:$0xff]  }
 0xf3f   :  { %14693 = vmatpush2.bf16.msra.mxu0 %v20998_v4  ;;  %v8129_v4 = vadd.f32 %v8128_v32, %v8086_v6 }
 0xf40   :  { %14694 = vmatprep.subr.bf16.mxu0 %v21003_v46  ;;  %v7479_v46 = vrot.slane %v7473_v41, 6  ;;  %v21051_v41 = vld [vmem:[#allocation35 + $0xaa4] ss:$40 sps:$4 sm:$0xff]  }
 0xf43   :  { %14695 = vmatpush2.bf16.msra.mxu0 %v21001_v22  ;;  %v7477_v22 = vrot.slane %v7469_v49, 6 }
 0xf44   :  { %14696 = vmatprep.subr.bf16.mxu0 %v21006_v3 }
 0xf45   :  { %v7483_v27 = vsel %vm1728_vm2, %v7479_v46, %v7477_v22  ;;  %v7481_v42 = vsel %vm1728_vm2, %v7477_v22, %v7479_v46  ;;  %v21079_v22 = vld [vmem:[#allocation35 + $0xe10] ss:$40 sps:$4 sm:$0xff]  }
 0xf46   :  { %v7487_v24 = vsel %vm1734_vm4, %v7481_v42, 0.0  ;;  %v21103_v42 = vld [vmem:[#allocation35 + $0xcd0] ss:$40 sps:$4 sm:$0xff]  }
 0xf47   :  { %14697 = vmatpush2.bf16.msra.mxu0 %v21004_v43  ;;  %v21031_v43 = vld [vmem:[#allocation35 + $0xb90] ss:$40 sps:$4 sm:$0xff]   ;;  %v8088_v6 = vadd.f32 %v23625_v54, %v7487_v24 }
 0xf48   :  { %14698 = vmatprep.subr.bf16.mxu0 %v21009_v30 }
 0xf4b   :  { %14699 = vmatpush2.bf16.msra.mxu0 %v21007_v45  ;;  %v7485_v45 = vsel %vm1733_vm3, %v7483_v27, 0.0 }
 0xf4c   :  { %14700 = vmatprep.subr.bf16.mxu0 %v21012_v21  ;;  %v8084_v47 = vadd.f32 %v23619_v28, %v7485_v45  ;;  %v21043_v28 = vld [vmem:[#allocation35 + $0xaf0] ss:$40 sps:$4 sm:$0xff]   ;;  %v21099_v45 = vld [vmem:[#allocation35 + $0xd24] ss:$40 sps:$4 sm:$0xff]  }
 0xf4e   :  { %v8127_v44 = vadd.f32 %v23617_v20, %v8084_v47  ;;  %v21055_v20 = vld [vmem:[#allocation35 + $0xa50] ss:$40 sps:$4 sm:$0xff]   ;;  %v21105_v47 = vld [vmem:[#allocation35 + $0xcd4] ss:$40 sps:$4 sm:$0xff]  }
 0xf4f   :  { %14701 = vmatpush2.bf16.msra.mxu0 %v21010_v56 }
 0xf50   :  { %14756 = vmatprep.subr.bf16.mxu0 %v21019_v57 }
 0xf51   :  { %v8169_v14 = vpop.f32.mrf.mxu1 }
 0xf52   :  { %14703 = vmatmul.mubr.bf16.vlgmr.msra.gmra.mxu0 %v21016_v11  ;;  %v8170_v8 = vadd.f32 %v8169_v14, %v8127_v44  ;;  %v21049_v11 = vld [vmem:[#allocation35 + $0xaa0] ss:$40 sps:$4 sm:$0xff]   ;;  %v21118_v44 = vld [vmem:[#allocation2 + $0x10] ss:$44 sps:$4 sm:$0xff]  }
 0xf53   :  { %14757 = vmatpush1.bf16.msra.mxu0 %v21017_v40  ;;  %14788 = vmatprep.mubr.bf16.mxu0 %v21023_v59  ;;  %v8171_v2 = vpop.f32.mrf.mxu1  ;;  %v8131_v40 = vadd.f32 %v23621_v31, %v8088_v6  ;;  %v21061_v14 = vld [vmem:[#allocation35 + $0xa00] ss:$40 sps:$4 sm:$0xff]   ;;  %v21069_v31 = vld [vmem:[#allocation35 + $0xeb4] ss:$40 sps:$4 sm:$0xff]  }
 0xf54   :  { %v8172_v5 = vadd.f32 %v8171_v2, %v8129_v4  ;;  %14758 = vmatprep.subr.bf16.mxu0 %v21027_v12  ;;  %v21057_v12 = vld [vmem:[#allocation35 + $0xa54] ss:$40 sps:$4 sm:$0xff]   ;;  %v8213_v49 = vadd.f32 %v23629_v18, %v8170_v8  ;;  %v21067_v18 = vld [vmem:[#allocation35 + $0xeb0] ss:$40 sps:$4 sm:$0xff]  }
 0xf55   :  { %v8173_v39 = vpop.f32.mrf.mxu1  ;;  %v21119_v6 = vld [vmem:[#allocation31 + $0x160] ss:$8 sps:$4 sm:$0xff]  }
 0xf56   :  { %v8215_v3 = vadd.f32 %v8214_v37, %v8172_v5  ;;  %v8225_v37 = vrot.slane %v6708_v36, %v23303_v26  ;;  %v8174_v54 = vadd.f32 %v8173_v39, %v8131_v40  ;;  %v21075_v5 = vld [vmem:[#allocation35 + $0xe64] ss:$40 sps:$4 sm:$0xff]   ;;  %v21130_v40 = vld [vmem:[#allocation31 + $0x134] ss:$8 sps:$4 sm:$0xff]  }
 0xf57   :  { %14759 = vmatpush1.bf16.msra.mxu0 %v21025_v19  ;;  %v8175_v32 = vpop.f32.mrf.mxu1  ;;  %v21125_v8 = vld [vmem:[#allocation31 + $0x140] ss:$8 sps:$4 sm:$0xff]  }
 0xf58   :  { %v8233_v29 = vadd.f32 %v8229_v15, %v8215_v3  ;;  %v8176_v30 = vadd.f32 %v8175_v32, %v8133_v9  ;;  %14760 = vmatprep.subr.bf16.mxu0 %v21033_v55  ;;  %v8232_v59 = vadd.f32 %v8225_v37, %v8213_v49  ;;  %v8217_v16 = vadd.f32 %v8216_v38, %v8174_v54  ;;  %v21081_v55 = vld [vmem:[#allocation35 + $0xe14] ss:$40 sps:$4 sm:$0xff]   ;;  %v21087_v38 = vld [vmem:[#allocation35 + $0xdc4] ss:$40 sps:$4 sm:$0xff]   ;;  %v21085_v9 = vld [vmem:[#allocation35 + $0xdc0] ss:$40 sps:$4 sm:$0xff]  }
 0xf59   :  { %v21093_v32 = vld [vmem:[#allocation35 + $0xd74] ss:$40 sps:$4 sm:$0xff]   ;;  %v21139_v54 = vld [vmem:[#allocation31 + $0x104] ss:$8 sps:$4 sm:$0xff]  }
 0xf5a   :  { %v8236_v7 = vsub.f32 0.0, %v8233_v29  ;;  %v8219_v21 = vadd.f32 %v8218_v33, %v8176_v30  ;;  %v8234_v2 = vadd.f32 %v8225_v37, %v8217_v16  ;;  %v21136_v49 = vld [vmem:[#allocation31 + $0x114] ss:$8 sps:$4 sm:$0xff]   ;;  %v21134_v37 = vld [vmem:[#allocation31 + $0x110] ss:$8 sps:$4 sm:$0xff]  }
 0xf5b   :  { %14761 = vmatpush1.bf16.msra.mxu0 %v21031_v43  ;;  %v21145_v16 = vld [vmem:[#allocation31 + $0x1e4] ss:$8 sps:$4 sm:$0xff]  }
 0xf5c   :  { %v8238_v56 = vmul.f32 1.442695, %v8236_v7  ;;  %v8235_v57 = vadd.f32 %v8229_v15, %v8219_v21  ;;  %14762 = vmatprep.subr.bf16.mxu0 %v21039_v63  ;;  %v21073_v15 = vld [vmem:[#allocation35 + $0xe60] ss:$40 sps:$4 sm:$0xff]   ;;  %v21091_v63 = vld [vmem:[#allocation35 + $0xd70] ss:$40 sps:$4 sm:$0xff]  }
 0xf5d   :  { %v21097_v21 = vld [vmem:[#allocation35 + $0xd20] ss:$40 sps:$4 sm:$0xff]  }
 0xf5e   :  { %22368 = vpow2.f32 %v8238_v56  ;;  %v8237_v62 = vsub.f32 0.0, %v8235_v57  ;;  %v21109_v56 = vld [vmem:[#allocation35 + $0xc80] ss:$40 sps:$4 sm:$0xff]   ;;  %v21115_v57 = vld [vmem:[#allocation31 + $0x170] ss:$8 sps:$4 sm:$0xff]  }
 0xf5f   :  { %14763 = vmatpush1.bf16.msra.mxu0 %v21037_v50  ;;  %v21111_v50 = vld [vmem:[#allocation35 + $0xc84] ss:$40 sps:$4 sm:$0xff]  }
 0xf60   :  { %v8240_v60 = vmul.f32 1.442695, %v8237_v62  ;;  %14764 = vmatprep.subr.bf16.mxu0 %v21045_v58  ;;  %v23653_v58 = vld [vmem:[#allocation2 + $0x18] ss:$44 sps:$4 sm:$0xff]  }
 0xf61   :  { %v21121_v62 = vld [vmem:[#allocation31 + $0x164] ss:$8 sps:$4 sm:$0xff]  }
 0xf62   :  { %22370 = vpow2.f32 %v8240_v60  ;;  %v21122_v60 = vld [vmem:[#allocation31 + $0x150] ss:$8 sps:$4 sm:$0xff]  }
 0xf63   :  { %14765 = vmatpush1.bf16.msra.mxu0 %v21043_v28  ;;  %22372 = vtanh.f32 %v8232_v59  ;;  %v21124_v28 = vld [vmem:[#allocation31 + $0x154] ss:$8 sps:$4 sm:$0xff]   ;;  %v21140_v59 = vld [vmem:[#allocation31 + $0x1f0] ss:$8 sps:$4 sm:$0xff]  }
 0xf64   :  { %14766 = vmatprep.subr.bf16.mxu0 %v21051_v41  ;;  %v21127_v41 = vld [vmem:[#allocation31 + $0x144] ss:$8 sps:$4 sm:$0xff]  }
 0xf67   :  { %14767 = vmatpush1.bf16.msra.mxu0 %v21049_v11  ;;  %v21128_v11 = vld [vmem:[#allocation31 + $0x130] ss:$8 sps:$4 sm:$0xff]  }
 0xf68   :  { %14768 = vmatprep.subr.bf16.mxu0 %v21057_v12  ;;  %v21133_v12 = vld [vmem:[#allocation31 + $0x124] ss:$8 sps:$4 sm:$0xff]  }
 0xf6b   :  { %v22369_v4 = vpop.eup %22368  ;;  %14769 = vmatpush1.bf16.msra.mxu0 %v21055_v20  ;;  %v21137_v20 = vld [vmem:[#allocation31 + $0x100] ss:$8 sps:$4 sm:$0xff]  }
 0xf6c   :  { %v8242_v46 = vadd.f32 1.0, %v22369_v4  ;;  %14770 = vmatprep.subr.bf16.mxu0 %v21063_v13  ;;  %v21142_v13 = vld [vmem:[#allocation31 + $0x1f4] ss:$8 sps:$4 sm:$0xff]   ;;  %v21143_v4 = vld [vmem:[#allocation31 + $0x1e0] ss:$8 sps:$4 sm:$0xff]  }
 0xf6e   :  { %22374 = vrcp.f32 %v8242_v46  ;;  %v21146_v46 = vld [vmem:[#allocation31 + $0x1d0] ss:$8 sps:$4 sm:$0xff]  }
 0xf6f   :  { %v22371_v19 = vpop.eup %22370  ;;  %14771 = vmatpush1.bf16.msra.mxu0 %v21061_v14  ;;  %22376 = vtanh.f32 %v8234_v2  ;;  %v21148_v14 = vld [vmem:[#allocation31 + $0x1d4] ss:$8 sps:$4 sm:$0xff]   ;;  %v21149_v2 = vld [vmem:[#allocation31 + $0x1c0] ss:$8 sps:$4 sm:$0xff]  }
 0xf70   :  { %v8243_v36 = vadd.f32 1.0, %v22371_v19  ;;  %14772 = vmatprep.subr.bf16.mxu0 %v21069_v31  ;;  %v22373_v39 = vpop.eup %22372  ;;  %v21151_v31 = vld [vmem:[#allocation31 + $0x1c4] ss:$8 sps:$4 sm:$0xff]   ;;  %v21154_v19 = vld [vmem:[#allocation31 + $0x1b4] ss:$8 sps:$4 sm:$0xff]  }
 0xf72   :  { %22378 = vrcp.f32 %v8243_v36  ;;  %v21157_v36 = vld [vmem:[#allocation31 + $0x1a4] ss:$8 sps:$4 sm:$0xff]  }
 0xf73   :  { %14773 = vmatpush2.bf16.msra.mxu0 %v21067_v18  ;;  %v21152_v18 = vld [vmem:[#allocation31 + $0x1b0] ss:$8 sps:$4 sm:$0xff]  }
 0xf74   :  { %14774 = vmatprep.subr.bf16.mxu0 %v21075_v5  ;;  %v21155_v5 = vld [vmem:[#allocation31 + $0x1a0] ss:$8 sps:$4 sm:$0xff]  }
 0xf77   :  { %14775 = vmatpush2.bf16.msra.mxu0 %v21073_v15  ;;  %v21160_v15 = vld [vmem:[#allocation31 + $0x194] ss:$8 sps:$4 sm:$0xff]  }
 0xf78   :  { %14776 = vmatprep.subr.bf16.mxu0 %v21081_v55  ;;  %v21158_v55 = vld [vmem:[#allocation31 + $0x190] ss:$8 sps:$4 sm:$0xff]  }
 0xf7b   :  { %v22375_v3 = vpop.eup %22374  ;;  %14777 = vmatpush2.bf16.msra.mxu0 %v21079_v22  ;;  %v21163_v22 = vld [vmem:[#allocation31 + $0x184] ss:$8 sps:$4 sm:$0xff]  }
 0xf7c   :  { %v8248_v27 = vmul.f32 %v22375_v3, %v22373_v39  ;;  %14778 = vmatprep.subr.bf16.mxu0 %v21087_v38  ;;  %v22377_v43 = vpop.eup %22376  ;;  %v21161_v38 = vld [vmem:[#allocation31 + $0x180] ss:$8 sps:$4 sm:$0xff]   ;;  %v21166_v39 = vld [vmem:[#allocation31 + $0x374] ss:$8 sps:$4 sm:$0xff]   ;;  %v21164_v3 = vld [vmem:[#allocation31 + $0x370] ss:$8 sps:$4 sm:$0xff]  }
 0xf7e   :  { %v19051_v29 = vpack.c.bf16 %v8248_v27, %v8248_v27  ;;  %v21167_v27 = vld [vmem:[#allocation31 + $0x360] ss:$8 sps:$4 sm:$0xff]  }
 0xf7f   :  { %v22379_v30 = vpop.eup %22378  ;;  %14779 = vmatpush2.bf16.msra.mxu0 %v21085_v9  ;;  %v21169_v9 = vld [vmem:[#allocation31 + $0x364] ss:$8 sps:$4 sm:$0xff]  }
 0xf80   :  { %8258 = vst [vmem:[#allocation2 + $0x1c] sm:$0xf] %v19051_v29  ;;  %v8249_v33 = vmul.f32 %v22379_v30, %v22377_v43  ;;  %14780 = vmatprep.subr.bf16.mxu0 %v21093_v32  ;;  %v21172_v32 = vld [vmem:[#allocation31 + $0x354] ss:$8 sps:$4 sm:$0xff]   ;;  %v21170_v43 = vld [vmem:[#allocation31 + $0x350] ss:$8 sps:$4 sm:$0xff]  }
 0xf81   :  { %v21175_v29 = vld [vmem:[#allocation31 + $0x344] ss:$8 sps:$4 sm:$0xff]   ;;  %v21173_v30 = vld [vmem:[#allocation31 + $0x340] ss:$8 sps:$4 sm:$0xff]  }
 0xf82   :  { %v19052_v7 = vpack.c.bf16 %v8249_v33, %v8249_v33  ;;  %v21176_v33 = vld [vmem:[#allocation31 + $0x330] ss:$8 sps:$4 sm:$0xff]  }
 0xf83   :  { %14781 = vmatpush2.bf16.msra.mxu0 %v21091_v63  ;;  %v21178_v63 = vld [vmem:[#allocation31 + $0x334] ss:$8 sps:$4 sm:$0xff]  }
 0xf84   :  { %8259 = vst [vmem:[#allocation2 + $0x48] sm:$0xf] %v19052_v7  ;;  %14782 = vmatprep.subr.bf16.mxu0 %v21099_v45  ;;  %v21181_v45 = vld [vmem:[#allocation31 + $0x324] ss:$8 sps:$4 sm:$0xff]   ;;  %v21184_v7 = vld [vmem:[#allocation31 + $0x314] ss:$8 sps:$4 sm:$0xff]  }
 0xf87   :  { %14783 = vmatpush2.bf16.msra.mxu0 %v21097_v21  ;;  %v21182_v21 = vld [vmem:[#allocation31 + $0x310] ss:$8 sps:$4 sm:$0xff]  }
 0xf88   :  { %14784 = vmatprep.subr.bf16.mxu0 %v21105_v47  ;;  %v21187_v47 = vld [vmem:[#allocation31 + $0x304] ss:$8 sps:$4 sm:$0xff]  }
 0xf8b   :  { %14785 = vmatpush2.bf16.msra.mxu0 %v21103_v42  ;;  %v23655_v24 = vld [vmem:[#allocation2 + $0x1c] ss:$44 sps:$4 sm:$0xff]  }
 0xf8c   :  { %14786 = vmatprep.subr.bf16.mxu0 %v21111_v50  ;;  %9366 = vmatprep.mubr.bf16.mxu1 %v23655_v24  ;;  %v21185_v42 = vld [vmem:[#allocation31 + $0x300] ss:$8 sps:$4 sm:$0xff]   ;;  %v21190_v50 = vld [vmem:[#allocation31 + $0x3f4] ss:$8 sps:$4 sm:$0xff]  }
 0xf8d   :  { %9367 = vmatmul.mubr.bf16.vlgmr.msra.gmra.mxu1 %v23653_v58 }
 0xf8e   :  { %10073 = vmatpush1.bf16.msra.mxu1 %v21115_v57  ;;  %10104 = vmatprep.mubr.bf16.mxu1 %v23602_v17  ;;  %v21131_v17 = vld [vmem:[#allocation31 + $0x120] ss:$8 sps:$4 sm:$0xff]   ;;  %v21193_v57 = vld [vmem:[#allocation31 + $0x3e4] ss:$8 sps:$4 sm:$0xff]  }
 0xf8f   :  { %14787 = vmatpush2.bf16.msra.mxu0 %v21109_v56  ;;  %10074 = vmatprep.subr.bf16.mxu1 %v21121_v62  ;;  %v21188_v56 = vld [vmem:[#allocation31 + $0x3f0] ss:$8 sps:$4 sm:$0xff]   ;;  %v21191_v62 = vld [vmem:[#allocation31 + $0x3e0] ss:$8 sps:$4 sm:$0xff]  }
 0xf92   :  { %14789 = vmatmul.mubr.bf16.vlgmr.msra.gmra.mxu0 %v21118_v44  ;;  %10075 = vmatpush1.bf16.msra.mxu1 %v21119_v6  ;;  %v21196_v6 = vld [vmem:[#allocation31 + $0x3d4] ss:$8 sps:$4 sm:$0xff]   ;;  %v21194_v44 = vld [vmem:[#allocation31 + $0x3d0] ss:$8 sps:$4 sm:$0xff]  }
 0xf93   :  { %14874 = vmatprep.mubr.bf16.mxu0 %v22988_v0  ;;  %10076 = vmatprep.subr.bf16.mxu1 %v21124_v28  ;;  %v21199_v28 = vld [vmem:[#allocation31 + $0x3c4] ss:$8 sps:$4 sm:$0xff]  }
 0xf96   :  { %10077 = vmatpush1.bf16.msra.mxu1 %v21122_v60  ;;  %v21197_v60 = vld [vmem:[#allocation31 + $0x3c0] ss:$8 sps:$4 sm:$0xff]  }
 0xf97   :  { %10078 = vmatprep.subr.bf16.mxu1 %v21127_v41  ;;  %v21202_v41 = vld [vmem:[#allocation31 + $0x3b4] ss:$8 sps:$4 sm:$0xff]  }
 0xf9a   :  { %10079 = vmatpush1.bf16.msra.mxu1 %v21125_v8  ;;  %v21200_v8 = vld [vmem:[#allocation31 + $0x3b0] ss:$8 sps:$4 sm:$0xff]  }
 0xf9b   :  { %10080 = vmatprep.subr.bf16.mxu1 %v21130_v40  ;;  %v21205_v40 = vld [vmem:[#allocation31 + $0x3a4] ss:$8 sps:$4 sm:$0xff]  }
 0xf9e   :  { %10081 = vmatpush1.bf16.msra.mxu1 %v21128_v11  ;;  %v21203_v11 = vld [vmem:[#allocation31 + $0x3a0] ss:$8 sps:$4 sm:$0xff]  }
 0xf9f   :  { %10082 = vmatprep.subr.bf16.mxu1 %v21133_v12  ;;  %v21208_v12 = vld [vmem:[#allocation31 + $0x394] ss:$8 sps:$4 sm:$0xff]  }
 0xfa2   :  { %10083 = vmatpush1.bf16.msra.mxu1 %v21131_v17  ;;  %v21206_v17 = vld [vmem:[#allocation31 + $0x390] ss:$8 sps:$4 sm:$0xff]  }
 0xfa3   :  { %10084 = vmatprep.subr.bf16.mxu1 %v21136_v49  ;;  %v21211_v49 = vld [vmem:[#allocation31 + $0x384] ss:$8 sps:$4 sm:$0xff]  }
 0xfa6   :  { %10085 = vmatpush1.bf16.msra.mxu1 %v21134_v37  ;;  %v21209_v37 = vld [vmem:[#allocation31 + $0x380] ss:$8 sps:$4 sm:$0xff]  }
 0xfa7   :  { %10086 = vmatprep.subr.bf16.mxu1 %v21139_v54  ;;  %v21214_v54 = vld [vmem:[#allocation35 + $0x734] ss:$40 sps:$4 sm:$0xff]  }
 0xfaa   :  { %10087 = vmatpush1.bf16.msra.mxu1 %v21137_v20  ;;  %v21212_v20 = vld [vmem:[#allocation35 + $0x730] ss:$40 sps:$4 sm:$0xff]  }
 0xfab   :  { %10088 = vmatprep.subr.bf16.mxu1 %v21142_v13  ;;  %v21219_v13 = vld [vmem:[#allocation35 + $0x6e4] ss:$40 sps:$4 sm:$0xff]  }
 0xfae   :  { %10089 = vmatpush2.bf16.msra.mxu1 %v21140_v59  ;;  %v23663_v59 = vld [vmem:[#allocation2 + $0xc] ss:$44 sps:$4 sm:$0xff]  }
 0xfaf   :  { %10090 = vmatprep.subr.bf16.mxu1 %v21145_v16  ;;  %v21217_v16 = vld [vmem:[#allocation35 + $0x6e0] ss:$40 sps:$4 sm:$0xff]  }
 0xfb2   :  { %10091 = vmatpush2.bf16.msra.mxu1 %v21143_v4  ;;  %v21222_v4 = vld [vmem:[#allocation35 + $0x694] ss:$40 sps:$4 sm:$0xff]  }
 0xfb3   :  { %10092 = vmatprep.subr.bf16.mxu1 %v21148_v14  ;;  %v21220_v14 = vld [vmem:[#allocation35 + $0x690] ss:$40 sps:$4 sm:$0xff]  }
 0xfb6   :  { %10093 = vmatpush2.bf16.msra.mxu1 %v21146_v46  ;;  %v21225_v46 = vld [vmem:[#allocation35 + $0x644] ss:$40 sps:$4 sm:$0xff]  }
 0xfb7   :  { %10094 = vmatprep.subr.bf16.mxu1 %v21151_v31  ;;  %v21223_v31 = vld [vmem:[#allocation35 + $0x640] ss:$40 sps:$4 sm:$0xff]  }
 0xfba   :  { %10095 = vmatpush2.bf16.msra.mxu1 %v21149_v2  ;;  %v21228_v2 = vld [vmem:[#allocation35 + $0x5f4] ss:$40 sps:$4 sm:$0xff]  }
 0xfbb   :  { %10096 = vmatprep.subr.bf16.mxu1 %v21154_v19  ;;  %v21226_v19 = vld [vmem:[#allocation35 + $0x5f0] ss:$40 sps:$4 sm:$0xff]  }
 0xfbe   :  { %10097 = vmatpush2.bf16.msra.mxu1 %v21152_v18  ;;  %v21231_v18 = vld [vmem:[#allocation35 + $0x5a4] ss:$40 sps:$4 sm:$0xff]  }
 0xfbf   :  { %10098 = vmatprep.subr.bf16.mxu1 %v21157_v36  ;;  %v21229_v36 = vld [vmem:[#allocation35 + $0x5a0] ss:$40 sps:$4 sm:$0xff]  }
 0xfc2   :  { %10099 = vmatpush2.bf16.msra.mxu1 %v21155_v5  ;;  %v21234_v5 = vld [vmem:[#allocation35 + $0x554] ss:$40 sps:$4 sm:$0xff]  }
 0xfc3   :  { %10100 = vmatprep.subr.bf16.mxu1 %v21160_v15  ;;  %v21232_v15 = vld [vmem:[#allocation35 + $0x550] ss:$40 sps:$4 sm:$0xff]  }
 0xfc6   :  { %10101 = vmatpush2.bf16.msra.mxu1 %v21158_v55  ;;  %v21237_v55 = vld [vmem:[#allocation35 + $0x504] ss:$40 sps:$4 sm:$0xff]  }
 0xfc7   :  { %10102 = vmatprep.subr.bf16.mxu1 %v21163_v22  ;;  %v21235_v22 = vld [vmem:[#allocation35 + $0x500] ss:$40 sps:$4 sm:$0xff]  }
 0xfca   :  { %10103 = vmatpush2.bf16.msra.mxu1 %v21161_v38  ;;  %v21240_v38 = vld [vmem:[#allocation35 + $0x9b4] ss:$40 sps:$4 sm:$0xff]  }
 0xfcb   :  { %10158 = vmatprep.subr.bf16.mxu1 %v21166_v39  ;;  %v21238_v39 = vld [vmem:[#allocation35 + $0x9b0] ss:$40 sps:$4 sm:$0xff]  }
 0xfcd   :  { %10105 = vmatmul.mubr.bf16.vlgmr.msra.gmra.mxu1 %v23606_v10  ;;  %v21179_v10 = vld [vmem:[#allocation31 + $0x320] ss:$8 sps:$4 sm:$0xff]  }
 0xfce   :  { %10159 = vmatpush1.bf16.msra.mxu1 %v21164_v3  ;;  %10190 = vmatprep.mubr.bf16.mxu1 %v23655_v24  ;;  %v21243_v3 = vld [vmem:[#allocation35 + $0x964] ss:$40 sps:$4 sm:$0xff]  }
 0xfcf   :  { %10160 = vmatprep.subr.bf16.mxu1 %v21169_v9  ;;  %v21241_v9 = vld [vmem:[#allocation35 + $0x960] ss:$40 sps:$4 sm:$0xff]  }
 0xfd2   :  { %10161 = vmatpush1.bf16.msra.mxu1 %v21167_v27  ;;  %v21246_v27 = vld [vmem:[#allocation35 + $0x914] ss:$40 sps:$4 sm:$0xff]  }
 0xfd3   :  { %10162 = vmatprep.subr.bf16.mxu1 %v21172_v32  ;;  %v21244_v32 = vld [vmem:[#allocation35 + $0x910] ss:$40 sps:$4 sm:$0xff]  }
 0xfd6   :  { %10163 = vmatpush1.bf16.msra.mxu1 %v21170_v43  ;;  %v21249_v43 = vld [vmem:[#allocation35 + $0x8c4] ss:$40 sps:$4 sm:$0xff]  }
 0xfd7   :  { %10164 = vmatprep.subr.bf16.mxu1 %v21175_v29  ;;  %v21247_v29 = vld [vmem:[#allocation35 + $0x8c0] ss:$40 sps:$4 sm:$0xff]  }
 0xfda   :  { %10165 = vmatpush1.bf16.msra.mxu1 %v21173_v30  ;;  %v21252_v30 = vld [vmem:[#allocation35 + $0x874] ss:$40 sps:$4 sm:$0xff]  }
 0xfdb   :  { %10166 = vmatprep.subr.bf16.mxu1 %v21178_v63  ;;  %v21250_v63 = vld [vmem:[#allocation35 + $0x870] ss:$40 sps:$4 sm:$0xff]  }
 0xfde   :  { %10167 = vmatpush1.bf16.msra.mxu1 %v21176_v33  ;;  %v21255_v33 = vld [vmem:[#allocation35 + $0x824] ss:$40 sps:$4 sm:$0xff]  }
 0xfdf   :  { %10168 = vmatprep.subr.bf16.mxu1 %v21181_v45  ;;  %v21253_v45 = vld [vmem:[#allocation35 + $0x820] ss:$40 sps:$4 sm:$0xff]  }
 0xfe2   :  { %10169 = vmatpush1.bf16.msra.mxu1 %v21179_v10  ;;  %v21258_v10 = vld [vmem:[#allocation35 + $0x7d4] ss:$40 sps:$4 sm:$0xff]  }
 0xfe3   :  { %10170 = vmatprep.subr.bf16.mxu1 %v21184_v7  ;;  %v21256_v7 = vld [vmem:[#allocation35 + $0x7d0] ss:$40 sps:$4 sm:$0xff]  }
 0xfe6   :  { %10171 = vmatpush1.bf16.msra.mxu1 %v21182_v21  ;;  %v21261_v21 = vld [vmem:[#allocation35 + $0x784] ss:$40 sps:$4 sm:$0xff]  }
 0xfe7   :  { %10172 = vmatprep.subr.bf16.mxu1 %v21187_v47  ;;  %v21259_v47 = vld [vmem:[#allocation35 + $0x780] ss:$40 sps:$4 sm:$0xff]  }
 0xfea   :  { %10173 = vmatpush1.bf16.msra.mxu1 %v21185_v42  ;;  %v21265_v42 = vld [vmem:[#allocation35 + $0x1134] ss:$40 sps:$4 sm:$0xff]  }
 0xfeb   :  { %10174 = vmatprep.subr.bf16.mxu1 %v21190_v50  ;;  %v21263_v50 = vld [vmem:[#allocation35 + $0x1130] ss:$40 sps:$4 sm:$0xff]  }
 0xfee   :  { %10175 = vmatpush2.bf16.msra.mxu1 %v21188_v56  ;;  %v23667_v56 = vld [vmem:[#allocation2 + $0x8] ss:$44 sps:$4 sm:$0xff]  }
 0xfef   :  { %10176 = vmatprep.subr.bf16.mxu1 %v21193_v57  ;;  %v21268_v57 = vld [vmem:[#allocation35 + $0x10e4] ss:$40 sps:$4 sm:$0xff]  }
 0xff2   :  { %10177 = vmatpush2.bf16.msra.mxu1 %v21191_v62  ;;  %v21266_v62 = vld [vmem:[#allocation35 + $0x10e0] ss:$40 sps:$4 sm:$0xff]  }
 0xff3   :  { %10178 = vmatprep.subr.bf16.mxu1 %v21196_v6  ;;  %v21271_v6 = vld [vmem:[#allocation35 + $0x1094] ss:$40 sps:$4 sm:$0xff]  }
 0xff6   :  { %10179 = vmatpush2.bf16.msra.mxu1 %v21194_v44  ;;  %v21269_v44 = vld [vmem:[#allocation35 + $0x1090] ss:$40 sps:$4 sm:$0xff]  }
 0xff7   :  { %10180 = vmatprep.subr.bf16.mxu1 %v21199_v28  ;;  %v21274_v28 = vld [vmem:[#allocation35 + $0x1044] ss:$40 sps:$4 sm:$0xff]  }
 0xffa   :  { %10181 = vmatpush2.bf16.msra.mxu1 %v21197_v60  ;;  %v21272_v60 = vld [vmem:[#allocation35 + $0x1040] ss:$40 sps:$4 sm:$0xff]  }
 0xffb   :  { %10182 = vmatprep.subr.bf16.mxu1 %v21202_v41  ;;  %v21277_v41 = vld [vmem:[#allocation35 + $0xff4] ss:$40 sps:$4 sm:$0xff]  }
 0xffe   :  { %10183 = vmatpush2.bf16.msra.mxu1 %v21200_v8  ;;  %v21275_v8 = vld [vmem:[#allocation35 + $0xff0] ss:$40 sps:$4 sm:$0xff]  }
 0xfff   :  { %10184 = vmatprep.subr.bf16.mxu1 %v21205_v40  ;;  %v21280_v40 = vld [vmem:[#allocation35 + $0xfa4] ss:$40 sps:$4 sm:$0xff]  }
0x1002   :  { %10185 = vmatpush2.bf16.msra.mxu1 %v21203_v11  ;;  %v21278_v11 = vld [vmem:[#allocation35 + $0xfa0] ss:$40 sps:$4 sm:$0xff]  }
0x1003   :  { %10186 = vmatprep.subr.bf16.mxu1 %v21208_v12  ;;  %v21283_v12 = vld [vmem:[#allocation35 + $0xf54] ss:$40 sps:$4 sm:$0xff]  }
0x1006   :  { %10187 = vmatpush2.bf16.msra.mxu1 %v21206_v17  ;;  %v21286_v17 = vld [vmem:[#allocation35 + $0xf04] ss:$40 sps:$4 sm:$0xff]  }
0x1007   :  { %10188 = vmatprep.subr.bf16.mxu1 %v21211_v49  ;;  %v21382_v49 = vld [vmem:[#allocation35 + $0x1634] ss:$40 sps:$4 sm:$0xff]  }
0x1008   :  { %14842 = vmatprep.subr.bf16.mxu0 %v21382_v49  ;;  %v21331_v49 = vld [vmem:[#allocation35 + $0x5c] ss:$40 sps:$4 sm:$0xff]  }
0x100a   :  { %10189 = vmatpush2.bf16.msra.mxu1 %v21209_v37  ;;  %v21284_v37 = vld [vmem:[#allocation35 + $0xf00] ss:$40 sps:$4 sm:$0xff]  }
0x100b   :  { %14713 = vmatprep.subr.bf16.mxu1 %v21214_v54  ;;  %v21380_v54 = vld [vmem:[#allocation35 + $0x1630] ss:$40 sps:$4 sm:$0xff]  }
0x100c   :  { %14843 = vmatpush1.bf16.msra.mxu0 %v21380_v54  ;;  %v21329_v54 = vld [vmem:[#allocation35 + $0x58] ss:$40 sps:$4 sm:$0xff]  }
0x100d   :  { %10191 = vmatmul.mubr.bf16.vlgmr.msra.gmra.mxu1 %v23653_v58 }
0x100e   :  { %14714 = vmatpush1.bf16.msra.mxu1 %v21212_v20  ;;  %14745 = vmatprep.mubr.bf16.mxu1 %v23663_v59  ;;  %v21289_v20 = vld [vmem:[#allocation35 + $0x13b4] ss:$40 sps:$4 sm:$0xff]  }
0x100f   :  { %14715 = vmatprep.subr.bf16.mxu1 %v21219_v13  ;;  %v21388_v13 = vld [vmem:[#allocation35 + $0x15e4] ss:$40 sps:$4 sm:$0xff]  }
0x1010   :  { %14844 = vmatprep.subr.bf16.mxu0 %v21388_v13  ;;  %v21334_v13 = vld [vmem:[#allocation35 + $0xc] ss:$40 sps:$4 sm:$0xff]  }
0x1012   :  { %14716 = vmatpush1.bf16.msra.mxu1 %v21217_v16  ;;  %v21287_v16 = vld [vmem:[#allocation35 + $0x13b0] ss:$40 sps:$4 sm:$0xff]  }
0x1013   :  { %14717 = vmatprep.subr.bf16.mxu1 %v21222_v4  ;;  %v21386_v4 = vld [vmem:[#allocation35 + $0x15e0] ss:$40 sps:$4 sm:$0xff]  }
0x1014   :  { %14845 = vmatpush1.bf16.msra.mxu0 %v21386_v4  ;;  %v21332_v4 = vld [vmem:[#allocation35 + $0x8] ss:$40 sps:$4 sm:$0xff]  }
0x1016   :  { %14718 = vmatpush1.bf16.msra.mxu1 %v21220_v14  ;;  %v21292_v14 = vld [vmem:[#allocation35 + $0x1364] ss:$40 sps:$4 sm:$0xff]  }
0x1017   :  { %14719 = vmatprep.subr.bf16.mxu1 %v21225_v46  ;;  %v21394_v46 = vld [vmem:[#allocation35 + $0x1594] ss:$40 sps:$4 sm:$0xff]  }
0x1018   :  { %14846 = vmatprep.subr.bf16.mxu0 %v21394_v46  ;;  %v21337_v46 = vld [vmem:[#allocation35 + $0x4bc] ss:$40 sps:$4 sm:$0xff]  }
0x101a   :  { %14720 = vmatpush1.bf16.msra.mxu1 %v21223_v31  ;;  %v21290_v31 = vld [vmem:[#allocation35 + $0x1360] ss:$40 sps:$4 sm:$0xff]  }
0x101b   :  { %14721 = vmatprep.subr.bf16.mxu1 %v21228_v2  ;;  %v21392_v2 = vld [vmem:[#allocation35 + $0x1590] ss:$40 sps:$4 sm:$0xff]  }
0x101c   :  { %14847 = vmatpush1.bf16.msra.mxu0 %v21392_v2 }
0x101e   :  { %14722 = vmatpush1.bf16.msra.mxu1 %v21226_v19  ;;  %v21295_v19 = vld [vmem:[#allocation35 + $0x1314] ss:$40 sps:$4 sm:$0xff]  }
0x101f   :  { %14723 = vmatprep.subr.bf16.mxu1 %v21231_v18  ;;  %v21400_v18 = vld [vmem:[#allocation35 + $0x1544] ss:$40 sps:$4 sm:$0xff]  }
0x1020   :  { %14848 = vmatprep.subr.bf16.mxu0 %v21400_v18 }
0x1022   :  { %14724 = vmatpush1.bf16.msra.mxu1 %v21229_v36  ;;  %v21293_v36 = vld [vmem:[#allocation35 + $0x1310] ss:$40 sps:$4 sm:$0xff]  }
0x1023   :  { %14725 = vmatprep.subr.bf16.mxu1 %v21234_v5  ;;  %v21398_v5 = vld [vmem:[#allocation35 + $0x1540] ss:$40 sps:$4 sm:$0xff]  }
0x1024   :  { %14849 = vmatpush1.bf16.msra.mxu0 %v21398_v5 }
0x1026   :  { %14726 = vmatpush1.bf16.msra.mxu1 %v21232_v15  ;;  %v21298_v15 = vld [vmem:[#allocation35 + $0x12c4] ss:$40 sps:$4 sm:$0xff]  }
0x1027   :  { %14727 = vmatprep.subr.bf16.mxu1 %v21237_v55  ;;  %v21406_v55 = vld [vmem:[#allocation35 + $0x14f4] ss:$40 sps:$4 sm:$0xff]  }
0x1028   :  { %14850 = vmatprep.subr.bf16.mxu0 %v21406_v55 }
0x102a   :  { %14728 = vmatpush1.bf16.msra.mxu1 %v21235_v22  ;;  %v21296_v22 = vld [vmem:[#allocation35 + $0x12c0] ss:$40 sps:$4 sm:$0xff]  }
0x102b   :  { %14729 = vmatprep.subr.bf16.mxu1 %v21240_v38  ;;  %v21404_v38 = vld [vmem:[#allocation35 + $0x14f0] ss:$40 sps:$4 sm:$0xff]  }
0x102c   :  { %14851 = vmatpush1.bf16.msra.mxu0 %v21404_v38 }
0x102e   :  { %14730 = vmatpush2.bf16.msra.mxu1 %v21238_v39  ;;  %v21301_v39 = vld [vmem:[#allocation35 + $0x1274] ss:$40 sps:$4 sm:$0xff]  }
0x102f   :  { %14731 = vmatprep.subr.bf16.mxu1 %v21243_v3  ;;  %v21412_v3 = vld [vmem:[#allocation35 + $0x14a4] ss:$40 sps:$4 sm:$0xff]  }
0x1030   :  { %14852 = vmatprep.subr.bf16.mxu0 %v21412_v3 }
0x1032   :  { %14732 = vmatpush2.bf16.msra.mxu1 %v21241_v9  ;;  %v21299_v9 = vld [vmem:[#allocation35 + $0x1270] ss:$40 sps:$4 sm:$0xff]  }
0x1033   :  { %14733 = vmatprep.subr.bf16.mxu1 %v21246_v27  ;;  %v21410_v27 = vld [vmem:[#allocation35 + $0x14a0] ss:$40 sps:$4 sm:$0xff]  }
0x1034   :  { %14853 = vmatpush1.bf16.msra.mxu0 %v21410_v27 }
0x1036   :  { %14734 = vmatpush2.bf16.msra.mxu1 %v21244_v32  ;;  %v21304_v32 = vld [vmem:[#allocation35 + $0x1224] ss:$40 sps:$4 sm:$0xff]  }
0x1037   :  { %14735 = vmatprep.subr.bf16.mxu1 %v21249_v43  ;;  %v21418_v43 = vld [vmem:[#allocation35 + $0x1454] ss:$40 sps:$4 sm:$0xff]  }
0x1038   :  { %14854 = vmatprep.subr.bf16.mxu0 %v21418_v43 }
0x103a   :  { %14736 = vmatpush2.bf16.msra.mxu1 %v21247_v29  ;;  %v21302_v29 = vld [vmem:[#allocation35 + $0x1220] ss:$40 sps:$4 sm:$0xff]  }
0x103b   :  { %14737 = vmatprep.subr.bf16.mxu1 %v21252_v30  ;;  %v21416_v30 = vld [vmem:[#allocation35 + $0x1450] ss:$40 sps:$4 sm:$0xff]  }
0x103c   :  { %14855 = vmatpush1.bf16.msra.mxu0 %v21416_v30 }
0x103e   :  { %14738 = vmatpush2.bf16.msra.mxu1 %v21250_v63  ;;  %v21307_v63 = vld [vmem:[#allocation35 + $0x11d4] ss:$40 sps:$4 sm:$0xff]  }
0x103f   :  { %14739 = vmatprep.subr.bf16.mxu1 %v21255_v33  ;;  %v21424_v33 = vld [vmem:[#allocation35 + $0x1404] ss:$40 sps:$4 sm:$0xff]  }
0x1040   :  { %14856 = vmatprep.subr.bf16.mxu0 %v21424_v33  ;;  %v21349_v33 = vld [vmem:[#allocation35 + $0x37c] ss:$40 sps:$4 sm:$0xff]  }
0x1042   :  { %14740 = vmatpush2.bf16.msra.mxu1 %v21253_v45  ;;  %v21305_v45 = vld [vmem:[#allocation35 + $0x11d0] ss:$40 sps:$4 sm:$0xff]  }
0x1043   :  { %14741 = vmatprep.subr.bf16.mxu1 %v21258_v10  ;;  %v21422_v10 = vld [vmem:[#allocation35 + $0x1400] ss:$40 sps:$4 sm:$0xff]  }
0x1044   :  { %14857 = vmatpush1.bf16.msra.mxu0 %v21422_v10 }
0x1046   :  { %14742 = vmatpush2.bf16.msra.mxu1 %v21256_v7  ;;  %v21310_v7 = vld [vmem:[#allocation35 + $0x1184] ss:$40 sps:$4 sm:$0xff]  }
0x1047   :  { %14743 = vmatprep.subr.bf16.mxu1 %v21261_v21  ;;  %v21430_v21 = vld [vmem:[#allocation35 + $0x73c] ss:$40 sps:$4 sm:$0xff]  }
0x1048   :  { %14928 = vmatprep.subr.bf16.mxu0 %v21430_v21  ;;  %v21347_v21 = vld [vmem:[#allocation35 + $0x378] ss:$40 sps:$4 sm:$0xff]  }
0x104a   :  { %14744 = vmatpush2.bf16.msra.mxu1 %v21259_v47  ;;  %v21308_v47 = vld [vmem:[#allocation35 + $0x1180] ss:$40 sps:$4 sm:$0xff]  }
0x104b   :  { %14799 = vmatprep.subr.bf16.mxu1 %v21265_v42  ;;  %v21313_v42 = vld [vmem:[#allocation35 + $0x23c] ss:$40 sps:$4 sm:$0xff]  }
0x104d   :  { %14746 = vmatmul.mubr.bf16.vlgmr.msra.gmra.mxu1 %v23667_v56 }
0x104e   :  { %14800 = vmatpush1.bf16.msra.mxu1 %v21263_v50  ;;  %14831 = vmatprep.mubr.bf16.mxu1 %v23655_v24  ;;  %v21281_v24 = vld [vmem:[#allocation35 + $0xf50] ss:$40 sps:$4 sm:$0xff]  }
0x104f   :  { %14801 = vmatprep.subr.bf16.mxu1 %v21268_v57  ;;  %v21311_v50 = vld [vmem:[#allocation35 + $0x238] ss:$40 sps:$4 sm:$0xff]   ;;  %v21316_v57 = vld [vmem:[#allocation35 + $0x1ec] ss:$40 sps:$4 sm:$0xff]  }
0x1052   :  { %14802 = vmatpush1.bf16.msra.mxu1 %v21266_v62  ;;  %v23672_v62 = vld [vmem:[#allocation2 + $0x4] ss:$44 sps:$4 sm:$0xff]  }
0x1053   :  { %14803 = vmatprep.subr.bf16.mxu1 %v21271_v6  ;;  %v21314_v6 = vld [vmem:[#allocation35 + $0x1e8] ss:$40 sps:$4 sm:$0xff]  }
0x1056   :  { %14804 = vmatpush1.bf16.msra.mxu1 %v21269_v44  ;;  %v21319_v44 = vld [vmem:[#allocation35 + $0x19c] ss:$40 sps:$4 sm:$0xff]  }
0x1057   :  { %14805 = vmatprep.subr.bf16.mxu1 %v21274_v28  ;;  %v21317_v28 = vld [vmem:[#allocation35 + $0x198] ss:$40 sps:$4 sm:$0xff]  }
0x105a   :  { %14806 = vmatpush1.bf16.msra.mxu1 %v21272_v60  ;;  %v21322_v60 = vld [vmem:[#allocation35 + $0x14c] ss:$40 sps:$4 sm:$0xff]  }
0x105b   :  { %14807 = vmatprep.subr.bf16.mxu1 %v21277_v41  ;;  %v21320_v41 = vld [vmem:[#allocation35 + $0x148] ss:$40 sps:$4 sm:$0xff]  }
0x105e   :  { %14808 = vmatpush1.bf16.msra.mxu1 %v21275_v8  ;;  %v21325_v8 = vld [vmem:[#allocation35 + $0xfc] ss:$40 sps:$4 sm:$0xff]  }
0x105f   :  { %14809 = vmatprep.subr.bf16.mxu1 %v21280_v40  ;;  %v21323_v40 = vld [vmem:[#allocation35 + $0xf8] ss:$40 sps:$4 sm:$0xff]  }
0x1062   :  { %14810 = vmatpush1.bf16.msra.mxu1 %v21278_v11  ;;  %v23675_v11 = vpop.f32.mrf.mxu0 }
0x1063   :  { %14811 = vmatprep.subr.bf16.mxu1 %v21283_v12  ;;  %v23677_v12 = vpop.f32.mrf.mxu1 }
0x1066   :  { %14812 = vmatpush1.bf16.msra.mxu1 %v21281_v24  ;;  %v21326_v24 = vld [vmem:[#allocation35 + $0xa8] ss:$40 sps:$4 sm:$0xff]  }
0x1067   :  { %14813 = vmatprep.subr.bf16.mxu1 %v21286_v17  ;;  %v9241_v17 = vpop.f32.mrf.mxu0 }
0x106a   :  { %14814 = vmatpush1.bf16.msra.mxu1 %v21284_v37  ;;  %v9284_v37 = vpop.f32.mrf.mxu1 }
0x106b   :  { %14815 = vmatprep.subr.bf16.mxu1 %v21289_v20  ;;  %v9243_v20 = vpop.f32.mrf.mxu0  ;;  %v9285_v43 = vadd.f32 %v9284_v37, %v9241_v17  ;;  %v9283_v37 = vadd.f32 %v23677_v12, %v23675_v11 }
0x106e   :  { %14816 = vmatpush2.bf16.msra.mxu1 %v21287_v16  ;;  %v9286_v16 = vpop.f32.mrf.mxu1 }
0x106f   :  { %14817 = vmatprep.subr.bf16.mxu1 %v21292_v14  ;;  %v9245_v14 = vpop.f32.mrf.mxu0 }
0x1070   :  { %v9288_v2 = vpop.f32.mrf.mxu1 }
0x1071   :  { %v9289_v27 = vadd.f32 %v9288_v2, %v9245_v14  ;;  %v21356_v14 = vld [vmem:[#allocation35 + $0x288] ss:$40 sps:$4 sm:$0xff]  }
0x1072   :  { %14818 = vmatpush2.bf16.msra.mxu1 %v21290_v31  ;;  %v23679_v31 = vpop.f32.mrf.mxu0  ;;  %v23681_v18 = vpop.f32.mrf.mxu1 }
0x1073   :  { %14819 = vmatprep.subr.bf16.mxu1 %v21295_v19  ;;  %v21335_v19 = vld [vmem:[#allocation35 + $0x4b8] ss:$40 sps:$4 sm:$0xff]  }
0x1074   :  { %v9327_v5 = vpop.f32.mrf.mxu0  ;;  %v9370_v55 = vpop.f32.mrf.mxu1 }
0x1075   :  { %v9328_v10 = vadd.f32 %v9327_v5, %v9285_v43 }
0x1076   :  { %14820 = vmatpush2.bf16.msra.mxu1 %v21293_v36  ;;  %v21340_v36 = vld [vmem:[#allocation35 + $0x46c] ss:$40 sps:$4 sm:$0xff]   ;;  %v9329_v38 = vpop.f32.mrf.mxu0  ;;  %v9372_v3 = vpop.f32.mrf.mxu1 }
0x1077   :  { %14821 = vmatprep.subr.bf16.mxu1 %v21298_v15  ;;  %v21338_v15 = vld [vmem:[#allocation35 + $0x468] ss:$40 sps:$4 sm:$0xff]  }
0x107a   :  { %14822 = vmatpush2.bf16.msra.mxu1 %v21296_v22  ;;  %v21343_v22 = vld [vmem:[#allocation35 + $0x41c] ss:$40 sps:$4 sm:$0xff]  }
0x107b   :  { %14823 = vmatprep.subr.bf16.mxu1 %v21301_v39  ;;  %v21341_v39 = vld [vmem:[#allocation35 + $0x418] ss:$40 sps:$4 sm:$0xff]  }
0x107e   :  { %14824 = vmatpush2.bf16.msra.mxu1 %v21299_v9  ;;  %v21346_v9 = vld [vmem:[#allocation35 + $0x3cc] ss:$40 sps:$4 sm:$0xff]  }
0x107f   :  { %14825 = vmatprep.subr.bf16.mxu1 %v21304_v32  ;;  %v9331_v32 = vpop.f32.mrf.mxu0 }
0x1081   :  { %v23683_v30 = vpop.f32.mrf.mxu0 }
0x1082   :  { %14826 = vmatpush2.bf16.msra.mxu1 %v21302_v29  ;;  %v21344_v29 = vld [vmem:[#allocation35 + $0x3c8] ss:$40 sps:$4 sm:$0xff]  }
0x1083   :  { %14827 = vmatprep.subr.bf16.mxu1 %v21307_v63  ;;  %v9374_v63 = vpop.f32.mrf.mxu1 }
0x1086   :  { %14828 = vmatpush2.bf16.msra.mxu1 %v21305_v45  ;;  %v9332_v45 = vadd.f32 %v9331_v32, %v9289_v27  ;;  %v8524_v32 = vld [vmem:[#allocation34] sm:$0x3] }
0x1087   :  { %14829 = vmatprep.subr.bf16.mxu1 %v21310_v7 }
0x1088   :  { %v9375_v7 = vadd.f32 %v9374_v63, %v9332_v45  ;;  %v21362_v45 = vld [vmem:[#allocation35 + $0xbe8] ss:$40 sps:$4 sm:$0xff]  }
0x108a   :  { %14830 = vmatpush2.bf16.msra.mxu1 %v21308_v47  ;;  %v10065_v47 = vpop.f32.mrf.mxu0 }
0x108b   :  { %14885 = vmatprep.subr.bf16.mxu1 %v21313_v42  ;;  %v21352_v42 = vld [vmem:[#allocation35 + $0x32c] ss:$40 sps:$4 sm:$0xff]  }
0x108d   :  { %14832 = vmatmul.mubr.bf16.vlgmr.msra.gmra.mxu1 %v23653_v58  ;;  %v21328_v58 = vld [vmem:[#allocation35 + $0xac] ss:$40 sps:$4 sm:$0xff]  }
0x108e   :  { %14886 = vmatpush1.bf16.msra.mxu1 %v21311_v50  ;;  %14917 = vmatprep.mubr.bf16.mxu1 %v23672_v62  ;;  %v9371_v50 = vadd.f32 %v9370_v55, %v9328_v10 }
0x108f   :  { %14887 = vmatprep.subr.bf16.mxu1 %v21316_v57  ;;  %v9380_v57 = vrot.slane %v9375_v7, 4  ;;  %v21367_v7 = vld [vmem:[#allocation35 + $0xb9c] ss:$40 sps:$4 sm:$0xff]  }
0x1092   :  { %14888 = vmatpush1.bf16.msra.mxu1 %v21314_v6  ;;  %v21350_v6 = vld [vmem:[#allocation35 + $0x328] ss:$40 sps:$4 sm:$0xff]  }
0x1093   :  { %14889 = vmatprep.subr.bf16.mxu1 %v21319_v44  ;;  %v23685_v44 = vpop.f32.mrf.mxu0 }
0x1096   :  { %14890 = vmatpush1.bf16.msra.mxu1 %v21317_v28  ;;  %v23687_v28 = vpop.f32.mrf.mxu1 }
0x1097   :  { %14891 = vmatprep.subr.bf16.mxu1 %v21322_v60  ;;  %v21355_v60 = vld [vmem:[#allocation35 + $0x2dc] ss:$40 sps:$4 sm:$0xff]  }
0x1098   :  { %v10108_v17 = vpop.f32.mrf.mxu1 }
0x109a   :  { %14892 = vmatpush1.bf16.msra.mxu1 %v21320_v41  ;;  %v9378_v41 = vrot.slane %v9371_v50, 4  ;;  %v23699_v2 = vpop.f32.mrf.mxu1 }
0x109b   :  { %14893 = vmatprep.subr.bf16.mxu1 %v21325_v8 }
0x109c   :  { %v9384_v8 = vsel %vm2671_vm5, %v9380_v57, %v9378_v41 }
0x109e   :  { %14894 = vmatpush1.bf16.msra.mxu1 %v21323_v40  ;;  %v21353_v40 = vld [vmem:[#allocation35 + $0x2d8] ss:$40 sps:$4 sm:$0xff]  }
0x109f   :  { %14895 = vmatprep.subr.bf16.mxu1 %v21328_v58  ;;  %v9287_v58 = vadd.f32 %v9286_v16, %v9243_v20  ;;  %v21361_v20 = vld [vmem:[#allocation35 + $0xc3c] ss:$40 sps:$4 sm:$0xff]  }
0x10a2   :  { %14896 = vmatpush1.bf16.msra.mxu1 %v21326_v24  ;;  %v10069_v24 = vpop.f32.mrf.mxu0 }
0x10a3   :  { %14897 = vmatprep.subr.bf16.mxu1 %v21331_v49  ;;  %v21358_v49 = vld [vmem:[#allocation35 + $0x28c] ss:$40 sps:$4 sm:$0xff]  }
0x10a6   :  { %14898 = vmatpush1.bf16.msra.mxu1 %v21329_v54  ;;  %v23693_v54 = vpop.f32.mrf.mxu0 }
0x10a7   :  { %14899 = vmatprep.subr.bf16.mxu1 %v21334_v13  ;;  %v9386_v13 = vsel %vm2676_vm6, %v9384_v8, 0.0  ;;  %v21370_v8 = vld [vmem:[#allocation35 + $0xb4c] ss:$40 sps:$4 sm:$0xff]  }
0x10a8   :  { %v10066_v16 = vadd.f32 %v10065_v47, %v9386_v13  ;;  %v21368_v13 = vld [vmem:[#allocation35 + $0xb48] ss:$40 sps:$4 sm:$0xff]  }
0x10aa   :  { %14900 = vmatpush1.bf16.msra.mxu1 %v21332_v4  ;;  %v9382_v4 = vsel %vm2671_vm5, %v9378_v41, %v9380_v57  ;;  %v10109_v5 = vadd.f32 %v10108_v17, %v10066_v16 }
0x10ab   :  { %14901 = vmatprep.subr.bf16.mxu1 %v21337_v46  ;;  %v9330_v46 = vadd.f32 %v9329_v38, %v9287_v58  ;;  %v9388_v12 = vsel %vm2677_vm8, %v9382_v4, 0.0  ;;  %v21364_v38 = vld [vmem:[#allocation35 + $0xbec] ss:$40 sps:$4 sm:$0xff]  }
0x10ad   :  { %v9373_v11 = vadd.f32 %v9372_v3, %v9330_v46  ;;  %v22409_v3 = vld [vmem:[#allocation2 + $0x14] ss:$44 sps:$4 sm:$0xff]  }
0x10ae   :  { %14902 = vmatpush2.bf16.msra.mxu1 %v21335_v19  ;;  %v10151_v19 = vpop.f32.mrf.mxu0 }
0x10af   :  { %14903 = vmatprep.subr.bf16.mxu1 %v21340_v36  ;;  %v9326_v36 = vadd.f32 %v23679_v31, %v9283_v37  ;;  %v9379_v27 = vrot.slane %v9373_v11, 4  ;;  %v10152_v63 = vadd.f32 %v10151_v19, %v10109_v5  ;;  %v21371_v19 = vld [vmem:[#allocation35 + $0xaf8] ss:$40 sps:$4 sm:$0xff]   ;;  %v21376_v11 = vld [vmem:[#allocation35 + $0xaac] ss:$40 sps:$4 sm:$0xff]  }
0x10b0   :  { %v21374_v5 = vld [vmem:[#allocation35 + $0xaa8] ss:$40 sps:$4 sm:$0xff]  }
0x10b1   :  { %v9369_v55 = vadd.f32 %v23681_v18, %v9326_v36 }
0x10b2   :  { %14904 = vmatpush2.bf16.msra.mxu1 %v21338_v15  ;;  %v21359_v15 = vld [vmem:[#allocation35 + $0xc38] ss:$40 sps:$4 sm:$0xff]  }
0x10b3   :  { %14905 = vmatprep.subr.bf16.mxu1 %v21343_v22  ;;  %v10112_v22 = vpop.f32.mrf.mxu1  ;;  %v9377_v10 = vrot.slane %v9369_v55, 4  ;;  %v21379_v55 = vld [vmem:[#allocation35 + $0xa5c] ss:$40 sps:$4 sm:$0xff]  }
0x10b5   :  { %v9381_v17 = vsel %vm2671_vm5, %v9377_v10, %v9379_v27 }
0x10b6   :  { %14906 = vmatpush2.bf16.msra.mxu1 %v21341_v39  ;;  %v10070_v39 = vadd.f32 %v10069_v24, %v9388_v12  ;;  %v9387_v46 = vsel %vm2677_vm8, %v9381_v17, 0.0  ;;  %v21425_v17 = vld [vmem:[#allocation35 + $0xcd8] ss:$40 sps:$4 sm:$0xff]  }
0x10b7   :  { %14907 = vmatprep.subr.bf16.mxu1 %v21346_v9  ;;  %v10153_v9 = vpop.f32.mrf.mxu0  ;;  %v10068_v36 = vadd.f32 %v23685_v44, %v9387_v46  ;;  %v21385_v44 = vld [vmem:[#allocation35 + $0xa0c] ss:$40 sps:$4 sm:$0xff]   ;;  %v21440_v46 = vld [vmem:[#allocation35 + $0x163c] ss:$40 sps:$4 sm:$0xff]  }
0x10b8   :  { %v10113_v31 = vadd.f32 %v10112_v22, %v10070_v39  ;;  %v21377_v22 = vld [vmem:[#allocation35 + $0xa58] ss:$40 sps:$4 sm:$0xff]  }
0x10b9   :  { %v10155_v47 = vpop.f32.mrf.mxu0  ;;  %v10111_v12 = vadd.f32 %v23699_v2, %v10068_v36  ;;  %v21383_v2 = vld [vmem:[#allocation35 + $0xa08] ss:$40 sps:$4 sm:$0xff]   ;;  %v21441_v36 = vld [vmem:[#allocation35 + $0x698] ss:$40 sps:$4 sm:$0xff]  }
0x10ba   :  { %14908 = vmatpush2.bf16.msra.mxu1 %v21344_v29  ;;  %v22408_v29 = vld [vmem:[#allocation2] ss:$44 sps:$4 sm:$0xff]  }
0x10bb   :  { %14909 = vmatprep.subr.bf16.mxu1 %v21349_v33  ;;  %v10209_v33 = vrot.slane %v8524_v32, %v23310_v34 }
0x10be   :  { %14910 = vmatpush2.bf16.msra.mxu1 %v21347_v21 }
0x10bf   :  { %14911 = vmatprep.subr.bf16.mxu1 %v21352_v42  ;;  %v9383_v42 = vsel %vm2671_vm5, %v9379_v27, %v9377_v10  ;;  %v21409_v10 = vld [vmem:[#allocation35 + $0xdcc] ss:$40 sps:$4 sm:$0xff]  }
0x10c2   :  { %14912 = vmatpush2.bf16.msra.mxu1 %v21350_v6  ;;  %v10156_v6 = vadd.f32 %v10155_v47, %v10113_v31  ;;  %v21391_v31 = vld [vmem:[#allocation35 + $0xebc] ss:$40 sps:$4 sm:$0xff]   ;;  %v21407_v47 = vld [vmem:[#allocation35 + $0xdc8] ss:$40 sps:$4 sm:$0xff]  }
0x10c3   :  { %14913 = vmatprep.subr.bf16.mxu1 %v21355_v60  ;;  %v21365_v60 = vld [vmem:[#allocation35 + $0xb98] ss:$40 sps:$4 sm:$0xff]  }
0x10c6   :  { %14914 = vmatpush2.bf16.msra.mxu1 %v21353_v40  ;;  %v9385_v40 = vsel %vm2676_vm6, %v9383_v42, 0.0  ;;  %v21415_v42 = vld [vmem:[#allocation35 + $0xd7c] ss:$40 sps:$4 sm:$0xff]  }
0x10c7   :  { %14915 = vmatprep.subr.bf16.mxu1 %v21358_v49  ;;  %v10064_v4 = vadd.f32 %v23683_v30, %v9385_v40 }
0x10c9   :  { %v10107_v48 = vadd.f32 %v23687_v28, %v10064_v4  ;;  %v10154_v28 = vadd.f32 %v10153_v9, %v10111_v12  ;;  %v21397_v9 = vld [vmem:[#allocation35 + $0xe6c] ss:$40 sps:$4 sm:$0xff]  }
0x10ca   :  { %14916 = vmatpush2.bf16.msra.mxu1 %v21356_v14  ;;  %v21373_v14 = vld [vmem:[#allocation35 + $0xafc] ss:$40 sps:$4 sm:$0xff]   ;;  %v21437_v4 = vld [vmem:[#allocation35 + $0x6ec] ss:$40 sps:$4 sm:$0xff]  }
0x10cb   :  { %14971 = vmatprep.subr.bf16.mxu1 %v21361_v20  ;;  %v10150_v30 = vadd.f32 %v23693_v54, %v10107_v48  ;;  %v21443_v48 = vld [vmem:[#allocation35 + $0x69c] ss:$40 sps:$4 sm:$0xff]   ;;  %v21449_v12 = vld [vmem:[#allocation35 + $0x64c] ss:$40 sps:$4 sm:$0xff]  }
0x10cd   :  { %v10192_v43 = vpop.f32.mrf.mxu1  ;;  %14918 = vmatmul.mubr.bf16.vlgmr.msra.gmra.mxu1 %v22408_v29 }
0x10ce   :  { %14972 = vmatpush1.bf16.msra.mxu1 %v21359_v15  ;;  %15003 = vmatprep.mubr.bf16.mxu1 %v22409_v3  ;;  %v10193_v51 = vadd.f32 %v10192_v43, %v10150_v30  ;;  %v10205_v15 = vrot.slane %v8524_v32, %v23303_v26  ;;  %v21389_v3 = vld [vmem:[#allocation35 + $0xeb8] ss:$40 sps:$4 sm:$0xff]   ;;  %v21444_v30 = vld [vmem:[#allocation35 + $0x15e8] ss:$40 sps:$4 sm:$0xff]  }
0x10cf   :  { %v10194_v18 = vpop.f32.mrf.mxu1  ;;  %14973 = vmatprep.subr.bf16.mxu1 %v21364_v38 }
0x10d0   :  { %v10195_v21 = vadd.f32 %v10194_v18, %v10152_v63  ;;  %v10212_v38 = vadd.f32 %v10205_v15, %v10193_v51  ;;  %v21395_v63 = vld [vmem:[#allocation35 + $0xe68] ss:$40 sps:$4 sm:$0xff]  }
0x10d1   :  { %v10196_v50 = vpop.f32.mrf.mxu1  ;;  %v21447_v51 = vld [vmem:[#allocation35 + $0x648] ss:$40 sps:$4 sm:$0xff]  }
0x10d2   :  { %v10213_v57 = vadd.f32 %v10209_v33, %v10195_v21  ;;  %14974 = vmatpush1.bf16.msra.mxu1 %v21362_v45  ;;  %v10197_v39 = vadd.f32 %v10196_v50, %v10154_v28  ;;  %v21401_v45 = vld [vmem:[#allocation35 + $0xe18] ss:$40 sps:$4 sm:$0xff]   ;;  %v21458_v28 = vld [vmem:[#allocation35 + $0x154c] ss:$40 sps:$4 sm:$0xff]  }
0x10d3   :  { %v10198_v41 = vpop.f32.mrf.mxu1  ;;  %14975 = vmatprep.subr.bf16.mxu1 %v21367_v7 }
0x10d4   :  { %v10216_v58 = vsub.f32 0.0, %v10213_v57  ;;  %v10199_v24 = vadd.f32 %v10198_v41, %v10156_v6  ;;  %v10214_v54 = vadd.f32 %v10205_v15, %v10197_v39  ;;  %v21413_v41 = vld [vmem:[#allocation35 + $0xd78] ss:$40 sps:$4 sm:$0xff]   ;;  %v21455_v15 = vld [vmem:[#allocation35 + $0x5fc] ss:$40 sps:$4 sm:$0xff]  }
0x10d5   :  { %v21456_v39 = vld [vmem:[#allocation35 + $0x1548] ss:$40 sps:$4 sm:$0xff]  }
0x10d6   :  { %v10218_v49 = vmul.f32 1.442695, %v10216_v58  ;;  %v10215_v37 = vadd.f32 %v10209_v33, %v10199_v24  ;;  %14976 = vmatpush1.bf16.msra.mxu1 %v21365_v60  ;;  %v21403_v33 = vld [vmem:[#allocation35 + $0xe1c] ss:$40 sps:$4 sm:$0xff]   ;;  %v21419_v58 = vld [vmem:[#allocation35 + $0xd28] ss:$40 sps:$4 sm:$0xff]  }
0x10d7   :  { %14977 = vmatprep.subr.bf16.mxu1 %v21370_v8  ;;  %v21421_v8 = vld [vmem:[#allocation35 + $0xd2c] ss:$40 sps:$4 sm:$0xff]   ;;  %v21427_v24 = vld [vmem:[#allocation35 + $0xcdc] ss:$40 sps:$4 sm:$0xff]  }
0x10d8   :  { %22380 = vpow2.f32 %v10218_v49  ;;  %v10217_v20 = vsub.f32 0.0, %v10215_v37  ;;  %v21434_v49 = vld [vmem:[#allocation35 + $0xc8c] ss:$40 sps:$4 sm:$0xff]   ;;  %v21428_v37 = vld [vmem:[#allocation35 + $0x738] ss:$40 sps:$4 sm:$0xff]  }
0x10da   :  { %v10220_v16 = vmul.f32 1.442695, %v10217_v20  ;;  %14978 = vmatpush1.bf16.msra.mxu1 %v21368_v13  ;;  %v21435_v20 = vld [vmem:[#allocation35 + $0x6e8] ss:$40 sps:$4 sm:$0xff]  }
0x10db   :  { %14979 = vmatprep.subr.bf16.mxu1 %v21373_v14  ;;  %v21432_v14 = vld [vmem:[#allocation35 + $0xc88] ss:$40 sps:$4 sm:$0xff]  }
0x10dc   :  { %22382 = vpow2.f32 %v10220_v16  ;;  %v21438_v16 = vld [vmem:[#allocation35 + $0x1638] ss:$40 sps:$4 sm:$0xff]  }
0x10dd   :  { %22384 = vtanh.f32 %v10212_v38  ;;  %v21461_v38 = vld [vmem:[#allocation35 + $0x5ac] ss:$40 sps:$4 sm:$0xff]  }
0x10de   :  { %14980 = vmatpush1.bf16.msra.mxu1 %v21371_v19  ;;  %v21446_v19 = vld [vmem:[#allocation35 + $0x15ec] ss:$40 sps:$4 sm:$0xff]  }
0x10df   :  { %14981 = vmatprep.subr.bf16.mxu1 %v21376_v11  ;;  %v22410_v11 = vld [vmem:[#allocation2 + $0x10] ss:$44 sps:$4 sm:$0xff]  }
0x10e2   :  { %14982 = vmatpush1.bf16.msra.mxu1 %v21374_v5  ;;  %v21452_v5 = vld [vmem:[#allocation35 + $0x159c] ss:$40 sps:$4 sm:$0xff]  }
0x10e3   :  { %14983 = vmatprep.subr.bf16.mxu1 %v21379_v55  ;;  %v21450_v55 = vld [vmem:[#allocation35 + $0x1598] ss:$40 sps:$4 sm:$0xff]  }
0x10e5   :  { %v22381_v27 = vpop.eup %22380 }
0x10e6   :  { %v10222_v29 = vadd.f32 1.0, %v22381_v27  ;;  %14984 = vmatpush1.bf16.msra.mxu1 %v21377_v22  ;;  %v21453_v22 = vld [vmem:[#allocation35 + $0x5f8] ss:$40 sps:$4 sm:$0xff]   ;;  %v21459_v27 = vld [vmem:[#allocation35 + $0x5a8] ss:$40 sps:$4 sm:$0xff]  }
0x10e7   :  { %14985 = vmatprep.subr.bf16.mxu1 %v21385_v44  ;;  %v21464_v44 = vld [vmem:[#allocation35 + $0x14fc] ss:$40 sps:$4 sm:$0xff]  }
0x10e8   :  { %22386 = vrcp.f32 %v10222_v29  ;;  %v21467_v29 = vld [vmem:[#allocation35 + $0x55c] ss:$40 sps:$4 sm:$0xff]  }
0x10e9   :  { %v22383_v43 = vpop.eup %22382  ;;  %22388 = vtanh.f32 %v10214_v54  ;;  %v21470_v54 = vld [vmem:[#allocation35 + $0x14ac] ss:$40 sps:$4 sm:$0xff]  }
0x10ea   :  { %v10223_v32 = vadd.f32 1.0, %v22383_v43  ;;  %14986 = vmatpush1.bf16.msra.mxu1 %v21383_v2  ;;  %v22385_v18 = vpop.eup %22384  ;;  %v21462_v2 = vld [vmem:[#allocation35 + $0x14f8] ss:$40 sps:$4 sm:$0xff]   ;;  %v21473_v43 = vld [vmem:[#allocation35 + $0x50c] ss:$40 sps:$4 sm:$0xff]  }
0x10eb   :  { %14987 = vmatprep.subr.bf16.mxu1 %v21391_v31  ;;  %v21465_v31 = vld [vmem:[#allocation35 + $0x558] ss:$40 sps:$4 sm:$0xff]  }
0x10ec   :  { %22390 = vrcp.f32 %v10223_v32  ;;  %v21468_v32 = vld [vmem:[#allocation35 + $0x14a8] ss:$40 sps:$4 sm:$0xff]  }
0x10ee   :  { %14988 = vmatpush2.bf16.msra.mxu1 %v21389_v3  ;;  %v21476_v3 = vld [vmem:[#allocation35 + $0x145c] ss:$40 sps:$4 sm:$0xff]  }
0x10ef   :  { %14989 = vmatprep.subr.bf16.mxu1 %v21397_v9  ;;  %v21471_v9 = vld [vmem:[#allocation35 + $0x508] ss:$40 sps:$4 sm:$0xff]  }
0x10f2   :  { %14990 = vmatpush2.bf16.msra.mxu1 %v21395_v63  ;;  %v21479_v63 = vld [vmem:[#allocation35 + $0x9bc] ss:$40 sps:$4 sm:$0xff]  }
0x10f3   :  { %14991 = vmatprep.subr.bf16.mxu1 %v21403_v33  ;;  %v21474_v33 = vld [vmem:[#allocation35 + $0x1458] ss:$40 sps:$4 sm:$0xff]  }
0x10f5   :  { %v22387_v7 = vpop.eup %22386 }
0x10f6   :  { %v10228_v21 = vmul.f32 %v22387_v7, %v22385_v18  ;;  %14992 = vmatpush2.bf16.msra.mxu1 %v21401_v45  ;;  %v22389_v50 = vpop.eup %22388  ;;  %v21482_v45 = vld [vmem:[#allocation35 + $0x140c] ss:$40 sps:$4 sm:$0xff]   ;;  %v21480_v7 = vld [vmem:[#allocation35 + $0x1408] ss:$40 sps:$4 sm:$0xff]  }
0x10f7   :  { %14993 = vmatprep.subr.bf16.mxu1 %v21409_v10  ;;  %v21477_v10 = vld [vmem:[#allocation35 + $0x9b8] ss:$40 sps:$4 sm:$0xff]   ;;  %v21485_v18 = vld [vmem:[#allocation35 + $0x96c] ss:$40 sps:$4 sm:$0xff]  }
0x10f8   :  { %v19053_v57 = vpack.c.bf16 %v10228_v21, %v10228_v21  ;;  %v21488_v21 = vld [vmem:[#allocation35 + $0x744] ss:$40 sps:$4 sm:$0xff]  }
0x10f9   :  { %v22391_v6 = vpop.eup %22390 }
0x10fa   :  { %10238 = vst [vmem:[#allocation2 + $0x20] sm:$0xf] %v19053_v57  ;;  %v10229_v60 = vmul.f32 %v22391_v6, %v22389_v50  ;;  %14994 = vmatpush2.bf16.msra.mxu1 %v21407_v47  ;;  %v21483_v47 = vld [vmem:[#allocation35 + $0x968] ss:$40 sps:$4 sm:$0xff]   ;;  %v21494_v57 = vld [vmem:[#allocation35 + $0x6f4] ss:$40 sps:$4 sm:$0xff]  }
0x10fb   :  { %14995 = vmatprep.subr.bf16.mxu1 %v21415_v42  ;;  %v21491_v42 = vld [vmem:[#allocation35 + $0x91c] ss:$40 sps:$4 sm:$0xff]   ;;  %v21486_v50 = vld [vmem:[#allocation35 + $0x740] ss:$40 sps:$4 sm:$0xff]  }
0x10fc   :  { %v19054_v40 = vpack.c.bf16 %v10229_v60, %v10229_v60  ;;  %v21489_v6 = vld [vmem:[#allocation35 + $0x918] ss:$40 sps:$4 sm:$0xff]   ;;  %v21497_v60 = vld [vmem:[#allocation35 + $0x8cc] ss:$40 sps:$4 sm:$0xff]  }
0x10fe   :  { %10239 = vst [vmem:[#allocation2 + $0x4c] sm:$0xf] %v19054_v40  ;;  %14996 = vmatpush2.bf16.msra.mxu1 %v21413_v41  ;;  %v21492_v41 = vld [vmem:[#allocation35 + $0x6f0] ss:$40 sps:$4 sm:$0xff]  }
0x10ff   :  { %14997 = vmatprep.subr.bf16.mxu1 %v21421_v8  ;;  %v21500_v8 = vld [vmem:[#allocation35 + $0x6a4] ss:$40 sps:$4 sm:$0xff]   ;;  %v21495_v40 = vld [vmem:[#allocation35 + $0x8c8] ss:$40 sps:$4 sm:$0xff]  }
0x1102   :  { %14998 = vmatpush2.bf16.msra.mxu1 %v21419_v58  ;;  %v21503_v58 = vld [vmem:[#allocation35 + $0x87c] ss:$40 sps:$4 sm:$0xff]  }
0x1103   :  { %14999 = vmatprep.subr.bf16.mxu1 %v21427_v24  ;;  %v21498_v24 = vld [vmem:[#allocation35 + $0x6a0] ss:$40 sps:$4 sm:$0xff]  }
0x1105   :  { %v23720_v13 = vld [vmem:[#allocation2 + $0x20] ss:$44 sps:$4 sm:$0xff]  }
0x1106   :  { %15000 = vmatpush2.bf16.msra.mxu1 %v21425_v17  ;;  %14875 = vmatmul.mubr.bf16.vlgmr.msra.gmra.mxu0 %v23720_v13  ;;  %v21506_v17 = vld [vmem:[#allocation35 + $0x654] ss:$40 sps:$4 sm:$0xff]  }
0x1107   :  { %15001 = vmatprep.subr.bf16.mxu1 %v21434_v49  ;;  %14929 = vmatpush1.bf16.msra.mxu0 %v21428_v37  ;;  %v21501_v49 = vld [vmem:[#allocation35 + $0x878] ss:$40 sps:$4 sm:$0xff]   ;;  %v21509_v37 = vld [vmem:[#allocation35 + $0x82c] ss:$40 sps:$4 sm:$0xff]  }
0x1108   :  { %14960 = vmatprep.mubr.bf16.mxu0 %v23663_v59  ;;  %14930 = vmatprep.subr.bf16.mxu0 %v21437_v4  ;;  %v21512_v4 = vld [vmem:[#allocation35 + $0x604] ss:$40 sps:$4 sm:$0xff]  }
0x110a   :  { %15002 = vmatpush2.bf16.msra.mxu1 %v21432_v14  ;;  %v21515_v14 = vld [vmem:[#allocation35 + $0x7dc] ss:$40 sps:$4 sm:$0xff]  }
0x110b   :  { %15057 = vmatprep.subr.bf16.mxu1 %v21440_v46  ;;  %14931 = vmatpush1.bf16.msra.mxu0 %v21435_v20  ;;  %v21510_v46 = vld [vmem:[#allocation35 + $0x600] ss:$40 sps:$4 sm:$0xff]   ;;  %v21518_v20 = vld [vmem:[#allocation35 + $0x5b4] ss:$40 sps:$4 sm:$0xff]  }
0x110c   :  { %14932 = vmatprep.subr.bf16.mxu0 %v21443_v48  ;;  %v21513_v48 = vld [vmem:[#allocation35 + $0x7d8] ss:$40 sps:$4 sm:$0xff]  }
0x110d   :  { %15004 = vmatmul.mubr.bf16.vlgmr.msra.gmra.mxu1 %v22410_v11  ;;  %v21519_v11 = vld [vmem:[#allocation35 + $0x788] ss:$40 sps:$4 sm:$0xff]  }
0x110e   :  { %15058 = vmatpush1.bf16.msra.mxu1 %v21438_v16  ;;  %15089 = vmatprep.mubr.bf16.mxu1 %v22988_v0  ;;  %v21521_v16 = vld [vmem:[#allocation35 + $0x78c] ss:$40 sps:$4 sm:$0xff]  }
0x110f   :  { %15059 = vmatprep.subr.bf16.mxu1 %v21446_v19  ;;  %14933 = vmatpush1.bf16.msra.mxu0 %v21441_v36  ;;  %v21516_v19 = vld [vmem:[#allocation35 + $0x5b0] ss:$40 sps:$4 sm:$0xff]   ;;  %v21524_v36 = vld [vmem:[#allocation35 + $0x564] ss:$40 sps:$4 sm:$0xff]  }
0x1110   :  { %14934 = vmatprep.subr.bf16.mxu0 %v21449_v12  ;;  %v21527_v12 = vld [vmem:[#allocation35 + $0x113c] ss:$40 sps:$4 sm:$0xff]  }
0x1112   :  { %15060 = vmatpush1.bf16.msra.mxu1 %v21444_v30  ;;  %v21522_v30 = vld [vmem:[#allocation35 + $0x560] ss:$40 sps:$4 sm:$0xff]  }
0x1113   :  { %15061 = vmatprep.subr.bf16.mxu1 %v21452_v5  ;;  %14935 = vmatpush1.bf16.msra.mxu0 %v21447_v51  ;;  %v21530_v5 = vld [vmem:[#allocation35 + $0x514] ss:$40 sps:$4 sm:$0xff]   ;;  %v21525_v51 = vld [vmem:[#allocation35 + $0x1138] ss:$40 sps:$4 sm:$0xff]  }
0x1114   :  { %14936 = vmatprep.subr.bf16.mxu0 %v21455_v15  ;;  %v21533_v15 = vld [vmem:[#allocation35 + $0x10ec] ss:$40 sps:$4 sm:$0xff]  }
0x1116   :  { %15062 = vmatpush1.bf16.msra.mxu1 %v21450_v55  ;;  %v21528_v55 = vld [vmem:[#allocation35 + $0x510] ss:$40 sps:$4 sm:$0xff]  }
0x1117   :  { %15063 = vmatprep.subr.bf16.mxu1 %v21458_v28  ;;  %14937 = vmatpush1.bf16.msra.mxu0 %v21453_v22  ;;  %v21536_v28 = vld [vmem:[#allocation35 + $0x9c4] ss:$40 sps:$4 sm:$0xff]   ;;  %v23728_v22 = vld [vmem:[#allocation2 + $0x1c] ss:$44 sps:$4 sm:$0xff]  }
0x1118   :  { %14938 = vmatprep.subr.bf16.mxu0 %v21461_v38  ;;  %v21531_v38 = vld [vmem:[#allocation35 + $0x10e8] ss:$40 sps:$4 sm:$0xff]  }
0x111a   :  { %15064 = vmatpush1.bf16.msra.mxu1 %v21456_v39  ;;  %v21539_v39 = vld [vmem:[#allocation35 + $0x109c] ss:$40 sps:$4 sm:$0xff]  }
0x111b   :  { %15065 = vmatprep.subr.bf16.mxu1 %v21464_v44  ;;  %14939 = vmatpush1.bf16.msra.mxu0 %v21459_v27  ;;  %v21534_v44 = vld [vmem:[#allocation35 + $0x9c0] ss:$40 sps:$4 sm:$0xff]   ;;  %v21542_v27 = vld [vmem:[#allocation35 + $0x974] ss:$40 sps:$4 sm:$0xff]  }
0x111c   :  { %14940 = vmatprep.subr.bf16.mxu0 %v21467_v29  ;;  %v21537_v29 = vld [vmem:[#allocation35 + $0x1098] ss:$40 sps:$4 sm:$0xff]  }
0x111e   :  { %15066 = vmatpush1.bf16.msra.mxu1 %v21462_v2  ;;  %v21545_v2 = vld [vmem:[#allocation35 + $0x104c] ss:$40 sps:$4 sm:$0xff]  }
0x111f   :  { %15067 = vmatprep.subr.bf16.mxu1 %v21470_v54  ;;  %14941 = vmatpush1.bf16.msra.mxu0 %v21465_v31  ;;  %v21548_v54 = vld [vmem:[#allocation35 + $0x924] ss:$40 sps:$4 sm:$0xff]   ;;  %v21543_v31 = vld [vmem:[#allocation35 + $0x1048] ss:$40 sps:$4 sm:$0xff]  }
0x1120   :  { %14942 = vmatprep.subr.bf16.mxu0 %v21473_v43  ;;  %v21551_v43 = vld [vmem:[#allocation35 + $0xffc] ss:$40 sps:$4 sm:$0xff]  }
0x1122   :  { %15068 = vmatpush1.bf16.msra.mxu1 %v21468_v32  ;;  %v21546_v32 = vld [vmem:[#allocation35 + $0x920] ss:$40 sps:$4 sm:$0xff]  }
0x1123   :  { %15069 = vmatprep.subr.bf16.mxu1 %v21476_v3  ;;  %14943 = vmatpush1.bf16.msra.mxu0 %v21471_v9  ;;  %v21554_v3 = vld [vmem:[#allocation35 + $0x8d4] ss:$40 sps:$4 sm:$0xff]   ;;  %v21549_v9 = vld [vmem:[#allocation35 + $0xff8] ss:$40 sps:$4 sm:$0xff]  }
0x1124   :  { %14944 = vmatprep.subr.bf16.mxu0 %v21479_v63  ;;  %v21557_v63 = vld [vmem:[#allocation35 + $0xfac] ss:$40 sps:$4 sm:$0xff]  }
0x1126   :  { %15070 = vmatpush1.bf16.msra.mxu1 %v21474_v33  ;;  %v21552_v33 = vld [vmem:[#allocation35 + $0x8d0] ss:$40 sps:$4 sm:$0xff]  }
0x1127   :  { %15071 = vmatprep.subr.bf16.mxu1 %v21482_v45  ;;  %14945 = vmatpush2.bf16.msra.mxu0 %v21477_v10  ;;  %v21560_v45 = vld [vmem:[#allocation35 + $0x884] ss:$40 sps:$4 sm:$0xff]   ;;  %v21555_v10 = vld [vmem:[#allocation35 + $0xfa8] ss:$40 sps:$4 sm:$0xff]  }
0x1128   :  { %14946 = vmatprep.subr.bf16.mxu0 %v21485_v18  ;;  %v21563_v18 = vld [vmem:[#allocation35 + $0xf5c] ss:$40 sps:$4 sm:$0xff]  }
0x112a   :  { %15072 = vmatpush1.bf16.msra.mxu1 %v21480_v7  ;;  %v21558_v7 = vld [vmem:[#allocation35 + $0x880] ss:$40 sps:$4 sm:$0xff]  }
0x112b   :  { %15143 = vmatprep.subr.bf16.mxu1 %v21488_v21  ;;  %14947 = vmatpush2.bf16.msra.mxu0 %v21483_v47  ;;  %v21566_v21 = vld [vmem:[#allocation35 + $0x834] ss:$40 sps:$4 sm:$0xff]   ;;  %v21561_v47 = vld [vmem:[#allocation35 + $0xf58] ss:$40 sps:$4 sm:$0xff]  }
0x112c   :  { %14948 = vmatprep.subr.bf16.mxu0 %v21491_v42  ;;  %v21569_v42 = vld [vmem:[#allocation35 + $0xf0c] ss:$40 sps:$4 sm:$0xff]  }
0x112d   :  { %15090 = vmatmul.mubr.bf16.vlgmr.msra.gmra.mxu1 %v23720_v13  ;;  %v21504_v13 = vld [vmem:[#allocation35 + $0x650] ss:$40 sps:$4 sm:$0xff]  }
0x112e   :  { %15144 = vmatpush1.bf16.msra.mxu1 %v21486_v50  ;;  %15175 = vmatprep.mubr.bf16.mxu1 %v23663_v59  ;;  %v21507_v59 = vld [vmem:[#allocation35 + $0x828] ss:$40 sps:$4 sm:$0xff]  }
0x112f   :  { %15145 = vmatprep.subr.bf16.mxu1 %v21494_v57  ;;  %14949 = vmatpush2.bf16.msra.mxu0 %v21489_v6  ;;  %v21564_v50 = vld [vmem:[#allocation35 + $0x830] ss:$40 sps:$4 sm:$0xff]   ;;  %v21572_v57 = vld [vmem:[#allocation35 + $0x7e4] ss:$40 sps:$4 sm:$0xff]  }
0x1130   :  { %14950 = vmatprep.subr.bf16.mxu0 %v21497_v60  ;;  %v21567_v6 = vld [vmem:[#allocation35 + $0xf08] ss:$40 sps:$4 sm:$0xff]   ;;  %v21575_v60 = vld [vmem:[#allocation35 + $0x13bc] ss:$40 sps:$4 sm:$0xff]  }
0x1132   :  { %15146 = vmatpush1.bf16.msra.mxu1 %v21492_v41  ;;  %v21570_v41 = vld [vmem:[#allocation35 + $0x7e0] ss:$40 sps:$4 sm:$0xff]  }
0x1133   :  { %15147 = vmatprep.subr.bf16.mxu1 %v21500_v8  ;;  %14951 = vmatpush2.bf16.msra.mxu0 %v21495_v40  ;;  %v21578_v8 = vld [vmem:[#allocation35 + $0x794] ss:$40 sps:$4 sm:$0xff]   ;;  %v21573_v40 = vld [vmem:[#allocation35 + $0x13b8] ss:$40 sps:$4 sm:$0xff]  }
0x1134   :  { %14952 = vmatprep.subr.bf16.mxu0 %v21503_v58  ;;  %v21581_v58 = vld [vmem:[#allocation35 + $0x136c] ss:$40 sps:$4 sm:$0xff]  }
0x1136   :  { %15148 = vmatpush1.bf16.msra.mxu1 %v21498_v24  ;;  %v21576_v24 = vld [vmem:[#allocation35 + $0x790] ss:$40 sps:$4 sm:$0xff]  }
0x1137   :  { %15149 = vmatprep.subr.bf16.mxu1 %v21506_v17  ;;  %14953 = vmatpush2.bf16.msra.mxu0 %v21501_v49  ;;  %v21584_v17 = vld [vmem:[#allocation35 + $0x1144] ss:$40 sps:$4 sm:$0xff]   ;;  %v21579_v49 = vld [vmem:[#allocation35 + $0x1368] ss:$40 sps:$4 sm:$0xff]  }
0x1138   :  { %14954 = vmatprep.subr.bf16.mxu0 %v21509_v37  ;;  %v21587_v37 = vld [vmem:[#allocation35 + $0x131c] ss:$40 sps:$4 sm:$0xff]  }
0x113a   :  { %15150 = vmatpush1.bf16.msra.mxu1 %v21504_v13  ;;  %v21582_v13 = vld [vmem:[#allocation35 + $0x1140] ss:$40 sps:$4 sm:$0xff]  }
0x113b   :  { %15151 = vmatprep.subr.bf16.mxu1 %v21512_v4  ;;  %14955 = vmatpush2.bf16.msra.mxu0 %v21507_v59  ;;  %v21590_v4 = vld [vmem:[#allocation35 + $0x10f4] ss:$40 sps:$4 sm:$0xff]   ;;  %v21585_v59 = vld [vmem:[#allocation35 + $0x1318] ss:$40 sps:$4 sm:$0xff]  }
0x113c   :  { %14956 = vmatprep.subr.bf16.mxu0 %v21515_v14  ;;  %v22412_v14 = vld [vmem:[#allocation2 + $0x8] ss:$44 sps:$4 sm:$0xff]  }
0x113e   :  { %15152 = vmatpush1.bf16.msra.mxu1 %v21510_v46  ;;  %v21593_v46 = vld [vmem:[#allocation35 + $0x12cc] ss:$40 sps:$4 sm:$0xff]  }
0x113f   :  { %15153 = vmatprep.subr.bf16.mxu1 %v21518_v20  ;;  %14957 = vmatpush2.bf16.msra.mxu0 %v21513_v48  ;;  %v21588_v20 = vld [vmem:[#allocation35 + $0x10f0] ss:$40 sps:$4 sm:$0xff]   ;;  %v21596_v48 = vld [vmem:[#allocation35 + $0x10a4] ss:$40 sps:$4 sm:$0xff]  }
0x1140   :  { %14958 = vmatprep.subr.bf16.mxu0 %v21521_v16  ;;  %v21591_v16 = vld [vmem:[#allocation35 + $0x12c8] ss:$40 sps:$4 sm:$0xff]  }
0x1142   :  { %15154 = vmatpush1.bf16.msra.mxu1 %v21516_v19  ;;  %v21599_v19 = vld [vmem:[#allocation35 + $0x127c] ss:$40 sps:$4 sm:$0xff]  }
0x1143   :  { %15155 = vmatprep.subr.bf16.mxu1 %v21524_v36  ;;  %14959 = vmatpush2.bf16.msra.mxu0 %v21519_v11  ;;  %v21594_v36 = vld [vmem:[#allocation35 + $0x10a0] ss:$40 sps:$4 sm:$0xff]   ;;  %v21602_v11 = vld [vmem:[#allocation35 + $0x1054] ss:$40 sps:$4 sm:$0xff]  }
0x1144   :  { %15014 = vmatprep.subr.bf16.mxu0 %v21527_v12  ;;  %v21597_v12 = vld [vmem:[#allocation35 + $0x1278] ss:$40 sps:$4 sm:$0xff]  }
0x1146   :  { %15156 = vmatpush1.bf16.msra.mxu1 %v21522_v30  ;;  %14961 = vmatmul.mubr.bf16.vlgmr.msra.gmra.mxu0 %v23667_v56  ;;  %v21540_v56 = vld [vmem:[#allocation35 + $0x970] ss:$40 sps:$4 sm:$0xff]   ;;  %v21605_v30 = vld [vmem:[#allocation35 + $0x122c] ss:$40 sps:$4 sm:$0xff]  }
0x1147   :  { %15157 = vmatprep.subr.bf16.mxu1 %v21530_v5  ;;  %15015 = vmatpush1.bf16.msra.mxu0 %v21525_v51  ;;  %v21600_v5 = vld [vmem:[#allocation35 + $0x1050] ss:$40 sps:$4 sm:$0xff]   ;;  %v21608_v51 = vld [vmem:[#allocation35 + $0x1004] ss:$40 sps:$4 sm:$0xff]  }
0x1148   :  { %15046 = vmatprep.mubr.bf16.mxu0 %v23728_v22  ;;  %15016 = vmatprep.subr.bf16.mxu0 %v21533_v15  ;;  %v21603_v15 = vld [vmem:[#allocation35 + $0x1228] ss:$40 sps:$4 sm:$0xff]  }
0x114a   :  { %15158 = vmatpush1.bf16.msra.mxu1 %v21528_v55  ;;  %v21611_v55 = vld [vmem:[#allocation35 + $0x11dc] ss:$40 sps:$4 sm:$0xff]  }
0x114b   :  { %15159 = vmatprep.subr.bf16.mxu1 %v21536_v28  ;;  %15017 = vmatpush1.bf16.msra.mxu0 %v21531_v38  ;;  %v21606_v28 = vld [vmem:[#allocation35 + $0x1000] ss:$40 sps:$4 sm:$0xff]  }
0x114c   :  { %15018 = vmatprep.subr.bf16.mxu0 %v21539_v39  ;;  %v21609_v38 = vld [vmem:[#allocation35 + $0x11d8] ss:$40 sps:$4 sm:$0xff]   ;;  %v21617_v39 = vld [vmem:[#allocation35 + $0x118c] ss:$40 sps:$4 sm:$0xff]  }
0x114e   :  { %15160 = vmatpush2.bf16.msra.mxu1 %v21534_v44  ;;  %v21612_v44 = vld [vmem:[#allocation35 + $0xfb0] ss:$40 sps:$4 sm:$0xff]  }
0x114f   :  { %15161 = vmatprep.subr.bf16.mxu1 %v21542_v27  ;;  %15019 = vmatpush1.bf16.msra.mxu0 %v21537_v29  ;;  %v21620_v27 = vld [vmem:[#allocation35 + $0xf64] ss:$40 sps:$4 sm:$0xff]   ;;  %v21615_v29 = vld [vmem:[#allocation35 + $0x1188] ss:$40 sps:$4 sm:$0xff]  }
0x1150   :  { %15020 = vmatprep.subr.bf16.mxu0 %v21545_v2  ;;  %v21623_v2 = vld [vmem:[#allocation35 + $0x244] ss:$40 sps:$4 sm:$0xff]  }
0x1152   :  { %15162 = vmatpush2.bf16.msra.mxu1 %v21540_v56  ;;  %v21618_v56 = vld [vmem:[#allocation35 + $0xf60] ss:$40 sps:$4 sm:$0xff]  }
0x1153   :  { %15163 = vmatprep.subr.bf16.mxu1 %v21548_v54  ;;  %15021 = vmatpush1.bf16.msra.mxu0 %v21543_v31  ;;  %v21626_v54 = vld [vmem:[#allocation35 + $0xf14] ss:$40 sps:$4 sm:$0xff]   ;;  %v21621_v31 = vld [vmem:[#allocation35 + $0x240] ss:$40 sps:$4 sm:$0xff]  }
0x1154   :  { %15022 = vmatprep.subr.bf16.mxu0 %v21551_v43  ;;  %v21629_v43 = vld [vmem:[#allocation35 + $0x1f4] ss:$40 sps:$4 sm:$0xff]  }
0x1156   :  { %15164 = vmatpush2.bf16.msra.mxu1 %v21546_v32  ;;  %v21624_v32 = vld [vmem:[#allocation35 + $0xf10] ss:$40 sps:$4 sm:$0xff]  }
0x1157   :  { %15165 = vmatprep.subr.bf16.mxu1 %v21554_v3  ;;  %15023 = vmatpush1.bf16.msra.mxu0 %v21549_v9  ;;  %v23732_v3 = vld [vmem:[#allocation2 + $0x18] ss:$44 sps:$4 sm:$0xff]  }
0x1158   :  { %15024 = vmatprep.subr.bf16.mxu0 %v21557_v63  ;;  %v21632_v9 = vld [vmem:[#allocation35 + $0x13c4] ss:$40 sps:$4 sm:$0xff]   ;;  %v21627_v63 = vld [vmem:[#allocation35 + $0x1f0] ss:$40 sps:$4 sm:$0xff]  }
0x115a   :  { %15166 = vmatpush2.bf16.msra.mxu1 %v21552_v33  ;;  %v21635_v33 = vld [vmem:[#allocation35 + $0x1a4] ss:$40 sps:$4 sm:$0xff]  }
0x115b   :  { %15167 = vmatprep.subr.bf16.mxu1 %v21560_v45  ;;  %15025 = vmatpush1.bf16.msra.mxu0 %v21555_v10  ;;  %v21630_v45 = vld [vmem:[#allocation35 + $0x13c0] ss:$40 sps:$4 sm:$0xff]   ;;  %v21638_v10 = vld [vmem:[#allocation35 + $0x1374] ss:$40 sps:$4 sm:$0xff]  }
0x115c   :  { %15026 = vmatprep.subr.bf16.mxu0 %v21563_v18  ;;  %v21633_v18 = vld [vmem:[#allocation35 + $0x1a0] ss:$40 sps:$4 sm:$0xff]  }
0x115e   :  { %15168 = vmatpush2.bf16.msra.mxu1 %v21558_v7  ;;  %v21641_v7 = vld [vmem:[#allocation35 + $0x154] ss:$40 sps:$4 sm:$0xff]  }
0x115f   :  { %15169 = vmatprep.subr.bf16.mxu1 %v21566_v21  ;;  %15027 = vmatpush1.bf16.msra.mxu0 %v21561_v47  ;;  %v21636_v21 = vld [vmem:[#allocation35 + $0x1370] ss:$40 sps:$4 sm:$0xff]   ;;  %v21644_v47 = vld [vmem:[#allocation35 + $0x1324] ss:$40 sps:$4 sm:$0xff]  }
0x1160   :  { %15028 = vmatprep.subr.bf16.mxu0 %v21569_v42  ;;  %v21639_v42 = vld [vmem:[#allocation35 + $0x150] ss:$40 sps:$4 sm:$0xff]  }
0x1162   :  { %15170 = vmatpush2.bf16.msra.mxu1 %v21564_v50  ;;  %v21647_v50 = vld [vmem:[#allocation35 + $0x104] ss:$40 sps:$4 sm:$0xff]  }
0x1163   :  { %15171 = vmatprep.subr.bf16.mxu1 %v21572_v57  ;;  %15029 = vmatpush1.bf16.msra.mxu0 %v21567_v6  ;;  %v21650_v57 = vld [vmem:[#allocation35 + $0x12d4] ss:$40 sps:$4 sm:$0xff]   ;;  %v21645_v6 = vld [vmem:[#allocation35 + $0x100] ss:$40 sps:$4 sm:$0xff]  }
0x1164   :  { %15030 = vmatprep.subr.bf16.mxu0 %v21575_v60  ;;  %v21653_v60 = vld [vmem:[#allocation35 + $0xb4] ss:$40 sps:$4 sm:$0xff]  }
0x1166   :  { %15172 = vmatpush2.bf16.msra.mxu1 %v21570_v41  ;;  %v21648_v41 = vld [vmem:[#allocation35 + $0x12d0] ss:$40 sps:$4 sm:$0xff]  }
0x1167   :  { %15173 = vmatprep.subr.bf16.mxu1 %v21578_v8  ;;  %15031 = vmatpush2.bf16.msra.mxu0 %v21573_v40  ;;  %v21656_v8 = vld [vmem:[#allocation35 + $0x1284] ss:$40 sps:$4 sm:$0xff]   ;;  %v21651_v40 = vld [vmem:[#allocation35 + $0xb0] ss:$40 sps:$4 sm:$0xff]  }
0x1168   :  { %15032 = vmatprep.subr.bf16.mxu0 %v21581_v58  ;;  %v21659_v58 = vld [vmem:[#allocation35 + $0x64] ss:$40 sps:$4 sm:$0xff]  }
0x116a   :  { %15174 = vmatpush2.bf16.msra.mxu1 %v21576_v24  ;;  %v21654_v24 = vld [vmem:[#allocation35 + $0x1280] ss:$40 sps:$4 sm:$0xff]  }
0x116b   :  { %15229 = vmatprep.subr.bf16.mxu1 %v21584_v17  ;;  %15033 = vmatpush2.bf16.msra.mxu0 %v21579_v49  ;;  %v21662_v17 = vld [vmem:[#allocation35 + $0x1234] ss:$40 sps:$4 sm:$0xff]   ;;  %v21657_v49 = vld [vmem:[#allocation35 + $0x60] ss:$40 sps:$4 sm:$0xff]  }
0x116c   :  { %15034 = vmatprep.subr.bf16.mxu0 %v21587_v37  ;;  %v21665_v37 = vld [vmem:[#allocation35 + $0x14] ss:$40 sps:$4 sm:$0xff]  }
0x116d   :  { %15176 = vmatmul.mubr.bf16.vlgmr.msra.gmra.mxu1 %v22412_v14  ;;  %v21671_v14 = vld [vmem:[#allocation35 + $0x4c4] ss:$40 sps:$4 sm:$0xff]  }
0x116e   :  { %15230 = vmatpush1.bf16.msra.mxu1 %v21582_v13  ;;  %15261 = vmatprep.mubr.bf16.mxu1 %v23728_v22  ;;  %v21614_v22 = vld [vmem:[#allocation35 + $0xfb4] ss:$40 sps:$4 sm:$0xff]   ;;  %v21660_v13 = vld [vmem:[#allocation35 + $0x1230] ss:$40 sps:$4 sm:$0xff]  }
0x116f   :  { %15231 = vmatprep.subr.bf16.mxu1 %v21590_v4  ;;  %15035 = vmatpush2.bf16.msra.mxu0 %v21585_v59  ;;  %v21668_v4 = vld [vmem:[#allocation35 + $0x11e4] ss:$40 sps:$4 sm:$0xff]   ;;  %v21663_v59 = vld [vmem:[#allocation35 + $0x10] ss:$40 sps:$4 sm:$0xff]  }
0x1170   :  { %15036 = vmatprep.subr.bf16.mxu0 %v21593_v46  ;;  %v21666_v46 = vld [vmem:[#allocation35 + $0x11e0] ss:$40 sps:$4 sm:$0xff]  }
0x1172   :  { %15232 = vmatpush1.bf16.msra.mxu1 %v21588_v20  ;;  %v21674_v20 = vld [vmem:[#allocation35 + $0x1194] ss:$40 sps:$4 sm:$0xff]  }
0x1173   :  { %15233 = vmatprep.subr.bf16.mxu1 %v21596_v48  ;;  %15037 = vmatpush2.bf16.msra.mxu0 %v21591_v16  ;;  %v21669_v48 = vld [vmem:[#allocation35 + $0x4c0] ss:$40 sps:$4 sm:$0xff]   ;;  %v21677_v16 = vld [vmem:[#allocation35 + $0x474] ss:$40 sps:$4 sm:$0xff]  }
0x1174   :  { %15038 = vmatprep.subr.bf16.mxu0 %v21599_v19  ;;  %v21672_v19 = vld [vmem:[#allocation35 + $0x1190] ss:$40 sps:$4 sm:$0xff]  }
0x1176   :  { %15234 = vmatpush1.bf16.msra.mxu1 %v21594_v36  ;;  %v21680_v36 = vld [vmem:[#allocation35 + $0x24c] ss:$40 sps:$4 sm:$0xff]  }
0x1177   :  { %15235 = vmatprep.subr.bf16.mxu1 %v21602_v11  ;;  %15039 = vmatpush2.bf16.msra.mxu0 %v21597_v12  ;;  %v21675_v11 = vld [vmem:[#allocation35 + $0x470] ss:$40 sps:$4 sm:$0xff]   ;;  %v21683_v12 = vld [vmem:[#allocation35 + $0x424] ss:$40 sps:$4 sm:$0xff]  }
0x1178   :  { %15040 = vmatprep.subr.bf16.mxu0 %v21605_v30  ;;  %v21678_v30 = vld [vmem:[#allocation35 + $0x248] ss:$40 sps:$4 sm:$0xff]  }
0x117a   :  { %15236 = vmatpush1.bf16.msra.mxu1 %v21600_v5  ;;  %v21686_v5 = vld [vmem:[#allocation35 + $0x1fc] ss:$40 sps:$4 sm:$0xff]  }
0x117b   :  { %15237 = vmatprep.subr.bf16.mxu1 %v21608_v51  ;;  %15041 = vmatpush2.bf16.msra.mxu0 %v21603_v15  ;;  %v21681_v51 = vld [vmem:[#allocation35 + $0x420] ss:$40 sps:$4 sm:$0xff]   ;;  %v21689_v15 = vld [vmem:[#allocation35 + $0x3d4] ss:$40 sps:$4 sm:$0xff]  }
0x117c   :  { %15042 = vmatprep.subr.bf16.mxu0 %v21611_v55  ;;  %v22414_v55 = vld [vmem:[#allocation2 + $0x4] ss:$44 sps:$4 sm:$0xff]  }
0x117e   :  { %15238 = vmatpush1.bf16.msra.mxu1 %v21606_v28  ;;  %v21684_v28 = vld [vmem:[#allocation35 + $0x1f8] ss:$40 sps:$4 sm:$0xff]  }
0x117f   :  { %15239 = vmatprep.subr.bf16.mxu1 %v21614_v22  ;;  %15043 = vmatpush2.bf16.msra.mxu0 %v21609_v38  ;;  %v21692_v22 = vld [vmem:[#allocation35 + $0x1ac] ss:$40 sps:$4 sm:$0xff]   ;;  %v21687_v38 = vld [vmem:[#allocation35 + $0x3d0] ss:$40 sps:$4 sm:$0xff]  }
0x1180   :  { %15044 = vmatprep.subr.bf16.mxu0 %v21617_v39  ;;  %v21695_v39 = vld [vmem:[#allocation35 + $0x384] ss:$40 sps:$4 sm:$0xff]  }
0x1182   :  { %15240 = vmatpush1.bf16.msra.mxu1 %v21612_v44  ;;  %v21690_v44 = vld [vmem:[#allocation35 + $0x1a8] ss:$40 sps:$4 sm:$0xff]  }
0x1183   :  { %15241 = vmatprep.subr.bf16.mxu1 %v21620_v27  ;;  %15045 = vmatpush2.bf16.msra.mxu0 %v21615_v29  ;;  %v21698_v27 = vld [vmem:[#allocation35 + $0x15c] ss:$40 sps:$4 sm:$0xff]   ;;  %v21693_v29 = vld [vmem:[#allocation35 + $0x380] ss:$40 sps:$4 sm:$0xff]  }
0x1184   :  { %15100 = vmatprep.subr.bf16.mxu0 %v21623_v2  ;;  %v21701_v2 = vld [vmem:[#allocation35 + $0x334] ss:$40 sps:$4 sm:$0xff]  }
0x1186   :  { %15242 = vmatpush1.bf16.msra.mxu1 %v21618_v56  ;;  %15047 = vmatmul.mubr.bf16.vlgmr.msra.gmra.mxu0 %v23732_v3  ;;  %v21696_v56 = vld [vmem:[#allocation35 + $0x158] ss:$40 sps:$4 sm:$0xff]  }
0x1187   :  { %15243 = vmatprep.subr.bf16.mxu1 %v21626_v54  ;;  %15101 = vmatpush1.bf16.msra.mxu0 %v21621_v31  ;;  %v21704_v54 = vld [vmem:[#allocation35 + $0x10c] ss:$40 sps:$4 sm:$0xff]   ;;  %v21699_v31 = vld [vmem:[#allocation35 + $0x330] ss:$40 sps:$4 sm:$0xff]  }
0x1188   :  { %15132 = vmatprep.mubr.bf16.mxu0 %v23672_v62  ;;  %15102 = vmatprep.subr.bf16.mxu0 %v21629_v43  ;;  %v21642_v62 = vld [vmem:[#allocation35 + $0x1320] ss:$40 sps:$4 sm:$0xff]   ;;  %v21707_v43 = vld [vmem:[#allocation35 + $0x2e4] ss:$40 sps:$4 sm:$0xff]  }
0x118a   :  { %15244 = vmatpush1.bf16.msra.mxu1 %v21624_v32  ;;  %v21702_v32 = vld [vmem:[#allocation35 + $0x108] ss:$40 sps:$4 sm:$0xff]  }
0x118b   :  { %15245 = vmatprep.subr.bf16.mxu1 %v21632_v9  ;;  %15103 = vmatpush1.bf16.msra.mxu0 %v21627_v63  ;;  %v21705_v9 = vld [vmem:[#allocation35 + $0x2e0] ss:$40 sps:$4 sm:$0xff]   ;;  %v21713_v63 = vld [vmem:[#allocation35 + $0x294] ss:$40 sps:$4 sm:$0xff]  }
0x118c   :  { %15104 = vmatprep.subr.bf16.mxu0 %v21635_v33  ;;  %v21708_v33 = vld [vmem:[#allocation35 + $0xb8] ss:$40 sps:$4 sm:$0xff]  }
0x118e   :  { %15246 = vmatpush2.bf16.msra.mxu1 %v21630_v45  ;;  %v21716_v45 = vld [vmem:[#allocation35 + $0x6c] ss:$40 sps:$4 sm:$0xff]  }
0x118f   :  { %15247 = vmatprep.subr.bf16.mxu1 %v21638_v10  ;;  %15105 = vmatpush1.bf16.msra.mxu0 %v21633_v18  ;;  %v21711_v10 = vld [vmem:[#allocation35 + $0x290] ss:$40 sps:$4 sm:$0xff]   ;;  %v21719_v18 = vld [vmem:[#allocation35 + $0xc44] ss:$40 sps:$4 sm:$0xff]  }
0x1190   :  { %15106 = vmatprep.subr.bf16.mxu0 %v21641_v7  ;;  %v21714_v7 = vld [vmem:[#allocation35 + $0x68] ss:$40 sps:$4 sm:$0xff]  }
0x1192   :  { %15248 = vmatpush2.bf16.msra.mxu1 %v21636_v21  ;;  %v21722_v21 = vld [vmem:[#allocation35 + $0x1c] ss:$40 sps:$4 sm:$0xff]  }
0x1193   :  { %15249 = vmatprep.subr.bf16.mxu1 %v21644_v47  ;;  %15107 = vmatpush1.bf16.msra.mxu0 %v21639_v42  ;;  %v21717_v47 = vld [vmem:[#allocation35 + $0xc40] ss:$40 sps:$4 sm:$0xff]   ;;  %v21725_v42 = vld [vmem:[#allocation35 + $0xbf4] ss:$40 sps:$4 sm:$0xff]  }
0x1194   :  { %15108 = vmatprep.subr.bf16.mxu0 %v21647_v50  ;;  %v21720_v50 = vld [vmem:[#allocation35 + $0x18] ss:$40 sps:$4 sm:$0xff]  }
0x1196   :  { %15250 = vmatpush2.bf16.msra.mxu1 %v21642_v62  ;;  %v23737_v62 = vld [vmem:[#allocation2] ss:$44 sps:$4 sm:$0xff]  }
0x1197   :  { %15251 = vmatprep.subr.bf16.mxu1 %v21650_v57  ;;  %15109 = vmatpush1.bf16.msra.mxu0 %v21645_v6  ;;  %v21728_v57 = vld [vmem:[#allocation35 + $0x4cc] ss:$40 sps:$4 sm:$0xff]  }
0x1198   :  { %15110 = vmatprep.subr.bf16.mxu0 %v21653_v60  ;;  %v23740_v6 = vld [vmem:[#allocation2 + $0x14] ss:$44 sps:$4 sm:$0xff]   ;;  %v21723_v60 = vld [vmem:[#allocation35 + $0xbf0] ss:$40 sps:$4 sm:$0xff]  }
0x119a   :  { %15252 = vmatpush2.bf16.msra.mxu1 %v21648_v41  ;;  %v21731_v41 = vld [vmem:[#allocation35 + $0xba4] ss:$40 sps:$4 sm:$0xff]  }
0x119b   :  { %15253 = vmatprep.subr.bf16.mxu1 %v21656_v8  ;;  %15111 = vmatpush1.bf16.msra.mxu0 %v21651_v40  ;;  %v21726_v8 = vld [vmem:[#allocation35 + $0x4c8] ss:$40 sps:$4 sm:$0xff]   ;;  %v21734_v40 = vld [vmem:[#allocation35 + $0x47c] ss:$40 sps:$4 sm:$0xff]  }
0x119c   :  { %15112 = vmatprep.subr.bf16.mxu0 %v21659_v58  ;;  %v21729_v58 = vld [vmem:[#allocation35 + $0xba0] ss:$40 sps:$4 sm:$0xff]  }
0x119e   :  { %15254 = vmatpush2.bf16.msra.mxu1 %v21654_v24  ;;  %v21737_v24 = vld [vmem:[#allocation35 + $0xb54] ss:$40 sps:$4 sm:$0xff]  }
0x119f   :  { %15255 = vmatprep.subr.bf16.mxu1 %v21662_v17  ;;  %15113 = vmatpush1.bf16.msra.mxu0 %v21657_v49  ;;  %v21732_v17 = vld [vmem:[#allocation35 + $0x478] ss:$40 sps:$4 sm:$0xff]   ;;  %v21740_v49 = vld [vmem:[#allocation35 + $0x42c] ss:$40 sps:$4 sm:$0xff]  }
0x11a0   :  { %15114 = vmatprep.subr.bf16.mxu0 %v21665_v37  ;;  %v21735_v37 = vld [vmem:[#allocation35 + $0xb50] ss:$40 sps:$4 sm:$0xff]  }
0x11a2   :  { %15256 = vmatpush2.bf16.msra.mxu1 %v21660_v13  ;;  %v21743_v13 = vld [vmem:[#allocation35 + $0xb04] ss:$40 sps:$4 sm:$0xff]  }
0x11a3   :  { %15257 = vmatprep.subr.bf16.mxu1 %v21668_v4  ;;  %15115 = vmatpush1.bf16.msra.mxu0 %v21663_v59  ;;  %v21738_v4 = vld [vmem:[#allocation35 + $0x428] ss:$40 sps:$4 sm:$0xff]   ;;  %v21746_v59 = vld [vmem:[#allocation35 + $0x3dc] ss:$40 sps:$4 sm:$0xff]  }
0x11a4   :  { %15116 = vmatprep.subr.bf16.mxu0 %v21671_v14  ;;  %v21741_v14 = vld [vmem:[#allocation35 + $0xb00] ss:$40 sps:$4 sm:$0xff]  }
0x11a6   :  { %15258 = vmatpush2.bf16.msra.mxu1 %v21666_v46  ;;  %v21749_v46 = vld [vmem:[#allocation35 + $0xab4] ss:$40 sps:$4 sm:$0xff]  }
0x11a7   :  { %15259 = vmatprep.subr.bf16.mxu1 %v21674_v20  ;;  %15117 = vmatpush2.bf16.msra.mxu0 %v21669_v48  ;;  %v21744_v20 = vld [vmem:[#allocation35 + $0x3d8] ss:$40 sps:$4 sm:$0xff]   ;;  %v21752_v48 = vld [vmem:[#allocation35 + $0x38c] ss:$40 sps:$4 sm:$0xff]  }
0x11a8   :  { %15118 = vmatprep.subr.bf16.mxu0 %v21677_v16  ;;  %v21747_v16 = vld [vmem:[#allocation35 + $0xab0] ss:$40 sps:$4 sm:$0xff]  }
0x11aa   :  { %15260 = vmatpush2.bf16.msra.mxu1 %v21672_v19  ;;  %v21755_v19 = vld [vmem:[#allocation35 + $0xa64] ss:$40 sps:$4 sm:$0xff]  }
0x11ab   :  { %15315 = vmatprep.subr.bf16.mxu1 %v21680_v36  ;;  %15119 = vmatpush2.bf16.msra.mxu0 %v21675_v11  ;;  %v21750_v36 = vld [vmem:[#allocation35 + $0x388] ss:$40 sps:$4 sm:$0xff]   ;;  %v23743_v11 = vpop.f32.mrf.mxu1 }
0x11ac   :  { %15120 = vmatprep.subr.bf16.mxu0 %v21683_v12  ;;  %v21758_v12 = vld [vmem:[#allocation35 + $0x33c] ss:$40 sps:$4 sm:$0xff]  }
0x11ad   :  { %15262 = vmatmul.mubr.bf16.vlgmr.msra.gmra.mxu1 %v23732_v3  ;;  %v21710_v3 = vld [vmem:[#allocation35 + $0xbc] ss:$40 sps:$4 sm:$0xff]  }
0x11ae   :  { %15316 = vmatpush1.bf16.msra.mxu1 %v21678_v30  ;;  %15347 = vmatprep.mubr.bf16.mxu1 %v22414_v55  ;;  %v21753_v30 = vld [vmem:[#allocation35 + $0xa60] ss:$40 sps:$4 sm:$0xff]   ;;  %v23747_v55 = vpop.f32.mrf.mxu1 }
0x11af   :  { %15317 = vmatprep.subr.bf16.mxu1 %v21686_v5  ;;  %15121 = vmatpush2.bf16.msra.mxu0 %v21681_v51  ;;  %v23745_v5 = vpop.f32.mrf.mxu0  ;;  %v21761_v51 = vld [vmem:[#allocation35 + $0xa14] ss:$40 sps:$4 sm:$0xff]  }
0x11b0   :  { %15122 = vmatprep.subr.bf16.mxu0 %v21689_v15  ;;  %v21756_v15 = vld [vmem:[#allocation35 + $0x338] ss:$40 sps:$4 sm:$0xff]  }
0x11b2   :  { %15318 = vmatpush1.bf16.msra.mxu1 %v21684_v28  ;;  %v21764_v28 = vld [vmem:[#allocation35 + $0x2ec] ss:$40 sps:$4 sm:$0xff]  }
0x11b3   :  { %15319 = vmatprep.subr.bf16.mxu1 %v21692_v22  ;;  %15123 = vmatpush2.bf16.msra.mxu0 %v21687_v38  ;;  %v21759_v22 = vld [vmem:[#allocation35 + $0xa10] ss:$40 sps:$4 sm:$0xff]   ;;  %v23749_v38 = vpop.f32.mrf.mxu0 }
0x11b4   :  { %15124 = vmatprep.subr.bf16.mxu0 %v21695_v39  ;;  %v21767_v39 = vld [vmem:[#allocation35 + $0xec4] ss:$40 sps:$4 sm:$0xff]  }
0x11b6   :  { %15320 = vmatpush1.bf16.msra.mxu1 %v21690_v44  ;;  %v21762_v44 = vld [vmem:[#allocation35 + $0x2e8] ss:$40 sps:$4 sm:$0xff]  }
0x11b7   :  { %15321 = vmatprep.subr.bf16.mxu1 %v21698_v27  ;;  %15125 = vmatpush2.bf16.msra.mxu0 %v21693_v29  ;;  %v23751_v27 = vpop.f32.mrf.mxu1  ;;  %v21770_v29 = vld [vmem:[#allocation35 + $0x29c] ss:$40 sps:$4 sm:$0xff]  }
0x11b8   :  { %15126 = vmatprep.subr.bf16.mxu0 %v21701_v2  ;;  %v21765_v2 = vld [vmem:[#allocation35 + $0xec0] ss:$40 sps:$4 sm:$0xff]  }
0x11ba   :  { %15322 = vmatpush1.bf16.msra.mxu1 %v21696_v56  ;;  %v23753_v56 = vpop.f32.mrf.mxu0 }
0x11bb   :  { %15323 = vmatprep.subr.bf16.mxu1 %v21704_v54  ;;  %15127 = vmatpush2.bf16.msra.mxu0 %v21699_v31  ;;  %v21773_v54 = vld [vmem:[#allocation35 + $0xe74] ss:$40 sps:$4 sm:$0xff]   ;;  %v21768_v31 = vld [vmem:[#allocation35 + $0x298] ss:$40 sps:$4 sm:$0xff]  }
0x11bc   :  { %15128 = vmatprep.subr.bf16.mxu0 %v21707_v43  ;;  %v23755_v43 = vpop.f32.mrf.mxu1 }
0x11be   :  { %15324 = vmatpush1.bf16.msra.mxu1 %v21702_v32  ;;  %v21776_v32 = vld [vmem:[#allocation35 + $0xc4c] ss:$40 sps:$4 sm:$0xff]  }
0x11bf   :  { %15325 = vmatprep.subr.bf16.mxu1 %v21710_v3  ;;  %15129 = vmatpush2.bf16.msra.mxu0 %v21705_v9  ;;  %v21771_v3 = vld [vmem:[#allocation35 + $0xe70] ss:$40 sps:$4 sm:$0xff]   ;;  %v23757_v9 = vpop.f32.mrf.mxu0 }
0x11c0   :  { %15130 = vmatprep.subr.bf16.mxu0 %v21713_v63  ;;  %v23759_v63 = vpop.f32.mrf.mxu1 }
0x11c2   :  { %15326 = vmatpush1.bf16.msra.mxu1 %v21708_v33  ;;  %v21779_v33 = vld [vmem:[#allocation35 + $0xe24] ss:$40 sps:$4 sm:$0xff]  }
0x11c3   :  { %15327 = vmatprep.subr.bf16.mxu1 %v21716_v45  ;;  %15131 = vmatpush2.bf16.msra.mxu0 %v21711_v10  ;;  %v21774_v45 = vld [vmem:[#allocation35 + $0xc48] ss:$40 sps:$4 sm:$0xff]   ;;  %v23761_v10 = vpop.f32.mrf.mxu0 }
0x11c4   :  { %15186 = vmatprep.subr.bf16.mxu0 %v21719_v18  ;;  %v21782_v18 = vld [vmem:[#allocation35 + $0xbfc] ss:$40 sps:$4 sm:$0xff]  }
0x11c6   :  { %15328 = vmatpush1.bf16.msra.mxu1 %v21714_v7  ;;  %15133 = vmatmul.mubr.bf16.vlgmr.msra.gmra.mxu0 %v23737_v62  ;;  %v21777_v7 = vld [vmem:[#allocation35 + $0xe20] ss:$40 sps:$4 sm:$0xff]  }
0x11c7   :  { %15329 = vmatprep.subr.bf16.mxu1 %v21722_v21  ;;  %15187 = vmatpush1.bf16.msra.mxu0 %v21717_v47  ;;  %v23763_v21 = vpop.f32.mrf.mxu1  ;;  %v21785_v47 = vld [vmem:[#allocation35 + $0xdd4] ss:$40 sps:$4 sm:$0xff]  }
0x11c8   :  { %15218 = vmatprep.mubr.bf16.mxu0 %v23740_v6  ;;  %15188 = vmatprep.subr.bf16.mxu0 %v21725_v42  ;;  %v21780_v42 = vld [vmem:[#allocation35 + $0xbf8] ss:$40 sps:$4 sm:$0xff]  }
0x11ca   :  { %15330 = vmatpush1.bf16.msra.mxu1 %v21720_v50  ;;  %v23767_v50 = vpop.f32.mrf.mxu0 }
0x11cb   :  { %15331 = vmatprep.subr.bf16.mxu1 %v21728_v57  ;;  %15189 = vmatpush1.bf16.msra.mxu0 %v21723_v60  ;;  %v21788_v57 = vld [vmem:[#allocation35 + $0xbac] ss:$40 sps:$4 sm:$0xff]   ;;  %v21783_v60 = vld [vmem:[#allocation35 + $0xdd0] ss:$40 sps:$4 sm:$0xff]  }
0x11cc   :  { %15190 = vmatprep.subr.bf16.mxu0 %v21731_v41  ;;  %v23769_v41 = vpop.f32.mrf.mxu1 }
0x11ce   :  { %15332 = vmatpush2.bf16.msra.mxu1 %v21726_v8  ;;  %v21791_v8 = vld [vmem:[#allocation35 + $0xd84] ss:$40 sps:$4 sm:$0xff]  }
0x11cf   :  { %15333 = vmatprep.subr.bf16.mxu1 %v21734_v40  ;;  %15191 = vmatpush1.bf16.msra.mxu0 %v21729_v58  ;;  %v21786_v40 = vld [vmem:[#allocation35 + $0xba8] ss:$40 sps:$4 sm:$0xff]   ;;  %v23771_v58 = vpop.f32.mrf.mxu0 }
0x11d0   :  { %15192 = vmatprep.subr.bf16.mxu0 %v21737_v24  ;;  %v21789_v24 = vld [vmem:[#allocation35 + $0xd80] ss:$40 sps:$4 sm:$0xff]  }
0x11d2   :  { %15334 = vmatpush2.bf16.msra.mxu1 %v21732_v17  ;;  %v21797_v17 = vld [vmem:[#allocation35 + $0xd34] ss:$40 sps:$4 sm:$0xff]  }
0x11d3   :  { %15335 = vmatprep.subr.bf16.mxu1 %v21740_v49  ;;  %15193 = vmatpush1.bf16.msra.mxu0 %v21735_v37  ;;  %v21792_v49 = vld [vmem:[#allocation35 + $0xb58] ss:$40 sps:$4 sm:$0xff]   ;;  %v23775_v37 = vpop.f32.mrf.mxu0 }
0x11d4   :  { %15194 = vmatprep.subr.bf16.mxu0 %v21743_v13 }
0x11d6   :  { %15336 = vmatpush2.bf16.msra.mxu1 %v21738_v4  ;;  %v21800_v4 = vld [vmem:[#allocation35 + $0xb0c] ss:$40 sps:$4 sm:$0xff]  }
0x11d7   :  { %15337 = vmatprep.subr.bf16.mxu1 %v21746_v59  ;;  %15195 = vmatpush1.bf16.msra.mxu0 %v21741_v14  ;;  %v21795_v59 = vld [vmem:[#allocation35 + $0xd30] ss:$40 sps:$4 sm:$0xff]   ;;  %v23777_v14 = vpop.f32.mrf.mxu0 }
0x11d8   :  { %15196 = vmatprep.subr.bf16.mxu0 %v21749_v46  ;;  %v21803_v46 = vld [vmem:[#allocation35 + $0xce4] ss:$40 sps:$4 sm:$0xff]  }
0x11da   :  { %15338 = vmatpush2.bf16.msra.mxu1 %v21744_v20  ;;  %v21798_v20 = vld [vmem:[#allocation35 + $0xb08] ss:$40 sps:$4 sm:$0xff]  }
0x11db   :  { %15339 = vmatprep.subr.bf16.mxu1 %v21752_v48  ;;  %15197 = vmatpush1.bf16.msra.mxu0 %v21747_v16  ;;  %v21806_v16 = vld [vmem:[#allocation35 + $0xabc] ss:$40 sps:$4 sm:$0xff]  }
0x11dc   :  { %15198 = vmatprep.subr.bf16.mxu0 %v21755_v19  ;;  %v21801_v19 = vld [vmem:[#allocation35 + $0xce0] ss:$40 sps:$4 sm:$0xff]  }
0x11de   :  { %15340 = vmatpush2.bf16.msra.mxu1 %v21750_v36  ;;  %v23781_v36 = vpop.f32.mrf.mxu0 }
0x11df   :  { %15341 = vmatprep.subr.bf16.mxu1 %v21758_v12  ;;  %15199 = vmatpush1.bf16.msra.mxu0 %v21753_v30  ;;  %v21809_v12 = vld [vmem:[#allocation35 + $0xc94] ss:$40 sps:$4 sm:$0xff]   ;;  %v21804_v30 = vld [vmem:[#allocation35 + $0xab8] ss:$40 sps:$4 sm:$0xff]  }
0x11e0   :  { %15200 = vmatprep.subr.bf16.mxu0 %v21761_v51 }
0x11e2   :  { %15342 = vmatpush2.bf16.msra.mxu1 %v21756_v15  ;;  %v21812_v15 = vld [vmem:[#allocation35 + $0xa6c] ss:$40 sps:$4 sm:$0xff]  }
0x11e3   :  { %15343 = vmatprep.subr.bf16.mxu1 %v21764_v28  ;;  %15201 = vmatpush1.bf16.msra.mxu0 %v21759_v22  ;;  %v21807_v28 = vld [vmem:[#allocation35 + $0xc90] ss:$40 sps:$4 sm:$0xff]   ;;  %v23783_v22 = vld [vmem:[#allocation37] sm:$0xff] }
0x11e4   :  { %15202 = vmatprep.subr.bf16.mxu0 %v21767_v39  ;;  %v23785_v39 = vpop.f32.mrf.mxu0 }
0x11e6   :  { %15344 = vmatpush2.bf16.msra.mxu1 %v21762_v44  ;;  %v21815_v44 = vld [vmem:[#allocation35 + $0x1644] ss:$40 sps:$4 sm:$0xff]  }
0x11e7   :  { %15345 = vmatprep.subr.bf16.mxu1 %v21770_v29  ;;  %15203 = vmatpush2.bf16.msra.mxu0 %v21765_v2  ;;  %v10985_v29 = vrot.slane %v23783_v22, %v3389_v61  ;;  %v21810_v2 = vld [vmem:[#allocation35 + $0xa68] ss:$40 sps:$4 sm:$0xff]   ;;  %v21824_v61 = vld [vmem:[#allocation35 + $0xecc] ss:$40 sps:$4 sm:$0xff]  }
0x11e8   :  { %15204 = vmatprep.subr.bf16.mxu0 %v21773_v54 }
0x11ea   :  { %15346 = vmatpush2.bf16.msra.mxu1 %v21768_v31  ;;  %v21818_v31 = vld [vmem:[#allocation35 + $0xa1c] ss:$40 sps:$4 sm:$0xff]  }
0x11eb   :  { %15401 = vmatprep.subr.bf16.mxu1 %v21776_v32  ;;  %15205 = vmatpush2.bf16.msra.mxu0 %v21771_v3  ;;  %v21813_v32 = vld [vmem:[#allocation35 + $0x1640] ss:$40 sps:$4 sm:$0xff]  }
0x11ec   :  { %15206 = vmatprep.subr.bf16.mxu0 %v21779_v33  ;;  %v23792_v33 = vpop.f32.mrf.mxu0 }
0x11ed   :  { %15348 = vmatmul.mubr.bf16.vlgmr.msra.gmra.mxu1 %v23737_v62  ;;  %v21794_v62 = vld [vmem:[#allocation35 + $0xb5c] ss:$40 sps:$4 sm:$0xff]  }
0x11ee   :  { %15402 = vmatpush1.bf16.msra.mxu1 %v21774_v45  ;;  %15433 = vmatprep.mubr.bf16.mxu1 %v23740_v6  ;;  %v23773_v6 = vpop.f32.mrf.mxu1  ;;  %v21821_v45 = vld [vmem:[#allocation35 + $0x15f4] ss:$40 sps:$4 sm:$0xff]  }
0x11ef   :  { %15403 = vmatprep.subr.bf16.mxu1 %v21782_v18  ;;  %15207 = vmatpush2.bf16.msra.mxu0 %v21777_v7  ;;  %v21816_v7 = vld [vmem:[#allocation35 + $0xa18] ss:$40 sps:$4 sm:$0xff]  }
0x11f0   :  { %15208 = vmatprep.subr.bf16.mxu0 %v21785_v47  ;;  %v14919_v13 = vpop.f32.mrf.mxu1 }
0x11f1   :  { %v14920_v18 = vadd.f32 %v14919_v13, %v10985_v29 }
0x11f2   :  { %15404 = vmatpush1.bf16.msra.mxu1 %v21780_v42  ;;  %v23779_v48 = vpop.f32.mrf.mxu1  ;;  %v23794_v42 = vld [vmem:[#allocation2 + $0x10] ss:$44 sps:$4 sm:$0xff]  }
0x11f3   :  { %15405 = vmatprep.subr.bf16.mxu1 %v21788_v57  ;;  %15209 = vmatpush2.bf16.msra.mxu0 %v21783_v60  ;;  %v21819_v60 = vld [vmem:[#allocation35 + $0x15f0] ss:$40 sps:$4 sm:$0xff]  }
0x11f4   :  { %15210 = vmatprep.subr.bf16.mxu0 %v21791_v8  ;;  %v14923_v51 = vpop.f32.mrf.mxu1 }
0x11f6   :  { %15406 = vmatpush1.bf16.msra.mxu1 %v21786_v40  ;;  %v23790_v54 = vpop.f32.mrf.mxu1 }
0x11f7   :  { %15407 = vmatprep.subr.bf16.mxu1 %v21794_v62  ;;  %15211 = vmatpush2.bf16.msra.mxu0 %v21789_v24  ;;  %v21827_v62 = vld [vmem:[#allocation35 + $0x15a4] ss:$40 sps:$4 sm:$0xff]   ;;  %v14924_v24 = vadd.f32 %v14923_v51, %v10985_v29  ;;  %v21831_v51 = vld [vmem:[#allocation35 + $0x1550] ss:$40 sps:$4 sm:$0xff]   ;;  %v21837_v29 = vld [vmem:[#allocation35 + $0x1500] ss:$40 sps:$4 sm:$0xff]  }
0x11f8   :  { %15212 = vmatprep.subr.bf16.mxu0 %v21797_v17  ;;  %v15005_v3 = vpop.f32.mrf.mxu1  ;;  %v21822_v17 = vld [vmem:[#allocation35 + $0xec8] ss:$40 sps:$4 sm:$0xff]  }
0x11fa   :  { %15408 = vmatpush1.bf16.msra.mxu1 %v21792_v49  ;;  %v23798_v8 = vpop.f32.mrf.mxu1 }
0x11fb   :  { %15409 = vmatprep.subr.bf16.mxu1 %v21800_v4  ;;  %15213 = vmatpush2.bf16.msra.mxu0 %v21795_v59  ;;  %v21830_v4 = vld [vmem:[#allocation35 + $0xe7c] ss:$40 sps:$4 sm:$0xff]  }
0x11fc   :  { %15214 = vmatprep.subr.bf16.mxu0 %v21803_v46  ;;  %v21825_v46 = vld [vmem:[#allocation35 + $0x15a0] ss:$40 sps:$4 sm:$0xff]  }
0x11fe   :  { %15410 = vmatpush1.bf16.msra.mxu1 %v21798_v20  ;;  %v15009_v20 = vpop.f32.mrf.mxu1 }
0x11ff   :  { %15411 = vmatprep.subr.bf16.mxu1 %v21806_v16  ;;  %15215 = vmatpush2.bf16.msra.mxu0 %v21801_v19  ;;  %v21833_v16 = vld [vmem:[#allocation35 + $0x1554] ss:$40 sps:$4 sm:$0xff]   ;;  %v21828_v19 = vld [vmem:[#allocation35 + $0xe78] ss:$40 sps:$4 sm:$0xff]  }
0x1200   :  { %15216 = vmatprep.subr.bf16.mxu0 %v21809_v12 }
0x1202   :  { %15412 = vmatpush1.bf16.msra.mxu1 %v21804_v30  ;;  %v21836_v30 = vld [vmem:[#allocation35 + $0xe2c] ss:$40 sps:$4 sm:$0xff]  }
0x1203   :  { %15413 = vmatprep.subr.bf16.mxu1 %v21812_v15  ;;  %15217 = vmatpush2.bf16.msra.mxu0 %v21807_v28  ;;  %v21839_v15 = vld [vmem:[#allocation35 + $0x1504] ss:$40 sps:$4 sm:$0xff]   ;;  %v21834_v28 = vld [vmem:[#allocation35 + $0xe28] ss:$40 sps:$4 sm:$0xff]  }
0x1204   :  { %15272 = vmatprep.subr.bf16.mxu0 %v21815_v44  ;;  %v21842_v44 = vld [vmem:[#allocation35 + $0xddc] ss:$40 sps:$4 sm:$0xff]  }
0x1206   :  { %15414 = vmatpush1.bf16.msra.mxu1 %v21810_v2  ;;  %v14962_v47 = vpop.f32.mrf.mxu0  ;;  %15219 = vmatmul.mubr.bf16.vlgmr.msra.gmra.mxu0 %v23794_v42  ;;  %v21845_v2 = vld [vmem:[#allocation35 + $0x14b4] ss:$40 sps:$4 sm:$0xff]  }
0x1207   :  { %15415 = vmatprep.subr.bf16.mxu1 %v21818_v31  ;;  %v14963_v57 = vadd.f32 %v14962_v47, %v14920_v18  ;;  %15273 = vmatpush1.bf16.msra.mxu0 %v21813_v32  ;;  %v21840_v31 = vld [vmem:[#allocation35 + $0xdd8] ss:$40 sps:$4 sm:$0xff]   ;;  %v21848_v32 = vld [vmem:[#allocation35 + $0xd8c] ss:$40 sps:$4 sm:$0xff]   ;;  %v21846_v18 = vld [vmem:[#allocation35 + $0xd88] ss:$40 sps:$4 sm:$0xff]  }
0x1208   :  { %15304 = vmatprep.mubr.bf16.mxu0 %v22988_v0  ;;  %v23800_v40 = vpop.f32.mrf.mxu0  ;;  %15274 = vmatprep.subr.bf16.mxu0 %v21821_v45  ;;  %v21851_v45 = vld [vmem:[#allocation35 + $0x1464] ss:$40 sps:$4 sm:$0xff]   ;;  %v21849_v47 = vld [vmem:[#allocation35 + $0x1460] ss:$40 sps:$4 sm:$0xff]  }
0x1209   :  { %v23802_v49 = vadd.f32 %v15005_v3, %v14963_v57  ;;  %v21843_v3 = vld [vmem:[#allocation35 + $0x14b0] ss:$40 sps:$4 sm:$0xff]  }
0x120a   :  { %15416 = vmatpush1.bf16.msra.mxu1 %v21816_v7  ;;  %v14966_v13 = vpop.f32.mrf.mxu0  ;;  %v21854_v7 = vld [vmem:[#allocation35 + $0xd3c] ss:$40 sps:$4 sm:$0xff]   ;;  %v21852_v57 = vld [vmem:[#allocation35 + $0xd38] ss:$40 sps:$4 sm:$0xff]  }
0x120b   :  { %15417 = vmatprep.subr.bf16.mxu1 %v21824_v61  ;;  %v14967_v59 = vadd.f32 %v14966_v13, %v14924_v24  ;;  %15275 = vmatpush1.bf16.msra.mxu0 %v21819_v60  ;;  %v21857_v61 = vld [vmem:[#allocation35 + $0x1414] ss:$40 sps:$4 sm:$0xff]  }
0x120c   :  { %15276 = vmatprep.subr.bf16.mxu0 %v21827_v62  ;;  %v21860_v60 = vld [vmem:[#allocation35 + $0xcec] ss:$40 sps:$4 sm:$0xff]   ;;  %v21855_v62 = vld [vmem:[#allocation35 + $0x1410] ss:$40 sps:$4 sm:$0xff]   ;;  %v21866_v13 = vld [vmem:[#allocation35 + $0xc9c] ss:$40 sps:$4 sm:$0xff]  }
0x120d   :  { %v23804_v12 = vadd.f32 %v15009_v20, %v14967_v59  ;;  %v21863_v24 = vld [vmem:[#allocation35 + $0x74c] ss:$40 sps:$4 sm:$0xff]   ;;  %v21869_v59 = vld [vmem:[#allocation35 + $0x6fc] ss:$40 sps:$4 sm:$0xff]  }
0x120e   :  { %15418 = vmatpush2.bf16.msra.mxu1 %v21822_v17  ;;  %v21858_v17 = vld [vmem:[#allocation35 + $0xce8] ss:$40 sps:$4 sm:$0xff]   ;;  %v23806_v20 = vld [vmem:[#allocation2 + $0x20] ss:$44 sps:$4 sm:$0xff]  }
0x120f   :  { %15419 = vmatprep.subr.bf16.mxu1 %v21830_v4  ;;  %15277 = vmatpush1.bf16.msra.mxu0 %v21825_v46  ;;  %v21861_v4 = vld [vmem:[#allocation35 + $0x748] ss:$40 sps:$4 sm:$0xff]   ;;  %v21864_v46 = vld [vmem:[#allocation35 + $0xc98] ss:$40 sps:$4 sm:$0xff]  }
0x1210   :  { %15278 = vmatprep.subr.bf16.mxu0 %v21833_v16  ;;  %v21872_v16 = vld [vmem:[#allocation35 + $0x164c] ss:$40 sps:$4 sm:$0xff]  }
0x1212   :  { %15420 = vmatpush2.bf16.msra.mxu1 %v21828_v19  ;;  %v23809_v19 = vld [vmem:[#allocation2 + $0xc] ss:$44 sps:$4 sm:$0xff]  }
0x1213   :  { %15421 = vmatprep.subr.bf16.mxu1 %v21836_v30  ;;  %15279 = vmatpush1.bf16.msra.mxu0 %v21831_v51  ;;  %v21867_v30 = vld [vmem:[#allocation35 + $0x6f8] ss:$40 sps:$4 sm:$0xff]   ;;  %v21875_v51 = vld [vmem:[#allocation35 + $0x6ac] ss:$40 sps:$4 sm:$0xff]  }
0x1214   :  { %15280 = vmatprep.subr.bf16.mxu0 %v21839_v15  ;;  %v21870_v15 = vld [vmem:[#allocation35 + $0x1648] ss:$40 sps:$4 sm:$0xff]  }
0x1216   :  { %15422 = vmatpush2.bf16.msra.mxu1 %v21834_v28  ;;  %v21878_v28 = vld [vmem:[#allocation35 + $0x15fc] ss:$40 sps:$4 sm:$0xff]  }
0x1217   :  { %15423 = vmatprep.subr.bf16.mxu1 %v21842_v44  ;;  %15281 = vmatpush1.bf16.msra.mxu0 %v21837_v29  ;;  %v21873_v44 = vld [vmem:[#allocation35 + $0x6a8] ss:$40 sps:$4 sm:$0xff]   ;;  %v21881_v29 = vld [vmem:[#allocation35 + $0x65c] ss:$40 sps:$4 sm:$0xff]  }
0x1218   :  { %15282 = vmatprep.subr.bf16.mxu0 %v21845_v2  ;;  %v21876_v2 = vld [vmem:[#allocation35 + $0x15f8] ss:$40 sps:$4 sm:$0xff]  }
0x121a   :  { %15424 = vmatpush2.bf16.msra.mxu1 %v21840_v31  ;;  %v21884_v31 = vld [vmem:[#allocation35 + $0x15ac] ss:$40 sps:$4 sm:$0xff]  }
0x121b   :  { %15425 = vmatprep.subr.bf16.mxu1 %v21848_v32  ;;  %15283 = vmatpush1.bf16.msra.mxu0 %v21843_v3  ;;  %v21879_v32 = vld [vmem:[#allocation35 + $0x658] ss:$40 sps:$4 sm:$0xff]   ;;  %v21887_v3 = vld [vmem:[#allocation35 + $0x60c] ss:$40 sps:$4 sm:$0xff]  }
0x121c   :  { %15284 = vmatprep.subr.bf16.mxu0 %v21851_v45  ;;  %v21882_v45 = vld [vmem:[#allocation35 + $0x15a8] ss:$40 sps:$4 sm:$0xff]  }
0x121e   :  { %15426 = vmatpush2.bf16.msra.mxu1 %v21846_v18  ;;  %v21890_v18 = vld [vmem:[#allocation35 + $0x155c] ss:$40 sps:$4 sm:$0xff]  }
0x121f   :  { %15427 = vmatprep.subr.bf16.mxu1 %v21854_v7  ;;  %15285 = vmatpush1.bf16.msra.mxu0 %v21849_v47  ;;  %v21885_v7 = vld [vmem:[#allocation35 + $0x608] ss:$40 sps:$4 sm:$0xff]   ;;  %v21888_v47 = vld [vmem:[#allocation35 + $0x1558] ss:$40 sps:$4 sm:$0xff]  }
0x1220   :  { %15286 = vmatprep.subr.bf16.mxu0 %v21857_v61  ;;  %v21896_v61 = vld [vmem:[#allocation35 + $0x150c] ss:$40 sps:$4 sm:$0xff]  }
0x1222   :  { %15428 = vmatpush2.bf16.msra.mxu1 %v21852_v57  ;;  %v21891_v57 = vld [vmem:[#allocation35 + $0x5b8] ss:$40 sps:$4 sm:$0xff]  }
0x1223   :  { %15429 = vmatprep.subr.bf16.mxu1 %v21860_v60  ;;  %15287 = vmatpush1.bf16.msra.mxu0 %v21855_v62  ;;  %v21899_v60 = vld [vmem:[#allocation35 + $0x56c] ss:$40 sps:$4 sm:$0xff]   ;;  %v21894_v62 = vld [vmem:[#allocation35 + $0x1508] ss:$40 sps:$4 sm:$0xff]  }
0x1224   :  { %15358 = vmatprep.subr.bf16.mxu0 %v21863_v24  ;;  %v21902_v24 = vld [vmem:[#allocation35 + $0x14bc] ss:$40 sps:$4 sm:$0xff]  }
0x1226   :  { %15430 = vmatpush2.bf16.msra.mxu1 %v21858_v17  ;;  %15305 = vmatmul.mubr.bf16.vlgmr.msra.gmra.mxu0 %v23806_v20  ;;  %v21897_v17 = vld [vmem:[#allocation35 + $0x568] ss:$40 sps:$4 sm:$0xff]  }
0x1227   :  { %15431 = vmatprep.subr.bf16.mxu1 %v21866_v13  ;;  %15359 = vmatpush1.bf16.msra.mxu0 %v21861_v4  ;;  %v21905_v13 = vld [vmem:[#allocation35 + $0x51c] ss:$40 sps:$4 sm:$0xff]   ;;  %v21900_v4 = vld [vmem:[#allocation35 + $0x14b8] ss:$40 sps:$4 sm:$0xff]  }
0x1228   :  { %15390 = vmatprep.mubr.bf16.mxu0 %v23809_v19  ;;  %15360 = vmatprep.subr.bf16.mxu0 %v21869_v59  ;;  %v21908_v59 = vld [vmem:[#allocation35 + $0x146c] ss:$40 sps:$4 sm:$0xff]  }
0x122a   :  { %15432 = vmatpush2.bf16.msra.mxu1 %v21864_v46  ;;  %v21903_v46 = vld [vmem:[#allocation35 + $0x518] ss:$40 sps:$4 sm:$0xff]  }
0x122b   :  { %15487 = vmatprep.subr.bf16.mxu1 %v21872_v16  ;;  %15361 = vmatpush1.bf16.msra.mxu0 %v21867_v30  ;;  %v21911_v16 = vld [vmem:[#allocation35 + $0x9cc] ss:$40 sps:$4 sm:$0xff]   ;;  %v21906_v30 = vld [vmem:[#allocation35 + $0x1468] ss:$40 sps:$4 sm:$0xff]  }
0x122c   :  { %15362 = vmatprep.subr.bf16.mxu0 %v21875_v51  ;;  %v23814_v51 = vpop.f32.mrf.mxu1 }
0x122d   :  { %15434 = vmatmul.mubr.bf16.vlgmr.msra.gmra.mxu1 %v23794_v42  ;;  %v21893_v42 = vld [vmem:[#allocation35 + $0x5bc] ss:$40 sps:$4 sm:$0xff]  }
0x122e   :  { %15488 = vmatpush1.bf16.msra.mxu1 %v21870_v15  ;;  %15519 = vmatprep.mubr.bf16.mxu1 %v22988_v0  ;;  %v21914_v15 = vld [vmem:[#allocation35 + $0x141c] ss:$40 sps:$4 sm:$0xff]  }
0x122f   :  { %15489 = vmatprep.subr.bf16.mxu1 %v21878_v28  ;;  %15363 = vmatpush1.bf16.msra.mxu0 %v21873_v44  ;;  %v21909_v28 = vld [vmem:[#allocation35 + $0x9c8] ss:$40 sps:$4 sm:$0xff]   ;;  %v15091_v44 = vpop.f32.mrf.mxu1 }
0x1230   :  { %15364 = vmatprep.subr.bf16.mxu0 %v21881_v29  ;;  %v23816_v29 = vpop.f32.mrf.mxu0 }
0x1232   :  { %15490 = vmatpush1.bf16.msra.mxu1 %v21876_v2  ;;  %v21917_v2 = vld [vmem:[#allocation35 + $0x97c] ss:$40 sps:$4 sm:$0xff]  }
0x1233   :  { %15491 = vmatprep.subr.bf16.mxu1 %v21884_v31  ;;  %15365 = vmatpush1.bf16.msra.mxu0 %v21879_v32  ;;  %v21912_v31 = vld [vmem:[#allocation35 + $0x1418] ss:$40 sps:$4 sm:$0xff]  }
0x1234   :  { %15366 = vmatprep.subr.bf16.mxu0 %v21887_v3  ;;  %v21920_v3 = vld [vmem:[#allocation35 + $0x754] ss:$40 sps:$4 sm:$0xff]  }
0x1236   :  { %15492 = vmatpush1.bf16.msra.mxu1 %v21882_v45 }
0x1237   :  { %15493 = vmatprep.subr.bf16.mxu1 %v21890_v18  ;;  %15367 = vmatpush1.bf16.msra.mxu0 %v21885_v7  ;;  %v21915_v18 = vld [vmem:[#allocation35 + $0x978] ss:$40 sps:$4 sm:$0xff]   ;;  %v23819_v7 = vpop.f32.mrf.mxu1 }
0x1238   :  { %15368 = vmatprep.subr.bf16.mxu0 %v21893_v42 }
0x123a   :  { %15494 = vmatpush1.bf16.msra.mxu1 %v21888_v47  ;;  %v21923_v47 = vld [vmem:[#allocation35 + $0x92c] ss:$40 sps:$4 sm:$0xff]  }
0x123b   :  { %15495 = vmatprep.subr.bf16.mxu1 %v21896_v61  ;;  %15369 = vmatpush1.bf16.msra.mxu0 %v21891_v57  ;;  %v21918_v61 = vld [vmem:[#allocation35 + $0x750] ss:$40 sps:$4 sm:$0xff]  }
0x123c   :  { %15370 = vmatprep.subr.bf16.mxu0 %v21899_v60  ;;  %v21926_v60 = vld [vmem:[#allocation35 + $0x704] ss:$40 sps:$4 sm:$0xff]  }
0x123e   :  { %15496 = vmatpush1.bf16.msra.mxu1 %v21894_v62 }
0x123f   :  { %15497 = vmatprep.subr.bf16.mxu1 %v21902_v24  ;;  %15371 = vmatpush1.bf16.msra.mxu0 %v21897_v17  ;;  %v21921_v24 = vld [vmem:[#allocation35 + $0x928] ss:$40 sps:$4 sm:$0xff]   ;;  %v15095_v17 = vpop.f32.mrf.mxu1 }
0x1240   :  { %15372 = vmatprep.subr.bf16.mxu0 %v21905_v13 }
0x1242   :  { %15498 = vmatpush1.bf16.msra.mxu1 %v21900_v4 }
0x1243   :  { %15499 = vmatprep.subr.bf16.mxu1 %v21908_v59  ;;  %15373 = vmatpush1.bf16.msra.mxu0 %v21903_v46  ;;  %v21924_v59 = vld [vmem:[#allocation35 + $0x700] ss:$40 sps:$4 sm:$0xff]   ;;  %v21932_v46 = vld [vmem:[#allocation35 + $0x6b4] ss:$40 sps:$4 sm:$0xff]  }
0x1244   :  { %15374 = vmatprep.subr.bf16.mxu0 %v21911_v16  ;;  %v21927_v16 = vld [vmem:[#allocation35 + $0x8d8] ss:$40 sps:$4 sm:$0xff]  }
0x1246   :  { %15500 = vmatpush1.bf16.msra.mxu1 %v21906_v30  ;;  %v15048_v32 = vpop.f32.mrf.mxu0  ;;  %v21935_v30 = vld [vmem:[#allocation35 + $0x88c] ss:$40 sps:$4 sm:$0xff]  }
0x1247   :  { %15501 = vmatprep.subr.bf16.mxu1 %v21914_v15  ;;  %v15049_v45 = vadd.f32 %v15048_v32, %v23802_v49  ;;  %15375 = vmatpush2.bf16.msra.mxu0 %v21909_v28  ;;  %v21929_v49 = vld [vmem:[#allocation35 + $0x8dc] ss:$40 sps:$4 sm:$0xff]   ;;  %v21933_v28 = vld [vmem:[#allocation35 + $0x888] ss:$40 sps:$4 sm:$0xff]   ;;  %v21947_v32 = vld [vmem:[#allocation35 + $0x7ec] ss:$40 sps:$4 sm:$0xff]  }
0x1248   :  { %v23821_v42 = vpop.f32.mrf.mxu0  ;;  %15376 = vmatprep.subr.bf16.mxu0 %v21917_v2  ;;  %v21938_v15 = vld [vmem:[#allocation35 + $0x664] ss:$40 sps:$4 sm:$0xff]   ;;  %v21944_v2 = vld [vmem:[#allocation35 + $0x614] ss:$40 sps:$4 sm:$0xff]  }
0x1249   :  { %v23825_v13 = vadd.f32 %v15091_v44, %v15049_v45  ;;  %v21941_v44 = vld [vmem:[#allocation35 + $0x83c] ss:$40 sps:$4 sm:$0xff]  }
0x124a   :  { %15502 = vmatpush1.bf16.msra.mxu1 %v21912_v31  ;;  %v15052_v57 = vpop.f32.mrf.mxu0  ;;  %v21939_v31 = vld [vmem:[#allocation35 + $0x838] ss:$40 sps:$4 sm:$0xff]   ;;  %v21950_v45 = vld [vmem:[#allocation35 + $0x5c4] ss:$40 sps:$4 sm:$0xff]  }
0x124b   :  { %15573 = vmatprep.subr.bf16.mxu1 %v21920_v3  ;;  %v15053_v62 = vadd.f32 %v15052_v57, %v23804_v12  ;;  %15377 = vmatpush2.bf16.msra.mxu0 %v21915_v18  ;;  %v21942_v3 = vld [vmem:[#allocation35 + $0x610] ss:$40 sps:$4 sm:$0xff]   ;;  %v21956_v57 = vld [vmem:[#allocation35 + $0x574] ss:$40 sps:$4 sm:$0xff]  }
0x124c   :  { %15378 = vmatprep.subr.bf16.mxu0 %v21923_v47  ;;  %v21945_v18 = vld [vmem:[#allocation35 + $0x7e8] ss:$40 sps:$4 sm:$0xff]   ;;  %v21953_v47 = vld [vmem:[#allocation35 + $0x79c] ss:$40 sps:$4 sm:$0xff]  }
0x124d   :  { %15520 = vmatmul.mubr.bf16.vlgmr.msra.gmra.mxu1 %v23806_v20  ;;  %v23827_v4 = vadd.f32 %v15095_v17, %v15053_v62  ;;  %v21930_v20 = vld [vmem:[#allocation35 + $0x6b0] ss:$40 sps:$4 sm:$0xff]   ;;  %v21959_v62 = vld [vmem:[#allocation35 + $0x114c] ss:$40 sps:$4 sm:$0xff]  }
0x124e   :  { %15574 = vmatpush1.bf16.msra.mxu1 %v21918_v61  ;;  %15605 = vmatprep.mubr.bf16.mxu1 %v23809_v19  ;;  %v21936_v19 = vld [vmem:[#allocation35 + $0x660] ss:$40 sps:$4 sm:$0xff]   ;;  %v21962_v17 = vld [vmem:[#allocation35 + $0x524] ss:$40 sps:$4 sm:$0xff]  }
0x124f   :  { %15575 = vmatprep.subr.bf16.mxu1 %v21926_v60  ;;  %v15747_v12 = vpack.c.bf16 %v23827_v4, %v23825_v13  ;;  %15379 = vmatpush2.bf16.msra.mxu0 %v21921_v24  ;;  %v21948_v61 = vld [vmem:[#allocation35 + $0x5c0] ss:$40 sps:$4 sm:$0xff]   ;;  %v21954_v24 = vld [vmem:[#allocation35 + $0x570] ss:$40 sps:$4 sm:$0xff]  }
0x1250   :  { %15380 = vmatprep.subr.bf16.mxu0 %v21929_v49  ;;  %v21951_v60 = vld [vmem:[#allocation35 + $0x798] ss:$40 sps:$4 sm:$0xff]   ;;  %v21957_v49 = vld [vmem:[#allocation35 + $0x1148] ss:$40 sps:$4 sm:$0xff]  }
0x1252   :  { %15576 = vmatpush1.bf16.msra.mxu1 %v21924_v59  ;;  %v21965_v59 = vld [vmem:[#allocation35 + $0x10fc] ss:$40 sps:$4 sm:$0xff]  }
0x1253   :  { %15577 = vmatprep.subr.bf16.mxu1 %v21932_v46  ;;  %15381 = vmatpush2.bf16.msra.mxu0 %v21927_v16  ;;  %v21960_v46 = vld [vmem:[#allocation35 + $0x520] ss:$40 sps:$4 sm:$0xff]  }
0x1254   :  { %15382 = vmatprep.subr.bf16.mxu0 %v21935_v30  ;;  %v23832_v16 = vld [vmem:[#allocation2 + $0x8] ss:$44 sps:$4 sm:$0xff]  }
0x1255   :  { %v21968_v30 = vld [vmem:[#allocation35 + $0x9d4] ss:$40 sps:$4 sm:$0xff]  }
0x1256   :  { %15578 = vmatpush1.bf16.msra.mxu1 %v21930_v20  ;;  %v23835_v20 = vld [vmem:[#allocation2 + $0x1c] ss:$44 sps:$4 sm:$0xff]  }
0x1257   :  { %15579 = vmatprep.subr.bf16.mxu1 %v21938_v15  ;;  %15383 = vmatpush2.bf16.msra.mxu0 %v21933_v28  ;;  %v21963_v15 = vld [vmem:[#allocation35 + $0x10f8] ss:$40 sps:$4 sm:$0xff]   ;;  %v21971_v28 = vld [vmem:[#allocation35 + $0x10ac] ss:$40 sps:$4 sm:$0xff]  }
0x1258   :  { %15384 = vmatprep.subr.bf16.mxu0 %v21941_v44  ;;  %v21966_v44 = vld [vmem:[#allocation35 + $0x9d0] ss:$40 sps:$4 sm:$0xff]  }
0x125a   :  { %15580 = vmatpush1.bf16.msra.mxu1 %v21936_v19  ;;  %v21974_v19 = vld [vmem:[#allocation35 + $0x984] ss:$40 sps:$4 sm:$0xff]  }
0x125b   :  { %15581 = vmatprep.subr.bf16.mxu1 %v21944_v2  ;;  %15385 = vmatpush2.bf16.msra.mxu0 %v21939_v31  ;;  %v21969_v2 = vld [vmem:[#allocation35 + $0x10a8] ss:$40 sps:$4 sm:$0xff]   ;;  %v21977_v31 = vld [vmem:[#allocation35 + $0x105c] ss:$40 sps:$4 sm:$0xff]  }
0x125c   :  { %15386 = vmatprep.subr.bf16.mxu0 %v21947_v32  ;;  %v21972_v32 = vld [vmem:[#allocation35 + $0x980] ss:$40 sps:$4 sm:$0xff]  }
0x125e   :  { %15582 = vmatpush1.bf16.msra.mxu1 %v21942_v3  ;;  %v21980_v3 = vld [vmem:[#allocation35 + $0x934] ss:$40 sps:$4 sm:$0xff]  }
0x125f   :  { %15583 = vmatprep.subr.bf16.mxu1 %v21950_v45  ;;  %15387 = vmatpush2.bf16.msra.mxu0 %v21945_v18  ;;  %v21975_v45 = vld [vmem:[#allocation35 + $0x1058] ss:$40 sps:$4 sm:$0xff]   ;;  %v21983_v18 = vld [vmem:[#allocation35 + $0x100c] ss:$40 sps:$4 sm:$0xff]  }
0x1260   :  { %15388 = vmatprep.subr.bf16.mxu0 %v21953_v47  ;;  %v21978_v47 = vld [vmem:[#allocation35 + $0x930] ss:$40 sps:$4 sm:$0xff]  }
0x1262   :  { %15584 = vmatpush1.bf16.msra.mxu1 %v21948_v61  ;;  %v21986_v61 = vld [vmem:[#allocation35 + $0x8e4] ss:$40 sps:$4 sm:$0xff]  }
0x1263   :  { %15585 = vmatprep.subr.bf16.mxu1 %v21956_v57  ;;  %15389 = vmatpush2.bf16.msra.mxu0 %v21951_v60  ;;  %v21981_v57 = vld [vmem:[#allocation35 + $0x1008] ss:$40 sps:$4 sm:$0xff]   ;;  %v21989_v60 = vld [vmem:[#allocation35 + $0xfbc] ss:$40 sps:$4 sm:$0xff]  }
0x1264   :  { %15444 = vmatprep.subr.bf16.mxu0 %v21959_v62  ;;  %v21984_v62 = vld [vmem:[#allocation35 + $0x8e0] ss:$40 sps:$4 sm:$0xff]  }
0x1266   :  { %15586 = vmatpush1.bf16.msra.mxu1 %v21954_v24  ;;  %15391 = vmatmul.mubr.bf16.vlgmr.msra.gmra.mxu0 %v23832_v16  ;;  %v21992_v24 = vld [vmem:[#allocation35 + $0x894] ss:$40 sps:$4 sm:$0xff]  }
0x1267   :  { %15587 = vmatprep.subr.bf16.mxu1 %v21962_v17  ;;  %15445 = vmatpush1.bf16.msra.mxu0 %v21957_v49  ;;  %v21987_v17 = vld [vmem:[#allocation35 + $0xfb8] ss:$40 sps:$4 sm:$0xff]   ;;  %v21995_v49 = vld [vmem:[#allocation35 + $0xf6c] ss:$40 sps:$4 sm:$0xff]  }
0x1268   :  { %15476 = vmatprep.mubr.bf16.mxu0 %v23835_v20  ;;  %15446 = vmatprep.subr.bf16.mxu0 %v21965_v59  ;;  %v21990_v59 = vld [vmem:[#allocation35 + $0x890] ss:$40 sps:$4 sm:$0xff]  }
0x126a   :  { %15588 = vmatpush1.bf16.msra.mxu1 %v21960_v46  ;;  %v21998_v46 = vld [vmem:[#allocation35 + $0x844] ss:$40 sps:$4 sm:$0xff]  }
0x126b   :  { %15589 = vmatprep.subr.bf16.mxu1 %v21968_v30  ;;  %15447 = vmatpush1.bf16.msra.mxu0 %v21963_v15  ;;  %v21993_v30 = vld [vmem:[#allocation35 + $0xf68] ss:$40 sps:$4 sm:$0xff]   ;;  %v22001_v15 = vld [vmem:[#allocation35 + $0xf1c] ss:$40 sps:$4 sm:$0xff]  }
0x126c   :  { %15448 = vmatprep.subr.bf16.mxu0 %v21971_v28  ;;  %v21996_v28 = vld [vmem:[#allocation35 + $0x840] ss:$40 sps:$4 sm:$0xff]  }
0x126e   :  { %15590 = vmatpush2.bf16.msra.mxu1 %v21966_v44  ;;  %v22004_v44 = vld [vmem:[#allocation35 + $0x7f4] ss:$40 sps:$4 sm:$0xff]  }
0x126f   :  { %15591 = vmatprep.subr.bf16.mxu1 %v21974_v19  ;;  %15449 = vmatpush1.bf16.msra.mxu0 %v21969_v2  ;;  %v21999_v19 = vld [vmem:[#allocation35 + $0xf18] ss:$40 sps:$4 sm:$0xff]   ;;  %v22007_v2 = vld [vmem:[#allocation35 + $0x13cc] ss:$40 sps:$4 sm:$0xff]  }
0x1270   :  { %15450 = vmatprep.subr.bf16.mxu0 %v21977_v31  ;;  %v22002_v31 = vld [vmem:[#allocation35 + $0x7f0] ss:$40 sps:$4 sm:$0xff]  }
0x1272   :  { %15592 = vmatpush2.bf16.msra.mxu1 %v21972_v32  ;;  %v22010_v32 = vld [vmem:[#allocation35 + $0x7a4] ss:$40 sps:$4 sm:$0xff]  }
0x1273   :  { %15593 = vmatprep.subr.bf16.mxu1 %v21980_v3  ;;  %15451 = vmatpush1.bf16.msra.mxu0 %v21975_v45  ;;  %v22005_v3 = vld [vmem:[#allocation35 + $0x13c8] ss:$40 sps:$4 sm:$0xff]   ;;  %v22013_v45 = vld [vmem:[#allocation35 + $0x137c] ss:$40 sps:$4 sm:$0xff]  }
0x1274   :  { %15452 = vmatprep.subr.bf16.mxu0 %v21983_v18  ;;  %v22008_v18 = vld [vmem:[#allocation35 + $0x7a0] ss:$40 sps:$4 sm:$0xff]  }
0x1276   :  { %15594 = vmatpush2.bf16.msra.mxu1 %v21978_v47  ;;  %v22016_v47 = vld [vmem:[#allocation35 + $0x1154] ss:$40 sps:$4 sm:$0xff]  }
0x1277   :  { %15595 = vmatprep.subr.bf16.mxu1 %v21986_v61  ;;  %15453 = vmatpush1.bf16.msra.mxu0 %v21981_v57  ;;  %v22011_v61 = vld [vmem:[#allocation35 + $0x1378] ss:$40 sps:$4 sm:$0xff]   ;;  %v22019_v57 = vld [vmem:[#allocation35 + $0x132c] ss:$40 sps:$4 sm:$0xff]  }
0x1278   :  { %15454 = vmatprep.subr.bf16.mxu0 %v21989_v60  ;;  %v22014_v60 = vld [vmem:[#allocation35 + $0x1150] ss:$40 sps:$4 sm:$0xff]  }
0x127a   :  { %15596 = vmatpush2.bf16.msra.mxu1 %v21984_v62  ;;  %v22022_v62 = vld [vmem:[#allocation35 + $0x1104] ss:$40 sps:$4 sm:$0xff]  }
0x127b   :  { %15597 = vmatprep.subr.bf16.mxu1 %v21992_v24  ;;  %15455 = vmatpush1.bf16.msra.mxu0 %v21987_v17  ;;  %v22017_v24 = vld [vmem:[#allocation35 + $0x1328] ss:$40 sps:$4 sm:$0xff]   ;;  %v22025_v17 = vld [vmem:[#allocation35 + $0x12dc] ss:$40 sps:$4 sm:$0xff]  }
0x127c   :  { %15456 = vmatprep.subr.bf16.mxu0 %v21995_v49  ;;  %v22020_v49 = vld [vmem:[#allocation35 + $0x1100] ss:$40 sps:$4 sm:$0xff]  }
0x127e   :  { %15598 = vmatpush2.bf16.msra.mxu1 %v21990_v59  ;;  %v22028_v59 = vld [vmem:[#allocation35 + $0x10b4] ss:$40 sps:$4 sm:$0xff]  }
0x127f   :  { %15599 = vmatprep.subr.bf16.mxu1 %v21998_v46  ;;  %15457 = vmatpush1.bf16.msra.mxu0 %v21993_v30  ;;  %v22023_v46 = vld [vmem:[#allocation35 + $0x12d8] ss:$40 sps:$4 sm:$0xff]   ;;  %v22031_v30 = vld [vmem:[#allocation35 + $0x128c] ss:$40 sps:$4 sm:$0xff]  }
0x1280   :  { %15458 = vmatprep.subr.bf16.mxu0 %v22001_v15  ;;  %v22026_v15 = vld [vmem:[#allocation35 + $0x10b0] ss:$40 sps:$4 sm:$0xff]  }
0x1282   :  { %15600 = vmatpush2.bf16.msra.mxu1 %v21996_v28  ;;  %v22034_v28 = vld [vmem:[#allocation35 + $0x1064] ss:$40 sps:$4 sm:$0xff]  }
0x1283   :  { %15601 = vmatprep.subr.bf16.mxu1 %v22004_v44  ;;  %15459 = vmatpush1.bf16.msra.mxu0 %v21999_v19  ;;  %v22029_v44 = vld [vmem:[#allocation35 + $0x1288] ss:$40 sps:$4 sm:$0xff]  }
0x1284   :  { %15460 = vmatprep.subr.bf16.mxu0 %v22007_v2  ;;  %v22032_v19 = vld [vmem:[#allocation35 + $0x1060] ss:$40 sps:$4 sm:$0xff]   ;;  %v22040_v2 = vld [vmem:[#allocation35 + $0x1014] ss:$40 sps:$4 sm:$0xff]  }
0x1286   :  { %15602 = vmatpush2.bf16.msra.mxu1 %v22002_v31  ;;  %v22043_v31 = vld [vmem:[#allocation35 + $0x11ec] ss:$40 sps:$4 sm:$0xff]  }
0x1287   :  { %15603 = vmatprep.subr.bf16.mxu1 %v22010_v32  ;;  %15461 = vmatpush2.bf16.msra.mxu0 %v22005_v3  ;;  %v22038_v32 = vld [vmem:[#allocation35 + $0x1010] ss:$40 sps:$4 sm:$0xff]   ;;  %v22046_v3 = vld [vmem:[#allocation35 + $0xfc4] ss:$40 sps:$4 sm:$0xff]  }
0x1288   :  { %15462 = vmatprep.subr.bf16.mxu0 %v22013_v45  ;;  %v22041_v45 = vld [vmem:[#allocation35 + $0x11e8] ss:$40 sps:$4 sm:$0xff]  }
0x128a   :  { %15604 = vmatpush2.bf16.msra.mxu1 %v22008_v18  ;;  %v22049_v18 = vld [vmem:[#allocation35 + $0x119c] ss:$40 sps:$4 sm:$0xff]  }
0x128b   :  { %15659 = vmatprep.subr.bf16.mxu1 %v22016_v47  ;;  %15463 = vmatpush2.bf16.msra.mxu0 %v22011_v61  ;;  %v22044_v47 = vld [vmem:[#allocation35 + $0xfc0] ss:$40 sps:$4 sm:$0xff]   ;;  %v22052_v61 = vld [vmem:[#allocation35 + $0xf74] ss:$40 sps:$4 sm:$0xff]  }
0x128c   :  { %15464 = vmatprep.subr.bf16.mxu0 %v22019_v57  ;;  %v22047_v57 = vld [vmem:[#allocation35 + $0x1198] ss:$40 sps:$4 sm:$0xff]  }
0x128d   :  { %15606 = vmatmul.mubr.bf16.vlgmr.msra.gmra.mxu1 %v23832_v16  ;;  %v22037_v16 = vld [vmem:[#allocation35 + $0x123c] ss:$40 sps:$4 sm:$0xff]  }
0x128e   :  { %15660 = vmatpush1.bf16.msra.mxu1 %v22014_v60  ;;  %15691 = vmatprep.mubr.bf16.mxu1 %v23835_v20  ;;  %v22035_v20 = vld [vmem:[#allocation35 + $0x1238] ss:$40 sps:$4 sm:$0xff]   ;;  %v22055_v60 = vld [vmem:[#allocation35 + $0x254] ss:$40 sps:$4 sm:$0xff]  }
0x128f   :  { %15661 = vmatprep.subr.bf16.mxu1 %v22022_v62  ;;  %15465 = vmatpush2.bf16.msra.mxu0 %v22017_v24  ;;  %v22050_v62 = vld [vmem:[#allocation35 + $0xf70] ss:$40 sps:$4 sm:$0xff]   ;;  %v22058_v24 = vld [vmem:[#allocation35 + $0xf24] ss:$40 sps:$4 sm:$0xff]  }
0x1290   :  { %15466 = vmatprep.subr.bf16.mxu0 %v22025_v17  ;;  %v22053_v17 = vld [vmem:[#allocation35 + $0x250] ss:$40 sps:$4 sm:$0xff]  }
0x1292   :  { %15662 = vmatpush1.bf16.msra.mxu1 %v22020_v49  ;;  %v22061_v49 = vld [vmem:[#allocation35 + $0x204] ss:$40 sps:$4 sm:$0xff]  }
0x1293   :  { %15663 = vmatprep.subr.bf16.mxu1 %v22028_v59  ;;  %15467 = vmatpush2.bf16.msra.mxu0 %v22023_v46  ;;  %v22056_v59 = vld [vmem:[#allocation35 + $0xf20] ss:$40 sps:$4 sm:$0xff]   ;;  %v23840_v46 = vld [vmem:[#allocation2 + $0x18] ss:$44 sps:$4 sm:$0xff]  }
0x1294   :  { %15468 = vmatprep.subr.bf16.mxu0 %v22031_v30  ;;  %v22064_v30 = vld [vmem:[#allocation35 + $0x13d4] ss:$40 sps:$4 sm:$0xff]  }
0x1296   :  { %15664 = vmatpush1.bf16.msra.mxu1 %v22026_v15  ;;  %v22423_v15 = vld [vmem:[#allocation2 + $0x4] ss:$44 sps:$4 sm:$0xff]  }
0x1297   :  { %15665 = vmatprep.subr.bf16.mxu1 %v22034_v28  ;;  %15469 = vmatpush2.bf16.msra.mxu0 %v22029_v44  ;;  %v22059_v28 = vld [vmem:[#allocation35 + $0x200] ss:$40 sps:$4 sm:$0xff]   ;;  %v22067_v44 = vld [vmem:[#allocation35 + $0x1b4] ss:$40 sps:$4 sm:$0xff]  }
0x1298   :  { %15470 = vmatprep.subr.bf16.mxu0 %v22037_v16  ;;  %v22062_v16 = vld [vmem:[#allocation35 + $0x13d0] ss:$40 sps:$4 sm:$0xff]  }
0x129a   :  { %15666 = vmatpush1.bf16.msra.mxu1 %v22032_v19  ;;  %v22070_v19 = vld [vmem:[#allocation35 + $0x1384] ss:$40 sps:$4 sm:$0xff]  }
0x129b   :  { %15667 = vmatprep.subr.bf16.mxu1 %v22040_v2  ;;  %15471 = vmatpush2.bf16.msra.mxu0 %v22035_v20  ;;  %v22065_v2 = vld [vmem:[#allocation35 + $0x1b0] ss:$40 sps:$4 sm:$0xff]   ;;  %v22073_v20 = vld [vmem:[#allocation35 + $0x164] ss:$40 sps:$4 sm:$0xff]  }
0x129c   :  { %15472 = vmatprep.subr.bf16.mxu0 %v22043_v31  ;;  %v22068_v31 = vld [vmem:[#allocation35 + $0x1380] ss:$40 sps:$4 sm:$0xff]  }
0x129e   :  { %15668 = vmatpush1.bf16.msra.mxu1 %v22038_v32  ;;  %v22076_v32 = vld [vmem:[#allocation35 + $0x1334] ss:$40 sps:$4 sm:$0xff]  }
0x129f   :  { %15669 = vmatprep.subr.bf16.mxu1 %v22046_v3  ;;  %15473 = vmatpush2.bf16.msra.mxu0 %v22041_v45  ;;  %v22071_v3 = vld [vmem:[#allocation35 + $0x160] ss:$40 sps:$4 sm:$0xff]   ;;  %v22079_v45 = vld [vmem:[#allocation35 + $0x114] ss:$40 sps:$4 sm:$0xff]  }
0x12a0   :  { %15474 = vmatprep.subr.bf16.mxu0 %v22049_v18  ;;  %v22074_v18 = vld [vmem:[#allocation35 + $0x1330] ss:$40 sps:$4 sm:$0xff]  }
0x12a2   :  { %15670 = vmatpush1.bf16.msra.mxu1 %v22044_v47  ;;  %v22082_v47 = vld [vmem:[#allocation35 + $0x12e4] ss:$40 sps:$4 sm:$0xff]  }
0x12a3   :  { %15671 = vmatprep.subr.bf16.mxu1 %v22052_v61  ;;  %15475 = vmatpush2.bf16.msra.mxu0 %v22047_v57  ;;  %v22077_v61 = vld [vmem:[#allocation35 + $0x110] ss:$40 sps:$4 sm:$0xff]   ;;  %v22085_v57 = vld [vmem:[#allocation35 + $0xc4] ss:$40 sps:$4 sm:$0xff]  }
0x12a4   :  { %15530 = vmatprep.subr.bf16.mxu0 %v22055_v60  ;;  %v22080_v60 = vld [vmem:[#allocation35 + $0x12e0] ss:$40 sps:$4 sm:$0xff]  }
0x12a6   :  { %15672 = vmatpush1.bf16.msra.mxu1 %v22050_v62  ;;  %15477 = vmatmul.mubr.bf16.vlgmr.msra.gmra.mxu0 %v23840_v46  ;;  %v22088_v62 = vld [vmem:[#allocation35 + $0x1294] ss:$40 sps:$4 sm:$0xff]  }
0x12a7   :  { %15673 = vmatprep.subr.bf16.mxu1 %v22058_v24  ;;  %15531 = vmatpush1.bf16.msra.mxu0 %v22053_v17  ;;  %v22083_v24 = vld [vmem:[#allocation35 + $0xc0] ss:$40 sps:$4 sm:$0xff]   ;;  %v22091_v17 = vld [vmem:[#allocation35 + $0x74] ss:$40 sps:$4 sm:$0xff]  }
0x12a8   :  { %15562 = vmatprep.mubr.bf16.mxu0 %v22423_v15  ;;  %15532 = vmatprep.subr.bf16.mxu0 %v22061_v49  ;;  %v22086_v49 = vld [vmem:[#allocation35 + $0x1290] ss:$40 sps:$4 sm:$0xff]  }
0x12a9   :  { %v22089_v15 = vld [vmem:[#allocation35 + $0x70] ss:$40 sps:$4 sm:$0xff]  }
0x12aa   :  { %15674 = vmatpush1.bf16.msra.mxu1 %v22056_v59  ;;  %v22094_v59 = vld [vmem:[#allocation35 + $0x1244] ss:$40 sps:$4 sm:$0xff]  }
0x12ab   :  { %15675 = vmatprep.subr.bf16.mxu1 %v22064_v30  ;;  %15533 = vmatpush1.bf16.msra.mxu0 %v22059_v28  ;;  %v10981_v30 = vrot.slane %v23783_v22, %v23310_v34  ;;  %v22097_v28 = vld [vmem:[#allocation35 + $0x24] ss:$40 sps:$4 sm:$0xff]  }
0x12ac   :  { %15534 = vmatprep.subr.bf16.mxu0 %v22067_v44 }
0x12ad   :  { %v14711_v44 = vadd.f32 %v23757_v9, %v10981_v30 }
0x12ae   :  { %15676 = vmatpush2.bf16.msra.mxu1 %v22062_v16  ;;  %v22092_v16 = vld [vmem:[#allocation35 + $0x1240] ss:$40 sps:$4 sm:$0xff]  }
0x12af   :  { %15677 = vmatprep.subr.bf16.mxu1 %v22070_v19  ;;  %15535 = vmatpush1.bf16.msra.mxu0 %v22065_v2  ;;  %v22100_v19 = vld [vmem:[#allocation35 + $0x11f4] ss:$40 sps:$4 sm:$0xff]   ;;  %v14707_v2 = vadd.f32 %v23749_v38, %v10981_v30  ;;  %v22113_v30 = vld [vmem:[#allocation35 + $0x3e0] ss:$40 sps:$4 sm:$0xff]  }
0x12b0   :  { %15536 = vmatprep.subr.bf16.mxu0 %v22073_v20  ;;  %v14754_v20 = vadd.f32 %v23755_v43, %v14711_v44 }
0x12b2   :  { %15678 = vmatpush2.bf16.msra.mxu1 %v22068_v31  ;;  %v22095_v31 = vld [vmem:[#allocation35 + $0x20] ss:$40 sps:$4 sm:$0xff]   ;;  %v14797_v9 = vadd.f32 %v23775_v37, %v14754_v20  ;;  %v22112_v37 = vld [vmem:[#allocation35 + $0x434] ss:$40 sps:$4 sm:$0xff]  }
0x12b3   :  { %15679 = vmatprep.subr.bf16.mxu1 %v22076_v32  ;;  %15537 = vmatpush1.bf16.msra.mxu0 %v22071_v3  ;;  %v22103_v32 = vld [vmem:[#allocation35 + $0x4d4] ss:$40 sps:$4 sm:$0xff]   ;;  %v14750_v3 = vadd.f32 %v23747_v55, %v14707_v2 }
0x12b4   :  { %15538 = vmatprep.subr.bf16.mxu0 %v22079_v45  ;;  %v22098_v45 = vld [vmem:[#allocation35 + $0x11f0] ss:$40 sps:$4 sm:$0xff]   ;;  %v14840_v43 = vadd.f32 %v23773_v6, %v14797_v9 }
0x12b5   :  { %v14793_v38 = vadd.f32 %v23767_v50, %v14750_v3  ;;  %v22110_v6 = vld [vmem:[#allocation35 + $0x430] ss:$40 sps:$4 sm:$0xff]   ;;  %v10996_v3 = vsub.s32 5, %v23299_v23 }
0x12b6   :  { %15680 = vmatpush2.bf16.msra.mxu1 %v22074_v18  ;;  %v22106_v18 = vld [vmem:[#allocation35 + $0x11a4] ss:$40 sps:$4 sm:$0xff]   ;;  %v14883_v55 = vadd.f32 %v23792_v33, %v14840_v43  ;;  %v10993_v43 = vrot.slane %v23783_v22, %v3397_v35 }
0x12b7   :  { %15681 = vmatprep.subr.bf16.mxu1 %v22082_v47  ;;  %15539 = vmatpush1.bf16.msra.mxu0 %v22077_v61  ;;  %v22101_v47 = vld [vmem:[#allocation35 + $0x4d0] ss:$40 sps:$4 sm:$0xff]   ;;  %v22109_v61 = vld [vmem:[#allocation35 + $0x484] ss:$40 sps:$4 sm:$0xff]  }
0x12b8   :  { %15540 = vmatprep.subr.bf16.mxu0 %v22085_v57  ;;  %v22104_v57 = vld [vmem:[#allocation35 + $0x11a0] ss:$40 sps:$4 sm:$0xff]  }
0x12ba   :  { %15682 = vmatpush2.bf16.msra.mxu1 %v22080_v60  ;;  %v14836_v60 = vadd.f32 %v23763_v21, %v14793_v38  ;;  %v23858_v21 = vpop.f32.mrf.mxu1 }
0x12bb   :  { %15683 = vmatprep.subr.bf16.mxu1 %v22088_v62  ;;  %15541 = vmatpush1.bf16.msra.mxu0 %v22083_v24  ;;  %v22107_v62 = vld [vmem:[#allocation35 + $0x480] ss:$40 sps:$4 sm:$0xff]   ;;  %v23854_v24 = vpop.f32.mrf.mxu0 }
0x12bc   :  { %15542 = vmatprep.subr.bf16.mxu0 %v22091_v17  ;;  %v14879_v17 = vadd.f32 %v23781_v36, %v14836_v60  ;;  %v22116_v36 = vld [vmem:[#allocation35 + $0x390] ss:$40 sps:$4 sm:$0xff]  }
0x12be   :  { %15684 = vmatpush2.bf16.msra.mxu1 %v22086_v49  ;;  %v15134_v49 = vpop.f32.mrf.mxu0  ;;  %v15746_v50 = vpack.c.bf16 %v14883_v55, %v14879_v17 }
0x12bf   :  { %15685 = vmatprep.subr.bf16.mxu1 %v22094_v59  ;;  %15543 = vmatpush1.bf16.msra.mxu0 %v22089_v15  ;;  %v22115_v59 = vld [vmem:[#allocation35 + $0x3e4] ss:$40 sps:$4 sm:$0xff]   ;;  %v15177_v15 = vpop.f32.mrf.mxu1 }
0x12c0   :  { %15544 = vmatprep.subr.bf16.mxu0 %v22097_v28  ;;  %v15136_v33 = vpop.f32.mrf.mxu0  ;;  %v22118_v28 = vld [vmem:[#allocation35 + $0x394] ss:$40 sps:$4 sm:$0xff]  }
0x12c2   :  { %15686 = vmatpush2.bf16.msra.mxu1 %v22092_v16  ;;  %v15138_v44 = vpop.f32.mrf.mxu0  ;;  %v15179_v16 = vpop.f32.mrf.mxu1 }
0x12c3   :  { %15687 = vmatprep.subr.bf16.mxu1 %v22100_v19  ;;  %15545 = vmatpush1.bf16.msra.mxu0 %v22095_v31  ;;  %v22121_v19 = vld [vmem:[#allocation35 + $0x344] ss:$40 sps:$4 sm:$0xff]   ;;  %v15139_v60 = vadd.f32 %v15138_v44, %v10993_v43 }
0x12c4   :  { %15546 = vmatprep.subr.bf16.mxu0 %v22103_v32  ;;  %v15140_v2 = vpop.f32.mrf.mxu0  ;;  %v15181_v20 = vpop.f32.mrf.mxu1  ;;  %v22124_v32 = vld [vmem:[#allocation35 + $0x2f4] ss:$40 sps:$4 sm:$0xff]  }
0x12c6   :  { %15688 = vmatpush2.bf16.msra.mxu1 %v22098_v45  ;;  %v15220_v31 = vpop.f32.mrf.mxu0  ;;  %v22122_v45 = vld [vmem:[#allocation35 + $0x2f0] ss:$40 sps:$4 sm:$0xff]  }
0x12c7   :  { %15689 = vmatprep.subr.bf16.mxu1 %v22106_v18  ;;  %15547 = vmatpush2.bf16.msra.mxu0 %v22101_v47  ;;  %v15183_v18 = vpop.f32.mrf.mxu1  ;;  %v22127_v47 = vld [vmem:[#allocation35 + $0x2a4] ss:$40 sps:$4 sm:$0xff]  }
0x12c8   :  { %15548 = vmatprep.subr.bf16.mxu0 %v22109_v61  ;;  %v15222_v9 = vpop.f32.mrf.mxu0  ;;  %v10997_v61 = vrot.slane %v23783_v22, %v10996_v3  ;;  %v22425_v3 = vld [vmem:[#allocation2] ss:$44 sps:$4 sm:$0xff]  }
0x12c9   :  { %v15263_v38 = vpop.f32.mrf.mxu1 }
0x12ca   :  { %15690 = vmatpush2.bf16.msra.mxu1 %v22104_v57  ;;  %v22125_v57 = vld [vmem:[#allocation35 + $0x2a0] ss:$40 sps:$4 sm:$0xff]   ;;  %v15224_v55 = vpop.f32.mrf.mxu0  ;;  %v15141_v17 = vadd.f32 %v15140_v2, %v10997_v61 }
0x12cb   :  { %15549 = vmatpush2.bf16.msra.mxu0 %v22107_v62  ;;  %v22130_v62 = vld [vmem:[#allocation35 + $0xc54] ss:$40 sps:$4 sm:$0xff]  }
0x12cc   :  { %15550 = vmatprep.subr.bf16.mxu0 %v22112_v37  ;;  %v15137_v37 = vadd.f32 %v15136_v33, %v10997_v61 }
0x12cd   :  { %15692 = vmatmul.mubr.bf16.vlgmr.msra.gmra.mxu1 %v23840_v46  ;;  %v22119_v46 = vld [vmem:[#allocation35 + $0x340] ss:$40 sps:$4 sm:$0xff]  }
0x12ce   :  { %15787 = vmatprep.mubr.bf16.mxu1 %v15746_v50  ;;  %v15265_v50 = vpop.f32.mrf.mxu1 }
0x12cf   :  { %15551 = vmatpush2.bf16.msra.mxu0 %v22110_v6  ;;  %v15135_v6 = vadd.f32 %v15134_v49, %v10993_v43 }
0x12d0   :  { %15552 = vmatprep.subr.bf16.mxu0 %v22115_v59  ;;  %v22128_v59 = vld [vmem:[#allocation35 + $0xc50] ss:$40 sps:$4 sm:$0xff]   ;;  %v15267_v22 = vpop.f32.mrf.mxu1 }
0x12d1   :  { %v15178_v44 = vadd.f32 %v15177_v15, %v15135_v6 }
0x12d3   :  { %15553 = vmatpush2.bf16.msra.mxu0 %v22113_v30  ;;  %v15182_v30 = vadd.f32 %v15181_v20, %v15139_v60  ;;  %v15221_v61 = vadd.f32 %v15220_v31, %v15178_v44  ;;  %v22134_v31 = vld [vmem:[#allocation35 + $0xbb0] ss:$40 sps:$4 sm:$0xff]   ;;  %v22142_v44 = vld [vmem:[#allocation35 + $0xb14] ss:$40 sps:$4 sm:$0xff]  }
0x12d4   :  { %15554 = vmatprep.subr.bf16.mxu0 %v22118_v28  ;;  %v15226_v28 = vpop.f32.mrf.mxu0 }
0x12d5   :  { %v15225_v33 = vadd.f32 %v15224_v55, %v15182_v30  ;;  %v15269_v55 = vpop.f32.mrf.mxu1  ;;  %v15264_v30 = vadd.f32 %v15263_v38, %v15221_v61  ;;  %v22158_v61 = vld [vmem:[#allocation35 + $0xe30] ss:$40 sps:$4 sm:$0xff]  }
0x12d7   :  { %15555 = vmatpush2.bf16.msra.mxu0 %v22116_v36  ;;  %v22133_v36 = vld [vmem:[#allocation35 + $0xc04] ss:$40 sps:$4 sm:$0xff]  }
0x12d8   :  { %15556 = vmatprep.subr.bf16.mxu0 %v22121_v19  ;;  %v15180_v19 = vadd.f32 %v15179_v16, %v15137_v37  ;;  %v22426_v16 = vld [vmem:[#allocation2 + $0x14] ss:$44 sps:$4 sm:$0xff]  }
0x12da   :  { %v15223_v20 = vadd.f32 %v15222_v9, %v15180_v19 }
0x12db   :  { %15557 = vmatpush2.bf16.msra.mxu0 %v22119_v46  ;;  %v15184_v46 = vadd.f32 %v15183_v18, %v15141_v17  ;;  %v22131_v18 = vld [vmem:[#allocation35 + $0xc00] ss:$40 sps:$4 sm:$0xff]  }
0x12dc   :  { %15558 = vmatprep.subr.bf16.mxu0 %v22124_v32  ;;  %v23865_v32 = vld [vmem:[#allocation37] sm:$0xff]  ;;  %v15266_v6 = vadd.f32 %v15265_v50, %v15223_v20 }
0x12dd   :  { %v10989_v35 = vrot.slane %v23865_v32, %v3393_v1  ;;  %v10977_v49 = vrot.slane %v23865_v32, %v23303_v26  ;;  %v22136_v1 = vld [vmem:[#allocation35 + $0xbb4] ss:$40 sps:$4 sm:$0xff]  }
0x12df   :  { %15559 = vmatpush2.bf16.msra.mxu0 %v22122_v45  ;;  %v15227_v45 = vadd.f32 %v15226_v28, %v15184_v46  ;;  %v14709_v15 = vadd.f32 %v23753_v56, %v10977_v49  ;;  %v14705_v37 = vadd.f32 %v23745_v5, %v10977_v49 }
0x12e0   :  { %15560 = vmatprep.subr.bf16.mxu0 %v22127_v47  ;;  %v14926_v47 = vadd.f32 %v23790_v54, %v10989_v35 }
0x12e1   :  { %v14752_v17 = vadd.f32 %v23751_v27, %v14709_v15  ;;  %v15270_v54 = vadd.f32 %v15269_v55, %v15227_v45  ;;  %v22148_v45 = vld [vmem:[#allocation35 + $0xa74] ss:$40 sps:$4 sm:$0xff]   ;;  %v22167_v55 = vld [vmem:[#allocation35 + $0xd40] ss:$40 sps:$4 sm:$0xff]  }
0x12e2   :  { %v14969_v60 = vadd.f32 %v23816_v29, %v14926_v47  ;;  %v14748_v29 = vadd.f32 %v23743_v11, %v14705_v37  ;;  %v22160_v47 = vld [vmem:[#allocation35 + $0xe34] ss:$40 sps:$4 sm:$0xff]   ;;  %v22175_v37 = vld [vmem:[#allocation35 + $0xca4] ss:$40 sps:$4 sm:$0xff]  }
0x12e3   :  { %15561 = vmatpush2.bf16.msra.mxu0 %v22125_v57  ;;  %v14922_v57 = vadd.f32 %v23779_v48, %v10989_v35  ;;  %v22139_v48 = vld [vmem:[#allocation35 + $0xb64] ss:$40 sps:$4 sm:$0xff]   ;;  %v14795_v27 = vadd.f32 %v23771_v58, %v14752_v17  ;;  %v22137_v35 = vld [vmem:[#allocation35 + $0xb60] ss:$40 sps:$4 sm:$0xff]   ;;  %v22166_v15 = vld [vmem:[#allocation35 + $0xd94] ss:$40 sps:$4 sm:$0xff]  }
0x12e4   :  { %15616 = vmatprep.subr.bf16.mxu0 %v22130_v62  ;;  %v15268_v62 = vadd.f32 %v15267_v22, %v15225_v33  ;;  %v15012_v46 = vadd.f32 %v23814_v51, %v14969_v60  ;;  %v14791_v33 = vadd.f32 %v23761_v10, %v14748_v29  ;;  %v22169_v60 = vld [vmem:[#allocation35 + $0xd44] ss:$40 sps:$4 sm:$0xff]   ;;  %v22173_v17 = vld [vmem:[#allocation35 + $0xca0] ss:$40 sps:$4 sm:$0xff]  }
0x12e5   :  { %v14838_v11 = vadd.f32 %v23769_v41, %v14795_v27  ;;  %v22143_v41 = vld [vmem:[#allocation35 + $0xac0] ss:$40 sps:$4 sm:$0xff]   ;;  %v22196_v27 = vld [vmem:[#allocation35 + $0x1474] ss:$40 sps:$4 sm:$0xff]  }
0x12e6   :  { %v15306_v2 = vpop.f32.mrf.mxu0  ;;  %15563 = vmatmul.mubr.bf16.vlgmr.msra.gmra.mxu0 %v22425_v3  ;;  %v14834_v58 = vadd.f32 %v23759_v63, %v14791_v33  ;;  %v22140_v3 = vld [vmem:[#allocation35 + $0xb10] ss:$40 sps:$4 sm:$0xff]   ;;  %v22185_v29 = vld [vmem:[#allocation35 + $0x1560] ss:$40 sps:$4 sm:$0xff]  }
0x12e7   :  { %15617 = vmatpush1.bf16.msra.mxu0 %v22128_v59  ;;  %15648 = vmatprep.mubr.bf16.mxu0 %v22426_v16  ;;  %v14965_v59 = vadd.f32 %v23800_v40, %v14922_v57  ;;  %v15307_v5 = vadd.f32 %v15306_v2, %v15264_v30  ;;  %v15055_v40 = vadd.f32 %v23854_v24, %v15012_v46  ;;  %v22145_v24 = vld [vmem:[#allocation35 + $0xac4] ss:$40 sps:$4 sm:$0xff]   ;;  %v22146_v63 = vld [vmem:[#allocation35 + $0xa70] ss:$40 sps:$4 sm:$0xff]   ;;  %v22154_v16 = vld [vmem:[#allocation35 + $0xed4] ss:$40 sps:$4 sm:$0xff]  }
0x12e8   :  { %v15308_v43 = vpop.f32.mrf.mxu0  ;;  %15618 = vmatprep.subr.bf16.mxu0 %v22133_v36  ;;  %v14881_v2 = vadd.f32 %v23785_v39, %v14838_v11  ;;  %v14877_v49 = vadd.f32 %v23777_v14, %v14834_v58  ;;  %v22151_v39 = vld [vmem:[#allocation35 + $0xa24] ss:$40 sps:$4 sm:$0xff]   ;;  %v22152_v14 = vld [vmem:[#allocation35 + $0xed0] ss:$40 sps:$4 sm:$0xff]   ;;  %v22179_v30 = vld [vmem:[#allocation35 + $0x1600] ss:$40 sps:$4 sm:$0xff]   ;;  %v15349_v11 = vpop.f32.mrf.mxu1 }
0x12e9   :  { %v15309_v36 = vadd.f32 %v15308_v43, %v15266_v6  ;;  %v15008_v22 = vadd.f32 %v23798_v8, %v14965_v59  ;;  %v15098_v8 = vadd.f32 %v23858_v21, %v15055_v40  ;;  %v22149_v21 = vld [vmem:[#allocation35 + $0xa20] ss:$40 sps:$4 sm:$0xff]   ;;  %v22163_v43 = vld [vmem:[#allocation35 + $0xde4] ss:$40 sps:$4 sm:$0xff]   ;;  %v22164_v57 = vld [vmem:[#allocation35 + $0xd90] ss:$40 sps:$4 sm:$0xff]  }
0x12ea   :  { %v15310_v9 = vpop.f32.mrf.mxu0  ;;  %v15745_v20 = vpack.c.bf16 %v14881_v2, %v14877_v49  ;;  %v22178_v6 = vld [vmem:[#allocation35 + $0x1654] ss:$40 sps:$4 sm:$0xff]   ;;  %v22427_v59 = vld [vmem:[#allocation2 + $0x10] ss:$44 sps:$4 sm:$0xff]   ;;  %v22204_v33 = vld [vmem:[#allocation2 + $0xc] ss:$44 sps:$4 sm:$0xff]  }
0x12eb   :  { %15619 = vmatpush1.bf16.msra.mxu0 %v22131_v18  ;;  %v15311_v28 = vadd.f32 %v15310_v9, %v15268_v62  ;;  %v15051_v51 = vadd.f32 %v23821_v42, %v15008_v22  ;;  %v22155_v18 = vld [vmem:[#allocation35 + $0xe80] ss:$40 sps:$4 sm:$0xff]   ;;  %v22172_v62 = vld [vmem:[#allocation35 + $0xcf4] ss:$40 sps:$4 sm:$0xff]   ;;  %v22170_v9 = vld [vmem:[#allocation35 + $0xcf0] ss:$40 sps:$4 sm:$0xff]  }
0x12ec   :  { %v15312_v56 = vpop.f32.mrf.mxu0  ;;  %15620 = vmatprep.subr.bf16.mxu0 %v22136_v1  ;;  %v22161_v1 = vld [vmem:[#allocation35 + $0xde0] ss:$40 sps:$4 sm:$0xff]   ;;  %v22193_v46 = vld [vmem:[#allocation35 + $0x14c4] ss:$40 sps:$4 sm:$0xff]   ;;  %v22207_v2 = vld [vmem:[#allocation38 + $0xe8] sm:$0xff]  }
0x12ed   :  { %v15313_v19 = vadd.f32 %v15312_v56, %v15270_v54  ;;  %v15749_v38 = vpack.c.bf16 %v15311_v28, %v15307_v5  ;;  %v15094_v10 = vadd.f32 %v23819_v7, %v15051_v51  ;;  %v22157_v7 = vld [vmem:[#allocation35 + $0xe84] ss:$40 sps:$4 sm:$0xff]   ;;  %v22176_v54 = vld [vmem:[#allocation35 + $0x1650] ss:$40 sps:$4 sm:$0xff]   ;;  %v22184_v28 = vld [vmem:[#allocation35 + $0x15b4] ss:$40 sps:$4 sm:$0xff]  }
0x12ee   :  { %v22182_v56 = vld [vmem:[#allocation35 + $0x15b0] ss:$40 sps:$4 sm:$0xff]   ;;  %v22191_v5 = vld [vmem:[#allocation35 + $0x14c0] ss:$40 sps:$4 sm:$0xff]  }
0x12ef   :  { %v15750_v50 = vpack.c.bf16 %v15313_v19, %v15309_v36  ;;  %15621 = vmatpush1.bf16.msra.mxu0 %v22134_v31  ;;  %v15748_v42 = vpack.c.bf16 %v15098_v8, %v15094_v10  ;;  %v22181_v31 = vld [vmem:[#allocation35 + $0x1604] ss:$40 sps:$4 sm:$0xff]   ;;  %v22190_v36 = vld [vmem:[#allocation35 + $0x1514] ss:$40 sps:$4 sm:$0xff]   ;;  %v22188_v19 = vld [vmem:[#allocation35 + $0x1510] ss:$40 sps:$4 sm:$0xff]  }
0x12f0   :  { %15622 = vmatprep.subr.bf16.mxu0 %v22139_v48  ;;  %v22187_v48 = vld [vmem:[#allocation35 + $0x1564] ss:$40 sps:$4 sm:$0xff]   ;;  %v22197_v22 = vld [vmem:[#allocation35 + $0x1420] ss:$40 sps:$4 sm:$0xff]   ;;  %v22208_v8 = vld [vmem:[#allocation38 + $0xa8] sm:$0xff]  }
0x12f1   :  { %15769 = vmatprep.subr.bf16.mxu1 %v15750_v50  ;;  %v22194_v50 = vld [vmem:[#allocation35 + $0x1470] ss:$40 sps:$4 sm:$0xff]   ;;  %v22200_v40 = vld [vmem:[#allocation38 + $0xf8] sm:$0xff]  }
0x12f2   :  { %15770 = vmatpush1.bf16.xpose.msra.mxu1 %v15749_v38  ;;  %v22201_v38 = vld [vmem:[#allocation38 + $0xb8] sm:$0xff]   ;;  %v22206_v58 = vld [vmem:[#allocation38 + $0xb0] sm:$0xff]   ;;  %v22210_v10 = vld [vmem:[#allocation38 + $0xa0] sm:$0xff]  }
0x12f3   :  { %15623 = vmatpush1.bf16.msra.mxu0 %v22137_v35  ;;  %v22199_v35 = vld [vmem:[#allocation35 + $0x1424] ss:$40 sps:$4 sm:$0xff]   ;;  %v22428_v51 = vld [vmem:[#allocation2 + $0x20] ss:$44 sps:$4 sm:$0xff]  }
0x12f4   :  { %15624 = vmatprep.subr.bf16.mxu0 %v22142_v44  ;;  %v22205_v44 = vld [vmem:[#allocation38 + $0xf0] sm:$0xff]  }
0x12f7   :  { %15625 = vmatpush1.bf16.msra.mxu0 %v22140_v3  ;;  %v15351_v3 = vpop.f32.mrf.mxu1 }
0x12f8   :  { %15626 = vmatprep.subr.bf16.mxu0 %v22145_v24  ;;  %v22209_v24 = vld [vmem:[#allocation38 + $0xe0] sm:$0xff]  }
0x12f9   :  { %15788 = vmatmul.mubr.bf16.vlgmr.msra.gmra.mxu1 %v15745_v20  ;;  %v15353_v49 = vpop.f32.mrf.mxu1  ;;  %v22211_v20 = vld [vmem:[#allocation38 + $0xd8] sm:$0xff]  }
0x12fa   :  { %15828 = vmatprep.mubr.bf16.mxu1 %v15748_v42  ;;  %v22212_v42 = vld [vmem:[#allocation38 + $0x98] sm:$0xff]  }
0x12fb   :  { %15627 = vmatpush1.bf16.msra.mxu0 %v22143_v41  ;;  %v15355_v41 = vpop.f32.mrf.mxu1 }
0x12fc   :  { %15628 = vmatprep.subr.bf16.mxu0 %v22148_v45 }
0x12fd   :  { %v15435_v45 = vpop.f32.mrf.mxu1 }
0x12ff   :  { %15629 = vmatpush1.bf16.msra.mxu0 %v22146_v63  ;;  %v22213_v63 = vld [vmem:[#allocation38 + $0xd0] sm:$0xff]  }
0x1300   :  { %15630 = vmatprep.subr.bf16.mxu0 %v22151_v39  ;;  %v22214_v39 = vld [vmem:[#allocation38 + $0x90] sm:$0xff]  }
0x1303   :  { %15631 = vmatpush1.bf16.msra.mxu0 %v22149_v21  ;;  %v15437_v21 = vpop.f32.mrf.mxu1 }
0x1304   :  { %15632 = vmatprep.subr.bf16.mxu0 %v22154_v16 }
0x1307   :  { %15633 = vmatpush2.bf16.msra.mxu0 %v22152_v14  ;;  %v22215_v14 = vld [vmem:[#allocation38 + $0xc8] sm:$0xff]  }
0x1308   :  { %15634 = vmatprep.subr.bf16.mxu0 %v22157_v7  ;;  %v11004_v7 = vsub.s32 7, %v23299_v23 }
0x130b   :  { %15635 = vmatpush2.bf16.msra.mxu0 %v22155_v18  ;;  %v22216_v18 = vld [vmem:[#allocation38 + $0x88] sm:$0xff]  }
0x130c   :  { %15636 = vmatprep.subr.bf16.mxu0 %v22160_v47  ;;  %v11000_v47 = vsub.s32 6, %v23299_v23 }
0x130f   :  { %15637 = vmatpush2.bf16.msra.mxu0 %v22158_v61  ;;  %v15439_v61 = vpop.f32.mrf.mxu1 }
0x1310   :  { %15638 = vmatprep.subr.bf16.mxu0 %v22163_v43 }
0x1313   :  { %15639 = vmatpush2.bf16.msra.mxu0 %v22161_v1  ;;  %v22217_v1 = vld [vmem:[#allocation38 + $0xc0] sm:$0xff]  }
0x1314   :  { %15640 = vmatprep.subr.bf16.mxu0 %v22166_v15  ;;  %v11005_v15 = vrot.slane %v23865_v32, %v11004_v7  ;;  %v22233_v7 = vld [vmem:[#allocation38 + $0x190] sm:$0xff]  }
0x1317   :  { %15641 = vmatpush2.bf16.msra.mxu0 %v22164_v57  ;;  %v22218_v57 = vld [vmem:[#allocation38 + $0x80] sm:$0xff]  }
0x1318   :  { %15642 = vmatprep.subr.bf16.mxu0 %v22169_v60  ;;  %v11001_v60 = vrot.slane %v23865_v32, %v11000_v47  ;;  %v22235_v47 = vld [vmem:[#allocation38 + $0x188] sm:$0xff]  }
0x131a   :  { %v15350_v23 = vadd.f32 %v15349_v11, %v11001_v60 }
0x131b   :  { %15643 = vmatpush2.bf16.msra.mxu0 %v22167_v55  ;;  %v15441_v55 = vpop.f32.mrf.mxu1 }
0x131c   :  { %15644 = vmatprep.subr.bf16.mxu0 %v22172_v62 }
0x131f   :  { %15645 = vmatpush2.bf16.msra.mxu0 %v22170_v9  ;;  %v22219_v9 = vld [vmem:[#allocation38 + $0x1f8] sm:$0xff]  }
0x1320   :  { %15646 = vmatprep.subr.bf16.mxu0 %v22175_v37  ;;  %v15521_v37 = vpop.f32.mrf.mxu1 }
0x1323   :  { %15647 = vmatpush2.bf16.msra.mxu0 %v22173_v17  ;;  %v15352_v17 = vadd.f32 %v15351_v3, %v11005_v15 }
0x1324   :  { %15702 = vmatprep.subr.bf16.mxu0 %v22178_v6  ;;  %v15354_v6 = vadd.f32 %v15353_v49, %v11001_v60 }
0x1326   :  { %15649 = vmatmul.mubr.bf16.vlgmr.msra.gmra.mxu0 %v22427_v59  ;;  %v15392_v16 = vpop.f32.mrf.mxu0  ;;  %v22202_v59 = vld [vmem:[#allocation2 + $0x8] ss:$44 sps:$4 sm:$0xff]  }
0x1327   :  { %15703 = vmatpush1.bf16.msra.mxu0 %v22176_v54  ;;  %15734 = vmatprep.mubr.bf16.mxu0 %v22988_v0  ;;  %v22220_v54 = vld [vmem:[#allocation38 + $0x1b8] sm:$0xff]   ;;  %v15393_v32 = vadd.f32 %v15392_v16, %v15350_v23 }
0x1328   :  { %15704 = vmatprep.subr.bf16.mxu0 %v22181_v31  ;;  %v15394_v43 = vpop.f32.mrf.mxu0  ;;  %v22231_v16 = vld [vmem:[#allocation38 + $0x198] sm:$0xff]  }
0x132a   :  { %v15396_v62 = vpop.f32.mrf.mxu0 }
0x132b   :  { %15705 = vmatpush1.bf16.msra.mxu0 %v22179_v30  ;;  %v22224_v30 = vld [vmem:[#allocation38 + $0x1f0] sm:$0xff]  }
0x132c   :  { %15706 = vmatprep.subr.bf16.mxu0 %v22184_v28  ;;  %v15398_v31 = vpop.f32.mrf.mxu0  ;;  %v15356_v28 = vadd.f32 %v15355_v41, %v11005_v15 }
0x132f   :  { %15707 = vmatpush1.bf16.msra.mxu0 %v22182_v56  ;;  %v15395_v56 = vadd.f32 %v15394_v43, %v15352_v17  ;;  %v22237_v43 = vld [vmem:[#allocation38 + $0x180] sm:$0xff]  }
0x1330   :  { %15708 = vmatprep.subr.bf16.mxu0 %v22187_v48  ;;  %v15397_v48 = vadd.f32 %v15396_v62, %v15354_v6 }
0x1333   :  { %15709 = vmatpush1.bf16.msra.mxu0 %v22185_v29  ;;  %v22223_v29 = vld [vmem:[#allocation2 + $0x1c] ss:$44 sps:$4 sm:$0xff]  }
0x1334   :  { %15710 = vmatprep.subr.bf16.mxu0 %v22190_v36  ;;  %v15523_v36 = vpop.f32.mrf.mxu1 }
0x1337   :  { %15711 = vmatpush1.bf16.msra.mxu0 %v22188_v19 }
0x1338   :  { %15712 = vmatprep.subr.bf16.mxu0 %v22193_v46  ;;  %v15399_v46 = vadd.f32 %v15398_v31, %v15356_v28  ;;  %v10971_v31 = vld [vmem:[#allocation37 + $0x8] sm:$0x3] }
0x133b   :  { %15713 = vmatpush1.bf16.msra.mxu0 %v22191_v5  ;;  %v22225_v5 = vld [vmem:[#allocation38 + $0x1b0] sm:$0xff]  }
0x133c   :  { %15714 = vmatprep.subr.bf16.mxu0 %v22196_v27 }
0x133f   :  { %15715 = vmatpush1.bf16.msra.mxu0 %v22194_v50  ;;  %v22226_v50 = vld [vmem:[#allocation38 + $0x1e8] sm:$0xff]  }
0x1340   :  { %15716 = vmatprep.subr.bf16.mxu0 %v22199_v35  ;;  %v15438_v35 = vadd.f32 %v15437_v21, %v15395_v56 }
0x1343   :  { %15717 = vmatpush1.bf16.msra.mxu0 %v22197_v22  ;;  %v15440_v22 = vadd.f32 %v15439_v61, %v15397_v48  ;;  %v22236_v61 = vld [vmem:[#allocation38 + $0x1c0] sm:$0xff]  }
0x1344   :  { %19138 = vmatprep.subr.bf16.mxu0 %v22200_v40  ;;  %v15525_v40 = vpop.f32.mrf.mxu1 }
0x1346   :  { %15735 = vmatmul.mubr.bf16.vlgmr.msra.gmra.mxu0 %v22428_v51  ;;  %v15442_v51 = vadd.f32 %v15441_v55, %v15399_v46  ;;  %v15527_v49 = vpop.f32.mrf.mxu1 }
0x1347   :  { %19139 = vmatpush3.bf16.msra.mxu0 %v22201_v38  ;;  %16776 = vmatprep.mubr.bf16.mxu0 %v22204_v33  ;;  %v15436_v38 = vadd.f32 %v15435_v45, %v15393_v32  ;;  %v22230_v45 = vld [vmem:[#allocation38 + $0x1d8] sm:$0xff]  }
0x1348   :  { %19140 = vmatprep.subr.bf16.mxu0 %v22205_v44 }
0x134b   :  { %19141 = vmatpush3.bf16.msra.mxu0 %v22206_v58  ;;  %v22227_v58 = vld [vmem:[#allocation38 + $0x1a8] sm:$0xff]  }
0x134c   :  { %19142 = vmatprep.subr.bf16.mxu0 %v22207_v2 }
0x134d   :  { %v15607_v15 = vpop.f32.mrf.mxu1 }
0x134f   :  { %19143 = vmatpush3.bf16.msra.mxu0 %v22208_v8  ;;  %v22228_v8 = vld [vmem:[#allocation38 + $0x1e0] sm:$0xff]   ;;  %v15609_v13 = vpop.f32.mrf.mxu1 }
0x1350   :  { %19144 = vmatprep.subr.bf16.mxu0 %v22209_v24 }
0x1351   :  { %v15611_v4 = vpop.f32.mrf.mxu1 }
0x1353   :  { %19145 = vmatpush3.bf16.msra.mxu0 %v22210_v10 }
0x1354   :  { %19146 = vmatprep.subr.bf16.mxu0 %v22211_v20 }
0x1357   :  { %19147 = vmatpush3.bf16.msra.mxu0 %v22212_v42  ;;  %v22229_v42 = vld [vmem:[#allocation38 + $0x1a0] sm:$0xff]  }
0x1358   :  { %19148 = vmatprep.subr.bf16.mxu0 %v22213_v63 }
0x135b   :  { %19149 = vmatpush3.bf16.msra.mxu0 %v22214_v39 }
0x135c   :  { %19150 = vmatprep.subr.bf16.mxu0 %v22215_v14  ;;  %v22232_v14 = vld [vmem:[#allocation38 + $0x1d0] sm:$0xff]  }
0x135f   :  { %19151 = vmatpush3.bf16.msra.mxu0 %v22216_v18  ;;  %v22234_v18 = vld [vmem:[#allocation38 + $0x1c8] sm:$0xff]  }
0x1360   :  { %19152 = vmatprep.subr.bf16.mxu0 %v22217_v1  ;;  %v22221_v1 = vld [vmem:[#allocation2 + $0x18] ss:$44 sps:$4 sm:$0xff]  }
0x1363   :  { %19153 = vmatpush3.bf16.msra.mxu0 %v22218_v57 }
0x1364   :  { %19182 = vmatprep.subr.bf16.mxu0 %v22219_v9 }
0x1366   :  { %v15478_v19 = vpop.f32.mrf.mxu0  ;;  %16777 = vmatmul.mubr.bf16.vlgmr.msra.gmra.mxu0 %v22202_v59 }
0x1367   :  { %19183 = vmatpush3.bf16.msra.mxu0 %v22220_v54  ;;  %16858 = vmatprep.mubr.bf16.mxu0 %v22223_v29  ;;  %v15479_v2 = vadd.f32 %v15478_v19, %v15436_v38 }
0x1368   :  { %v15480_v27 = vpop.f32.mrf.mxu0  ;;  %19184 = vmatprep.subr.bf16.mxu0 %v22224_v30  ;;  %v11013_v30 = vrot.slane %v10971_v31, %v23310_v34 }
0x1369   :  { %v15481_v33 = vadd.f32 %v15480_v27, %v15438_v35  ;;  %v15522_v63 = vadd.f32 %v15521_v37, %v15479_v2 }
0x136a   :  { %v15482_v44 = vpop.f32.mrf.mxu0 }
0x136b   :  { %v15483_v11 = vadd.f32 %v15482_v44, %v15440_v22  ;;  %19185 = vmatpush3.bf16.msra.mxu0 %v22225_v5  ;;  %v15524_v20 = vadd.f32 %v15523_v36, %v15481_v33  ;;  %v11009_v5 = vrot.slane %v10971_v31, %v23303_v26 }
0x136c   :  { %v15484_v3 = vpop.f32.mrf.mxu0  ;;  %19186 = vmatprep.subr.bf16.mxu0 %v22226_v50 }
0x136d   :  { %v15485_v24 = vadd.f32 %v15484_v3, %v15442_v51  ;;  %v15526_v10 = vadd.f32 %v15525_v40, %v15483_v11 }
0x136f   :  { %v15528_v41 = vadd.f32 %v15527_v49, %v15485_v24  ;;  %19187 = vmatpush3.bf16.msra.mxu0 %v22227_v58  ;;  %v15751_v21 = vpack.c.bf16 %v15526_v10, %v15522_v63 }
0x1370   :  { %19188 = vmatprep.subr.bf16.mxu0 %v22228_v8 }
0x1371   :  { %v15752_v39 = vpack.c.bf16 %v15528_v41, %v15524_v20 }
0x1373   :  { %15810 = vmatprep.subr.bf16.mxu1 %v15752_v39  ;;  %19189 = vmatpush3.bf16.msra.mxu0 %v22229_v42 }
0x1374   :  { %15811 = vmatpush1.bf16.xpose.msra.mxu1 %v15751_v21  ;;  %19190 = vmatprep.subr.bf16.mxu0 %v22230_v45 }
0x1377   :  { %19191 = vmatpush3.bf16.msra.mxu0 %v22231_v16 }
0x1378   :  { %19192 = vmatprep.subr.bf16.mxu0 %v22232_v14 }
0x137b   :  { %15829 = vmatmul.mubr.bf16.vlgmr.msra.gmra.mxu1 %v15747_v12  ;;  %19193 = vmatpush3.bf16.msra.mxu0 %v22233_v7  ;;  %v15613_v12 = vpop.f32.mrf.mxu1 }
0x137c   :  { %19194 = vmatprep.subr.bf16.mxu0 %v22234_v18  ;;  %15899 = vmatprep.mubr.bf16.mxu1 %v22988_v0 }
0x137f   :  { %19195 = vmatpush3.bf16.msra.mxu0 %v22235_v47 }
0x1380   :  { %19196 = vmatprep.subr.bf16.mxu0 %v22236_v61 }
0x1383   :  { %19197 = vmatpush3.bf16.msra.mxu0 %v22237_v43 }
0x1384   :  { %19273 = vmatprep.subr.bf16.mxu0 %v22989_v25 }
0x1386   :  { %16859 = vmatmul.mubr.bf16.vlgmr.msra.gmra.mxu0 %v22221_v1 }
0x1387   :  { %19289 = vmatprep.mubr.msk.bf16.mxu0 %vm22990_vm0, %v22989_v25 }
0x138d   :  { %v15693_v57 = vpop.f32.mrf.mxu1 }
0x138f   :  { %v15695_v60 = vpop.f32.mrf.mxu1 }
0x1391   :  { %v15697_v55 = vpop.f32.mrf.mxu1 }
0x1393   :  { %v15699_v62 = vpop.f32.mrf.mxu1 }
0x13a6   :  { %v15564_v6 = vpop.f32.mrf.mxu0 }
0x13a7   :  { %v15565_v35 = vadd.f32 %v15564_v6, %v11009_v5 }
0x13a8   :  { %v15566_v54 = vpop.f32.mrf.mxu0 }
0x13a9   :  { %v15567_v50 = vadd.f32 %v15566_v54, %v11013_v30  ;;  %v15608_v38 = vadd.f32 %v15607_v15, %v15565_v35  ;;  %v22251_v35 = vld [vmem:[#allocation38 + $0x50] sm:$0xff]  }
0x13aa   :  { %v15568_v23 = vpop.f32.mrf.mxu0 }
0x13ab   :  { %v15569_v27 = vadd.f32 %v15568_v23, %v11009_v5  ;;  %v15610_v40 = vadd.f32 %v15609_v13, %v15567_v50  ;;  %v22248_v5 = vld [vmem:[#allocation38 + $0x20] sm:$0xff]   ;;  %v22250_v50 = vld [vmem:[#allocation38 + $0x18] sm:$0xff]  }
0x13ac   :  { %v15570_v59 = vpop.f32.mrf.mxu0 }
0x13ad   :  { %v15571_v56 = vadd.f32 %v15570_v59, %v11013_v30  ;;  %v15612_v22 = vadd.f32 %v15611_v4, %v15569_v27  ;;  %v22249_v27 = vld [vmem:[#allocation38 + $0x58] sm:$0xff]  }
0x13af   :  { %v15614_v36 = vadd.f32 %v15613_v12, %v15571_v56 }
0x13b9   :  { %v15789_v0 = vpop.f32.mrf.mxu1 }
0x13bb   :  { %v15791_v9 = vpop.f32.mrf.mxu1 }
0x13bc   :  { %v22277_v9 = vld [vmem:[#allocation38 + $0x2b8] sm:$0xff]  }
0x13bd   :  { %v15792_v37 = vpop.f32.mrf.mxu1  ;;  %19274 = vmatpush3.bf16.msra.mxu0 %v22277_v9  ;;  %v22296_v9 = vld [vmem:[#allocation38 + $0x208] sm:$0xff]  }
0x13be   :  { %19275 = vmatprep.subr.bf16.mxu0 %v22989_v25 }
0x13bf   :  { %v15794_v17 = vpop.f32.mrf.mxu1 }
0x13c0   :  { %v22283_v17 = vld [vmem:[#allocation38 + $0x2a8] sm:$0xff]  }
0x13e6   :  { %v15650_v28 = vpop.f32.mrf.mxu0 }
0x13e7   :  { %v15651_v34 = vadd.f32 %v15650_v28, %v15608_v38  ;;  %v22239_v28 = vld [vmem:[#allocation38 + $0x38] sm:$0xff]   ;;  %v22254_v38 = vld [vmem:[#allocation38 + $0x8] sm:$0xff]  }
0x13e8   :  { %v15652_v48 = vpop.f32.mrf.mxu0 }
0x13e9   :  { %v15653_v11 = vadd.f32 %v15652_v48, %v15610_v40  ;;  %v15694_v8 = vadd.f32 %v15693_v57, %v15651_v34  ;;  %v22243_v48 = vld [vmem:[#allocation38 + $0x70] sm:$0xff]   ;;  %v22253_v40 = vld [vmem:[#allocation38 + $0x48] sm:$0xff]   ;;  %v22258_v34 = vld [vmem:[#allocation38 + $0x138] sm:$0xff]  }
0x13ea   :  { %v15654_v29 = vpop.f32.mrf.mxu0 }
0x13eb   :  { %v15655_v44 = vadd.f32 %v15654_v29, %v15612_v22  ;;  %v15696_v3 = vadd.f32 %v15695_v60, %v15653_v11  ;;  %v22242_v29 = vld [vmem:[#allocation2 + $0x4] ss:$44 sps:$4 sm:$0xff]  }
0x13ec   :  { %v15656_v32 = vpop.f32.mrf.mxu0  ;;  %v22252_v22 = vld [vmem:[#allocation38 + $0x10] sm:$0xff]   ;;  %v22257_v11 = vld [vmem:[#allocation38 + $0x178] sm:$0xff]  }
0x13ed   :  { %v15657_v19 = vadd.f32 %v15656_v32, %v15614_v36  ;;  %v15698_v58 = vadd.f32 %v15697_v55, %v15655_v44  ;;  %v22244_v36 = vld [vmem:[#allocation38 + $0x30] sm:$0xff]   ;;  %v22245_v32 = vld [vmem:[#allocation38 + $0x68] sm:$0xff]   ;;  %v22255_v44 = vld [vmem:[#allocation38 + $0x40] sm:$0xff]  }
0x13ef   :  { %v15700_v46 = vadd.f32 %v15699_v62, %v15657_v19  ;;  %v22246_v19 = vld [vmem:[#allocation38 + $0x28] sm:$0xff]  }
0x1406   :  { %v15736_v33 = vpop.f32.mrf.mxu0 }
0x1407   :  { %v15737_v26 = vadd.f32 %v15736_v33, %v15694_v8  ;;  %v22256_v33 = vld [vmem:[#allocation38] sm:$0xff]   ;;  %v22264_v8 = vld [vmem:[#allocation38 + $0x168] sm:$0xff]  }
0x1408   :  { %v15738_v51 = vpop.f32.mrf.mxu0 }
0x1409   :  { %v15739_v10 = vadd.f32 %v15738_v51, %v15696_v3  ;;  %v22240_v51 = vld [vmem:[#allocation2] ss:$44 sps:$4 sm:$0xff]  }
0x140a   :  { %v15740_v2 = vpop.f32.mrf.mxu0  ;;  %v22263_v3 = vld [vmem:[#allocation38 + $0x130] sm:$0xff]  }
0x140b   :  { %v15741_v24 = vadd.f32 %v15740_v2, %v15698_v58  ;;  %v22262_v58 = vld [vmem:[#allocation38 + $0x170] sm:$0xff]   ;;  %v22261_v2 = vld [vmem:[#allocation2 + $0x14] ss:$44 sps:$4 sm:$0xff]  }
0x140c   :  { %v15742_v49 = vpop.f32.mrf.mxu0 }
0x140d   :  { %v15743_v20 = vadd.f32 %v15742_v49, %v15700_v46  ;;  %v15753_v42 = vpack.c.bf16 %v15741_v24, %v15737_v26  ;;  %v22247_v46 = vld [vmem:[#allocation38 + $0x60] sm:$0xff]   ;;  %v22265_v24 = vld [vmem:[#allocation38 + $0x128] sm:$0xff]   ;;  %v22269_v26 = vld [vmem:[#allocation38 + $0x118] sm:$0xff]  }
0x140e   :  { %v22266_v49 = vld [vmem:[#allocation38 + $0x160] sm:$0xff]  }
0x140f   :  { %v15754_v41 = vpack.c.bf16 %v15743_v20, %v15739_v10  ;;  %v22267_v10 = vld [vmem:[#allocation38 + $0x120] sm:$0xff]   ;;  %v22268_v20 = vld [vmem:[#allocation38 + $0x158] sm:$0xff]  }
0x1411   :  { %15881 = vmatprep.subr.bf16.mxu1 %v15754_v41  ;;  %v22270_v41 = vld [vmem:[#allocation38 + $0x150] sm:$0xff]  }
0x1412   :  { %15882 = vmatpush1.bf16.msra.mxu1 %v15753_v42  ;;  %v22271_v42 = vld [vmem:[#allocation38 + $0x110] sm:$0xff]  }
0x1413   :  { %19116 = vmatprep.subr.bf16.mxu1 %v22238_v53  ;;  %v22294_v53 = vld [vmem:[#allocation38 + $0x248] sm:$0xff]  }
0x143b   :  { %v15830_v63 = vpop.f32.mrf.mxu1 }
0x143c   :  { %v15831_v45 = vadd.f32 %v15830_v63, %v15789_v0  ;;  %v22272_v63 = vld [vmem:[#allocation38 + $0x148] sm:$0xff]  }
0x143d   :  { %v15832_v39 = vpop.f32.mrf.mxu1 }
0x143e   :  { %v15837_v21 = vmul.f32 0.044194173, %v15831_v45  ;;  %v22273_v45 = vld [vmem:[#allocation38 + $0x108] sm:$0xff]   ;;  %v22274_v39 = vld [vmem:[#allocation38 + $0x140] sm:$0xff]  }
0x143f   :  { %v15833_v16 = vpop.f32.mrf.mxu1 }
0x1440   :  { %v15834_v14 = vadd.f32 %v15833_v16, %v15792_v37  ;;  %v15839_v7 = vsel %vm23326_vm7, %v15837_v21, -1e+30  ;;  %v22280_v37 = vld [vmem:[#allocation38 + $0x2b0] sm:$0xff]   ;;  %v22275_v21 = vld [vmem:[#allocation38 + $0x100] sm:$0xff]   ;;  %v22276_v16 = vld [vmem:[#allocation38 + $0x278] sm:$0xff]  }
0x1441   :  { %v15835_v18 = vpop.f32.mrf.mxu1  ;;  %v15841_v47 = vsel %vm661_vm11, %v15839_v7, -inf  ;;  %19276 = vmatpush3.bf16.msra.mxu0 %v22280_v37  ;;  %v22297_v37 = vld [vmem:[#allocation38 + $0x240] sm:$0xff]  }
0x1442   :  { %v15838_v61 = vmul.f32 0.044194173, %v15834_v14  ;;  %15842 = vmax.xlane.f32.xlu1 %v15841_v47  ;;  %19277 = vmatprep.subr.bf16.mxu0 %v22989_v25  ;;  %v22278_v14 = vld [vmem:[#allocation38 + $0x238] sm:$0xff]   ;;  %v22279_v18 = vld [vmem:[#allocation38 + $0x270] sm:$0xff]   ;;  %v22286_v47 = vld [vmem:[#allocation38 + $0x2a0] sm:$0xff]  }
0x1444   :  { %v15840_v43 = vsel %vm23331_vm10, %v15838_v61, -1e+30  ;;  %v22281_v61 = vld [vmem:[#allocation38 + $0x230] sm:$0xff]  }
0x1445   :  { %v15844_v1 = vsel %vm661_vm11, %v15840_v43, -inf  ;;  %19278 = vmatpush3.bf16.msra.mxu0 %v22283_v17  ;;  %v22299_v17 = vld [vmem:[#allocation38 + $0x200] sm:$0xff]  }
0x1446   :  { %15845 = vmax.xlane.f32.xlu1 %v15844_v1  ;;  %19279 = vmatprep.subr.bf16.mxu0 %v22989_v25  ;;  %v22289_v1 = vld [vmem:[#allocation38 + $0x298] sm:$0xff]  }
0x1449   :  { %19280 = vmatpush3.bf16.msra.mxu0 %v22286_v47 }
0x144a   :  { %19281 = vmatprep.subr.bf16.mxu0 %v22989_v25 }
0x144d   :  { %19282 = vmatpush3.bf16.msra.mxu0 %v22289_v1 }
0x144e   :  { %19283 = vmatprep.subr.bf16.mxu0 %v22989_v25 }
0x14cb   :  { %v15843_v15 = vpop.xlane.xlu1 %15842 }
0x14cc   :  { %v15847_v13 = vsub.f32 %v15839_v7, %v15843_v15  ;;  %v22259_v7 = vld [vmem:[#allocation2 + $0x10] ss:$44 sps:$4 sm:$0xff]  }
0x14cd   :  { %v22284_v15 = vld [vmem:[#allocation38 + $0x228] sm:$0xff]  }
0x14ce   :  { %v15849_v4 = vmul.f32 1.442695, %v15847_v13  ;;  %v22285_v13 = vld [vmem:[#allocation38 + $0x260] sm:$0xff]  }
0x14cf   :  { %v15846_v12 = vpop.xlane.xlu1 %15845 }
0x14d0   :  { %22392 = vpow2.f32 %v15849_v4  ;;  %v15848_v57 = vsub.f32 %v15840_v43, %v15846_v12  ;;  %v22282_v43 = vld [vmem:[#allocation38 + $0x268] sm:$0xff]   ;;  %v22292_v4 = vld [vmem:[#allocation38 + $0x290] sm:$0xff]   ;;  %v22287_v12 = vld [vmem:[#allocation38 + $0x220] sm:$0xff]  }
0x14d1   :  { %19284 = vmatpush3.bf16.msra.mxu0 %v22292_v4 }
0x14d2   :  { %v15851_v60 = vmul.f32 1.442695, %v15848_v57  ;;  %19285 = vmatprep.subr.bf16.mxu0 %v22989_v25  ;;  %v22295_v57 = vld [vmem:[#allocation38 + $0x288] sm:$0xff]  }
0x14d4   :  { %22394 = vpow2.f32 %v15851_v60  ;;  %v22288_v60 = vld [vmem:[#allocation38 + $0x258] sm:$0xff]  }
0x14d5   :  { %19286 = vmatpush3.bf16.msra.mxu0 %v22295_v57 }
0x14d6   :  { %19287 = vmatprep.subr.bf16.mxu0 %v22989_v25 }
0x14dd   :  { %v22393_v52 = vpop.eup %22392 }
0x14de   :  { %v15853_v55 = vsel %vm661_vm11, %v22393_v52, 0.0 }
0x14df   :  { %15854 = vadd.xlane.f32.xlu0 %v15853_v55  ;;  %v22290_v55 = vld [vmem:[#allocation38 + $0x218] sm:$0xff]  }
0x14e1   :  { %v22395_v62 = vpop.eup %22394 }
0x14e2   :  { %v15856_v0 = vsel %vm661_vm11, %v22395_v62, 0.0 }
0x14e3   :  { %15857 = vadd.xlane.f32.xlu1 %v15856_v0  ;;  %v22293_v0 = vld [vmem:[#allocation38 + $0x210] sm:$0xff]  }
0x1568   :  { %v15855_v6 = vpop.xlane.xlu0 %15854 }
0x1569   :  { %22396 = vrcp.f32 %v15855_v6 }
0x156c   :  { %v15858_v54 = vpop.xlane.xlu1 %15857 }
0x156d   :  { %22398 = vrcp.f32 %v15858_v54 }
0x1576   :  { %v22397_v23 = vpop.eup %22396 }
0x1577   :  { %v15861_v59 = vmul.f32 %v22397_v23, %v22393_v52  ;;  %v22298_v52 = vld [vmem:[#allocation38 + $0x280] sm:$0xff]  }
0x1578   :  { %19288 = vmatpush3.bf16.msra.mxu0 %v22298_v52 }
0x157a   :  { %v22399_v31 = vpop.eup %22398 }
0x157b   :  { %v15862_v30 = vmul.f32 %v22399_v31, %v22395_v62  ;;  %v22291_v62 = vld [vmem:[#allocation38 + $0x250] sm:$0xff]  }
0x157d   :  { %v15863_v56 = vpack.c.bf16 %v15862_v30, %v15861_v59  ;;  %v22300_v30 = vld [vmem:[#allocation2 + $0x20] ss:$44 sps:$4 sm:$0xff]  }
0x157f   :  { %18934 = vmatmul.mubr.msk.bf16.vlgmr.msra.gmra.mxu1 %vm661_vm11, %v15863_v56 }
0x1580   :  { %19117 = vmatpush3.bf16.msra.mxu1 %v22239_v28  ;;  %16735 = vmatprep.mubr.bf16.mxu1 %v22242_v29  ;;  %v19154_v29 = vpop.f32.mrf.mxu0 }
0x1581   :  { %19118 = vmatprep.subr.bf16.mxu1 %v22243_v48 }
0x1584   :  { %19119 = vmatpush3.bf16.msra.mxu1 %v22244_v36 }
0x1585   :  { %19120 = vmatprep.subr.bf16.mxu1 %v22245_v32  ;;  %v19155_v32 = vpop.f32.mrf.mxu0 }
0x1588   :  { %19121 = vmatpush3.bf16.msra.mxu1 %v22246_v19 }
0x1589   :  { %19122 = vmatprep.subr.bf16.mxu1 %v22247_v46  ;;  %v19157_v46 = vpop.f32.mrf.mxu0 }
0x158c   :  { %19123 = vmatpush3.bf16.msra.mxu1 %v22248_v5 }
0x158d   :  { %19124 = vmatprep.subr.bf16.mxu1 %v22249_v27  ;;  %v19158_v27 = vpop.f32.mrf.mxu0 }
0x1590   :  { %19125 = vmatpush3.bf16.msra.mxu1 %v22250_v50 }
0x1591   :  { %19126 = vmatprep.subr.bf16.mxu1 %v22251_v35  ;;  %v19198_v35 = vpop.f32.mrf.mxu0 }
0x1594   :  { %19127 = vmatpush3.bf16.msra.mxu1 %v22252_v22 }
0x1595   :  { %19128 = vmatprep.subr.bf16.mxu1 %v22253_v40 }
0x1598   :  { %19129 = vmatpush3.bf16.msra.mxu1 %v22254_v38  ;;  %v19199_v38 = vpop.f32.mrf.mxu0 }
0x1599   :  { %19130 = vmatprep.subr.bf16.mxu1 %v22255_v44  ;;  %v18937_v44 = vld [vmem:[#allocation40] ss:$0 sm:$0xff] }
0x159c   :  { %19131 = vmatpush3.bf16.msra.mxu1 %v22256_v33 }
0x159d   :  { %19160 = vmatprep.subr.bf16.mxu1 %v22257_v11 }
0x159f   :  { %16736 = vmatmul.mubr.bf16.vlgmr.msra.gmra.mxu1 %v22240_v51  ;;  %v19201_v51 = vpop.f32.mrf.mxu0 }
0x15a0   :  { %19161 = vmatpush3.bf16.msra.mxu1 %v22258_v34  ;;  %16817 = vmatprep.mubr.bf16.mxu1 %v22261_v2 }
0x15a1   :  { %19162 = vmatprep.subr.bf16.mxu1 %v22262_v58  ;;  %v19156_v58 = vadd.f32 %v19155_v32, %v19154_v29 }
0x15a4   :  { %19163 = vmatpush3.bf16.msra.mxu1 %v22263_v3 }
0x15a5   :  { %19164 = vmatprep.subr.bf16.mxu1 %v22264_v8 }
0x15a8   :  { %19165 = vmatpush3.bf16.msra.mxu1 %v22265_v24 }
0x15a9   :  { %19166 = vmatprep.subr.bf16.mxu1 %v22266_v49  ;;  %v19202_v49 = vpop.f32.mrf.mxu0 }
0x15ac   :  { %19167 = vmatpush3.bf16.msra.mxu1 %v22267_v10  ;;  %v19159_v10 = vadd.f32 %v19158_v27, %v19157_v46 }
0x15ad   :  { %19168 = vmatprep.subr.bf16.mxu1 %v22268_v20 }
0x15b0   :  { %19169 = vmatpush3.bf16.msra.mxu1 %v22269_v26 }
0x15b1   :  { %19170 = vmatprep.subr.bf16.mxu1 %v22270_v41 }
0x15b4   :  { %19171 = vmatpush3.bf16.msra.mxu1 %v22271_v42 }
0x15b5   :  { %19172 = vmatprep.subr.bf16.mxu1 %v22272_v63  ;;  %v19200_v63 = vadd.f32 %v19199_v38, %v19198_v35 }
0x15b8   :  { %19173 = vmatpush3.bf16.msra.mxu1 %v22273_v45 }
0x15b9   :  { %19174 = vmatprep.subr.bf16.mxu1 %v22274_v39 }
0x15bc   :  { %19175 = vmatpush3.bf16.msra.mxu1 %v22275_v21 }
0x15bd   :  { %19204 = vmatprep.subr.bf16.mxu1 %v22276_v16 }
0x15bf   :  { %16818 = vmatmul.mubr.bf16.vlgmr.msra.gmra.mxu1 %v22259_v7 }
0x15c0   :  { %19205 = vmatpush3.bf16.msra.mxu1 %v22278_v14 }
0x15c1   :  { %19206 = vmatprep.subr.bf16.mxu1 %v22279_v18 }
0x15c4   :  { %19207 = vmatpush3.bf16.msra.mxu1 %v22281_v61  ;;  %v19203_v61 = vadd.f32 %v19202_v49, %v19201_v51 }
0x15c5   :  { %19208 = vmatprep.subr.bf16.mxu1 %v22282_v43 }
0x15c8   :  { %19209 = vmatpush3.bf16.msra.mxu1 %v22284_v15 }
0x15c9   :  { %19210 = vmatprep.subr.bf16.mxu1 %v22285_v13 }
0x15cc   :  { %19211 = vmatpush3.bf16.msra.mxu1 %v22287_v12 }
0x15cd   :  { %19212 = vmatprep.subr.bf16.mxu1 %v22288_v60 }
0x15d0   :  { %19213 = vmatpush3.bf16.msra.mxu1 %v22290_v55 }
0x15d1   :  { %19214 = vmatprep.subr.bf16.mxu1 %v22291_v62 }
0x15d4   :  { %19215 = vmatpush3.bf16.msra.mxu1 %v22293_v0 }
0x15d5   :  { %19216 = vmatprep.subr.bf16.mxu1 %v22294_v53 }
0x15d8   :  { %19217 = vmatpush3.bf16.msra.mxu1 %v22296_v9 }
0x15d9   :  { %19218 = vmatprep.subr.bf16.mxu1 %v22297_v37 }
0x15dc   :  { %19219 = vmatpush3.bf16.msra.mxu1 %v22299_v17 }
0x163f   :  { %v15901_v6 = vpop.f32.mrf.mxu1 }
0x1641   :  { %v15903_v54 = vpop.f32.mrf.mxu1 }
0x1642   :  { %v19055_v23 = vpack.c.bf16 %v15903_v54, %v15901_v6 }
0x1643   :  { %v15905_v31 = vpop.f32.mrf.mxu1 }
0x1644   :  { %15922 = vst [vmem:[#allocation2 + $0x24] sm:$0xff] %v19055_v23 }
0x1645   :  { %v15907_v25 = vpop.f32.mrf.mxu1 }
0x1646   :  { %v19056_v59 = vpack.c.bf16 %v15907_v25, %v15905_v31 }
0x1648   :  { %15923 = vst [vmem:[#allocation2 + $0x50] sm:$0xff] %v19056_v59 }
0x164f   :  { %v22302_v28 = vld [vmem:[#allocation2 + $0x24] ss:$44 sps:$4 sm:$0xff]   ;;  %v22303_v56 = vld [vmem:[#allocation2 + $0x28] ss:$44 sps:$4 sm:$0xff]  }
0x1650   :  { %16899 = vmatprep.mubr.bf16.mxu1 %v22302_v28  ;;  %19290 = vmatmul.mubr.bf16.vlgmr.msra.gmra.mxu0 %v22303_v56 }
0x1651   :  { %16900 = vmatmul.mubr.bf16.vlgmr.msra.gmra.mxu1 %v22300_v30 }
0x165f   :  { %v19132_v48 = vpop.f32.mrf.mxu1 }
0x1661   :  { %v19133_v36 = vpop.f32.mrf.mxu1 }
0x1662   :  { %v19134_v40 = vadd.f32 %v19133_v36, %v19132_v48 }
0x1663   :  { %v19135_v19 = vpop.f32.mrf.mxu1 }
0x1664   :  { %v16738_v11 = vadd.f32 %v19134_v40, %v18937_v44 }
0x1665   :  { %v19136_v5 = vpop.f32.mrf.mxu1 }
0x1666   :  { %v19137_v34 = vadd.f32 %v19136_v5, %v19135_v19  ;;  %v16779_v24 = vadd.f32 %v19156_v58, %v16738_v11 }
0x1668   :  { %v16741_v8 = vadd.f32 %v19137_v34, %v18937_v44 }
0x166a   :  { %v16782_v45 = vadd.f32 %v19159_v10, %v16741_v8 }
0x167f   :  { %v19176_v50 = vpop.f32.mrf.mxu1 }
0x1681   :  { %v19177_v22 = vpop.f32.mrf.mxu1 }
0x1682   :  { %v19178_v2 = vadd.f32 %v19177_v22, %v19176_v50 }
0x1683   :  { %v19179_v33 = vpop.f32.mrf.mxu1 }
0x1684   :  { %v16820_v20 = vadd.f32 %v19178_v2, %v16779_v24 }
0x1685   :  { %v19180_v3 = vpop.f32.mrf.mxu1 }
0x1686   :  { %v19181_v26 = vadd.f32 %v19180_v3, %v19179_v33  ;;  %v16861_v14 = vadd.f32 %v19200_v63, %v16820_v20 }
0x1688   :  { %v16823_v16 = vadd.f32 %v19181_v26, %v16782_v45 }
0x168a   :  { %v16864_v4 = vadd.f32 %v19203_v61, %v16823_v16 }
0x1710   :  { %v16942_v41 = vpop.f32.mrf.mxu0 }
0x1711   :  { %v19220_v42 = vpop.f32.mrf.mxu1 }
0x1712   :  { %v19291_v39 = vpop.f32.mrf.mxu0 }
0x1713   :  { %v19221_v21 = vpop.f32.mrf.mxu1 }
0x1714   :  { %v19222_v7 = vadd.f32 %v19221_v21, %v19220_v42  ;;  %v16945_v18 = vpop.f32.mrf.mxu0 }
0x1715   :  { %v19223_v47 = vpop.f32.mrf.mxu1 }
0x1716   :  { %v16902_v43 = vadd.f32 %v19222_v7, %v16861_v14  ;;  %v19292_v1 = vpop.f32.mrf.mxu0 }
0x1717   :  { %v19224_v15 = vpop.f32.mrf.mxu1 }
0x1718   :  { %v16943_v13 = vadd.f32 %v16942_v41, %v16902_v43  ;;  %v19225_v12 = vadd.f32 %v19224_v15, %v19223_v47 }
0x171a   :  { %16949 = vst [vmem:[%s23988_s14] sm:$0xff] %v16943_v13  ;;  %v16905_v57 = vadd.f32 %v19225_v12, %v16864_v4 }
0x171c   :  { %v16946_v60 = vadd.f32 %v16945_v18, %v16905_v57 }
0x171e   :  { %16950 = vst [vmem:[%s23988_s14 + $0x8] sm:$0xff] %v16946_v60 }
0x171f   :  { %16955 = vsyncpa [#allocation4], 1 }
0x1720   :  { %16956 = vsyncpa [#allocation6], 1 }
0x1721   :  { %16957 = vsyncpa [#allocation9], 1 }
0x1722   :  { %16958 = vsyncpa [#allocation12], 1 }
0x1723   :  { %16959 = vsyncpa [#allocation15], 1 }
0x1724   :  { %16960 = vsyncpa [#allocation18], 1 }
0x1725   :  { %16961 = vsyncpa [#allocation21], 1 }
0x1726   :  { %16962 = vsyncpa [#allocation24], 1 }
0x1727   :  { %16963 = vsyncpa [#allocation27], 1 }
0x1728   :  { %16964 = vsyncpa [#allocation30], 1 }
0x1729   :  { %16965 = vsyncpa [#allocation33], 1 }
0x172a   :  { %16966 = vsyncpa [#allocation36], 1 }
0x172b   :  { %16967 = vsyncpa [#allocation39], 1 }

</bundles_post_ra>
